<compile_context>
chip_gen: v7x
topology: tpu7x:2x2x1
jax: 0.10.0
libtpu: 0.0.40
codegen_flags: <defaults>
</compile_context>

<pallas_src>
import functools

import jax
import jax.numpy as jnp
from jax import lax
from jax.experimental import pallas as pl
from jax.experimental.pallas import tpu as pltpu


def _emotion_cnn_kernel(xs1_ref, w1_ref, b1_ref, w2_ref, b2_ref, w3_ref, b3_ref,
                        wfc1_ref, bfc1_ref, wfc2_ref, bfc2_ref, out_ref):
    f32 = jnp.float32
    dot = functools.partial(jnp.dot, preferred_element_type=f32)

    # xs1_ref[t, r, j] = PADDED_input[r, 2j + t]  (column-shift planes, t=0..3)
    _, hp, wa = xs1_ref.shape          # hp = H+2, wa = W//2 (= stage-1 pooled W)
    ha = (hp - 2) // 2                 # pooled rows after stage 1
    hb, hc = ha // 2, ha // 4
    wb, wc = wa // 2, wa // 4
    c1, c2, c3 = w1_ref.shape[0], w2_ref.shape[0], w3_ref.shape[0]

    def conv_pool_stage(planes, n_rows_out, w_cm, b_col):
        """Fused conv3x3(pad=1) + bias + ReLU + maxpool2x2 for one stage.

        planes[(t, r)]: (Cin, Wout) = PADDED[r, 2j + t, :] channel-major.
        Returns n_rows_out channel-major pooled rows of shape (Cout, Wout).
        ReLU/bias applied once after the 4-way parity max (they commute).
        """
        rows = []
        for i in range(n_rows_out):
            best = None
            for ph in range(2):
                for pw in range(2):
                    # im2col: 9 taps stacked on sublanes -> one MXU matmul.
                    patch = jnp.concatenate(
                        [planes[(pw + dw, 2 * i + ph + dh)]
                         for dh in range(3) for dw in range(3)], axis=0)
                    acc = dot(w_cm, patch)                 # (Cout, Wout)
                    best = acc if best is None else jnp.maximum(best, acc)
            rows.append(jnp.maximum(best + b_col, 0.0))
        return rows

    def shift_planes(rows, w_in, w_out, c):
        """Next-stage shift planes from pooled channel-major rows.

        planes[(t, r)][ci, j] = PADDED_next[r, 2j + t, ci], built with 0/1
        gather matmuls (column index 2j + t - 1 of the unpadded row, zero when
        out of range -> padding comes for free).  Avoids strided slices.
        """
        iw = lax.broadcasted_iota(jnp.int32, (w_in, w_out), 0)
        ij = lax.broadcasted_iota(jnp.int32, (w_in, w_out), 1)
        zero = jnp.zeros((c, w_out), f32)
        planes = {}
        n = len(rows)
        for t in range(4):
            sel = (iw == 2 * ij + (t - 1)).astype(f32)     # (w_in, w_out)
            planes[(t, 0)] = zero
            planes[(t, n + 1)] = zero
            for i in range(n):
                planes[(t, i + 1)] = dot(rows[i], sel)     # (c, w_out)
        return planes

    # ---- Stage 1: conv1 (1 -> c1) + ReLU + pool ----
    planes1 = {(t, r): xs1_ref[t, r:r + 1, :]              # (1, wa)
               for t in range(4) for r in range(hp)}
    o1 = conv_pool_stage(planes1, ha, w1_ref[...], b1_ref[...])     # (c1, wa)

    # ---- Stage 2: conv2 (c1 -> c2) + ReLU + pool ----
    planes2 = shift_planes(o1, wa, wb, c1)
    o2 = conv_pool_stage(planes2, hb, w2_ref[...], b2_ref[...])     # (c2, wb)

    # ---- Stage 3: conv3 (c2 -> c3) + ReLU + pool ----
    planes3 = shift_planes(o2, wb, wc, c2)
    o3 = conv_pool_stage(planes3, hc, w3_ref[...], b3_ref[...])     # (c3, wc)

    # ---- Flatten in torch NCHW order: index = c*(hc*wc) + h*wc + w ----
    flat = jnp.concatenate(
        [o3[h][c:c + 1, :] for c in range(c3) for h in range(hc)], axis=1)

    # ---- FC head ----
    # TODO(synk): dropout1/dropout2 are eval-mode identities (no RNG masking);
    # dropout1 is not even used in the reference forward().
    h1 = jnp.maximum(dot(flat, wfc1_ref[...]) + bfc1_ref[...], 0.0)  # (1, 128)
    out = dot(h1, wfc2_ref[...]) + bfc2_ref[...]                     # (1, nclass)
    out_ref[...] = out.astype(out_ref.dtype)


def emotion_cnn_forward(x_nchw, params):
    """Fused forward: (N, 1, H, W) -> (N, n_classes)."""
    N, cin, H, W = x_nchw.shape
    assert cin == 1 and H % 8 == 0 and W % 8 == 0

    # --- tiny XLA-side prep (input is ~8 KB; weights are reshaped once) ---
    xp = jnp.pad(x_nchw[:, 0], ((0, 0), (1, 1), (1, 1)))             # (N, H+2, W+2)
    # Column-shift planes: xs1[n, t, r, j] = padded[n, r, 2j + t], t = 0..3.
    xs1 = jnp.stack([xp[:, :, t:t + W:2] for t in range(4)], axis=1)  # (N,4,H+2,W//2)

    def conv_w(w_hwio):          # (3,3,Ci,Co) -> (Co, 9*Ci) channel-major taps
        co = w_hwio.shape[-1]
        return jnp.transpose(w_hwio, (3, 0, 1, 2)).reshape(co, -1)

    w1, b1 = conv_w(params["w1"]), params["b1"].reshape(-1, 1)
    w2, b2 = conv_w(params["w2"]), params["b2"].reshape(-1, 1)
    w3, b3 = conv_w(params["w3"]), params["b3"].reshape(-1, 1)
    wfc1, bfc1 = params["wfc1"], params["bfc1"].reshape(1, -1)
    wfc2, bfc2 = params["wfc2"], params["bfc2"].reshape(1, -1)
    nclass = wfc2.shape[1]

    def full_spec(shape):
        return pl.BlockSpec(shape, lambda n: (0,) * len(shape))

    out = pl.pallas_call(
        _emotion_cnn_kernel,
        out_shape=jax.ShapeDtypeStruct((N, 1, nclass), jnp.float32),
        grid=(N,),
        in_specs=[
            pl.BlockSpec((None,) + tuple(xs1.shape[1:]), lambda n: (n, 0, 0, 0)),
            full_spec(w1.shape), full_spec(b1.shape),
            full_spec(w2.shape), full_spec(b2.shape),
            full_spec(w3.shape), full_spec(b3.shape),
            full_spec(wfc1.shape), full_spec(bfc1.shape),
            full_spec(wfc2.shape), full_spec(bfc2.shape),
        ],
        out_specs=pl.BlockSpec((None, 1, nclass), lambda n: (n, 0, 0)),
        compiler_params=pltpu.CompilerParams(
            dimension_semantics=("parallel",)),
    )(xs1, w1, b1, w2, b2, w3, b3, wfc1, bfc1, wfc2, bfc2)
    return out.reshape(N, nclass)


def reference_forward(x_nchw, params):
    """Pure-JAX reference mirroring the PyTorch forward (NCHW throughout)."""
    hp = jax.lax.Precision.HIGHEST

    def conv(x, w_hwio, b):
        w_oihw = jnp.transpose(w_hwio, (3, 2, 0, 1))
        y = jax.lax.conv_general_dilated(
            x, w_oihw, window_strides=(1, 1), padding=((1, 1), (1, 1)),
            dimension_numbers=("NCHW", "OIHW", "NCHW"), precision=hp)
        return y + b.reshape(1, -1, 1, 1)

    def pool(x):
        n, c, h, w = x.shape
        return x.reshape(n, c, h // 2, 2, w // 2, 2).max(axis=(3, 5))

    x = pool(jax.nn.relu(conv(x_nchw, params["w1"], params["b1"])))
    x = pool(jax.nn.relu(conv(x, params["w2"], params["b2"])))
    x = pool(jax.nn.relu(conv(x, params["w3"], params["b3"])))
    n = x.shape[0]
    x = x.reshape(n, -1)
    h = jax.nn.relu(jnp.dot(x, params["wfc1"], precision=hp) + params["bfc1"])
    return jnp.dot(h, params["wfc2"], precision=hp) + params["bfc2"]


if __name__ == "__main__":
    key = jax.random.PRNGKey(0)
    ks = jax.random.split(key, 11)
    params = {
        "w1":   jax.random.normal(ks[0], (3, 3, 1, 16), jnp.float32) * 0.10,
        "b1":   jax.random.normal(ks[1], (16,), jnp.float32) * 0.10,
        "w2":   jax.random.normal(ks[2], (3, 3, 16, 32), jnp.float32) * 0.05,
        "b2":   jax.random.normal(ks[3], (32,), jnp.float32) * 0.05,
        "w3":   jax.random.normal(ks[4], (3, 3, 32, 64), jnp.float32) * 0.05,
        "b3":   jax.random.normal(ks[5], (64,), jnp.float32) * 0.05,
        # Linear weights stored as (in, out) == transpose of torch's (out, in);
        # the "in" index follows torch's NCHW flatten order (c*62 + w).
        "wfc1": jax.random.normal(ks[6], (64 * 1 * 62, 128), jnp.float32) * 0.02,
        "bfc1": jax.random.normal(ks[7], (128,), jnp.float32) * 0.02,
        "wfc2": jax.random.normal(ks[8], (128, 6), jnp.float32) * 0.10,
        "bfc2": jax.random.normal(ks[9], (6,), jnp.float32) * 0.10,
    }

    # fc1 expects 64*1*62 features -> spatial (8, 496) before the three pools
    # (8->4->2->1, 496->248->124->62); batch=2, 1 channel (NCHW).
    x = jax.random.normal(ks[10], (2, 1, 8, 496), jnp.float32)

    fwd = jax.jit(emotion_cnn_forward)
    out = jax.block_until_ready(fwd(x, params))
    ref = jax.block_until_ready(reference_forward(x, params))

    assert out.shape == (2, 6), out.shape
    if not jnp.allclose(out, ref, atol=5e-2, rtol=5e-2):
        raise AssertionError(
            f"mismatch: max abs err = {float(jnp.max(jnp.abs(out - ref)))}")
    print("KERNEL_OK")
</pallas_src>

<mosaic_0001>
module attributes {stable_mosaic.version = 11 : i64} {
  func.func @_emotion_cnn_kernel(%arg0: i32, %arg1: memref<1x4x10x248xf32, #tpu.memory_space<vmem>>, %arg2: memref<16x9xf32, #tpu.memory_space<vmem>>, %arg3: memref<16x1xf32, #tpu.memory_space<vmem>>, %arg4: memref<32x144xf32, #tpu.memory_space<vmem>>, %arg5: memref<32x1xf32, #tpu.memory_space<vmem>>, %arg6: memref<64x288xf32, #tpu.memory_space<vmem>>, %arg7: memref<64x1xf32, #tpu.memory_space<vmem>>, %arg8: memref<3968x128xf32, #tpu.memory_space<vmem>>, %arg9: memref<1x128xf32, #tpu.memory_space<vmem>>, %arg10: memref<128x6xf32, #tpu.memory_space<vmem>>, %arg11: memref<1x6xf32, #tpu.memory_space<vmem>>, %arg12: memref<1x1x6xf32, #tpu.memory_space<vmem>>) attributes {dimension_semantics = [#tpu.dimension_semantics<parallel>], iteration_bounds = array<i64: 2>, scalar_prefetch = 0 : i64, scratch_operands = 0 : i64, tpu.core_type = #tpu.core_type<tc>, window_params = [{transform_indices = @transform_0, window_bounds = array<i64: 1, 4, 10, 248>}, {pipeline_mode = #tpu.pipeline_mode<synchronous>, transform_indices = @transform_1, window_bounds = array<i64: 16, 9>}, {pipeline_mode = #tpu.pipeline_mode<synchronous>, transform_indices = @transform_2, window_bounds = array<i64: 16, 1>}, {pipeline_mode = #tpu.pipeline_mode<synchronous>, transform_indices = @transform_3, window_bounds = array<i64: 32, 144>}, {pipeline_mode = #tpu.pipeline_mode<synchronous>, transform_indices = @transform_4, window_bounds = array<i64: 32, 1>}, {pipeline_mode = #tpu.pipeline_mode<synchronous>, transform_indices = @transform_5, window_bounds = array<i64: 64, 288>}, {pipeline_mode = #tpu.pipeline_mode<synchronous>, transform_indices = @transform_6, window_bounds = array<i64: 64, 1>}, {pipeline_mode = #tpu.pipeline_mode<synchronous>, transform_indices = @transform_7, window_bounds = array<i64: 3968, 128>}, {pipeline_mode = #tpu.pipeline_mode<synchronous>, transform_indices = @transform_8, window_bounds = array<i64: 1, 128>}, {pipeline_mode = #tpu.pipeline_mode<synchronous>, transform_indices = @transform_9, window_bounds = array<i64: 128, 6>}, {pipeline_mode = #tpu.pipeline_mode<synchronous>, transform_indices = @transform_10, window_bounds = array<i64: 1, 6>}, {transform_indices = @transform_11, window_bounds = array<i64: 1, 1, 6>}]} {
    %c0 = arith.constant 0 : index
    %c0_0 = arith.constant 0 : index
    %c0_1 = arith.constant 0 : index
    %c0_2 = arith.constant 0 : index
    %0 = vector.load %arg1[%c0, %c0_0, %c0_1, %c0_2] : memref<1x4x10x248xf32, #tpu.memory_space<vmem>>, vector<1x1x1x248xf32>
    %1 = vector.shape_cast %0 : vector<1x1x1x248xf32> to vector<1x248xf32>
    %c0_3 = arith.constant 0 : index
    %c0_4 = arith.constant 0 : index
    %c1 = arith.constant 1 : index
    %c0_5 = arith.constant 0 : index
    %2 = vector.load %arg1[%c0_3, %c0_4, %c1, %c0_5] : memref<1x4x10x248xf32, #tpu.memory_space<vmem>>, vector<1x1x1x248xf32>
    %3 = vector.shape_cast %2 : vector<1x1x1x248xf32> to vector<1x248xf32>
    %c0_6 = arith.constant 0 : index
    %c0_7 = arith.constant 0 : index
    %c2 = arith.constant 2 : index
    %c0_8 = arith.constant 0 : index
    %4 = vector.load %arg1[%c0_6, %c0_7, %c2, %c0_8] : memref<1x4x10x248xf32, #tpu.memory_space<vmem>>, vector<1x1x1x248xf32>
    %5 = vector.shape_cast %4 : vector<1x1x1x248xf32> to vector<1x248xf32>
    %c0_9 = arith.constant 0 : index
    %c0_10 = arith.constant 0 : index
    %c3 = arith.constant 3 : index
    %c0_11 = arith.constant 0 : index
    %6 = vector.load %arg1[%c0_9, %c0_10, %c3, %c0_11] : memref<1x4x10x248xf32, #tpu.memory_space<vmem>>, vector<1x1x1x248xf32>
    %7 = vector.shape_cast %6 : vector<1x1x1x248xf32> to vector<1x248xf32>
    %c0_12 = arith.constant 0 : index
    %c0_13 = arith.constant 0 : index
    %c4 = arith.constant 4 : index
    %c0_14 = arith.constant 0 : index
    %8 = vector.load %arg1[%c0_12, %c0_13, %c4, %c0_14] : memref<1x4x10x248xf32, #tpu.memory_space<vmem>>, vector<1x1x1x248xf32>
    %9 = vector.shape_cast %8 : vector<1x1x1x248xf32> to vector<1x248xf32>
    %c0_15 = arith.constant 0 : index
    %c0_16 = arith.constant 0 : index
    %c5 = arith.constant 5 : index
    %c0_17 = arith.constant 0 : index
    %10 = vector.load %arg1[%c0_15, %c0_16, %c5, %c0_17] : memref<1x4x10x248xf32, #tpu.memory_space<vmem>>, vector<1x1x1x248xf32>
    %11 = vector.shape_cast %10 : vector<1x1x1x248xf32> to vector<1x248xf32>
    %c0_18 = arith.constant 0 : index
    %c0_19 = arith.constant 0 : index
    %c6 = arith.constant 6 : index
    %c0_20 = arith.constant 0 : index
    %12 = vector.load %arg1[%c0_18, %c0_19, %c6, %c0_20] : memref<1x4x10x248xf32, #tpu.memory_space<vmem>>, vector<1x1x1x248xf32>
    %13 = vector.shape_cast %12 : vector<1x1x1x248xf32> to vector<1x248xf32>
    %c0_21 = arith.constant 0 : index
    %c0_22 = arith.constant 0 : index
    %c7 = arith.constant 7 : index
    %c0_23 = arith.constant 0 : index
    %14 = vector.load %arg1[%c0_21, %c0_22, %c7, %c0_23] : memref<1x4x10x248xf32, #tpu.memory_space<vmem>>, vector<1x1x1x248xf32>
    %15 = vector.shape_cast %14 : vector<1x1x1x248xf32> to vector<1x248xf32>
    %c0_24 = arith.constant 0 : index
    %c0_25 = arith.constant 0 : index
    %c8 = arith.constant 8 : index
    %c0_26 = arith.constant 0 : index
    %16 = vector.load %arg1[%c0_24, %c0_25, %c8, %c0_26] : memref<1x4x10x248xf32, #tpu.memory_space<vmem>>, vector<1x1x1x248xf32>
    %17 = vector.shape_cast %16 : vector<1x1x1x248xf32> to vector<1x248xf32>
    %c0_27 = arith.constant 0 : index
    %c0_28 = arith.constant 0 : index
    %c9 = arith.constant 9 : index
    %c0_29 = arith.constant 0 : index
    %18 = vector.load %arg1[%c0_27, %c0_28, %c9, %c0_29] : memref<1x4x10x248xf32, #tpu.memory_space<vmem>>, vector<1x1x1x248xf32>
    %19 = vector.shape_cast %18 : vector<1x1x1x248xf32> to vector<1x248xf32>
    %c0_30 = arith.constant 0 : index
    %c1_31 = arith.constant 1 : index
    %c0_32 = arith.constant 0 : index
    %c0_33 = arith.constant 0 : index
    %20 = vector.load %arg1[%c0_30, %c1_31, %c0_32, %c0_33] : memref<1x4x10x248xf32, #tpu.memory_space<vmem>>, vector<1x1x1x248xf32>
    %21 = vector.shape_cast %20 : vector<1x1x1x248xf32> to vector<1x248xf32>
    %c0_34 = arith.constant 0 : index
    %c1_35 = arith.constant 1 : index
    %c1_36 = arith.constant 1 : index
    %c0_37 = arith.constant 0 : index
    %22 = vector.load %arg1[%c0_34, %c1_35, %c1_36, %c0_37] : memref<1x4x10x248xf32, #tpu.memory_space<vmem>>, vector<1x1x1x248xf32>
    %23 = vector.shape_cast %22 : vector<1x1x1x248xf32> to vector<1x248xf32>
    %c0_38 = arith.constant 0 : index
    %c1_39 = arith.constant 1 : index
    %c2_40 = arith.constant 2 : index
    %c0_41 = arith.constant 0 : index
    %24 = vector.load %arg1[%c0_38, %c1_39, %c2_40, %c0_41] : memref<1x4x10x248xf32, #tpu.memory_space<vmem>>, vector<1x1x1x248xf32>
    %25 = vector.shape_cast %24 : vector<1x1x1x248xf32> to vector<1x248xf32>
    %c0_42 = arith.constant 0 : index
    %c1_43 = arith.constant 1 : index
    %c3_44 = arith.constant 3 : index
    %c0_45 = arith.constant 0 : index
    %26 = vector.load %arg1[%c0_42, %c1_43, %c3_44, %c0_45] : memref<1x4x10x248xf32, #tpu.memory_space<vmem>>, vector<1x1x1x248xf32>
    %27 = vector.shape_cast %26 : vector<1x1x1x248xf32> to vector<1x248xf32>
    %c0_46 = arith.constant 0 : index
    %c1_47 = arith.constant 1 : index
    %c4_48 = arith.constant 4 : index
    %c0_49 = arith.constant 0 : index
    %28 = vector.load %arg1[%c0_46, %c1_47, %c4_48, %c0_49] : memref<1x4x10x248xf32, #tpu.memory_space<vmem>>, vector<1x1x1x248xf32>
    %29 = vector.shape_cast %28 : vector<1x1x1x248xf32> to vector<1x248xf32>
    %c0_50 = arith.constant 0 : index
    %c1_51 = arith.constant 1 : index
    %c5_52 = arith.constant 5 : index
    %c0_53 = arith.constant 0 : index
    %30 = vector.load %arg1[%c0_50, %c1_51, %c5_52, %c0_53] : memref<1x4x10x248xf32, #tpu.memory_space<vmem>>, vector<1x1x1x248xf32>
    %31 = vector.shape_cast %30 : vector<1x1x1x248xf32> to vector<1x248xf32>
    %c0_54 = arith.constant 0 : index
    %c1_55 = arith.constant 1 : index
    %c6_56 = arith.constant 6 : index
    %c0_57 = arith.constant 0 : index
    %32 = vector.load %arg1[%c0_54, %c1_55, %c6_56, %c0_57] : memref<1x4x10x248xf32, #tpu.memory_space<vmem>>, vector<1x1x1x248xf32>
    %33 = vector.shape_cast %32 : vector<1x1x1x248xf32> to vector<1x248xf32>
    %c0_58 = arith.constant 0 : index
    %c1_59 = arith.constant 1 : index
    %c7_60 = arith.constant 7 : index
    %c0_61 = arith.constant 0 : index
    %34 = vector.load %arg1[%c0_58, %c1_59, %c7_60, %c0_61] : memref<1x4x10x248xf32, #tpu.memory_space<vmem>>, vector<1x1x1x248xf32>
    %35 = vector.shape_cast %34 : vector<1x1x1x248xf32> to vector<1x248xf32>
    %c0_62 = arith.constant 0 : index
    %c1_63 = arith.constant 1 : index
    %c8_64 = arith.constant 8 : index
    %c0_65 = arith.constant 0 : index
    %36 = vector.load %arg1[%c0_62, %c1_63, %c8_64, %c0_65] : memref<1x4x10x248xf32, #tpu.memory_space<vmem>>, vector<1x1x1x248xf32>
    %37 = vector.shape_cast %36 : vector<1x1x1x248xf32> to vector<1x248xf32>
    %c0_66 = arith.constant 0 : index
    %c1_67 = arith.constant 1 : index
    %c9_68 = arith.constant 9 : index
    %c0_69 = arith.constant 0 : index
    %38 = vector.load %arg1[%c0_66, %c1_67, %c9_68, %c0_69] : memref<1x4x10x248xf32, #tpu.memory_space<vmem>>, vector<1x1x1x248xf32>
    %39 = vector.shape_cast %38 : vector<1x1x1x248xf32> to vector<1x248xf32>
    %c0_70 = arith.constant 0 : index
    %c2_71 = arith.constant 2 : index
    %c0_72 = arith.constant 0 : index
    %c0_73 = arith.constant 0 : index
    %40 = vector.load %arg1[%c0_70, %c2_71, %c0_72, %c0_73] : memref<1x4x10x248xf32, #tpu.memory_space<vmem>>, vector<1x1x1x248xf32>
    %41 = vector.shape_cast %40 : vector<1x1x1x248xf32> to vector<1x248xf32>
    %c0_74 = arith.constant 0 : index
    %c2_75 = arith.constant 2 : index
    %c1_76 = arith.constant 1 : index
    %c0_77 = arith.constant 0 : index
    %42 = vector.load %arg1[%c0_74, %c2_75, %c1_76, %c0_77] : memref<1x4x10x248xf32, #tpu.memory_space<vmem>>, vector<1x1x1x248xf32>
    %43 = vector.shape_cast %42 : vector<1x1x1x248xf32> to vector<1x248xf32>
    %c0_78 = arith.constant 0 : index
    %c2_79 = arith.constant 2 : index
    %c2_80 = arith.constant 2 : index
    %c0_81 = arith.constant 0 : index
    %44 = vector.load %arg1[%c0_78, %c2_79, %c2_80, %c0_81] : memref<1x4x10x248xf32, #tpu.memory_space<vmem>>, vector<1x1x1x248xf32>
    %45 = vector.shape_cast %44 : vector<1x1x1x248xf32> to vector<1x248xf32>
    %c0_82 = arith.constant 0 : index
    %c2_83 = arith.constant 2 : index
    %c3_84 = arith.constant 3 : index
    %c0_85 = arith.constant 0 : index
    %46 = vector.load %arg1[%c0_82, %c2_83, %c3_84, %c0_85] : memref<1x4x10x248xf32, #tpu.memory_space<vmem>>, vector<1x1x1x248xf32>
    %47 = vector.shape_cast %46 : vector<1x1x1x248xf32> to vector<1x248xf32>
    %c0_86 = arith.constant 0 : index
    %c2_87 = arith.constant 2 : index
    %c4_88 = arith.constant 4 : index
    %c0_89 = arith.constant 0 : index
    %48 = vector.load %arg1[%c0_86, %c2_87, %c4_88, %c0_89] : memref<1x4x10x248xf32, #tpu.memory_space<vmem>>, vector<1x1x1x248xf32>
    %49 = vector.shape_cast %48 : vector<1x1x1x248xf32> to vector<1x248xf32>
    %c0_90 = arith.constant 0 : index
    %c2_91 = arith.constant 2 : index
    %c5_92 = arith.constant 5 : index
    %c0_93 = arith.constant 0 : index
    %50 = vector.load %arg1[%c0_90, %c2_91, %c5_92, %c0_93] : memref<1x4x10x248xf32, #tpu.memory_space<vmem>>, vector<1x1x1x248xf32>
    %51 = vector.shape_cast %50 : vector<1x1x1x248xf32> to vector<1x248xf32>
    %c0_94 = arith.constant 0 : index
    %c2_95 = arith.constant 2 : index
    %c6_96 = arith.constant 6 : index
    %c0_97 = arith.constant 0 : index
    %52 = vector.load %arg1[%c0_94, %c2_95, %c6_96, %c0_97] : memref<1x4x10x248xf32, #tpu.memory_space<vmem>>, vector<1x1x1x248xf32>
    %53 = vector.shape_cast %52 : vector<1x1x1x248xf32> to vector<1x248xf32>
    %c0_98 = arith.constant 0 : index
    %c2_99 = arith.constant 2 : index
    %c7_100 = arith.constant 7 : index
    %c0_101 = arith.constant 0 : index
    %54 = vector.load %arg1[%c0_98, %c2_99, %c7_100, %c0_101] : memref<1x4x10x248xf32, #tpu.memory_space<vmem>>, vector<1x1x1x248xf32>
    %55 = vector.shape_cast %54 : vector<1x1x1x248xf32> to vector<1x248xf32>
    %c0_102 = arith.constant 0 : index
    %c2_103 = arith.constant 2 : index
    %c8_104 = arith.constant 8 : index
    %c0_105 = arith.constant 0 : index
    %56 = vector.load %arg1[%c0_102, %c2_103, %c8_104, %c0_105] : memref<1x4x10x248xf32, #tpu.memory_space<vmem>>, vector<1x1x1x248xf32>
    %57 = vector.shape_cast %56 : vector<1x1x1x248xf32> to vector<1x248xf32>
    %c0_106 = arith.constant 0 : index
    %c2_107 = arith.constant 2 : index
    %c9_108 = arith.constant 9 : index
    %c0_109 = arith.constant 0 : index
    %58 = vector.load %arg1[%c0_106, %c2_107, %c9_108, %c0_109] : memref<1x4x10x248xf32, #tpu.memory_space<vmem>>, vector<1x1x1x248xf32>
    %59 = vector.shape_cast %58 : vector<1x1x1x248xf32> to vector<1x248xf32>
    %c0_110 = arith.constant 0 : index
    %c3_111 = arith.constant 3 : index
    %c0_112 = arith.constant 0 : index
    %c0_113 = arith.constant 0 : index
    %60 = vector.load %arg1[%c0_110, %c3_111, %c0_112, %c0_113] : memref<1x4x10x248xf32, #tpu.memory_space<vmem>>, vector<1x1x1x248xf32>
    %61 = vector.shape_cast %60 : vector<1x1x1x248xf32> to vector<1x248xf32>
    %c0_114 = arith.constant 0 : index
    %c3_115 = arith.constant 3 : index
    %c1_116 = arith.constant 1 : index
    %c0_117 = arith.constant 0 : index
    %62 = vector.load %arg1[%c0_114, %c3_115, %c1_116, %c0_117] : memref<1x4x10x248xf32, #tpu.memory_space<vmem>>, vector<1x1x1x248xf32>
    %63 = vector.shape_cast %62 : vector<1x1x1x248xf32> to vector<1x248xf32>
    %c0_118 = arith.constant 0 : index
    %c3_119 = arith.constant 3 : index
    %c2_120 = arith.constant 2 : index
    %c0_121 = arith.constant 0 : index
    %64 = vector.load %arg1[%c0_118, %c3_119, %c2_120, %c0_121] : memref<1x4x10x248xf32, #tpu.memory_space<vmem>>, vector<1x1x1x248xf32>
    %65 = vector.shape_cast %64 : vector<1x1x1x248xf32> to vector<1x248xf32>
    %c0_122 = arith.constant 0 : index
    %c3_123 = arith.constant 3 : index
    %c3_124 = arith.constant 3 : index
    %c0_125 = arith.constant 0 : index
    %66 = vector.load %arg1[%c0_122, %c3_123, %c3_124, %c0_125] : memref<1x4x10x248xf32, #tpu.memory_space<vmem>>, vector<1x1x1x248xf32>
    %67 = vector.shape_cast %66 : vector<1x1x1x248xf32> to vector<1x248xf32>
    %c0_126 = arith.constant 0 : index
    %c3_127 = arith.constant 3 : index
    %c4_128 = arith.constant 4 : index
    %c0_129 = arith.constant 0 : index
    %68 = vector.load %arg1[%c0_126, %c3_127, %c4_128, %c0_129] : memref<1x4x10x248xf32, #tpu.memory_space<vmem>>, vector<1x1x1x248xf32>
    %69 = vector.shape_cast %68 : vector<1x1x1x248xf32> to vector<1x248xf32>
    %c0_130 = arith.constant 0 : index
    %c3_131 = arith.constant 3 : index
    %c5_132 = arith.constant 5 : index
    %c0_133 = arith.constant 0 : index
    %70 = vector.load %arg1[%c0_130, %c3_131, %c5_132, %c0_133] : memref<1x4x10x248xf32, #tpu.memory_space<vmem>>, vector<1x1x1x248xf32>
    %71 = vector.shape_cast %70 : vector<1x1x1x248xf32> to vector<1x248xf32>
    %c0_134 = arith.constant 0 : index
    %c3_135 = arith.constant 3 : index
    %c6_136 = arith.constant 6 : index
    %c0_137 = arith.constant 0 : index
    %72 = vector.load %arg1[%c0_134, %c3_135, %c6_136, %c0_137] : memref<1x4x10x248xf32, #tpu.memory_space<vmem>>, vector<1x1x1x248xf32>
    %73 = vector.shape_cast %72 : vector<1x1x1x248xf32> to vector<1x248xf32>
    %c0_138 = arith.constant 0 : index
    %c3_139 = arith.constant 3 : index
    %c7_140 = arith.constant 7 : index
    %c0_141 = arith.constant 0 : index
    %74 = vector.load %arg1[%c0_138, %c3_139, %c7_140, %c0_141] : memref<1x4x10x248xf32, #tpu.memory_space<vmem>>, vector<1x1x1x248xf32>
    %75 = vector.shape_cast %74 : vector<1x1x1x248xf32> to vector<1x248xf32>
    %c0_142 = arith.constant 0 : index
    %c3_143 = arith.constant 3 : index
    %c8_144 = arith.constant 8 : index
    %c0_145 = arith.constant 0 : index
    %76 = vector.load %arg1[%c0_142, %c3_143, %c8_144, %c0_145] : memref<1x4x10x248xf32, #tpu.memory_space<vmem>>, vector<1x1x1x248xf32>
    %77 = vector.shape_cast %76 : vector<1x1x1x248xf32> to vector<1x248xf32>
    %c0_146 = arith.constant 0 : index
    %c3_147 = arith.constant 3 : index
    %c9_148 = arith.constant 9 : index
    %c0_149 = arith.constant 0 : index
    %78 = vector.load %arg1[%c0_146, %c3_147, %c9_148, %c0_149] : memref<1x4x10x248xf32, #tpu.memory_space<vmem>>, vector<1x1x1x248xf32>
    %79 = vector.shape_cast %78 : vector<1x1x1x248xf32> to vector<1x248xf32>
    %c0_150 = arith.constant 0 : index
    %c0_151 = arith.constant 0 : index
    %80 = vector.load %arg2[%c0_150, %c0_151] : memref<16x9xf32, #tpu.memory_space<vmem>>, vector<16x9xf32>
    %c0_152 = arith.constant 0 : index
    %c0_153 = arith.constant 0 : index
    %81 = vector.load %arg3[%c0_152, %c0_153] : memref<16x1xf32, #tpu.memory_space<vmem>>, vector<16x1xf32>
    %82 = tpu.concatenate %1, %21, %41, %3, %23, %43, %5, %25, %45 in 0 : vector<1x248xf32>, vector<1x248xf32>, vector<1x248xf32>, vector<1x248xf32>, vector<1x248xf32>, vector<1x248xf32>, vector<1x248xf32>, vector<1x248xf32>, vector<1x248xf32> -> vector<9x248xf32>
    %cst = arith.constant dense<0.000000e+00> : vector<16x248xf32>
    %83 = tpu.matmul %80, %82, %cst {dimension_numbers = #tpu.dot_dimension_numbers<[1], [0], [0], [1], [0, 0, 1, 1], [], []>} : vector<16x9xf32>, vector<9x248xf32>, vector<16x248xf32> -> vector<16x248xf32>
    %84 = tpu.concatenate %21, %41, %61, %23, %43, %63, %25, %45, %65 in 0 : vector<1x248xf32>, vector<1x248xf32>, vector<1x248xf32>, vector<1x248xf32>, vector<1x248xf32>, vector<1x248xf32>, vector<1x248xf32>, vector<1x248xf32>, vector<1x248xf32> -> vector<9x248xf32>
    %cst_154 = arith.constant dense<0.000000e+00> : vector<16x248xf32>
    %85 = tpu.matmul %80, %84, %cst_154 {dimension_numbers = #tpu.dot_dimension_numbers<[1], [0], [0], [1], [0, 0, 1, 1], [], []>} : vector<16x9xf32>, vector<9x248xf32>, vector<16x248xf32> -> vector<16x248xf32>
    %86 = arith.maximumf %83, %85 : vector<16x248xf32>
    %87 = tpu.concatenate %3, %23, %43, %5, %25, %45, %7, %27, %47 in 0 : vector<1x248xf32>, vector<1x248xf32>, vector<1x248xf32>, vector<1x248xf32>, vector<1x248xf32>, vector<1x248xf32>, vector<1x248xf32>, vector<1x248xf32>, vector<1x248xf32> -> vector<9x248xf32>
    %cst_155 = arith.constant dense<0.000000e+00> : vector<16x248xf32>
    %88 = tpu.matmul %80, %87, %cst_155 {dimension_numbers = #tpu.dot_dimension_numbers<[1], [0], [0], [1], [0, 0, 1, 1], [], []>} : vector<16x9xf32>, vector<9x248xf32>, vector<16x248xf32> -> vector<16x248xf32>
    %89 = arith.maximumf %86, %88 : vector<16x248xf32>
    %90 = tpu.concatenate %23, %43, %63, %25, %45, %65, %27, %47, %67 in 0 : vector<1x248xf32>, vector<1x248xf32>, vector<1x248xf32>, vector<1x248xf32>, vector<1x248xf32>, vector<1x248xf32>, vector<1x248xf32>, vector<1x248xf32>, vector<1x248xf32> -> vector<9x248xf32>
    %cst_156 = arith.constant dense<0.000000e+00> : vector<16x248xf32>
    %91 = tpu.matmul %80, %90, %cst_156 {dimension_numbers = #tpu.dot_dimension_numbers<[1], [0], [0], [1], [0, 0, 1, 1], [], []>} : vector<16x9xf32>, vector<9x248xf32>, vector<16x248xf32> -> vector<16x248xf32>
    %92 = arith.maximumf %89, %91 : vector<16x248xf32>
    %93 = vector.broadcast %81 : vector<16x1xf32> to vector<16x248xf32>
    %94 = arith.addf %92, %93 : vector<16x248xf32>
    %cst_157 = arith.constant 0.000000e+00 : f32
    %95 = vector.broadcast %cst_157 : f32 to vector<16x248xf32>
    %96 = arith.maximumf %94, %95 : vector<16x248xf32>
    %97 = tpu.concatenate %5, %25, %45, %7, %27, %47, %9, %29, %49 in 0 : vector<1x248xf32>, vector<1x248xf32>, vector<1x248xf32>, vector<1x248xf32>, vector<1x248xf32>, vector<1x248xf32>, vector<1x248xf32>, vector<1x248xf32>, vector<1x248xf32> -> vector<9x248xf32>
    %cst_158 = arith.constant dense<0.000000e+00> : vector<16x248xf32>
    %98 = tpu.matmul %80, %97, %cst_158 {dimension_numbers = #tpu.dot_dimension_numbers<[1], [0], [0], [1], [0, 0, 1, 1], [], []>} : vector<16x9xf32>, vector<9x248xf32>, vector<16x248xf32> -> vector<16x248xf32>
    %99 = tpu.concatenate %25, %45, %65, %27, %47, %67, %29, %49, %69 in 0 : vector<1x248xf32>, vector<1x248xf32>, vector<1x248xf32>, vector<1x248xf32>, vector<1x248xf32>, vector<1x248xf32>, vector<1x248xf32>, vector<1x248xf32>, vector<1x248xf32> -> vector<9x248xf32>
    %cst_159 = arith.constant dense<0.000000e+00> : vector<16x248xf32>
    %100 = tpu.matmul %80, %99, %cst_159 {dimension_numbers = #tpu.dot_dimension_numbers<[1], [0], [0], [1], [0, 0, 1, 1], [], []>} : vector<16x9xf32>, vector<9x248xf32>, vector<16x248xf32> -> vector<16x248xf32>
    %101 = arith.maximumf %98, %100 : vector<16x248xf32>
    %102 = tpu.concatenate %7, %27, %47, %9, %29, %49, %11, %31, %51 in 0 : vector<1x248xf32>, vector<1x248xf32>, vector<1x248xf32>, vector<1x248xf32>, vector<1x248xf32>, vector<1x248xf32>, vector<1x248xf32>, vector<1x248xf32>, vector<1x248xf32> -> vector<9x248xf32>
    %cst_160 = arith.constant dense<0.000000e+00> : vector<16x248xf32>
    %103 = tpu.matmul %80, %102, %cst_160 {dimension_numbers = #tpu.dot_dimension_numbers<[1], [0], [0], [1], [0, 0, 1, 1], [], []>} : vector<16x9xf32>, vector<9x248xf32>, vector<16x248xf32> -> vector<16x248xf32>
    %104 = arith.maximumf %101, %103 : vector<16x248xf32>
    %105 = tpu.concatenate %27, %47, %67, %29, %49, %69, %31, %51, %71 in 0 : vector<1x248xf32>, vector<1x248xf32>, vector<1x248xf32>, vector<1x248xf32>, vector<1x248xf32>, vector<1x248xf32>, vector<1x248xf32>, vector<1x248xf32>, vector<1x248xf32> -> vector<9x248xf32>
    %cst_161 = arith.constant dense<0.000000e+00> : vector<16x248xf32>
    %106 = tpu.matmul %80, %105, %cst_161 {dimension_numbers = #tpu.dot_dimension_numbers<[1], [0], [0], [1], [0, 0, 1, 1], [], []>} : vector<16x9xf32>, vector<9x248xf32>, vector<16x248xf32> -> vector<16x248xf32>
    %107 = arith.maximumf %104, %106 : vector<16x248xf32>
    %108 = vector.broadcast %81 : vector<16x1xf32> to vector<16x248xf32>
    %109 = arith.addf %107, %108 : vector<16x248xf32>
    %cst_162 = arith.constant 0.000000e+00 : f32
    %110 = vector.broadcast %cst_162 : f32 to vector<16x248xf32>
    %111 = arith.maximumf %109, %110 : vector<16x248xf32>
    %112 = tpu.concatenate %9, %29, %49, %11, %31, %51, %13, %33, %53 in 0 : vector<1x248xf32>, vector<1x248xf32>, vector<1x248xf32>, vector<1x248xf32>, vector<1x248xf32>, vector<1x248xf32>, vector<1x248xf32>, vector<1x248xf32>, vector<1x248xf32> -> vector<9x248xf32>
    %cst_163 = arith.constant dense<0.000000e+00> : vector<16x248xf32>
    %113 = tpu.matmul %80, %112, %cst_163 {dimension_numbers = #tpu.dot_dimension_numbers<[1], [0], [0], [1], [0, 0, 1, 1], [], []>} : vector<16x9xf32>, vector<9x248xf32>, vector<16x248xf32> -> vector<16x248xf32>
    %114 = tpu.concatenate %29, %49, %69, %31, %51, %71, %33, %53, %73 in 0 : vector<1x248xf32>, vector<1x248xf32>, vector<1x248xf32>, vector<1x248xf32>, vector<1x248xf32>, vector<1x248xf32>, vector<1x248xf32>, vector<1x248xf32>, vector<1x248xf32> -> vector<9x248xf32>
    %cst_164 = arith.constant dense<0.000000e+00> : vector<16x248xf32>
    %115 = tpu.matmul %80, %114, %cst_164 {dimension_numbers = #tpu.dot_dimension_numbers<[1], [0], [0], [1], [0, 0, 1, 1], [], []>} : vector<16x9xf32>, vector<9x248xf32>, vector<16x248xf32> -> vector<16x248xf32>
    %116 = arith.maximumf %113, %115 : vector<16x248xf32>
    %117 = tpu.concatenate %11, %31, %51, %13, %33, %53, %15, %35, %55 in 0 : vector<1x248xf32>, vector<1x248xf32>, vector<1x248xf32>, vector<1x248xf32>, vector<1x248xf32>, vector<1x248xf32>, vector<1x248xf32>, vector<1x248xf32>, vector<1x248xf32> -> vector<9x248xf32>
    %cst_165 = arith.constant dense<0.000000e+00> : vector<16x248xf32>
    %118 = tpu.matmul %80, %117, %cst_165 {dimension_numbers = #tpu.dot_dimension_numbers<[1], [0], [0], [1], [0, 0, 1, 1], [], []>} : vector<16x9xf32>, vector<9x248xf32>, vector<16x248xf32> -> vector<16x248xf32>
    %119 = arith.maximumf %116, %118 : vector<16x248xf32>
    %120 = tpu.concatenate %31, %51, %71, %33, %53, %73, %35, %55, %75 in 0 : vector<1x248xf32>, vector<1x248xf32>, vector<1x248xf32>, vector<1x248xf32>, vector<1x248xf32>, vector<1x248xf32>, vector<1x248xf32>, vector<1x248xf32>, vector<1x248xf32> -> vector<9x248xf32>
    %cst_166 = arith.constant dense<0.000000e+00> : vector<16x248xf32>
    %121 = tpu.matmul %80, %120, %cst_166 {dimension_numbers = #tpu.dot_dimension_numbers<[1], [0], [0], [1], [0, 0, 1, 1], [], []>} : vector<16x9xf32>, vector<9x248xf32>, vector<16x248xf32> -> vector<16x248xf32>
    %122 = arith.maximumf %119, %121 : vector<16x248xf32>
    %123 = vector.broadcast %81 : vector<16x1xf32> to vector<16x248xf32>
    %124 = arith.addf %122, %123 : vector<16x248xf32>
    %cst_167 = arith.constant 0.000000e+00 : f32
    %125 = vector.broadcast %cst_167 : f32 to vector<16x248xf32>
    %126 = arith.maximumf %124, %125 : vector<16x248xf32>
    %127 = tpu.concatenate %13, %33, %53, %15, %35, %55, %17, %37, %57 in 0 : vector<1x248xf32>, vector<1x248xf32>, vector<1x248xf32>, vector<1x248xf32>, vector<1x248xf32>, vector<1x248xf32>, vector<1x248xf32>, vector<1x248xf32>, vector<1x248xf32> -> vector<9x248xf32>
    %cst_168 = arith.constant dense<0.000000e+00> : vector<16x248xf32>
    %128 = tpu.matmul %80, %127, %cst_168 {dimension_numbers = #tpu.dot_dimension_numbers<[1], [0], [0], [1], [0, 0, 1, 1], [], []>} : vector<16x9xf32>, vector<9x248xf32>, vector<16x248xf32> -> vector<16x248xf32>
    %129 = tpu.concatenate %33, %53, %73, %35, %55, %75, %37, %57, %77 in 0 : vector<1x248xf32>, vector<1x248xf32>, vector<1x248xf32>, vector<1x248xf32>, vector<1x248xf32>, vector<1x248xf32>, vector<1x248xf32>, vector<1x248xf32>, vector<1x248xf32> -> vector<9x248xf32>
    %cst_169 = arith.constant dense<0.000000e+00> : vector<16x248xf32>
    %130 = tpu.matmul %80, %129, %cst_169 {dimension_numbers = #tpu.dot_dimension_numbers<[1], [0], [0], [1], [0, 0, 1, 1], [], []>} : vector<16x9xf32>, vector<9x248xf32>, vector<16x248xf32> -> vector<16x248xf32>
    %131 = arith.maximumf %128, %130 : vector<16x248xf32>
    %132 = tpu.concatenate %15, %35, %55, %17, %37, %57, %19, %39, %59 in 0 : vector<1x248xf32>, vector<1x248xf32>, vector<1x248xf32>, vector<1x248xf32>, vector<1x248xf32>, vector<1x248xf32>, vector<1x248xf32>, vector<1x248xf32>, vector<1x248xf32> -> vector<9x248xf32>
    %cst_170 = arith.constant dense<0.000000e+00> : vector<16x248xf32>
    %133 = tpu.matmul %80, %132, %cst_170 {dimension_numbers = #tpu.dot_dimension_numbers<[1], [0], [0], [1], [0, 0, 1, 1], [], []>} : vector<16x9xf32>, vector<9x248xf32>, vector<16x248xf32> -> vector<16x248xf32>
    %134 = arith.maximumf %131, %133 : vector<16x248xf32>
    %135 = tpu.concatenate %35, %55, %75, %37, %57, %77, %39, %59, %79 in 0 : vector<1x248xf32>, vector<1x248xf32>, vector<1x248xf32>, vector<1x248xf32>, vector<1x248xf32>, vector<1x248xf32>, vector<1x248xf32>, vector<1x248xf32>, vector<1x248xf32> -> vector<9x248xf32>
    %cst_171 = arith.constant dense<0.000000e+00> : vector<16x248xf32>
    %136 = tpu.matmul %80, %135, %cst_171 {dimension_numbers = #tpu.dot_dimension_numbers<[1], [0], [0], [1], [0, 0, 1, 1], [], []>} : vector<16x9xf32>, vector<9x248xf32>, vector<16x248xf32> -> vector<16x248xf32>
    %137 = arith.maximumf %134, %136 : vector<16x248xf32>
    %138 = vector.broadcast %81 : vector<16x1xf32> to vector<16x248xf32>
    %139 = arith.addf %137, %138 : vector<16x248xf32>
    %cst_172 = arith.constant 0.000000e+00 : f32
    %140 = vector.broadcast %cst_172 : f32 to vector<16x248xf32>
    %141 = arith.maximumf %139, %140 : vector<16x248xf32>
    %142 = tpu.iota {dimensions = array<i32: 0>} : vector<248x124xi32>
    %143 = tpu.iota {dimensions = array<i32: 1>} : vector<248x124xi32>
    %cst_173 = arith.constant 0.000000e+00 : f32
    %144 = vector.broadcast %cst_173 : f32 to vector<16x124xf32>
    %c2_i32 = arith.constant 2 : i32
    %145 = vector.broadcast %c2_i32 : i32 to vector<248x124xi32>
    %146 = arith.muli %145, %143 : vector<248x124xi32>
    %c-1_i32 = arith.constant -1 : i32
    %147 = vector.broadcast %c-1_i32 : i32 to vector<248x124xi32>
    %148 = arith.addi %146, %147 : vector<248x124xi32>
    %149 = arith.cmpi eq, %142, %148 : vector<248x124xi32>
    %150 = arith.extui %149 : vector<248x124xi1> to vector<248x124xi32>
    %151 = arith.sitofp %150 : vector<248x124xi32> to vector<248x124xf32>
    %cst_174 = arith.constant dense<0.000000e+00> : vector<16x124xf32>
    %152 = tpu.matmul %96, %151, %cst_174 {dimension_numbers = #tpu.dot_dimension_numbers<[1], [0], [0], [1], [0, 0, 1, 1], [], []>} : vector<16x248xf32>, vector<248x124xf32>, vector<16x124xf32> -> vector<16x124xf32>
    %cst_175 = arith.constant dense<0.000000e+00> : vector<16x124xf32>
    %153 = tpu.matmul %111, %151, %cst_175 {dimension_numbers = #tpu.dot_dimension_numbers<[1], [0], [0], [1], [0, 0, 1, 1], [], []>} : vector<16x248xf32>, vector<248x124xf32>, vector<16x124xf32> -> vector<16x124xf32>
    %cst_176 = arith.constant dense<0.000000e+00> : vector<16x124xf32>
    %154 = tpu.matmul %126, %151, %cst_176 {dimension_numbers = #tpu.dot_dimension_numbers<[1], [0], [0], [1], [0, 0, 1, 1], [], []>} : vector<16x248xf32>, vector<248x124xf32>, vector<16x124xf32> -> vector<16x124xf32>
    %cst_177 = arith.constant dense<0.000000e+00> : vector<16x124xf32>
    %155 = tpu.matmul %141, %151, %cst_177 {dimension_numbers = #tpu.dot_dimension_numbers<[1], [0], [0], [1], [0, 0, 1, 1], [], []>} : vector<16x248xf32>, vector<248x124xf32>, vector<16x124xf32> -> vector<16x124xf32>
    %c2_i32_178 = arith.constant 2 : i32
    %156 = vector.broadcast %c2_i32_178 : i32 to vector<248x124xi32>
    %157 = arith.muli %156, %143 : vector<248x124xi32>
    %c0_i32 = arith.constant 0 : i32
    %158 = vector.broadcast %c0_i32 : i32 to vector<248x124xi32>
    %159 = arith.addi %157, %158 : vector<248x124xi32>
    %160 = arith.cmpi eq, %142, %159 : vector<248x124xi32>
    %161 = arith.extui %160 : vector<248x124xi1> to vector<248x124xi32>
    %162 = arith.sitofp %161 : vector<248x124xi32> to vector<248x124xf32>
    %cst_179 = arith.constant dense<0.000000e+00> : vector<16x124xf32>
    %163 = tpu.matmul %96, %162, %cst_179 {dimension_numbers = #tpu.dot_dimension_numbers<[1], [0], [0], [1], [0, 0, 1, 1], [], []>} : vector<16x248xf32>, vector<248x124xf32>, vector<16x124xf32> -> vector<16x124xf32>
    %cst_180 = arith.constant dense<0.000000e+00> : vector<16x124xf32>
    %164 = tpu.matmul %111, %162, %cst_180 {dimension_numbers = #tpu.dot_dimension_numbers<[1], [0], [0], [1], [0, 0, 1, 1], [], []>} : vector<16x248xf32>, vector<248x124xf32>, vector<16x124xf32> -> vector<16x124xf32>
    %cst_181 = arith.constant dense<0.000000e+00> : vector<16x124xf32>
    %165 = tpu.matmul %126, %162, %cst_181 {dimension_numbers = #tpu.dot_dimension_numbers<[1], [0], [0], [1], [0, 0, 1, 1], [], []>} : vector<16x248xf32>, vector<248x124xf32>, vector<16x124xf32> -> vector<16x124xf32>
    %cst_182 = arith.constant dense<0.000000e+00> : vector<16x124xf32>
    %166 = tpu.matmul %141, %162, %cst_182 {dimension_numbers = #tpu.dot_dimension_numbers<[1], [0], [0], [1], [0, 0, 1, 1], [], []>} : vector<16x248xf32>, vector<248x124xf32>, vector<16x124xf32> -> vector<16x124xf32>
    %c2_i32_183 = arith.constant 2 : i32
    %167 = vector.broadcast %c2_i32_183 : i32 to vector<248x124xi32>
    %168 = arith.muli %167, %143 : vector<248x124xi32>
    %c1_i32 = arith.constant 1 : i32
    %169 = vector.broadcast %c1_i32 : i32 to vector<248x124xi32>
    %170 = arith.addi %168, %169 : vector<248x124xi32>
    %171 = arith.cmpi eq, %142, %170 : vector<248x124xi32>
    %172 = arith.extui %171 : vector<248x124xi1> to vector<248x124xi32>
    %173 = arith.sitofp %172 : vector<248x124xi32> to vector<248x124xf32>
    %cst_184 = arith.constant dense<0.000000e+00> : vector<16x124xf32>
    %174 = tpu.matmul %96, %173, %cst_184 {dimension_numbers = #tpu.dot_dimension_numbers<[1], [0], [0], [1], [0, 0, 1, 1], [], []>} : vector<16x248xf32>, vector<248x124xf32>, vector<16x124xf32> -> vector<16x124xf32>
    %cst_185 = arith.constant dense<0.000000e+00> : vector<16x124xf32>
    %175 = tpu.matmul %111, %173, %cst_185 {dimension_numbers = #tpu.dot_dimension_numbers<[1], [0], [0], [1], [0, 0, 1, 1], [], []>} : vector<16x248xf32>, vector<248x124xf32>, vector<16x124xf32> -> vector<16x124xf32>
    %cst_186 = arith.constant dense<0.000000e+00> : vector<16x124xf32>
    %176 = tpu.matmul %126, %173, %cst_186 {dimension_numbers = #tpu.dot_dimension_numbers<[1], [0], [0], [1], [0, 0, 1, 1], [], []>} : vector<16x248xf32>, vector<248x124xf32>, vector<16x124xf32> -> vector<16x124xf32>
    %cst_187 = arith.constant dense<0.000000e+00> : vector<16x124xf32>
    %177 = tpu.matmul %141, %173, %cst_187 {dimension_numbers = #tpu.dot_dimension_numbers<[1], [0], [0], [1], [0, 0, 1, 1], [], []>} : vector<16x248xf32>, vector<248x124xf32>, vector<16x124xf32> -> vector<16x124xf32>
    %c2_i32_188 = arith.constant 2 : i32
    %178 = vector.broadcast %c2_i32_188 : i32 to vector<248x124xi32>
    %179 = arith.muli %178, %143 : vector<248x124xi32>
    %c2_i32_189 = arith.constant 2 : i32
    %180 = vector.broadcast %c2_i32_189 : i32 to vector<248x124xi32>
    %181 = arith.addi %179, %180 : vector<248x124xi32>
    %182 = arith.cmpi eq, %142, %181 : vector<248x124xi32>
    %183 = arith.extui %182 : vector<248x124xi1> to vector<248x124xi32>
    %184 = arith.sitofp %183 : vector<248x124xi32> to vector<248x124xf32>
    %cst_190 = arith.constant dense<0.000000e+00> : vector<16x124xf32>
    %185 = tpu.matmul %96, %184, %cst_190 {dimension_numbers = #tpu.dot_dimension_numbers<[1], [0], [0], [1], [0, 0, 1, 1], [], []>} : vector<16x248xf32>, vector<248x124xf32>, vector<16x124xf32> -> vector<16x124xf32>
    %cst_191 = arith.constant dense<0.000000e+00> : vector<16x124xf32>
    %186 = tpu.matmul %111, %184, %cst_191 {dimension_numbers = #tpu.dot_dimension_numbers<[1], [0], [0], [1], [0, 0, 1, 1], [], []>} : vector<16x248xf32>, vector<248x124xf32>, vector<16x124xf32> -> vector<16x124xf32>
    %cst_192 = arith.constant dense<0.000000e+00> : vector<16x124xf32>
    %187 = tpu.matmul %126, %184, %cst_192 {dimension_numbers = #tpu.dot_dimension_numbers<[1], [0], [0], [1], [0, 0, 1, 1], [], []>} : vector<16x248xf32>, vector<248x124xf32>, vector<16x124xf32> -> vector<16x124xf32>
    %cst_193 = arith.constant dense<0.000000e+00> : vector<16x124xf32>
    %188 = tpu.matmul %141, %184, %cst_193 {dimension_numbers = #tpu.dot_dimension_numbers<[1], [0], [0], [1], [0, 0, 1, 1], [], []>} : vector<16x248xf32>, vector<248x124xf32>, vector<16x124xf32> -> vector<16x124xf32>
    %c0_194 = arith.constant 0 : index
    %c0_195 = arith.constant 0 : index
    %189 = vector.load %arg4[%c0_194, %c0_195] : memref<32x144xf32, #tpu.memory_space<vmem>>, vector<32x144xf32>
    %c0_196 = arith.constant 0 : index
    %c0_197 = arith.constant 0 : index
    %190 = vector.load %arg5[%c0_196, %c0_197] : memref<32x1xf32, #tpu.memory_space<vmem>>, vector<32x1xf32>
    %191 = tpu.concatenate %144, %144, %144, %152, %163, %174, %153, %164, %175 in 0 : vector<16x124xf32>, vector<16x124xf32>, vector<16x124xf32>, vector<16x124xf32>, vector<16x124xf32>, vector<16x124xf32>, vector<16x124xf32>, vector<16x124xf32>, vector<16x124xf32> -> vector<144x124xf32>
    %cst_198 = arith.constant dense<0.000000e+00> : vector<32x124xf32>
    %192 = tpu.matmul %189, %191, %cst_198 {dimension_numbers = #tpu.dot_dimension_numbers<[1], [0], [0], [1], [0, 0, 1, 1], [], []>} : vector<32x144xf32>, vector<144x124xf32>, vector<32x124xf32> -> vector<32x124xf32>
    %193 = tpu.concatenate %144, %144, %144, %163, %174, %185, %164, %175, %186 in 0 : vector<16x124xf32>, vector<16x124xf32>, vector<16x124xf32>, vector<16x124xf32>, vector<16x124xf32>, vector<16x124xf32>, vector<16x124xf32>, vector<16x124xf32>, vector<16x124xf32> -> vector<144x124xf32>
    %cst_199 = arith.constant dense<0.000000e+00> : vector<32x124xf32>
    %194 = tpu.matmul %189, %193, %cst_199 {dimension_numbers = #tpu.dot_dimension_numbers<[1], [0], [0], [1], [0, 0, 1, 1], [], []>} : vector<32x144xf32>, vector<144x124xf32>, vector<32x124xf32> -> vector<32x124xf32>
    %195 = arith.maximumf %192, %194 : vector<32x124xf32>
    %196 = tpu.concatenate %152, %163, %174, %153, %164, %175, %154, %165, %176 in 0 : vector<16x124xf32>, vector<16x124xf32>, vector<16x124xf32>, vector<16x124xf32>, vector<16x124xf32>, vector<16x124xf32>, vector<16x124xf32>, vector<16x124xf32>, vector<16x124xf32> -> vector<144x124xf32>
    %cst_200 = arith.constant dense<0.000000e+00> : vector<32x124xf32>
    %197 = tpu.matmul %189, %196, %cst_200 {dimension_numbers = #tpu.dot_dimension_numbers<[1], [0], [0], [1], [0, 0, 1, 1], [], []>} : vector<32x144xf32>, vector<144x124xf32>, vector<32x124xf32> -> vector<32x124xf32>
    %198 = arith.maximumf %195, %197 : vector<32x124xf32>
    %199 = tpu.concatenate %163, %174, %185, %164, %175, %186, %165, %176, %187 in 0 : vector<16x124xf32>, vector<16x124xf32>, vector<16x124xf32>, vector<16x124xf32>, vector<16x124xf32>, vector<16x124xf32>, vector<16x124xf32>, vector<16x124xf32>, vector<16x124xf32> -> vector<144x124xf32>
    %cst_201 = arith.constant dense<0.000000e+00> : vector<32x124xf32>
    %200 = tpu.matmul %189, %199, %cst_201 {dimension_numbers = #tpu.dot_dimension_numbers<[1], [0], [0], [1], [0, 0, 1, 1], [], []>} : vector<32x144xf32>, vector<144x124xf32>, vector<32x124xf32> -> vector<32x124xf32>
    %201 = arith.maximumf %198, %200 : vector<32x124xf32>
    %202 = vector.broadcast %190 : vector<32x1xf32> to vector<32x124xf32>
    %203 = arith.addf %201, %202 : vector<32x124xf32>
    %cst_202 = arith.constant 0.000000e+00 : f32
    %204 = vector.broadcast %cst_202 : f32 to vector<32x124xf32>
    %205 = arith.maximumf %203, %204 : vector<32x124xf32>
    %206 = tpu.concatenate %153, %164, %175, %154, %165, %176, %155, %166, %177 in 0 : vector<16x124xf32>, vector<16x124xf32>, vector<16x124xf32>, vector<16x124xf32>, vector<16x124xf32>, vector<16x124xf32>, vector<16x124xf32>, vector<16x124xf32>, vector<16x124xf32> -> vector<144x124xf32>
    %cst_203 = arith.constant dense<0.000000e+00> : vector<32x124xf32>
    %207 = tpu.matmul %189, %206, %cst_203 {dimension_numbers = #tpu.dot_dimension_numbers<[1], [0], [0], [1], [0, 0, 1, 1], [], []>} : vector<32x144xf32>, vector<144x124xf32>, vector<32x124xf32> -> vector<32x124xf32>
    %208 = tpu.concatenate %164, %175, %186, %165, %176, %187, %166, %177, %188 in 0 : vector<16x124xf32>, vector<16x124xf32>, vector<16x124xf32>, vector<16x124xf32>, vector<16x124xf32>, vector<16x124xf32>, vector<16x124xf32>, vector<16x124xf32>, vector<16x124xf32> -> vector<144x124xf32>
    %cst_204 = arith.constant dense<0.000000e+00> : vector<32x124xf32>
    %209 = tpu.matmul %189, %208, %cst_204 {dimension_numbers = #tpu.dot_dimension_numbers<[1], [0], [0], [1], [0, 0, 1, 1], [], []>} : vector<32x144xf32>, vector<144x124xf32>, vector<32x124xf32> -> vector<32x124xf32>
    %210 = arith.maximumf %207, %209 : vector<32x124xf32>
    %211 = tpu.concatenate %154, %165, %176, %155, %166, %177, %144, %144, %144 in 0 : vector<16x124xf32>, vector<16x124xf32>, vector<16x124xf32>, vector<16x124xf32>, vector<16x124xf32>, vector<16x124xf32>, vector<16x124xf32>, vector<16x124xf32>, vector<16x124xf32> -> vector<144x124xf32>
    %cst_205 = arith.constant dense<0.000000e+00> : vector<32x124xf32>
    %212 = tpu.matmul %189, %211, %cst_205 {dimension_numbers = #tpu.dot_dimension_numbers<[1], [0], [0], [1], [0, 0, 1, 1], [], []>} : vector<32x144xf32>, vector<144x124xf32>, vector<32x124xf32> -> vector<32x124xf32>
    %213 = arith.maximumf %210, %212 : vector<32x124xf32>
    %214 = tpu.concatenate %165, %176, %187, %166, %177, %188, %144, %144, %144 in 0 : vector<16x124xf32>, vector<16x124xf32>, vector<16x124xf32>, vector<16x124xf32>, vector<16x124xf32>, vector<16x124xf32>, vector<16x124xf32>, vector<16x124xf32>, vector<16x124xf32> -> vector<144x124xf32>
    %cst_206 = arith.constant dense<0.000000e+00> : vector<32x124xf32>
    %215 = tpu.matmul %189, %214, %cst_206 {dimension_numbers = #tpu.dot_dimension_numbers<[1], [0], [0], [1], [0, 0, 1, 1], [], []>} : vector<32x144xf32>, vector<144x124xf32>, vector<32x124xf32> -> vector<32x124xf32>
    %216 = arith.maximumf %213, %215 : vector<32x124xf32>
    %217 = vector.broadcast %190 : vector<32x1xf32> to vector<32x124xf32>
    %218 = arith.addf %216, %217 : vector<32x124xf32>
    %cst_207 = arith.constant 0.000000e+00 : f32
    %219 = vector.broadcast %cst_207 : f32 to vector<32x124xf32>
    %220 = arith.maximumf %218, %219 : vector<32x124xf32>
    %221 = tpu.iota {dimensions = array<i32: 0>} : vector<124x62xi32>
    %222 = tpu.iota {dimensions = array<i32: 1>} : vector<124x62xi32>
    %cst_208 = arith.constant 0.000000e+00 : f32
    %223 = vector.broadcast %cst_208 : f32 to vector<32x62xf32>
    %c2_i32_209 = arith.constant 2 : i32
    %224 = vector.broadcast %c2_i32_209 : i32 to vector<124x62xi32>
    %225 = arith.muli %224, %222 : vector<124x62xi32>
    %c-1_i32_210 = arith.constant -1 : i32
    %226 = vector.broadcast %c-1_i32_210 : i32 to vector<124x62xi32>
    %227 = arith.addi %225, %226 : vector<124x62xi32>
    %228 = arith.cmpi eq, %221, %227 : vector<124x62xi32>
    %229 = arith.extui %228 : vector<124x62xi1> to vector<124x62xi32>
    %230 = arith.sitofp %229 : vector<124x62xi32> to vector<124x62xf32>
    %cst_211 = arith.constant dense<0.000000e+00> : vector<32x62xf32>
    %231 = tpu.matmul %205, %230, %cst_211 {dimension_numbers = #tpu.dot_dimension_numbers<[1], [0], [0], [1], [0, 0, 1, 1], [], []>} : vector<32x124xf32>, vector<124x62xf32>, vector<32x62xf32> -> vector<32x62xf32>
    %cst_212 = arith.constant dense<0.000000e+00> : vector<32x62xf32>
    %232 = tpu.matmul %220, %230, %cst_212 {dimension_numbers = #tpu.dot_dimension_numbers<[1], [0], [0], [1], [0, 0, 1, 1], [], []>} : vector<32x124xf32>, vector<124x62xf32>, vector<32x62xf32> -> vector<32x62xf32>
    %c2_i32_213 = arith.constant 2 : i32
    %233 = vector.broadcast %c2_i32_213 : i32 to vector<124x62xi32>
    %234 = arith.muli %233, %222 : vector<124x62xi32>
    %c0_i32_214 = arith.constant 0 : i32
    %235 = vector.broadcast %c0_i32_214 : i32 to vector<124x62xi32>
    %236 = arith.addi %234, %235 : vector<124x62xi32>
    %237 = arith.cmpi eq, %221, %236 : vector<124x62xi32>
    %238 = arith.extui %237 : vector<124x62xi1> to vector<124x62xi32>
    %239 = arith.sitofp %238 : vector<124x62xi32> to vector<124x62xf32>
    %cst_215 = arith.constant dense<0.000000e+00> : vector<32x62xf32>
    %240 = tpu.matmul %205, %239, %cst_215 {dimension_numbers = #tpu.dot_dimension_numbers<[1], [0], [0], [1], [0, 0, 1, 1], [], []>} : vector<32x124xf32>, vector<124x62xf32>, vector<32x62xf32> -> vector<32x62xf32>
    %cst_216 = arith.constant dense<0.000000e+00> : vector<32x62xf32>
    %241 = tpu.matmul %220, %239, %cst_216 {dimension_numbers = #tpu.dot_dimension_numbers<[1], [0], [0], [1], [0, 0, 1, 1], [], []>} : vector<32x124xf32>, vector<124x62xf32>, vector<32x62xf32> -> vector<32x62xf32>
    %c2_i32_217 = arith.constant 2 : i32
    %242 = vector.broadcast %c2_i32_217 : i32 to vector<124x62xi32>
    %243 = arith.muli %242, %222 : vector<124x62xi32>
    %c1_i32_218 = arith.constant 1 : i32
    %244 = vector.broadcast %c1_i32_218 : i32 to vector<124x62xi32>
    %245 = arith.addi %243, %244 : vector<124x62xi32>
    %246 = arith.cmpi eq, %221, %245 : vector<124x62xi32>
    %247 = arith.extui %246 : vector<124x62xi1> to vector<124x62xi32>
    %248 = arith.sitofp %247 : vector<124x62xi32> to vector<124x62xf32>
    %cst_219 = arith.constant dense<0.000000e+00> : vector<32x62xf32>
    %249 = tpu.matmul %205, %248, %cst_219 {dimension_numbers = #tpu.dot_dimension_numbers<[1], [0], [0], [1], [0, 0, 1, 1], [], []>} : vector<32x124xf32>, vector<124x62xf32>, vector<32x62xf32> -> vector<32x62xf32>
    %cst_220 = arith.constant dense<0.000000e+00> : vector<32x62xf32>
    %250 = tpu.matmul %220, %248, %cst_220 {dimension_numbers = #tpu.dot_dimension_numbers<[1], [0], [0], [1], [0, 0, 1, 1], [], []>} : vector<32x124xf32>, vector<124x62xf32>, vector<32x62xf32> -> vector<32x62xf32>
    %c2_i32_221 = arith.constant 2 : i32
    %251 = vector.broadcast %c2_i32_221 : i32 to vector<124x62xi32>
    %252 = arith.muli %251, %222 : vector<124x62xi32>
    %c2_i32_222 = arith.constant 2 : i32
    %253 = vector.broadcast %c2_i32_222 : i32 to vector<124x62xi32>
    %254 = arith.addi %252, %253 : vector<124x62xi32>
    %255 = arith.cmpi eq, %221, %254 : vector<124x62xi32>
    %256 = arith.extui %255 : vector<124x62xi1> to vector<124x62xi32>
    %257 = arith.sitofp %256 : vector<124x62xi32> to vector<124x62xf32>
    %cst_223 = arith.constant dense<0.000000e+00> : vector<32x62xf32>
    %258 = tpu.matmul %205, %257, %cst_223 {dimension_numbers = #tpu.dot_dimension_numbers<[1], [0], [0], [1], [0, 0, 1, 1], [], []>} : vector<32x124xf32>, vector<124x62xf32>, vector<32x62xf32> -> vector<32x62xf32>
    %cst_224 = arith.constant dense<0.000000e+00> : vector<32x62xf32>
    %259 = tpu.matmul %220, %257, %cst_224 {dimension_numbers = #tpu.dot_dimension_numbers<[1], [0], [0], [1], [0, 0, 1, 1], [], []>} : vector<32x124xf32>, vector<124x62xf32>, vector<32x62xf32> -> vector<32x62xf32>
    %c0_225 = arith.constant 0 : index
    %c0_226 = arith.constant 0 : index
    %260 = vector.load %arg6[%c0_225, %c0_226] : memref<64x288xf32, #tpu.memory_space<vmem>>, vector<64x288xf32>
    %c0_227 = arith.constant 0 : index
    %c0_228 = arith.constant 0 : index
    %261 = vector.load %arg7[%c0_227, %c0_228] : memref<64x1xf32, #tpu.memory_space<vmem>>, vector<64x1xf32>
    %262 = tpu.concatenate %223, %223, %223, %231, %240, %249, %232, %241, %250 in 0 : vector<32x62xf32>, vector<32x62xf32>, vector<32x62xf32>, vector<32x62xf32>, vector<32x62xf32>, vector<32x62xf32>, vector<32x62xf32>, vector<32x62xf32>, vector<32x62xf32> -> vector<288x62xf32>
    %cst_229 = arith.constant dense<0.000000e+00> : vector<64x62xf32>
    %263 = tpu.matmul %260, %262, %cst_229 {dimension_numbers = #tpu.dot_dimension_numbers<[1], [0], [0], [1], [0, 0, 1, 1], [], []>} : vector<64x288xf32>, vector<288x62xf32>, vector<64x62xf32> -> vector<64x62xf32>
    %264 = tpu.concatenate %223, %223, %223, %240, %249, %258, %241, %250, %259 in 0 : vector<32x62xf32>, vector<32x62xf32>, vector<32x62xf32>, vector<32x62xf32>, vector<32x62xf32>, vector<32x62xf32>, vector<32x62xf32>, vector<32x62xf32>, vector<32x62xf32> -> vector<288x62xf32>
    %cst_230 = arith.constant dense<0.000000e+00> : vector<64x62xf32>
    %265 = tpu.matmul %260, %264, %cst_230 {dimension_numbers = #tpu.dot_dimension_numbers<[1], [0], [0], [1], [0, 0, 1, 1], [], []>} : vector<64x288xf32>, vector<288x62xf32>, vector<64x62xf32> -> vector<64x62xf32>
    %266 = arith.maximumf %263, %265 : vector<64x62xf32>
    %267 = tpu.concatenate %231, %240, %249, %232, %241, %250, %223, %223, %223 in 0 : vector<32x62xf32>, vector<32x62xf32>, vector<32x62xf32>, vector<32x62xf32>, vector<32x62xf32>, vector<32x62xf32>, vector<32x62xf32>, vector<32x62xf32>, vector<32x62xf32> -> vector<288x62xf32>
    %cst_231 = arith.constant dense<0.000000e+00> : vector<64x62xf32>
    %268 = tpu.matmul %260, %267, %cst_231 {dimension_numbers = #tpu.dot_dimension_numbers<[1], [0], [0], [1], [0, 0, 1, 1], [], []>} : vector<64x288xf32>, vector<288x62xf32>, vector<64x62xf32> -> vector<64x62xf32>
    %269 = arith.maximumf %266, %268 : vector<64x62xf32>
    %270 = tpu.concatenate %240, %249, %258, %241, %250, %259, %223, %223, %223 in 0 : vector<32x62xf32>, vector<32x62xf32>, vector<32x62xf32>, vector<32x62xf32>, vector<32x62xf32>, vector<32x62xf32>, vector<32x62xf32>, vector<32x62xf32>, vector<32x62xf32> -> vector<288x62xf32>
    %cst_232 = arith.constant dense<0.000000e+00> : vector<64x62xf32>
    %271 = tpu.matmul %260, %270, %cst_232 {dimension_numbers = #tpu.dot_dimension_numbers<[1], [0], [0], [1], [0, 0, 1, 1], [], []>} : vector<64x288xf32>, vector<288x62xf32>, vector<64x62xf32> -> vector<64x62xf32>
    %272 = arith.maximumf %269, %271 : vector<64x62xf32>
    %273 = vector.broadcast %261 : vector<64x1xf32> to vector<64x62xf32>
    %274 = arith.addf %272, %273 : vector<64x62xf32>
    %cst_233 = arith.constant 0.000000e+00 : f32
    %275 = vector.broadcast %cst_233 : f32 to vector<64x62xf32>
    %276 = arith.maximumf %274, %275 : vector<64x62xf32>
    %277 = vector.extract_strided_slice %276 {offsets = [0, 0], sizes = [1, 62], strides = [1, 1]} : vector<64x62xf32> to vector<1x62xf32>
    %278 = vector.extract_strided_slice %276 {offsets = [1, 0], sizes = [1, 62], strides = [1, 1]} : vector<64x62xf32> to vector<1x62xf32>
    %279 = vector.extract_strided_slice %276 {offsets = [2, 0], sizes = [1, 62], strides = [1, 1]} : vector<64x62xf32> to vector<1x62xf32>
    %280 = vector.extract_strided_slice %276 {offsets = [3, 0], sizes = [1, 62], strides = [1, 1]} : vector<64x62xf32> to vector<1x62xf32>
    %281 = vector.extract_strided_slice %276 {offsets = [4, 0], sizes = [1, 62], strides = [1, 1]} : vector<64x62xf32> to vector<1x62xf32>
    %282 = vector.extract_strided_slice %276 {offsets = [5, 0], sizes = [1, 62], strides = [1, 1]} : vector<64x62xf32> to vector<1x62xf32>
    %283 = vector.extract_strided_slice %276 {offsets = [6, 0], sizes = [1, 62], strides = [1, 1]} : vector<64x62xf32> to vector<1x62xf32>
    %284 = vector.extract_strided_slice %276 {offsets = [7, 0], sizes = [1, 62], strides = [1, 1]} : vector<64x62xf32> to vector<1x62xf32>
    %285 = vector.extract_strided_slice %276 {offsets = [8, 0], sizes = [1, 62], strides = [1, 1]} : vector<64x62xf32> to vector<1x62xf32>
    %286 = vector.extract_strided_slice %276 {offsets = [9, 0], sizes = [1, 62], strides = [1, 1]} : vector<64x62xf32> to vector<1x62xf32>
    %287 = vector.extract_strided_slice %276 {offsets = [10, 0], sizes = [1, 62], strides = [1, 1]} : vector<64x62xf32> to vector<1x62xf32>
    %288 = vector.extract_strided_slice %276 {offsets = [11, 0], sizes = [1, 62], strides = [1, 1]} : vector<64x62xf32> to vector<1x62xf32>
    %289 = vector.extract_strided_slice %276 {offsets = [12, 0], sizes = [1, 62], strides = [1, 1]} : vector<64x62xf32> to vector<1x62xf32>
    %290 = vector.extract_strided_slice %276 {offsets = [13, 0], sizes = [1, 62], strides = [1, 1]} : vector<64x62xf32> to vector<1x62xf32>
    %291 = vector.extract_strided_slice %276 {offsets = [14, 0], sizes = [1, 62], strides = [1, 1]} : vector<64x62xf32> to vector<1x62xf32>
    %292 = vector.extract_strided_slice %276 {offsets = [15, 0], sizes = [1, 62], strides = [1, 1]} : vector<64x62xf32> to vector<1x62xf32>
    %293 = vector.extract_strided_slice %276 {offsets = [16, 0], sizes = [1, 62], strides = [1, 1]} : vector<64x62xf32> to vector<1x62xf32>
    %294 = vector.extract_strided_slice %276 {offsets = [17, 0], sizes = [1, 62], strides = [1, 1]} : vector<64x62xf32> to vector<1x62xf32>
    %295 = vector.extract_strided_slice %276 {offsets = [18, 0], sizes = [1, 62], strides = [1, 1]} : vector<64x62xf32> to vector<1x62xf32>
    %296 = vector.extract_strided_slice %276 {offsets = [19, 0], sizes = [1, 62], strides = [1, 1]} : vector<64x62xf32> to vector<1x62xf32>
    %297 = vector.extract_strided_slice %276 {offsets = [20, 0], sizes = [1, 62], strides = [1, 1]} : vector<64x62xf32> to vector<1x62xf32>
    %298 = vector.extract_strided_slice %276 {offsets = [21, 0], sizes = [1, 62], strides = [1, 1]} : vector<64x62xf32> to vector<1x62xf32>
    %299 = vector.extract_strided_slice %276 {offsets = [22, 0], sizes = [1, 62], strides = [1, 1]} : vector<64x62xf32> to vector<1x62xf32>
    %300 = vector.extract_strided_slice %276 {offsets = [23, 0], sizes = [1, 62], strides = [1, 1]} : vector<64x62xf32> to vector<1x62xf32>
    %301 = vector.extract_strided_slice %276 {offsets = [24, 0], sizes = [1, 62], strides = [1, 1]} : vector<64x62xf32> to vector<1x62xf32>
    %302 = vector.extract_strided_slice %276 {offsets = [25, 0], sizes = [1, 62], strides = [1, 1]} : vector<64x62xf32> to vector<1x62xf32>
    %303 = vector.extract_strided_slice %276 {offsets = [26, 0], sizes = [1, 62], strides = [1, 1]} : vector<64x62xf32> to vector<1x62xf32>
    %304 = vector.extract_strided_slice %276 {offsets = [27, 0], sizes = [1, 62], strides = [1, 1]} : vector<64x62xf32> to vector<1x62xf32>
    %305 = vector.extract_strided_slice %276 {offsets = [28, 0], sizes = [1, 62], strides = [1, 1]} : vector<64x62xf32> to vector<1x62xf32>
    %306 = vector.extract_strided_slice %276 {offsets = [29, 0], sizes = [1, 62], strides = [1, 1]} : vector<64x62xf32> to vector<1x62xf32>
    %307 = vector.extract_strided_slice %276 {offsets = [30, 0], sizes = [1, 62], strides = [1, 1]} : vector<64x62xf32> to vector<1x62xf32>
    %308 = vector.extract_strided_slice %276 {offsets = [31, 0], sizes = [1, 62], strides = [1, 1]} : vector<64x62xf32> to vector<1x62xf32>
    %309 = vector.extract_strided_slice %276 {offsets = [32, 0], sizes = [1, 62], strides = [1, 1]} : vector<64x62xf32> to vector<1x62xf32>
    %310 = vector.extract_strided_slice %276 {offsets = [33, 0], sizes = [1, 62], strides = [1, 1]} : vector<64x62xf32> to vector<1x62xf32>
    %311 = vector.extract_strided_slice %276 {offsets = [34, 0], sizes = [1, 62], strides = [1, 1]} : vector<64x62xf32> to vector<1x62xf32>
    %312 = vector.extract_strided_slice %276 {offsets = [35, 0], sizes = [1, 62], strides = [1, 1]} : vector<64x62xf32> to vector<1x62xf32>
    %313 = vector.extract_strided_slice %276 {offsets = [36, 0], sizes = [1, 62], strides = [1, 1]} : vector<64x62xf32> to vector<1x62xf32>
    %314 = vector.extract_strided_slice %276 {offsets = [37, 0], sizes = [1, 62], strides = [1, 1]} : vector<64x62xf32> to vector<1x62xf32>
    %315 = vector.extract_strided_slice %276 {offsets = [38, 0], sizes = [1, 62], strides = [1, 1]} : vector<64x62xf32> to vector<1x62xf32>
    %316 = vector.extract_strided_slice %276 {offsets = [39, 0], sizes = [1, 62], strides = [1, 1]} : vector<64x62xf32> to vector<1x62xf32>
    %317 = vector.extract_strided_slice %276 {offsets = [40, 0], sizes = [1, 62], strides = [1, 1]} : vector<64x62xf32> to vector<1x62xf32>
    %318 = vector.extract_strided_slice %276 {offsets = [41, 0], sizes = [1, 62], strides = [1, 1]} : vector<64x62xf32> to vector<1x62xf32>
    %319 = vector.extract_strided_slice %276 {offsets = [42, 0], sizes = [1, 62], strides = [1, 1]} : vector<64x62xf32> to vector<1x62xf32>
    %320 = vector.extract_strided_slice %276 {offsets = [43, 0], sizes = [1, 62], strides = [1, 1]} : vector<64x62xf32> to vector<1x62xf32>
    %321 = vector.extract_strided_slice %276 {offsets = [44, 0], sizes = [1, 62], strides = [1, 1]} : vector<64x62xf32> to vector<1x62xf32>
    %322 = vector.extract_strided_slice %276 {offsets = [45, 0], sizes = [1, 62], strides = [1, 1]} : vector<64x62xf32> to vector<1x62xf32>
    %323 = vector.extract_strided_slice %276 {offsets = [46, 0], sizes = [1, 62], strides = [1, 1]} : vector<64x62xf32> to vector<1x62xf32>
    %324 = vector.extract_strided_slice %276 {offsets = [47, 0], sizes = [1, 62], strides = [1, 1]} : vector<64x62xf32> to vector<1x62xf32>
    %325 = vector.extract_strided_slice %276 {offsets = [48, 0], sizes = [1, 62], strides = [1, 1]} : vector<64x62xf32> to vector<1x62xf32>
    %326 = vector.extract_strided_slice %276 {offsets = [49, 0], sizes = [1, 62], strides = [1, 1]} : vector<64x62xf32> to vector<1x62xf32>
    %327 = vector.extract_strided_slice %276 {offsets = [50, 0], sizes = [1, 62], strides = [1, 1]} : vector<64x62xf32> to vector<1x62xf32>
    %328 = vector.extract_strided_slice %276 {offsets = [51, 0], sizes = [1, 62], strides = [1, 1]} : vector<64x62xf32> to vector<1x62xf32>
    %329 = vector.extract_strided_slice %276 {offsets = [52, 0], sizes = [1, 62], strides = [1, 1]} : vector<64x62xf32> to vector<1x62xf32>
    %330 = vector.extract_strided_slice %276 {offsets = [53, 0], sizes = [1, 62], strides = [1, 1]} : vector<64x62xf32> to vector<1x62xf32>
    %331 = vector.extract_strided_slice %276 {offsets = [54, 0], sizes = [1, 62], strides = [1, 1]} : vector<64x62xf32> to vector<1x62xf32>
    %332 = vector.extract_strided_slice %276 {offsets = [55, 0], sizes = [1, 62], strides = [1, 1]} : vector<64x62xf32> to vector<1x62xf32>
    %333 = vector.extract_strided_slice %276 {offsets = [56, 0], sizes = [1, 62], strides = [1, 1]} : vector<64x62xf32> to vector<1x62xf32>
    %334 = vector.extract_strided_slice %276 {offsets = [57, 0], sizes = [1, 62], strides = [1, 1]} : vector<64x62xf32> to vector<1x62xf32>
    %335 = vector.extract_strided_slice %276 {offsets = [58, 0], sizes = [1, 62], strides = [1, 1]} : vector<64x62xf32> to vector<1x62xf32>
    %336 = vector.extract_strided_slice %276 {offsets = [59, 0], sizes = [1, 62], strides = [1, 1]} : vector<64x62xf32> to vector<1x62xf32>
    %337 = vector.extract_strided_slice %276 {offsets = [60, 0], sizes = [1, 62], strides = [1, 1]} : vector<64x62xf32> to vector<1x62xf32>
    %338 = vector.extract_strided_slice %276 {offsets = [61, 0], sizes = [1, 62], strides = [1, 1]} : vector<64x62xf32> to vector<1x62xf32>
    %339 = vector.extract_strided_slice %276 {offsets = [62, 0], sizes = [1, 62], strides = [1, 1]} : vector<64x62xf32> to vector<1x62xf32>
    %340 = vector.extract_strided_slice %276 {offsets = [63, 0], sizes = [1, 62], strides = [1, 1]} : vector<64x62xf32> to vector<1x62xf32>
    %341 = tpu.concatenate %277, %278, %279, %280, %281, %282, %283, %284, %285, %286, %287, %288, %289, %290, %291, %292 in 1 : vector<1x62xf32>, vector<1x62xf32>, vector<1x62xf32>, vector<1x62xf32>, vector<1x62xf32>, vector<1x62xf32>, vector<1x62xf32>, vector<1x62xf32>, vector<1x62xf32>, vector<1x62xf32>, vector<1x62xf32>, vector<1x62xf32>, vector<1x62xf32>, vector<1x62xf32>, vector<1x62xf32>, vector<1x62xf32> -> vector<1x992xf32>
    %342 = tpu.concatenate %293, %294, %295, %296, %297, %298, %299, %300, %301, %302, %303, %304, %305, %306, %307, %308 in 1 : vector<1x62xf32>, vector<1x62xf32>, vector<1x62xf32>, vector<1x62xf32>, vector<1x62xf32>, vector<1x62xf32>, vector<1x62xf32>, vector<1x62xf32>, vector<1x62xf32>, vector<1x62xf32>, vector<1x62xf32>, vector<1x62xf32>, vector<1x62xf32>, vector<1x62xf32>, vector<1x62xf32>, vector<1x62xf32> -> vector<1x992xf32>
    %343 = tpu.concatenate %309, %310, %311, %312, %313, %314, %315, %316, %317, %318, %319, %320, %321, %322, %323, %324 in 1 : vector<1x62xf32>, vector<1x62xf32>, vector<1x62xf32>, vector<1x62xf32>, vector<1x62xf32>, vector<1x62xf32>, vector<1x62xf32>, vector<1x62xf32>, vector<1x62xf32>, vector<1x62xf32>, vector<1x62xf32>, vector<1x62xf32>, vector<1x62xf32>, vector<1x62xf32>, vector<1x62xf32>, vector<1x62xf32> -> vector<1x992xf32>
    %344 = tpu.concatenate %325, %326, %327, %328, %329, %330, %331, %332, %333, %334, %335, %336, %337, %338, %339, %340 in 1 : vector<1x62xf32>, vector<1x62xf32>, vector<1x62xf32>, vector<1x62xf32>, vector<1x62xf32>, vector<1x62xf32>, vector<1x62xf32>, vector<1x62xf32>, vector<1x62xf32>, vector<1x62xf32>, vector<1x62xf32>, vector<1x62xf32>, vector<1x62xf32>, vector<1x62xf32>, vector<1x62xf32>, vector<1x62xf32> -> vector<1x992xf32>
    %345 = tpu.concatenate %341, %342, %343, %344 in 1 : vector<1x992xf32>, vector<1x992xf32>, vector<1x992xf32>, vector<1x992xf32> -> vector<1x3968xf32>
    %c0_234 = arith.constant 0 : index
    %c0_235 = arith.constant 0 : index
    %346 = vector.load %arg8[%c0_234, %c0_235] : memref<3968x128xf32, #tpu.memory_space<vmem>>, vector<3968x128xf32>
    %cst_236 = arith.constant dense<0.000000e+00> : vector<1x128xf32>
    %347 = tpu.matmul %345, %346, %cst_236 {dimension_numbers = #tpu.dot_dimension_numbers<[1], [0], [0], [1], [0, 0, 1, 1], [], []>} : vector<1x3968xf32>, vector<3968x128xf32>, vector<1x128xf32> -> vector<1x128xf32>
    %c0_237 = arith.constant 0 : index
    %c0_238 = arith.constant 0 : index
    %348 = vector.load %arg9[%c0_237, %c0_238] : memref<1x128xf32, #tpu.memory_space<vmem>>, vector<1x128xf32>
    %349 = arith.addf %347, %348 : vector<1x128xf32>
    %cst_239 = arith.constant 0.000000e+00 : f32
    %350 = vector.broadcast %cst_239 : f32 to vector<1x128xf32>
    %351 = arith.maximumf %349, %350 : vector<1x128xf32>
    %c0_240 = arith.constant 0 : index
    %c0_241 = arith.constant 0 : index
    %352 = vector.load %arg10[%c0_240, %c0_241] : memref<128x6xf32, #tpu.memory_space<vmem>>, vector<128x6xf32>
    %cst_242 = arith.constant dense<0.000000e+00> : vector<1x6xf32>
    %353 = tpu.matmul %351, %352, %cst_242 {dimension_numbers = #tpu.dot_dimension_numbers<[1], [0], [0], [1], [0, 0, 1, 1], [], []>} : vector<1x128xf32>, vector<128x6xf32>, vector<1x6xf32> -> vector<1x6xf32>
    %c0_243 = arith.constant 0 : index
    %c0_244 = arith.constant 0 : index
    %354 = vector.load %arg11[%c0_243, %c0_244] : memref<1x6xf32, #tpu.memory_space<vmem>>, vector<1x6xf32>
    %355 = arith.addf %353, %354 : vector<1x6xf32>
    %c0_245 = arith.constant 0 : index
    %c0_246 = arith.constant 0 : index
    %c0_247 = arith.constant 0 : index
    %356 = vector.load %arg12[%c0_245, %c0_246, %c0_247] : memref<1x1x6xf32, #tpu.memory_space<vmem>>, vector<1x1x6xf32>
    %357 = vector.shape_cast %356 : vector<1x1x6xf32> to vector<1x6xf32>
    %358 = vector.shape_cast %355 : vector<1x6xf32> to vector<1x1x6xf32>
    tpu.vector_store %arg12[%c0_245, %c0_246, %c0_247], %358 {strides = array<i32>} : memref<1x1x6xf32, #tpu.memory_space<vmem>>, vector<1x1x6xf32>,
    return
  }
  func.func @transform_0(%arg0: i32) -> (i32, i32, i32, i32) {
    %c0_i32 = arith.constant 0 : i32
    %c0_i32_0 = arith.constant 0 : i32
    %c0_i32_1 = arith.constant 0 : i32
    %c0_i32_2 = arith.constant 0 : i32
    return %arg0, %c0_i32, %c0_i32_0, %c0_i32_1 : i32, i32, i32, i32
  }
  func.func @transform_1(%arg0: i32) -> (i32, i32) {
    %c0_i32 = arith.constant 0 : i32
    %c0_i32_0 = arith.constant 0 : i32
    %c0_i32_1 = arith.constant 0 : i32
    return %c0_i32, %c0_i32_0 : i32, i32
  }
  func.func @transform_2(%arg0: i32) -> (i32, i32) {
    %c0_i32 = arith.constant 0 : i32
    %c0_i32_0 = arith.constant 0 : i32
    %c0_i32_1 = arith.constant 0 : i32
    return %c0_i32, %c0_i32_0 : i32, i32
  }
  func.func @transform_3(%arg0: i32) -> (i32, i32) {
    %c0_i32 = arith.constant 0 : i32
    %c0_i32_0 = arith.constant 0 : i32
    %c0_i32_1 = arith.constant 0 : i32
    return %c0_i32, %c0_i32_0 : i32, i32
  }
  func.func @transform_4(%arg0: i32) -> (i32, i32) {
    %c0_i32 = arith.constant 0 : i32
    %c0_i32_0 = arith.constant 0 : i32
    %c0_i32_1 = arith.constant 0 : i32
    return %c0_i32, %c0_i32_0 : i32, i32
  }
  func.func @transform_5(%arg0: i32) -> (i32, i32) {
    %c0_i32 = arith.constant 0 : i32
    %c0_i32_0 = arith.constant 0 : i32
    %c0_i32_1 = arith.constant 0 : i32
    return %c0_i32, %c0_i32_0 : i32, i32
  }
  func.func @transform_6(%arg0: i32) -> (i32, i32) {
    %c0_i32 = arith.constant 0 : i32
    %c0_i32_0 = arith.constant 0 : i32
    %c0_i32_1 = arith.constant 0 : i32
    return %c0_i32, %c0_i32_0 : i32, i32
  }
  func.func @transform_7(%arg0: i32) -> (i32, i32) {
    %c0_i32 = arith.constant 0 : i32
    %c0_i32_0 = arith.constant 0 : i32
    %c0_i32_1 = arith.constant 0 : i32
    return %c0_i32, %c0_i32_0 : i32, i32
  }
  func.func @transform_8(%arg0: i32) -> (i32, i32) {
    %c0_i32 = arith.constant 0 : i32
    %c0_i32_0 = arith.constant 0 : i32
    %c0_i32_1 = arith.constant 0 : i32
    return %c0_i32, %c0_i32_0 : i32, i32
  }
  func.func @transform_9(%arg0: i32) -> (i32, i32) {
    %c0_i32 = arith.constant 0 : i32
    %c0_i32_0 = arith.constant 0 : i32
    %c0_i32_1 = arith.constant 0 : i32
    return %c0_i32, %c0_i32_0 : i32, i32
  }
  func.func @transform_10(%arg0: i32) -> (i32, i32) {
    %c0_i32 = arith.constant 0 : i32
    %c0_i32_0 = arith.constant 0 : i32
    %c0_i32_1 = arith.constant 0 : i32
    return %c0_i32, %c0_i32_0 : i32, i32
  }
  func.func @transform_11(%arg0: i32) -> (i32, i32, i32) {
    %c0_i32 = arith.constant 0 : i32
    %c0_i32_0 = arith.constant 0 : i32
    %c0_i32_1 = arith.constant 0 : i32
    return %arg0, %c0_i32, %c0_i32_0 : i32, i32, i32
  }
}

</mosaic_0001>

<bundles_post_ra>
// kernel: emotion_cnn_forward.1
= control target key start
LH: loop header
LB: loop body
LE: loop exit
PB: predicated region body
PF: predicated region fallthrough
CT: control target
= control target key end

     0   :  { %s18442_s0 = inlined_call_operand.vmem [shape: f32[2,4,10,248], index: 0, kind: input, shape index: {}]   ;;  %s18443_s1 = inlined_call_operand.vmem [shape: f32[16,9], index: 1, kind: input, shape index: {}]   ;;  %s18444_s2 = inlined_call_operand.vmem [shape: f32[16,1], index: 2, kind: input, shape index: {}]   ;;  %s18445_s3 = inlined_call_operand.vmem [shape: f32[32,144], index: 3, kind: input, shape index: {}]   ;;  %s18446_s4 = inlined_call_operand.vmem [shape: f32[32,1], index: 4, kind: input, shape index: {}]   ;;  %s18447_s5 = inlined_call_operand.vmem [shape: f32[64,288], index: 5, kind: input, shape index: {}]   ;;  %s18448_s6 = inlined_call_operand.vmem [shape: f32[64,1], index: 6, kind: input, shape index: {}]   ;;  %s18449_s7 = inlined_call_operand.hbm [shape: f32[3968,128], index: 7, kind: input, shape index: {}]   ;;  %s18450_s8 = inlined_call_operand.hbm [shape: f32[1,128], index: 8, kind: input, shape index: {}]   ;;  %s18451_s9 = inlined_call_operand.vmem [shape: f32[128,6], index: 9, kind: input, shape index: {}]   ;;  %s18452_s10 = inlined_call_operand.hbm [shape: f32[1,6], index: 10, kind: input, shape index: {}]   ;;  %s18453_s11 = inlined_call_operand.hbm [shape: f32[2,1,6], index: 11, kind: output, shape index: {}]  }
   0x1   :  { %18619 = sst [smem:[#allocation46_spill]] %s18450_s8 }
   0x2   :  { %16 = vsyncpa [#allocation3], 0 }
   0x3   :  { %17 = vsyncpa [#allocation6], 0 }
   0x4   :  { %18 = vsyncpa [#allocation4], 0 }
   0x5   :  { %20 = vsyncpa [#allocation4 + $0x1], 0  ;;  %s13643_s17 = smov 0   ;;  %s13645_s18 = smov 0  }
   0x6   :  { %s13647_s19 = smov 0   ;;  %s13649_s20 = smov 0  }
   0x7 LB: > { %18620 = sst [smem:[#allocation12_spill]] %s13538_s17  ;;  %s13664_s21 = sadd.s32 4294967295, %s13550_s20   ;;  %s13550_s20 = sphi %s13649_s20, %s18958_s20   ;;  %s13546_s19 = sphi %s13647_s19, %s18960_s19   ;;  %s13542_s18 = sphi %s13645_s18, %s18962_s18   ;;  %s13538_s17 = sphi %s13643_s17, %s18961_s17  }
   0x8   : > { %18621 = sst [smem:[#allocation13_spill]] %s13546_s19  ;;  %s8937_s22 = sadd.s32 4294967294, %s13550_s20  }
   0x9   : > { %s13668_s23 = sadd.s32 1, %s13550_s20   ;;  %s269_s24 = sadd.s32 1, %s13546_s19 }
   0xa   : > { %18622 = sst [smem:[#allocation14_spill]] %s13668_s23  ;;  %s266_s25 = ssub.s32 %s13550_s20, %s13668_s23 }
   0xb   : > { %p279_p0 = scmp.ne.s32.totalorder %s13546_s19, %s13542_s18  ;;  %p267_p1 = scmp.eq.s32.totalorder %s266_s25, 0 }
   0xc   : > { %p280_p2 = scmp.eq.s32.totalorder %s13664_s21, 1  ;;  %p285_p3 = scmp.ne.s32.totalorder %s13542_s18, %s13538_s17 }
   0xd   : > { %p286_p4 = scmp.eq.s32.totalorder %s8937_s22, 1  ;;  %p8938_p7 = scmp.ge.s32.totalorder %s13550_s20, 1 }
   0xe   : > { %s13679_s26 = scalar_select %p267_p1, %s13546_s19, %s269_s24  }
   0xf   : > { %p13681_p5 = por %p280_p2, %p279_p0  ;;  %p13685_p6 = por %p286_p4, %p285_p3 }
  0x10   : > { %18623 = sst [smem:[#allocation15_spill]] %s13679_s26  ;;  %p293_p8 = scmp.lt.s32.totalorder %s13550_s20, 3 }
  0x11   : > { %s18624_s27 = scalar_select %p13681_p5, 1, 0 }
  0x12   : > { %s18625_s28 = scalar_select %p13685_p6, 1, 0 }
  0x13   : > { %p18457_p9 = scmp.eq.s32.totalorder %s13664_s21, 0  ;;  %p13692_p10 = pnand %p8938_p7, %p293_p8 }
  0x14   : > { %18626 = sst [smem:[#allocation16_spill]] %s18625_s28  ;;  %s13552_s30 = smov [#allocation5]  }
  0x15   : > { %s18627_s29 = scalar_select %p13692_p10, 1, 0 }
  0x16   : > { %s337_s12 = sshll.u32 %s13552_s30, 4  ;;  %p13211_p11 = pneg %p13692_p10  ;;  %s338_s12 = int_to_ptr.vmem [resolvable:$true] %s337_s12 }
  0x17   : > { %s13553_s13 = smov [#allocation2]   ;;  %s13554_s16 = smov [#allocation7]  }
  0x18   : > { %s323_s14 = sshll.u32 %s13553_s13, 4  ;;  %p13700_p12 = pnand %p18457_p9, %p13211_p11  ;;  %s13704_s14 = int_to_ptr.vmem [resolvable:$true] %s323_s14 }
  0x19   : > { %s13706_s22 = sshll.u32 %s13554_s16, 4  ;;  %s18629_s8 = sld [smem:[#allocation46_spill]]  ;;  %s352_s22 = int_to_ptr.vmem [resolvable:$true] %s13706_s22 }
  0x1a   : > { %p13716_p0 = pneg %p13700_p12 }
  0x1f   : > { %s13396_s30 = scalar_lea.hbm %s18629_s8, 16 }
  0x20   : > { %p13397_p13 = scmp.ne.s32.totalorder %s18629_s8, %s13396_s30  ;;  %p13403_p3 = scmp.lt.u32.totalorder %s13396_s30, %s18629_s8 }
  0x22   : > { %p13399_p1 = pnand %p13716_p0, %p13397_p13 }
  0x24   : > { %p13400_p2 = pneg %p13399_p1 }
  0x26   : > { %p13405_p4 = pnand %p13403_p3, %p13400_p2 }
  0x28   : > { %13408 = shalt.err (!%p13405_p4)
}
  0x29   : > { %s13409_s24 = scalar_lea.vmem %s338_s12, 16  ;;  %s13416_s19 = scalar_lea.vmem %s338_s12, 32 }
  0x2a   : > { %p13410_p7 = scmp.ne.s32.totalorder %s338_s12, %s13409_s24  ;;  %p13417_p9 = scmp.lt.s32.totalorder %s338_s12, %s338_s12 }
  0x2b   : > { %p13418_p6 = scmp.lt.s32.totalorder %s13416_s19, %s13409_s24 }
  0x2c   : > { %p13412_p8 = pnand %p13410_p7, %p13716_p0 }
  0x2d   : > { %p13419_p5 = por %p13418_p6, %p13417_p9 }
  0x2e   : > { %p13413_p11 = pneg %p13412_p8 }
  0x30   : > { %p13420_p10 = pnand %p13419_p5, %p13413_p11 }
  0x32   : > { %13423 = shalt.err (!%p13420_p10)
}
  0x33   : > { %13217 = dma.hbm_to_vmem [thread:$0]  (!%p13700_p12), %s18629_s8, 16, %s338_s12, [#allocation6]  }
  0x34   : > { %s13424_s16 = scalar_lea.hbm %s18449_s7, 63488 }
  0x35   : > { %p13425_p13 = scmp.ne.s32.totalorder %s18449_s7, %s13424_s16  ;;  %p13431_p5 = scmp.lt.u32.totalorder %s13424_s16, %s18449_s7 }
  0x37   : > { %p13427_p1 = pnand %p13425_p13, %p13716_p0 }
  0x39   : > { %p13428_p6 = pneg %p13427_p1 }
  0x3b   : > { %p13433_p9 = pnand %p13431_p5, %p13428_p6 }
  0x3d   : > { %13436 = shalt.err (!%p13433_p9)
}
  0x3e   : > { %s13437_s12 = scalar_lea.vmem %s13704_s14, 63488  ;;  %p13445_p4 = scmp.lt.s32.totalorder %s13704_s14, %s13704_s14 }
  0x3f   : > { %p13438_p10 = scmp.ne.s32.totalorder %s13704_s14, %s13437_s12  ;;  %p13446_p7 = scmp.lt.s32.totalorder %s13437_s12, %s13437_s12 }
  0x41   : > { %p13440_p2 = pnand %p13438_p10, %p13716_p0  ;;  %p13447_p8 = por %p13446_p7, %p13445_p4 }
  0x43   : > { %p13441_p3 = pneg %p13440_p2 }
  0x45   : > { %p13448_p11 = pnand %p13447_p8, %p13441_p3 }
  0x47   : > { %13451 = shalt.err (!%p13448_p11)
}
  0x48   : > { %s13555_s17 = smov 128   ;;  %s13556_s28 = smov 8  }
  0x49   : > { %13214 = dma.hbm_to_vmem [thread:$0]  (!%p13700_p12), %s18449_s7, 63488, %s13704_s14, [#allocation3], %s13555_s17, %s13555_s17, %s13556_s28  }
  0x4a   : > { %s13452_s16 = scalar_lea.hbm %s18452_s10, 16 }
  0x4b   : > { %p13453_p13 = scmp.ne.s32.totalorder %s18452_s10, %s13452_s16  ;;  %p13459_p5 = scmp.lt.u32.totalorder %s13452_s16, %s18452_s10 }
  0x4d   : > { %p13455_p1 = pnand %p13453_p13, %p13716_p0 }
  0x4f   : > { %p13456_p6 = pneg %p13455_p1 }
  0x51   : > { %p13461_p9 = pnand %p13459_p5, %p13456_p6 }
  0x53   : > { %13464 = shalt.err (!%p13461_p9)
}
  0x54   : > { %s13465_s26 = scalar_lea.vmem %s352_s22, 16  ;;  %s13472_s14 = scalar_lea.vmem %s352_s22, 32 }
  0x55   : > { %p13466_p10 = scmp.ne.s32.totalorder %s352_s22, %s13465_s26  ;;  %p13473_p4 = scmp.lt.s32.totalorder %s352_s22, %s352_s22 }
  0x56   : > { %p13474_p7 = scmp.lt.s32.totalorder %s13472_s14, %s13465_s26 }
  0x57   : > { %p13468_p2 = pnand %p13466_p10, %p13716_p0 }
  0x58   : > { %p13475_p8 = por %p13474_p7, %p13473_p4 }
  0x59   : > { %p13469_p3 = pneg %p13468_p2 }
  0x5b   : > { %p13476_p11 = pnand %p13475_p8, %p13469_p3 }
  0x5d   : > { %13479 = shalt.err (!%p13476_p11)
}
  0x5e   : > { %13220 = dma.hbm_to_vmem [thread:$0]  (!%p13700_p12), %s18452_s10, 16, %s352_s22, [#allocation6]  }
  0x5f   : > { %p18631_p13 = scmp.ne.s32.totalorder %s18627_s29, 0 }
  0x61   : > { %372 = sbr.rel (%p18631_p13) target bundleno = 2951 (0xb87), region = 64 }
  0x68   : > { %p18632_p1 = scmp.eq.s32.totalorder %s13664_s21, 0 }
  0x6a   : > { %13525 = dma.done.wait (%p18632_p1), [#allocation3], 63488   ;;  %p18633_p0 = pmov %p18632_p1 }
  0x6c   : > { %13527 = vsyncadd (%p18633_p0), [#allocation3], 4294903808  ;;  %p18634_p6 = pmov %p18633_p0 }
  0x6d   : > { %p18635_p5 = pmov %p18633_p0 }
  0x6e   : > { %13529 = dma.done.wait (%p18634_p6), [#allocation6], 32  }
  0x6f   : > { %13531 = vsyncadd (%p18635_p5), [#allocation6], 4294967264  ;;  %p419_p9 = scmp.lt.s32.totalorder %s13664_s21, 1  ;;  %v508_v0 = vlaneseq  ;;  %v18469_v2 = vmov 0.0   ;;  %v13558_v5 = vmov 0   ;;  %vm604_vm0 = vcmask 1040384  }
  0x70   : > { %700 = vmatprep.mubr.f32.mxu0 %v18469_v2  ;;  %1076 = vmatprep.mubr.f32.mxu1 %v18469_v2  ;;  %vm607_vm1 = vcmask 1041408   ;;  %vm610_vm2 = vcmask 1042432   ;;  %vm18462_vm3 = vcmask 1043456   ;;  %vm616_vm4 = vcmask 1044480   ;;  %s13563_s28 = smov 62   ;;  %s13566_s25 = smov 120  }
  0x71   : > { %s420_s8 = scalar_select %p419_p9, %s13664_s21, 1  ;;  %v13787_v1 = vshrl.u32 %v508_v0, 7  ;;  %13294 = vset.pattern.permute.xlu0 %v13558_v5  ;;  %13295 = vset.pattern.permute.xlu1 %v13558_v5  ;;  %vm619_vm5 = vcmask 1045504   ;;  %vm622_vm6 = vcmask 1046528   ;;  %vm625_vm7 = vcmask 72704  }
  0x72   : > { %vm13559_vm8 = vmmov 1   ;;  %v18471_v59 = vmov 1.0|1.0   ;;  %s13568_s23 = smov 50   ;;  %s13569_s30 = smov 54  }
  0x73   : > { %s9931_s29 = sshll.u32 %s420_s8, 7  ;;  %v13792_v3 = vsub.s32 0, %v13787_v1  ;;  %v13795_v4 = vsub.s32 1, %v13787_v1  ;;  %vm13888_vm9 = vmpackc.low %vm604_vm0, %vm13559_vm8  ;;  %s13564_s8 = smov 124  }
  0x74   : > { %s13800_s13 = scalar_lea.vmem %s18442_s0, %s9931_s29  ;;  %s13565_s29 = smov 58  }
  0x75   : > { %v424_v6 = vld [vmem:[%s13800_s13] ss:$8 sm:$0x3]  ;;  %v8949_v7 = vld [vmem:[%s13800_s13 + $0x1] ss:$8 sm:$0x3] }
  0x76   : > { %v8950_v8 = vld [vmem:[%s13800_s13 + $0x2] ss:$8 sm:$0x3]  ;;  %v8958_v9 = vld [vmem:[%s13800_s13 + $0x20] ss:$8 sm:$0x3]  ;;  %v511_v10 = vrot.slane %v424_v6, %v13792_v3  ;;  %v515_v11 = vrot.slane %v424_v6, %v13795_v4  ;;  %v544_v12 = vrot.slane %v8949_v7, %v13792_v3  ;;  %v548_v13 = vrot.slane %v8949_v7, %v13795_v4 }
  0x77   : > { %v8959_v14 = vld [vmem:[%s13800_s13 + $0x21] ss:$8 sm:$0x3]  ;;  %v8960_v15 = vld [vmem:[%s13800_s13 + $0x22] ss:$8 sm:$0x3]  ;;  %v522_v16 = vrot.slane %v8958_v9, %v13792_v3  ;;  %v526_v17 = vrot.slane %v8958_v9, %v13795_v4  ;;  %v577_v18 = vrot.slane %v8950_v8, %v13792_v3  ;;  %v581_v19 = vrot.slane %v8950_v8, %v13795_v4 }
  0x78   : > { %v8968_v20 = vld [vmem:[%s13800_s13 + $0x40] ss:$8 sm:$0x3]  ;;  %v8969_v21 = vld [vmem:[%s13800_s13 + $0x41] ss:$8 sm:$0x3]  ;;  %v13819_v22 = vrot.slane %v8959_v14, %v13792_v3  ;;  %v13822_v23 = vrot.slane %v8959_v14, %v13795_v4  ;;  %v13825_v24 = vrot.slane %v8960_v15, %v13792_v3  ;;  %v13828_v25 = vrot.slane %v8960_v15, %v13795_v4 }
  0x79   : > { %v8970_v26 = vld [vmem:[%s13800_s13 + $0x42] ss:$8 sm:$0x3]  ;;  %v533_v27 = vrot.slane %v8968_v20, %v13792_v3  ;;  %v537_v28 = vrot.slane %v8968_v20, %v13795_v4  ;;  %v13834_v29 = vrot.slane %v8969_v21, %v13792_v3  ;;  %v13837_v30 = vrot.slane %v8969_v21, %v13795_v4  ;;  %v8978_v43 = vld [vmem:[%s13800_s13 + $0x60] ss:$8 sm:$0x3] }
  0x7a   : > { %v13840_v31 = vrot.slane %v8970_v26, %v13792_v3  ;;  %v13843_v32 = vrot.slane %v8970_v26, %v13795_v4  ;;  %v606_v33 = vsel %vm604_vm0, %v515_v11, %v526_v17  ;;  %v876_v34 = vsel %vm604_vm0, %v544_v12, %v13819_v22  ;;  %v8979_v48 = vld [vmem:[%s13800_s13 + $0x61] ss:$8 sm:$0x3]  ;;  %v8980_v53 = vld [vmem:[%s13800_s13 + $0x62] ss:$8 sm:$0x3] }
  0x7b   : > { %v609_v35 = vsel %vm607_vm1, %v606_v33, %v537_v28  ;;  %v746_v36 = vsel %vm604_vm0, %v522_v16, %v533_v27  ;;  %v877_v37 = vsel %vm604_vm0, %v548_v13, %v13822_v23  ;;  %v878_v38 = vsel %vm607_vm1, %v876_v34, %v13834_v29  ;;  %v8951_v8 = vld [vmem:[%s13800_s13 + $0x3] ss:$8 sm:$0x3]  ;;  %s13570_s16 = smov 112   ;;  %s13571_s24 = smov 46  }
  0x7c   : > { %v612_v39 = vsel %vm610_vm2, %v609_v35, %v548_v13  ;;  %v879_v40 = vsel %vm607_vm1, %v877_v37, %v13837_v30  ;;  %v880_v41 = vsel %vm610_vm2, %v878_v38, %v577_v18  ;;  %v1136_v42 = vsel %vm604_vm0, %v577_v18, %v13825_v24  ;;  %s13572_s19 = smov 108   ;;  %s13573_s12 = smov 42  }
  0x7d   : > { %v615_v44 = vsel %vm18462_vm3, %v612_v39, %v13822_v23  ;;  %v881_v45 = vsel %vm610_vm2, %v879_v40, %v581_v19  ;;  %v13866_v46 = vsel %vm18462_vm3, %v880_v41, %v13825_v24  ;;  %v1137_v47 = vsel %vm604_vm0, %v581_v19, %v13828_v25  ;;  %v13961_v39 = vld [vmem:[%s18443_s1] sm:$0xff]  ;;  %s18618_s17 = smov 104   ;;  %s18616_s15 = smov 100  }
  0x7e   : > { %v618_v49 = vsel %vm616_vm4, %v615_v44, %v13837_v30  ;;  %v1138_v50 = vsel %vm607_vm1, %v1136_v42, %v13840_v31  ;;  %v13877_v51 = vsel %vm607_vm1, %v1137_v47, %v13843_v32  ;;  %v605_v52 = vsel %vm604_vm0, %v511_v10, %v522_v16  ;;  %s13576_s22 = smov 34   ;;  %s13577_s26 = smov 38  }
  0x7f   : > { %v621_v54 = vsel %vm619_vm5, %v618_v49, %v581_v19  ;;  %v608_v55 = vsel %vm607_vm1, %v605_v52, %v533_v27  ;;  %v717_v56 = vrot.slane %v8978_v43, %v13792_v3  ;;  %v721_v57 = vrot.slane %v8978_v43, %v13795_v4  ;;  %v8981_v52 = vld [vmem:[%s13800_s13 + $0x63] ss:$8 sm:$0x3]  ;;  %s18948_s14 = smov 100   ;;  %p18954_p10 = scmp.ne.s32.totalorder %s18624_s27, 0 }
  0x80   : > { %v624_v58 = vsel %vm622_vm6, %v621_v54, %v13828_v25  ;;  %v611_v60 = vsel %vm610_vm2, %v608_v55, %v544_v12  ;;  %v13894_v61 = vrot.slane %v8979_v48, %v13792_v3  ;;  %v13897_v62 = vrot.slane %v8979_v48, %v13795_v4 }
  0x81   : > { %v11247_v63 = vpack.c.bf16 %v13843_v32, %v624_v58  ;;  %v614_v5 = vsel %vm18462_vm3, %v611_v60, %v13819_v22  ;;  %v13903_v6 = vrot.slane %v8980_v53, %v13792_v3  ;;  %v13906_v7 = vrot.slane %v8980_v53, %v13795_v4  ;;  %v8962_v60 = vld [vmem:[%s13800_s13 + $0x24] ss:$8 sm:$0x3] }
  0x82   : > { %v617_v9 = vsel %vm616_vm4, %v614_v5, %v13834_v29  ;;  %v747_v10 = vsel %vm604_vm0, %v526_v17, %v537_v28  ;;  %v1244_v11 = vsel %vm604_vm0, %v13825_v24, %v13840_v31  ;;  %v1245_v12 = vsel %vm604_vm0, %v13828_v25, %v13843_v32  ;;  %v8961_v17 = vld [vmem:[%s13800_s13 + $0x23] ss:$8 sm:$0x3] }
  0x83   : > { %11249 = vmatprep.subr.msk.bf16.mxu0 %vm13888_vm9, %v11247_v63  ;;  %v620_v13 = vsel %vm619_vm5, %v617_v9, %v577_v18  ;;  %v749_v14 = vsel %vm607_vm1, %v747_v10, %v721_v57  ;;  %v13924_v15 = vsel %vm607_vm1, %v1244_v11, %v13903_v6  ;;  %v13928_v16 = vsel %vm607_vm1, %v1245_v12, %v13906_v7  ;;  %v8971_v18 = vld [vmem:[%s13800_s13 + $0x43] ss:$8 sm:$0x3]  ;;  %v8972_v9 = vld [vmem:[%s13800_s13 + $0x44] ss:$8 sm:$0x3] }
  0x84   : > { %v623_v19 = vsel %vm622_vm6, %v620_v13, %v13825_v24  ;;  %v751_v20 = vsel %vm610_vm2, %v749_v14, %v13822_v23  ;;  %v748_v21 = vsel %vm607_vm1, %v746_v36, %v717_v56  ;;  %v849_v26 = vrot.slane %v8951_v8, %v13792_v3  ;;  %v505_v63 = vld [vmem:[%s18444_s2] sm:$0xff]  ;;  %v14013_v5 = vld [vmem:[%s18443_s1 + $0x8] sm:$0xff] }
  0x85   : > { %v11250_v27 = vpack.c.bf16 %v13840_v31, %v623_v19  ;;  %v753_v28 = vsel %vm18462_vm3, %v751_v20, %v13837_v30  ;;  %v750_v33 = vsel %vm610_vm2, %v748_v21, %v13819_v22  ;;  %v13944_v34 = vrot.slane %v8951_v8, %v13795_v4  ;;  %1089 = vperm.xlu0 %13294, %v505_v63  }
  0x86   : > { %v755_v35 = vsel %vm616_vm4, %v753_v28, %v13897_v62  ;;  %v752_v36 = vsel %vm18462_vm3, %v750_v33, %v13834_v29  ;;  %v13951_v37 = vrot.slane %v8961_v17, %v13792_v3  ;;  %v13954_v38 = vrot.slane %v8961_v17, %v13795_v4 }
  0x87   : > { %11252 = vmatpush1.bf16.msk.msra.mxu0 %vm13888_vm9, %v11250_v27  ;;  %v757_v40 = vsel %vm619_vm5, %v755_v35, %v13828_v25  ;;  %v754_v41 = vsel %vm616_vm4, %v752_v36, %v13894_v61  ;;  %v13968_v42 = vrot.slane %v8971_v18, %v13792_v3  ;;  %v13971_v43 = vrot.slane %v8971_v18, %v13795_v4  ;;  %v506_v18 = vld [vmem:[%s18444_s2 + $0x8] sm:$0xff] }
  0x88   : > { %v759_v44 = vsel %vm622_vm6, %v757_v40, %v13843_v32  ;;  %v756_v47 = vsel %vm619_vm5, %v754_v41, %v13825_v24  ;;  %v883_v48 = vsel %vm18462_vm3, %v881_v45, %v13828_v25  ;;  %v13980_v49 = vsel %vm610_vm2, %v1138_v50, %v849_v26  ;;  %v8952_v41 = vld [vmem:[%s13800_s13 + $0x4] ss:$8 sm:$0x3] }
  0x89   : > { %v11253_v53 = vpack.c.bf16 %v13906_v7, %v759_v44  ;;  %v758_v54 = vsel %vm622_vm6, %v756_v47, %v13840_v31  ;;  %v885_v55 = vsel %vm616_vm4, %v883_v48, %v13843_v32  ;;  %v13990_v56 = vsel %vm604_vm0, %v849_v26, %v13951_v37  ;;  %1094 = vperm.xlu0 %13294, %v506_v18   ;;  %v5712_v18 = vld [vmem:[%s18448_s6 + $0x10] sm:$0xff] }
  0x8a   : > { %8990 = vmatmul.mubr.msk.f32.vlgmr.msra.gmra.mrb[0].mxu0 %vm625_vm7, %v13961_v39  ;;  %v11256_v45 = vpack.c.bf16 %v13903_v6, %v758_v54  ;;  %v887_v50 = vsel %vm619_vm5, %v885_v55, %v13944_v34  ;;  %v14000_v57 = vsel %vm604_vm0, %v13944_v34, %v13954_v38  ;;  %v884_v58 = vsel %vm616_vm4, %v13866_v46, %v13840_v31 }
  0x8b   : > { %706 = vmatprep.mubr.f32.mxu0 %v18469_v2  ;;  %11255 = vmatprep.subr.msk.bf16.mxu0 %vm13888_vm9, %v11253_v53  ;;  %v889_v8 = vsel %vm622_vm6, %v887_v50, %v13954_v38  ;;  %v886_v46 = vsel %vm619_vm5, %v884_v58, %v849_v26  ;;  %v14022_v10 = vrot.slane %v8981_v52, %v13792_v3 }
  0x8c   : > { %11258 = vmatpush1.bf16.msk.msra.mxu0 %vm13888_vm9, %v11256_v45  ;;  %v11259_v11 = vpack.c.bf16 %v13971_v43, %v889_v8  ;;  %v888_v12 = vsel %vm622_vm6, %v886_v46, %v13951_v37  ;;  %v987_v13 = vrot.slane %v8981_v52, %v13795_v4  ;;  %v989_v14 = vsel %vm604_vm0, %v13822_v23, %v13837_v30  ;;  %v4214_v46 = vld [vmem:[%s18446_s4 + $0x10] sm:$0xff] }
  0x8d   : > { %v11262_v17 = vpack.c.bf16 %v13968_v42, %v888_v12  ;;  %v991_v19 = vsel %vm607_vm1, %v989_v14, %v13897_v62  ;;  %v14037_v20 = vrot.slane %v8962_v60, %v13792_v3  ;;  %v14040_v21 = vrot.slane %v8962_v60, %v13795_v4  ;;  %v8963_v14 = vld [vmem:[%s13800_s13 + $0x25] ss:$8 sm:$0x3]  ;;  %4593 = vperm.xlu0 %13294, %v4214_v46  }
  0x8e   : > { %8991 = vmatmul.mubr.msk.f32.gmra.mrb[2].mxu0 %vm625_vm7, %v14013_v5  ;;  %11261 = vmatprep.subr.msk.bf16.mxu0 %vm13888_vm9, %v11259_v11  ;;  %v993_v23 = vsel %vm610_vm2, %v991_v19, %v13828_v25  ;;  %v14049_v30 = vrot.slane %v8972_v9, %v13792_v3  ;;  %v14052_v62 = vrot.slane %v8972_v9, %v13795_v4 }
  0x8f   : > { %828 = vmatprep.mubr.f32.mxu0 %v18469_v2  ;;  %v995_v26 = vsel %vm18462_vm3, %v993_v23, %v13843_v32  ;;  %v1248_v25 = vsel %vm610_vm2, %v13924_v15, %v13951_v37  ;;  %v1249_v27 = vsel %vm610_vm2, %v13928_v16, %v13954_v38  ;;  %v1486_v28 = vsel %vm604_vm0, %v13951_v37, %v13968_v42 }
  0x90   : > { %v997_v33 = vsel %vm616_vm4, %v995_v26, %v13906_v7  ;;  %v1250_v35 = vsel %vm18462_vm3, %v1248_v25, %v13968_v42  ;;  %v1251_v32 = vsel %vm18462_vm3, %v1249_v27, %v13971_v43  ;;  %v1487_v15 = vsel %vm604_vm0, %v13954_v38, %v13971_v43 }
  0x91   : > { %v999_v16 = vsel %vm619_vm5, %v997_v33, %v13954_v38  ;;  %v1252_v36 = vsel %vm616_vm4, %v1250_v35, %v14022_v10  ;;  %v1253_v40 = vsel %vm616_vm4, %v1251_v32, %v987_v13  ;;  %v1488_v7 = vsel %vm607_vm1, %v1486_v28, %v14022_v10  ;;  %6619 = vperm.xlu0 %13294, %v5712_v18  }
  0x92   : > { %8994 = vmatmul.mubr.msk.f32.vlgmr.msra.gmra.mrb[4].mxu0 %vm625_vm7, %v13961_v39  ;;  %v1001_v44 = vsel %vm622_vm6, %v999_v16, %v13971_v43  ;;  %v1254_v47 = vsel %vm619_vm5, %v1252_v36, %v14037_v20  ;;  %v1489_v48 = vsel %vm607_vm1, %v1487_v15, %v987_v13  ;;  %v1490_v52 = vsel %vm610_vm2, %v1488_v7, %v14037_v20 }
  0x93   : > { %834 = vmatprep.mubr.f32.mxu0 %v18469_v2  ;;  %11264 = vmatpush1.bf16.msk.msra.mxu0 %vm13888_vm9, %v11262_v17  ;;  %v11265_v53 = vpack.c.bf16 %v987_v13, %v1001_v44  ;;  %v1491_v54 = vsel %vm610_vm2, %v1489_v48, %v14040_v21  ;;  %v14102_v55 = vsel %vm18462_vm3, %v1490_v52, %v14049_v30 }
  0x94   : > { %v14106_v45 = vsel %vm18462_vm3, %v1491_v54, %v14052_v62  ;;  %v988_v50 = vsel %vm604_vm0, %v13819_v22, %v13834_v29  ;;  %v1109_v58 = vrot.slane %v8952_v41, %v13792_v3  ;;  %v14113_v60 = vrot.slane %v8952_v41, %v13795_v4  ;;  %v8982_v29 = vld [vmem:[%s13800_s13 + $0x64] ss:$8 sm:$0x3] }
  0x95   : > { %13195 = vmatprep.subr.msk.bf16.mxu1 %vm13888_vm9, %v11265_v53  ;;  %v990_v63 = vsel %vm607_vm1, %v988_v50, %v13894_v61  ;;  %11267 = vmatprep.subr.msk.bf16.mxu0 %vm13888_vm9, %v11265_v53  ;;  %v1141_v8 = vsel %vm610_vm2, %v13877_v51, %v13944_v34  ;;  %v1376_v22 = vsel %vm607_vm1, %v13990_v56, %v13968_v42 }
  0x96   : > { %8995 = vmatmul.mubr.msk.f32.gmra.mrb[6].mxu0 %vm625_vm7, %v14013_v5  ;;  %v992_v61 = vsel %vm610_vm2, %v990_v63, %v13825_v24  ;;  %v1143_v9 = vsel %vm18462_vm3, %v1141_v8, %v13954_v38  ;;  %v1378_v51 = vsel %vm610_vm2, %v1376_v22, %v1109_v58  ;;  %v1624_v34 = vsel %vm604_vm0, %v1109_v58, %v14037_v20 }
  0x97   : > { %958 = vmatprep.mubr.f32.mxu0 %v18469_v2  ;;  %v994_v56 = vsel %vm18462_vm3, %v992_v61, %v13840_v31  ;;  %v1145_v11 = vsel %vm616_vm4, %v1143_v9, %v13971_v43  ;;  %v14148_v24 = vsel %vm604_vm0, %v14113_v60, %v14040_v21  ;;  %v1142_v38 = vsel %vm18462_vm3, %v13980_v49, %v13951_v37 }
  0x98   : > { %v996_v12 = vsel %vm616_vm4, %v994_v56, %v13903_v6  ;;  %v1147_v13 = vsel %vm619_vm5, %v1145_v11, %v14113_v60  ;;  %v1144_v31 = vsel %vm616_vm4, %v1142_v38, %v13968_v42  ;;  %v14161_v17 = vrot.slane %v8982_v29, %v13792_v3 }
  0x99   : > { %v998_v19 = vsel %vm619_vm5, %v996_v12, %v13951_v37  ;;  %v1149_v49 = vsel %vm622_vm6, %v1147_v13, %v14040_v21  ;;  %v1146_v6 = vsel %vm619_vm5, %v1144_v31, %v1109_v58  ;;  %v1243_v23 = vrot.slane %v8982_v29, %v13795_v4  ;;  %v8983_v58 = vld [vmem:[%s13800_s13 + $0x65] ss:$8 sm:$0x3]  ;;  %v8954_v13 = vld [vmem:[%s13800_s13 + $0x6] ss:$8 sm:$0x3] }
  0x9a   : > { %8998 = vmatmul.mubr.msk.f32.vlgmr.msra.gmra.mrb[8].mxu0 %vm625_vm7, %v13961_v39  ;;  %v1000_v26 = vsel %vm622_vm6, %v998_v19, %v13968_v42  ;;  %v11271_v37 = vpack.c.bf16 %v14052_v62, %v1149_v49  ;;  %v1148_v25 = vsel %vm622_vm6, %v1146_v6, %v14037_v20  ;;  %v1255_v27 = vsel %vm619_vm5, %v1253_v40, %v14040_v21  ;;  %v8953_v42 = vld [vmem:[%s13800_s13 + $0x5] ss:$8 sm:$0x3] }
  0x9b   : > { %964 = vmatprep.mubr.f32.mxu0 %v18469_v2  ;;  %v11268_v28 = vpack.c.bf16 %v14022_v10, %v1000_v26  ;;  %v11274_v33 = vpack.c.bf16 %v14049_v30, %v1148_v25  ;;  %v1257_v35 = vsel %vm622_vm6, %v1255_v27, %v14052_v62  ;;  %v14187_v32 = vrot.slane %v8963_v14, %v13792_v3  ;;  %v8973_v40 = vld [vmem:[%s13800_s13 + $0x45] ss:$8 sm:$0x3]  ;;  %v8974_v26 = vld [vmem:[%s13800_s13 + $0x46] ss:$8 sm:$0x3] }
  0x9c   : > { %v11277_v15 = vpack.c.bf16 %v1243_v23, %v1257_v35  ;;  %v1732_v16 = vsel %vm604_vm0, %v14037_v20, %v14049_v30  ;;  %v1733_v36 = vsel %vm604_vm0, %v14040_v21, %v14052_v62  ;;  %v1256_v10 = vsel %vm622_vm6, %v1254_v47, %v14049_v30 }
  0x9d   : > { %13196 = vmatpush1.bf16.msk.msra.mxu1 %vm13888_vm9, %v11268_v28  ;;  %11270 = vmatpush1.bf16.msk.msra.mxu0 %vm13888_vm9, %v11268_v28  ;;  %v1734_v7 = vsel %vm607_vm1, %v1732_v16, %v14161_v17  ;;  %v14206_v41 = vsel %vm607_vm1, %v1733_v36, %v1243_v23  ;;  %v11280_v44 = vpack.c.bf16 %v14161_v17, %v1256_v10  ;;  %v8984_v16 = vld [vmem:[%s13800_s13 + $0x66] ss:$8 sm:$0x3] }
  0x9e   : > { %8999 = vmatmul.mubr.msk.f32.gmra.mrb[10].mxu0 %vm625_vm7, %v14013_v5  ;;  %11273 = vmatprep.subr.msk.bf16.mxu0 %vm13888_vm9, %v11271_v37  ;;  %v14215_v47 = vsel %vm610_vm2, %v1734_v7, %v14187_v32  ;;  %v1347_v48 = vrot.slane %v8953_v42, %v13792_v3  ;;  %v14219_v52 = vrot.slane %v8953_v42, %v13795_v4  ;;  %v8965_v7 = vld [vmem:[%s13800_s13 + $0x27] ss:$8 sm:$0x3] }
  0x9f   : > { %1070 = vmatprep.mubr.f32.mxu0 %v18469_v2  ;;  %11279 = vmatprep.subr.msk.bf16.mxu1 %vm13888_vm9, %v11277_v15  ;;  %v14225_v53 = vrot.slane %v8963_v14, %v13795_v4  ;;  %v14228_v54 = vrot.slane %v8973_v40, %v13792_v3  ;;  %v14231_v50 = vrot.slane %v8973_v40, %v13795_v4 }
  0xa0   : > { %9003 = vmatmul.mubr.msk.f32.vlgmr.msra.gmra.mrb[0].mxu1 %vm625_vm7, %v14013_v5  ;;  %v1377_v63 = vsel %vm607_vm1, %v14000_v57, %v13971_v43  ;;  %v1626_v8 = vsel %vm607_vm1, %v1624_v34, %v14049_v30  ;;  %v1862_v22 = vsel %vm604_vm0, %v1347_v48, %v14187_v32  ;;  %v1380_v29 = vsel %vm18462_vm3, %v1378_v51, %v14037_v20  ;;  %v8964_v57 = vld [vmem:[%s13800_s13 + $0x26] ss:$8 sm:$0x3] }
  0xa1   : > { %11282 = vmatpush1.bf16.msk.msra.mxu1 %vm13888_vm9, %v11280_v44  ;;  %1326 = vmatprep.mubr.f32.mxu1 %v18469_v2  ;;  %v1379_v46 = vsel %vm610_vm2, %v1377_v63, %v14113_v60  ;;  %v1628_v61 = vsel %vm610_vm2, %v1626_v8, %v1347_v48  ;;  %v14254_v43 = vsel %vm604_vm0, %v14219_v52, %v14225_v53  ;;  %v5711_v44 = vld [vmem:[%s18448_s6 + $0x8] sm:$0xff] }
  0xa2   : > { %9002 = vmatmul.mubr.msk.f32.vlgmr.msra.gmra.mrb[12].mxu0 %vm625_vm7, %v13961_v39  ;;  %v1381_v20 = vsel %vm18462_vm3, %v1379_v46, %v14040_v21  ;;  %v1382_v9 = vsel %vm616_vm4, %v1380_v29, %v14049_v30  ;;  %v14264_v60 = vrot.slane %v8983_v58, %v13792_v3  ;;  %v14267_v51 = vrot.slane %v8983_v58, %v13795_v4 }
  0xa3   : > { %11276 = vmatpush1.bf16.msk.msra.mxu0 %vm13888_vm9, %v11274_v33  ;;  %1218 = vmatprep.mubr.f32.mxu0 %v18469_v2  ;;  %v1383_v34 = vsel %vm616_vm4, %v1381_v20, %v14052_v62  ;;  %v1384_v56 = vsel %vm619_vm5, %v1382_v9, %v1347_v48  ;;  %v1495_v21 = vsel %vm616_vm4, %v14106_v45, %v1243_v23 }
  0xa4   : > { %9010 = vmatmul.mubr.msk.f32.vlgmr.msra.gmra.mrb[2].mxu1 %vm625_vm7, %v13961_v39  ;;  %v1385_v30 = vsel %vm619_vm5, %v1383_v34, %v14219_v52  ;;  %v1386_v11 = vsel %vm622_vm6, %v1384_v56, %v14187_v32  ;;  %v1497_v38 = vsel %vm619_vm5, %v1495_v21, %v14225_v53  ;;  %v14286_v12 = vrot.slane %v8964_v57, %v13792_v3 }
  0xa5   : > { %v1387_v45 = vsel %vm622_vm6, %v1385_v30, %v14225_v53  ;;  %1332 = vmatprep.mubr.f32.mxu1 %v18469_v2  ;;  %v11286_v31 = vpack.c.bf16 %v14228_v54, %v1386_v11  ;;  %v1499_v14 = vsel %vm622_vm6, %v1497_v38, %v14231_v50  ;;  %v1974_v19 = vsel %vm604_vm0, %v14187_v32, %v14228_v54 }
  0xa6   : > { %9006 = vmatmul.mubr.msk.f32.vlgmr.msra.gmra.mrb[14].mxu0 %vm625_vm7, %v13961_v39  ;;  %v11283_v49 = vpack.c.bf16 %v14231_v50, %v1387_v45  ;;  %v11289_v6 = vpack.c.bf16 %v14267_v51, %v1499_v14  ;;  %v1975_v23 = vsel %vm604_vm0, %v14225_v53, %v14231_v50  ;;  %v1976_v18 = vsel %vm607_vm1, %v1974_v19, %v14264_v60  ;;  %v8955_v45 = vld [vmem:[%s13800_s13 + $0x7] ss:$8 sm:$0x3] }
  0xa7   : > { %1224 = vmatprep.mubr.f32.mxu0 %v18469_v2  ;;  %v14311_v37 = vsel %vm607_vm1, %v1975_v23, %v14267_v51  ;;  %v14315_v25 = vsel %vm610_vm2, %v1976_v18, %v14286_v12  ;;  %v1494_v27 = vsel %vm616_vm4, %v14102_v55, %v14161_v17  ;;  %v1597_v28 = vrot.slane %v8954_v13, %v13792_v3 }
  0xa8   : > { %11285 = vmatprep.subr.msk.bf16.mxu0 %vm13888_vm9, %v11283_v49  ;;  %9011 = vmatmul.mubr.msk.f32.gmra.mrb[4].mxu1 %vm625_vm7, %v14013_v5  ;;  %v1496_v33 = vsel %vm619_vm5, %v1494_v27, %v14187_v32  ;;  %v14328_v35 = vrot.slane %v8954_v13, %v13795_v4  ;;  %v14331_v42 = vrot.slane %v8964_v57, %v13795_v4  ;;  %v8975_v49 = vld [vmem:[%s13800_s13 + $0x47] ss:$8 sm:$0x3] }
  0xa9   : > { %11288 = vmatpush1.bf16.msk.msra.mxu0 %vm13888_vm9, %v11286_v31  ;;  %11291 = vmatprep.subr.msk.bf16.mxu1 %vm13888_vm9, %v11289_v6  ;;  %v1498_v55 = vsel %vm622_vm6, %v1496_v33, %v14228_v54  ;;  %v14340_v17 = vrot.slane %v8974_v26, %v13792_v3  ;;  %v14343_v15 = vrot.slane %v8974_v26, %v13795_v4  ;;  %v8985_v33 = vld [vmem:[%s13800_s13 + $0x67] ss:$8 sm:$0x3] }
  0xaa   : > { %9007 = vmatmul.mubr.msk.f32.gmra.mrb[16].mxu0 %vm625_vm7, %v14013_v5  ;;  %v11292_v36 = vpack.c.bf16 %v14264_v60, %v1498_v55  ;;  %1568 = vmatprep.mubr.f32.mxu1 %v18469_v2  ;;  %v1627_v10 = vsel %vm607_vm1, %v14148_v24, %v14052_v62  ;;  %v1864_v40 = vsel %vm607_vm1, %v1862_v22, %v14228_v54 }
  0xab   : > { %1456 = vmatprep.mubr.f32.mxu0 %v18469_v2  ;;  %v1629_v48 = vsel %vm610_vm2, %v1627_v10, %v14219_v52  ;;  %v14363_v58 = vsel %vm610_vm2, %v1864_v40, %v1597_v28  ;;  %v2112_v63 = vsel %vm604_vm0, %v1597_v28, %v14286_v12  ;;  %v14370_v62 = vsel %vm604_vm0, %v14328_v35, %v14331_v42 }
  0xac   : > { %11294 = vmatpush1.bf16.msk.msra.mxu1 %vm13888_vm9, %v11292_v36  ;;  %v1631_v24 = vsel %vm18462_vm3, %v1629_v48, %v14225_v53  ;;  %v1630_v52 = vsel %vm18462_vm3, %v1628_v61, %v14187_v32  ;;  %v14379_v8 = vrot.slane %v8984_v16, %v13792_v3  ;;  %v14382_v22 = vrot.slane %v8984_v16, %v13795_v4 }
  0xad   : > { %v1633_v29 = vsel %vm616_vm4, %v1631_v24, %v14231_v50  ;;  %v1632_v46 = vsel %vm616_vm4, %v1630_v52, %v14228_v54  ;;  %v1737_v57 = vsel %vm610_vm2, %v14206_v41, %v14225_v53  ;;  %v14392_v20 = vrot.slane %v8965_v7, %v13792_v3  ;;  %6614 = vperm.xlu0 %13294, %v5711_v44   ;;  %v5714_v53 = vld [vmem:[%s18448_s6 + $0x20] sm:$0xff] }
  0xae   : > { %9014 = vmatmul.mubr.msk.f32.vlgmr.msra.gmra.mrb[18].mxu0 %vm625_vm7, %v13961_v39  ;;  %v1635_v32 = vsel %vm619_vm5, %v1633_v29, %v14328_v35  ;;  %v1634_v61 = vsel %vm619_vm5, %v1632_v46, %v1597_v28  ;;  %v1739_v9 = vsel %vm18462_vm3, %v1737_v57, %v14231_v50  ;;  %v2220_v41 = vsel %vm604_vm0, %v14286_v12, %v14340_v17 }
  0xaf   : > { %9018 = vmatmul.mubr.msk.f32.vlgmr.msra.gmra.mrb[6].mxu1 %vm625_vm7, %v13961_v39  ;;  %1462 = vmatprep.mubr.f32.mxu0 %v18469_v2  ;;  %v1637_v34 = vsel %vm622_vm6, %v1635_v32, %v14331_v42  ;;  %v1636_v56 = vsel %vm622_vm6, %v1634_v61, %v14286_v12  ;;  %v1741_v21 = vsel %vm616_vm4, %v1739_v9, %v14267_v51  ;;  %v8956_v61 = vld [vmem:[%s13800_s13 + $0x10] ss:$8 sm:$0x3] }
  0xb0   : > { %v11295_v30 = vpack.c.bf16 %v14343_v15, %v1637_v34  ;;  %1574 = vmatprep.mubr.f32.mxu1 %v18469_v2  ;;  %v11298_v11 = vpack.c.bf16 %v14340_v17, %v1636_v56  ;;  %v1743_v38 = vsel %vm619_vm5, %v1741_v21, %v14331_v42  ;;  %v2221_v13 = vsel %vm604_vm0, %v14331_v42, %v14343_v15  ;;  %v8966_v56 = vld [vmem:[%s13800_s13 + $0x30] ss:$8 sm:$0x3] }
  0xb1   : > { %v1745_v31 = vsel %vm622_vm6, %v1743_v38, %v14343_v15  ;;  %v2222_v51 = vsel %vm607_vm1, %v2220_v41, %v14379_v8  ;;  %v14431_v14 = vsel %vm607_vm1, %v2221_v13, %v14382_v22  ;;  %v1738_v19 = vsel %vm18462_vm3, %v14215_v47, %v14228_v54  ;;  %6629 = vperm.xlu0 %13294, %v5714_v53   ;;  %v8976_v38 = vld [vmem:[%s13800_s13 + $0x50] ss:$8 sm:$0x3] }
  0xb2   : > { %9015 = vmatmul.mubr.msk.f32.gmra.mrb[20].mxu0 %vm625_vm7, %v14013_v5  ;;  %11297 = vmatprep.subr.msk.bf16.mxu0 %vm13888_vm9, %v11295_v30  ;;  %v11301_v6 = vpack.c.bf16 %v14382_v22, %v1745_v31  ;;  %v14444_v23 = vsel %vm610_vm2, %v2222_v51, %v14392_v20  ;;  %v1740_v18 = vsel %vm616_vm4, %v1738_v19, %v14264_v60 }
  0xb3   : > { %11300 = vmatpush1.bf16.msk.msra.mxu0 %vm13888_vm9, %v11298_v11  ;;  %9019 = vmatmul.mubr.msk.f32.gmra.mrb[8].mxu1 %vm625_vm7, %v14013_v5  ;;  %v1742_v47 = vsel %vm619_vm5, %v1740_v18, %v14286_v12  ;;  %v1835_v54 = vrot.slane %v8955_v45, %v13792_v3  ;;  %v14456_v26 = vrot.slane %v8955_v45, %v13795_v4 }
  0xb4   : > { %11303 = vmatprep.subr.msk.bf16.mxu1 %vm13888_vm9, %v11301_v6  ;;  %1706 = vmatprep.mubr.f32.mxu0 %v18469_v2  ;;  %v1744_v60 = vsel %vm622_vm6, %v1742_v47, %v14340_v17  ;;  %v14464_v27 = vrot.slane %v8965_v7, %v13795_v4  ;;  %v14467_v28 = vrot.slane %v8975_v49, %v13792_v3 }
  0xb5   : > { %v11304_v55 = vpack.c.bf16 %v14379_v8, %v1744_v60  ;;  %1814 = vmatprep.mubr.f32.mxu1 %v18469_v2  ;;  %v14473_v16 = vrot.slane %v8975_v49, %v13795_v4  ;;  %v1865_v36 = vsel %vm607_vm1, %v14254_v43, %v14231_v50  ;;  %v2114_v10 = vsel %vm607_vm1, %v2112_v63, %v14340_v17 }
  0xb6   : > { %9022 = vmatmul.mubr.msk.f32.vlgmr.msra.gmra.mrb[22].mxu0 %vm625_vm7, %v13961_v39  ;;  %v1867_v40 = vsel %vm610_vm2, %v1865_v36, %v14328_v35  ;;  %v2116_v7 = vsel %vm610_vm2, %v2114_v10, %v1835_v54  ;;  %v2350_v44 = vsel %vm604_vm0, %v1835_v54, %v14392_v20  ;;  %v14490_v48 = vsel %vm604_vm0, %v14456_v26, %v14464_v27 }
  0xb7   : > { %11306 = vmatpush1.bf16.msk.msra.mxu1 %vm13888_vm9, %v11304_v55  ;;  %1712 = vmatprep.mubr.f32.mxu0 %v18469_v2  ;;  %v1869_v50 = vsel %vm18462_vm3, %v1867_v40, %v14331_v42  ;;  %v1868_v43 = vsel %vm18462_vm3, %v14363_v58, %v14286_v12  ;;  %v14501_v35 = vrot.slane %v8985_v33, %v13792_v3  ;;  %v2602_v40 = vand.u32 127, %v508_v0 }
  0xb8   : > { %v1871_v63 = vsel %vm616_vm4, %v1869_v50, %v14343_v15  ;;  %v1870_v24 = vsel %vm616_vm4, %v1868_v43, %v14340_v17  ;;  %v14508_v52 = vrot.slane %v8985_v33, %v13795_v4  ;;  %v1979_v29 = vsel %vm610_vm2, %v14311_v37, %v14331_v42 }
  0xb9   : > { %v1873_v12 = vsel %vm619_vm5, %v1871_v63, %v14456_v26  ;;  %v1872_v58 = vsel %vm619_vm5, %v1870_v24, %v1835_v54  ;;  %v1981_v46 = vsel %vm18462_vm3, %v1979_v29, %v14343_v15  ;;  %v2462_v57 = vsel %vm604_vm0, %v14392_v20, %v14467_v28 }
  0xba   : > { %9026 = vmatmul.mubr.msk.f32.vlgmr.msra.gmra.mrb[10].mxu1 %vm625_vm7, %v13961_v39  ;;  %9023 = vmatmul.mubr.msk.f32.gmra.mrb[24].mxu0 %vm625_vm7, %v14013_v5  ;;  %v1875_v37 = vsel %vm622_vm6, %v1873_v12, %v14464_v27  ;;  %v1874_v42 = vsel %vm622_vm6, %v1872_v58, %v14392_v20  ;;  %v1983_v32 = vsel %vm616_vm4, %v1981_v46, %v14382_v22  ;;  %v8957_v12 = vld [vmem:[%s13800_s13 + $0x11] ss:$8 sm:$0x3] }
  0xbb   : > { %v11307_v9 = vpack.c.bf16 %v14473_v16, %v1875_v37  ;;  %1820 = vmatprep.mubr.f32.mxu1 %v18469_v2  ;;  %v11310_v41 = vpack.c.bf16 %v14467_v28, %v1874_v42  ;;  %v1985_v53 = vsel %vm619_vm5, %v1983_v32, %v14464_v27  ;;  %v2463_v34 = vsel %vm604_vm0, %v14464_v27, %v14473_v16  ;;  %v8967_v46 = vld [vmem:[%s13800_s13 + $0x31] ss:$8 sm:$0x3] }
  0xbc   : > { %v1987_v21 = vsel %vm622_vm6, %v1985_v53, %v14473_v16  ;;  %v2464_v22 = vsel %vm607_vm1, %v2462_v57, %v14501_v35  ;;  %v14547_v30 = vsel %vm607_vm1, %v2463_v34, %v14508_v52  ;;  %1944 = vmatprep.mubr.f32.mxu0 %v18469_v2  ;;  %v1980_v11 = vsel %vm18462_vm3, %v14315_v25, %v14340_v17  ;;  %v8977_v32 = vld [vmem:[%s13800_s13 + $0x51] ss:$8 sm:$0x3] }
  0xbd   : > { %11309 = vmatprep.subr.msk.bf16.mxu0 %vm13888_vm9, %v11307_v9  ;;  %v11313_v13 = vpack.c.bf16 %v14508_v52, %v1987_v21  ;;  %v1982_v45 = vsel %vm616_vm4, %v1980_v11, %v14379_v8  ;;  %v2085_v31 = vrot.slane %v8956_v61, %v13792_v3  ;;  %v14561_v51 = vrot.slane %v8956_v61, %v13795_v4  ;;  %v8986_v8 = vld [vmem:[%s13800_s13 + $0x70] ss:$8 sm:$0x3]  ;;  %v8987_v21 = vld [vmem:[%s13800_s13 + $0x71] ss:$8 sm:$0x3] }
  0xbe   : > { %11312 = vmatpush1.bf16.msk.msra.mxu0 %vm13888_vm9, %v11310_v41  ;;  %9027 = vmatmul.mubr.msk.f32.gmra.mrb[12].mxu1 %vm625_vm7, %v14013_v5  ;;  %v1984_v25 = vsel %vm619_vm5, %v1982_v45, %v14392_v20  ;;  %v14570_v17 = vrot.slane %v8966_v56, %v13792_v3  ;;  %v14573_v19 = vrot.slane %v8966_v56, %v13795_v4  ;;  %v14643_v61 = vmul.u32 2, %v2602_v40  ;;  %s13567_s13 = smov 116  }
  0xbf   : > { %11315 = vmatprep.subr.msk.bf16.mxu1 %vm13888_vm9, %v11313_v13  ;;  %v1986_v49 = vsel %vm622_vm6, %v1984_v25, %v14467_v28  ;;  %2056 = vmatprep.mubr.f32.mxu1 %v18469_v2  ;;  %v2107_v6 = vrot.slane %v8976_v38, %v13792_v3  ;;  %v14583_v18 = vrot.slane %v8976_v38, %v13795_v4  ;;  %v18639_v40 = vmov 0 }
  0xc0   : > { %v11316_v47 = vpack.c.bf16 %v14501_v35, %v1986_v49  ;;  %v2115_v54 = vsel %vm607_vm1, %v14370_v62, %v14343_v15  ;;  %v2352_v60 = vsel %vm607_vm1, %v2350_v44, %v14467_v28  ;;  %v2118_v33 = vsel %vm18462_vm3, %v2116_v7, %v14392_v20 }
  0xc1   : > { %9030 = vmatmul.mubr.msk.f32.vlgmr.msra.gmra.mrb[26].mxu0 %vm625_vm7, %v13961_v39  ;;  %v2117_v55 = vsel %vm610_vm2, %v2115_v54, %v14456_v26  ;;  %v2354_v36 = vsel %vm610_vm2, %v2352_v60, %v2085_v31  ;;  %v2120_v10 = vsel %vm616_vm4, %v2118_v33, %v14467_v28  ;;  %v2215_v15 = vrot.slane %v8986_v8, %v13792_v3 }
  0xc2   : > { %11318 = vmatpush1.bf16.msk.msra.mxu1 %vm13888_vm9, %v11316_v47  ;;  %1950 = vmatprep.mubr.f32.mxu0 %v18469_v2  ;;  %v2119_v62 = vsel %vm18462_vm3, %v2117_v55, %v14464_v27  ;;  %v2122_v20 = vsel %vm619_vm5, %v2120_v10, %v2085_v31  ;;  %v2219_v26 = vrot.slane %v8986_v8, %v13795_v4  ;;  %v14674_v31 = vadd.s32 8, %v13787_v1 }
  0xc3   : > { %v2121_v7 = vsel %vm616_vm4, %v2119_v62, %v14473_v16  ;;  %v2124_v44 = vsel %vm622_vm6, %v2122_v20, %v14570_v17  ;;  %v2225_v50 = vsel %vm610_vm2, %v14431_v14, %v14464_v27  ;;  %v2466_v43 = vsel %vm610_vm2, %v2464_v22, %v14570_v17 }
  0xc4   : > { %v2123_v63 = vsel %vm619_vm5, %v2121_v7, %v14561_v51  ;;  %v11322_v24 = vpack.c.bf16 %v2107_v6, %v2124_v44  ;;  %v2227_v0 = vsel %vm18462_vm3, %v2225_v50, %v14473_v16  ;;  %v2468_v29 = vsel %vm18462_vm3, %v2466_v43, %v2107_v6 }
  0xc5   : > { %9034 = vmatmul.mubr.msk.f32.vlgmr.msra.gmra.mrb[14].mxu1 %vm625_vm7, %v13961_v39  ;;  %9031 = vmatmul.mubr.msk.f32.gmra.mrb[28].mxu0 %vm625_vm7, %v14013_v5  ;;  %v2125_v14 = vsel %vm622_vm6, %v2123_v63, %v14573_v19  ;;  %v2229_v27 = vsel %vm616_vm4, %v2227_v0, %v14508_v52  ;;  %v2470_v58 = vsel %vm616_vm4, %v2468_v29, %v2215_v15  ;;  %v14716_v62 = vadd.s32 24, %v13787_v1 }
  0xc6   : > { %v11319_v57 = vpack.c.bf16 %v14583_v18, %v2125_v14  ;;  %2062 = vmatprep.mubr.f32.mxu1 %v18469_v2  ;;  %v2231_v37 = vsel %vm619_vm5, %v2229_v27, %v14573_v19  ;;  %2194 = vmatprep.mubr.f32.mxu0 %v18469_v2  ;;  %v2226_v42 = vsel %vm18462_vm3, %v14444_v23, %v14467_v28  ;;  %v18481_v7 = vmov 0.0|0.0  }
  0xc7   : > { %v2233_v52 = vsel %vm622_vm6, %v2231_v37, %v14583_v18  ;;  %v2228_v9 = vsel %vm616_vm4, %v2226_v42, %v14501_v35  ;;  %v2323_v41 = vrot.slane %v8957_v12, %v13792_v3  ;;  %v2327_v53 = vrot.slane %v8957_v12, %v13795_v4 }
  0xc8   : > { %11321 = vmatprep.subr.msk.bf16.mxu0 %vm13888_vm9, %v11319_v57  ;;  %v11325_v34 = vpack.c.bf16 %v2219_v26, %v2233_v52  ;;  %v2230_v23 = vsel %vm619_vm5, %v2228_v9, %v14570_v17  ;;  %v2334_v28 = vrot.slane %v8967_v46, %v13792_v3  ;;  %v2338_v56 = vrot.slane %v8967_v46, %v13795_v4 }
  0xc9   : > { %11324 = vmatpush1.bf16.msk.msra.mxu0 %vm13888_vm9, %v11322_v24  ;;  %9035 = vmatmul.mubr.msk.f32.gmra.mrb[16].mxu1 %vm625_vm7, %v14013_v5  ;;  %v2232_v35 = vsel %vm622_vm6, %v2230_v23, %v2107_v6  ;;  %v2345_v22 = vrot.slane %v8977_v32, %v13792_v3  ;;  %v2349_v11 = vrot.slane %v8977_v32, %v13795_v4  ;;  %v14744_v44 = vadd.s32 32, %v13787_v1 }
  0xca   : > { %11327 = vmatprep.subr.msk.bf16.mxu1 %vm13888_vm9, %v11325_v34  ;;  %v11328_v38 = vpack.c.bf16 %v2215_v15, %v2232_v35  ;;  %2302 = vmatprep.mubr.f32.mxu1 %v18469_v2  ;;  %v2353_v13 = vsel %vm607_vm1, %v14490_v48, %v14473_v16  ;;  %v2356_v45 = vsel %vm18462_vm3, %v2354_v36, %v14570_v17  ;;  %v14692_v17 = vadd.s32 4294967295, %v14643_v61 }
  0xcb   : > { %v2355_v25 = vsel %vm610_vm2, %v2353_v13, %v14561_v51  ;;  %v2358_v8 = vsel %vm616_vm4, %v2356_v45, %v2107_v6  ;;  %v2457_v49 = vrot.slane %v8987_v21, %v13792_v3  ;;  %v2461_v47 = vrot.slane %v8987_v21, %v13795_v4 }
  0xcc   : > { %11330 = vmatpush1.bf16.msk.msra.mxu1 %vm13888_vm9, %v11328_v38  ;;  %9038 = vmatmul.mubr.msk.f32.vlgmr.msra.gmra.mrb[30].mxu0 %vm625_vm7, %v13961_v39  ;;  %v2357_v16 = vsel %vm18462_vm3, %v2355_v25, %v14573_v19  ;;  %v2360_v48 = vsel %vm619_vm5, %v2358_v8, %v2323_v41  ;;  %v2467_v51 = vsel %vm610_vm2, %v14547_v30, %v14573_v19  ;;  %v14713_v15 = vadd.s32 16, %v13787_v1 }
  0xcd   : > { %18638 = vst [vmem:[#allocation17_spill] sm:$0xff] %v14692_v17  ;;  %2200 = vmatprep.mubr.f32.mxu0 %v18469_v2  ;;  %v2359_v3 = vsel %vm616_vm4, %v2357_v16, %v14583_v18  ;;  %v2362_v4 = vsel %vm622_vm6, %v2360_v48, %v2334_v28  ;;  %v2469_v6 = vsel %vm18462_vm3, %v2467_v51, %v14583_v18  ;;  %v14747_v50 = vadd.s32 40, %v13787_v1 }
  0xce   : > { %v2472_v54 = vsel %vm619_vm5, %v2470_v58, %v2334_v28  ;;  %v2361_v60 = vsel %vm619_vm5, %v2359_v3, %v2327_v53  ;;  %v2471_v33 = vsel %vm616_vm4, %v2469_v6, %v2219_v26  ;;  %v11334_v55 = vpack.c.bf16 %v2345_v22, %v2362_v4 }
  0xcf   : > { %v2474_v30 = vsel %vm622_vm6, %v2472_v54, %v2345_v22  ;;  %9042 = vmatmul.mubr.msk.f32.vlgmr.msra.gmra.mrb[18].mxu1 %vm625_vm7, %v13961_v39  ;;  %v2363_v19 = vsel %vm622_vm6, %v2361_v60, %v2338_v56  ;;  %v2473_v36 = vsel %vm619_vm5, %v2471_v33, %v2338_v56  ;;  %vm2605_vm10 = vcmp.eq.s32.totalorder %v13787_v1, %v14692_v17 }
  0xd0   : > { %9039 = vmatmul.mubr.msk.f32.gmra.mrb[32].mxu0 %vm625_vm7, %v14013_v5  ;;  %v11331_v18 = vpack.c.bf16 %v2349_v11, %v2363_v19  ;;  %2308 = vmatprep.mubr.f32.mxu1 %v18469_v2  ;;  %v2475_v10 = vsel %vm622_vm6, %v2473_v36, %v2349_v11  ;;  %v11340_v26 = vpack.c.bf16 %v2457_v49, %v2474_v30  ;;  %v18642_v43 = vmov 0 }
  0xd1   : > { %v11337_v20 = vpack.c.bf16 %v2461_v47, %v2475_v10  ;;  %2432 = vmatprep.mubr.f32.mxu0 %v18469_v2  ;;  %vm2606_vm11 = vcmp.eq.s32.totalorder %v14674_v31, %v14692_v17  ;;  %vm2607_vm13 = vcmp.eq.s32.totalorder %v14713_v15, %v14692_v17  ;;  %vm2608_vm14 = vcmp.eq.s32.totalorder %v14716_v62, %v14692_v17 }
  0xd2   : > { %11333 = vmatprep.subr.msk.bf16.mxu0 %vm13888_vm9, %v11331_v18  ;;  %vm14732_vm12 = vmpackc.low %vm2606_vm11, %vm2605_vm10  ;;  %vm2609_vm0 = vcmp.eq.s32.totalorder %v14744_v44, %v14692_v17  ;;  %vm2610_vm1 = vcmp.eq.s32.totalorder %v14747_v50, %v14692_v17  ;;  %v14769_v63 = vadd.s32 48, %v13787_v1  ;;  %v14772_v24 = vadd.s32 56, %v13787_v1 }
  0xd3   : > { %11336 = vmatpush1.bf16.msk.msra.mxu0 %vm13888_vm9, %v11334_v55  ;;  %9043 = vmatmul.mubr.msk.f32.gmra.mrb[20].mxu1 %vm625_vm7, %v14013_v5  ;;  %v18640_v40 = vsel %vm14732_vm12, 4294967295, %v18639_v40  ;;  %vm14759_vm15 = vmpackc.low %vm2608_vm14, %vm2607_vm13  ;;  %v14795_v0 = vadd.s32 64, %v13787_v1  ;;  %v14798_v29 = vadd.s32 72, %v13787_v1  ;;  %v14817_v12 = vadd.s32 80, %v13787_v1 }
  0xd4   : > { %11339 = vmatprep.subr.msk.bf16.mxu1 %vm13888_vm9, %v11337_v20  ;;  %2544 = vmatprep.mubr.f32.mxu1 %v18469_v2  ;;  %18641 = vst [vmem:[#allocation18_spill] sm:$0xff] %v18640_v40  ;;  %v18643_v43 = vsel %vm14759_vm15, 4294967295, %v18642_v43  ;;  %vm14786_vm2 = vmpackc.low %vm2610_vm1, %vm2609_vm0  ;;  %vm2611_vm4 = vcmp.eq.s32.totalorder %v14769_v63, %v14692_v17  ;;  %vm2612_vm5 = vcmp.eq.s32.totalorder %v14772_v24, %v14692_v17  ;;  %v14820_v14 = vadd.s32 88, %v13787_v1 }
  0xd5   : > { %11342 = vmatpush1.bf16.msk.msra.mxu1 %vm13888_vm9, %v11340_v26  ;;  %11343 = vmatprep.subr.bf16.mxu0 %v18481_v7  ;;  %18644 = vst [vmem:[#allocation19_spill] sm:$0xff] %v18643_v43  ;;  %vm14808_vm6 = vmpackc.low %vm2612_vm5, %vm2611_vm4  ;;  %vm2614_vm8 = vcmp.eq.s32.totalorder %v14798_v29, %v14692_v17  ;;  %v18651_v27 = vmov 0  ;;  %vm2615_vm10 = vcmp.eq.s32.totalorder %v14817_v12, %v14692_v17  ;;  %v14839_v58 = vadd.s32 96, %v13787_v1 }
  0xd6   : > { %9046 = vmatmul.mubr.msk.f32.vlgmr.msra.gmra.mrb[34].mxu0 %vm625_vm7, %v13961_v39  ;;  %11388 = vmatprep.subr.bf16.mxu1 %v18481_v7  ;;  %vm2616_vm11 = vcmp.eq.s32.totalorder %v14820_v14, %v14692_v17  ;;  %v14842_v46 = vadd.s32 104, %v13787_v1  ;;  %v18654_v57 = vmov 0  ;;  %v14861_v37 = vadd.s32 112, %v13787_v1 }
  0xd7   : > { %2438 = vmatprep.mubr.f32.mxu0 %v18469_v2  ;;  %11345 = vmatpush1.bf16.msk.msra.mxu0 %vm14732_vm12, %v18471_v59  ;;  %vm14852_vm13 = vmpackc.low %vm2616_vm11, %vm2615_vm10  ;;  %vm2617_vm14 = vcmp.eq.s32.totalorder %v14839_v58, %v14692_v17  ;;  %v14864_v42 = vadd.s32 120, %v13787_v1  ;;  %v18657_v32 = vmov 0  ;;  %v14883_v52 = vadd.s32 128, %v13787_v1 }
  0xd8   : > { %9050 = vmatmul.mubr.msk.f32.vlgmr.msra.gmra.mrb[22].mxu1 %vm625_vm7, %v13961_v39  ;;  %11346 = vmatprep.subr.bf16.mxu0 %v18481_v7  ;;  %v18645_v39 = vmov 0  ;;  %v18655_v57 = vsel %vm14852_vm13, 4294967295, %v18654_v57  ;;  %vm2618_vm0 = vcmp.eq.s32.totalorder %v14842_v46, %v14692_v17  ;;  %vm18463_vm4 = vcmp.eq.s32.totalorder %v14861_v37, %v14692_v17 }
  0xd9   : > { %2550 = vmatprep.mubr.f32.mxu1 %v18469_v2  ;;  %11390 = vmatpush1.bf16.msk.msra.mxu1 %vm14732_vm12, %v18471_v59  ;;  %v18646_v39 = vsel %vm14786_vm2, 4294967295, %v18645_v39  ;;  %18656 = vst [vmem:[#allocation23_spill] sm:$0xff] %v18655_v57  ;;  %vm14874_vm1 = vmpackc.low %vm2618_vm0, %vm2617_vm14  ;;  %vm18464_vm5 = vcmp.eq.s32.totalorder %v14864_v42, %v14692_v17  ;;  %v14886_v9 = vadd.s32 136, %v13787_v1  ;;  %v14911_v53 = vadd.s32 144, %v13787_v1 }
  0xda   : > { %9047 = vmatmul.mubr.msk.f32.gmra.mrb[36].mxu0 %vm625_vm7, %v14013_v5  ;;  %11391 = vmatprep.subr.bf16.mxu1 %v18481_v7  ;;  %18647 = vst [vmem:[#allocation20_spill] sm:$0xff] %v18646_v39  ;;  %v18658_v32 = vsel %vm14874_vm1, 4294967295, %v18657_v32  ;;  %v14914_v34 = vadd.s32 152, %v13787_v1  ;;  %v14933_v28 = vadd.s32 160, %v13787_v1  ;;  %v14936_v56 = vadd.s32 168, %v13787_v1 }
  0xdb   : > { %11348 = vmatpush1.bf16.msk.msra.mxu0 %vm14759_vm15, %v18471_v59  ;;  %18659 = vst [vmem:[#allocation24_spill] sm:$0xff] %v18658_v32  ;;  %vm2622_vm10 = vcmp.eq.s32.totalorder %v14886_v9, %v14692_v17  ;;  %vm2623_vm14 = vcmp.eq.s32.totalorder %v14911_v53, %v14692_v17  ;;  %v18666_v21 = vmov 0  ;;  %v14955_v35 = vadd.s32 176, %v13787_v1 }
  0xdc   : > { %9051 = vmatmul.mubr.msk.f32.gmra.mrb[24].mxu1 %vm625_vm7, %v14013_v5  ;;  %11349 = vmatprep.subr.bf16.mxu0 %v18481_v7  ;;  %v18648_v5 = vmov 0  ;;  %vm2613_vm7 = vcmp.eq.s32.totalorder %v14795_v0, %v14692_v17  ;;  %vm2624_vm0 = vcmp.eq.s32.totalorder %v14914_v34, %v14692_v17  ;;  %18664 = vst [vmem:[#allocation25_spill] sm:$0xff] %v14933_v28  ;;  %18665 = vst [vmem:[#allocation26_spill] sm:$0xff] %v14936_v56  ;;  %v14958_v22 = vadd.s32 184, %v13787_v1 }
  0xdd   : > { %11393 = vmatpush1.bf16.msk.msra.mxu1 %vm14759_vm15, %v18471_v59  ;;  %v18649_v5 = vsel %vm14808_vm6, 4294967295, %v18648_v5  ;;  %vm14830_vm9 = vmpackc.low %vm2614_vm8, %vm2613_vm7  ;;  %vm2621_vm8 = vcmp.eq.s32.totalorder %v14883_v52, %v14692_v17  ;;  %vm2626_vm3 = vcmp.eq.s32.totalorder %v14936_v56, %v14692_v17  ;;  %18668 = vst [vmem:[#allocation27_spill] sm:$0xff] %v14955_v35  ;;  %v18670_v11 = vmov 0 }
  0xde   : > { %11394 = vmatprep.subr.bf16.mxu1 %v18481_v7  ;;  %18650 = vst [vmem:[#allocation21_spill] sm:$0xff] %v18649_v5  ;;  %v18652_v27 = vsel %vm14830_vm9, 4294967295, %v18651_v27  ;;  %vm14902_vm7 = vmpackc.low %vm18464_vm5, %vm18463_vm4  ;;  %vm2628_vm4 = vcmp.eq.s32.totalorder %v14958_v22, %v14692_v17  ;;  %v14977_v38 = vadd.s32 192, %v13787_v1  ;;  %v14980_v13 = vadd.s32 200, %v13787_v1 }
  0xdf   : > { %11351 = vmatpush1.bf16.msk.msra.mxu0 %vm14786_vm2, %v18471_v59  ;;  %18653 = vst [vmem:[#allocation22_spill] sm:$0xff] %v18652_v27  ;;  %vm14924_vm11 = vmpackc.low %vm2622_vm10, %vm2621_vm8  ;;  %vm2625_vm10 = vcmp.eq.s32.totalorder %v14933_v28, %v14692_v17  ;;  %v14999_v25 = vadd.s32 208, %v13787_v1  ;;  %v15002_v8 = vadd.s32 216, %v13787_v1  ;;  %v15021_v47 = vadd.s32 224, %v13787_v1 }
  0xe0   : > { %11352 = vmatprep.subr.bf16.mxu0 %v18481_v7  ;;  %vm14946_vm8 = vmpackc.low %vm2624_vm0, %vm2623_vm14  ;;  %18669 = vst [vmem:[#allocation28_spill] sm:$0xff] %v14958_v22  ;;  %vm2627_vm0 = vcmp.eq.s32.totalorder %v14955_v35, %v14692_v17  ;;  %vm2630_vm5 = vcmp.eq.s32.totalorder %v14980_v13, %v14692_v17  ;;  %v15024_v16 = vadd.s32 232, %v13787_v1  ;;  %v15055_v3 = vadd.s32 240, %v13787_v1 }
  0xe1   : > { %11396 = vmatpush1.bf16.msk.msra.mxu1 %vm14786_vm2, %v18471_v59  ;;  %v18667_v21 = vsel %vm14946_vm8, 4294967295, %v18666_v21  ;;  %vm14968_vm14 = vmpackc.low %vm2626_vm3, %vm2625_vm10  ;;  %18672 = vst [vmem:[#allocation29_spill] sm:$0xff] %v14977_v38  ;;  %vm2629_vm10 = vcmp.eq.s32.totalorder %v14977_v38, %v14692_v17  ;;  %v18479_v4 = vmov 1.0   ;;  %v18707_v49 = vmov 0 }
  0xe2   : > { %11397 = vmatprep.subr.bf16.mxu1 %v18481_v7  ;;  %v18671_v11 = vsel %vm14968_vm14, 4294967295, %v18670_v11  ;;  %18673 = vst [vmem:[#allocation30_spill] sm:$0xff] %v14980_v13  ;;  %vm14990_vm3 = vmpackc.low %vm2628_vm4, %vm2627_vm0  ;;  %vm2631_vm0 = vcmp.eq.s32.totalorder %v14999_v25, %v14692_v17 }
  0xe3   : > { %11354 = vmatpush1.bf16.msk.msra.mxu0 %vm14808_vm6, %v18471_v59  ;;  %18676 = vst [vmem:[#allocation31_spill] sm:$0xff] %v14999_v25  ;;  %18677 = vst [vmem:[#allocation32_spill] sm:$0xff] %v15002_v8 }
  0xe4   : > { %11355 = vmatprep.subr.bf16.mxu0 %v18481_v7  ;;  %vm15012_vm4 = vmpackc.low %vm2630_vm5, %vm2629_vm10  ;;  %18680 = vst [vmem:[#allocation33_spill] sm:$0xff] %v15021_v47  ;;  %vm2633_vm10 = vcmp.eq.s32.totalorder %v15021_v47, %v14692_v17 }
  0xe5   : > { %11399 = vmatpush1.bf16.msk.msra.mxu1 %vm14808_vm6, %v18471_v59  ;;  %18681 = vst [vmem:[#allocation34_spill] sm:$0xff] %v15024_v16 }
  0xe6   : > { %11400 = vmatprep.subr.bf16.mxu1 %v18481_v7 }
  0xe7   : > { %11357 = vmatpush1.bf16.msk.msra.mxu0 %vm14830_vm9, %v18471_v59 }
  0xe8   : > { %11358 = vmatprep.subr.bf16.mxu0 %v18481_v7 }
  0xe9   : > { %11402 = vmatpush1.bf16.msk.msra.mxu1 %vm14830_vm9, %v18471_v59 }
  0xea   : > { %11403 = vmatprep.subr.bf16.mxu1 %v18481_v7 }
  0xeb   : > { %11360 = vmatpush1.bf16.msk.msra.mxu0 %vm14852_vm13, %v18471_v59  ;;  %v18744_v40 = vld [vmem:[#allocation33_spill] sm:$0xff] }
  0xec   : > { %11361 = vmatprep.subr.bf16.mxu0 %v18481_v7 }
  0xed   : > { %11405 = vmatpush1.bf16.msk.msra.mxu1 %vm14852_vm13, %v18471_v59 }
  0xee   : > { %11406 = vmatprep.subr.bf16.mxu1 %v18481_v7 }
  0xef   : > { %11363 = vmatpush1.bf16.msk.msra.mxu0 %vm14874_vm1, %v18471_v59 }
  0xf0   : > { %11364 = vmatprep.subr.bf16.mxu0 %v18481_v7 }
  0xf1   : > { %11408 = vmatpush1.bf16.msk.msra.mxu1 %vm14874_vm1, %v18471_v59 }
  0xf2   : > { %11409 = vmatprep.subr.bf16.mxu1 %v18481_v7 }
  0xf3   : > { %11366 = vmatpush1.bf16.msk.msra.mxu0 %vm14902_vm7, %v18471_v59 }
  0xf4   : > { %11367 = vmatprep.subr.bf16.mxu0 %v18481_v7 }
  0xf5   : > { %11411 = vmatpush1.bf16.msk.msra.mxu1 %vm14902_vm7, %v18471_v59 }
  0xf6   : > { %11412 = vmatprep.subr.bf16.mxu1 %v18481_v7 }
  0xf7   : > { %11369 = vmatpush1.bf16.msk.msra.mxu0 %vm14924_vm11, %v18471_v59 }
  0xf8   : > { %11370 = vmatprep.subr.bf16.mxu0 %v18481_v7 }
  0xf9   : > { %11414 = vmatpush1.bf16.msk.msra.mxu1 %vm14924_vm11, %v18471_v59 }
  0xfa   : > { %11415 = vmatprep.subr.bf16.mxu1 %v18481_v7 }
  0xfb   : > { %11372 = vmatpush1.bf16.msk.msra.mxu0 %vm14946_vm8, %v18471_v59 }
  0xfc   : > { %11373 = vmatprep.subr.bf16.mxu0 %v18481_v7 }
  0xfd   : > { %11417 = vmatpush1.bf16.msk.msra.mxu1 %vm14946_vm8, %v18471_v59  ;;  %vm2632_vm8 = vcmp.eq.s32.totalorder %v15002_v8, %v14692_v17 }
  0xfe   : > { %11418 = vmatprep.subr.bf16.mxu1 %v18481_v7  ;;  %vm15034_vm5 = vmpackc.low %vm2632_vm8, %vm2631_vm0  ;;  %vm18508_vm0 = vcmask 982016  }
  0xff   : > { %11375 = vmatpush1.bf16.msk.msra.mxu0 %vm14968_vm14, %v18471_v59 }
 0x100   : > { %11376 = vmatprep.subr.bf16.mxu0 %v18481_v7 }
 0x101   : > { %11420 = vmatpush1.bf16.msk.msra.mxu1 %vm14968_vm14, %v18471_v59  ;;  %vm2634_vm14 = vcmp.eq.s32.totalorder %v15024_v16, %v14692_v17 }
 0x102   : > { %11421 = vmatprep.subr.bf16.mxu1 %v18481_v7  ;;  %vm15050_vm8 = vmpackc.low %vm2634_vm14, %vm2633_vm10  ;;  %vm18503_vm14 = vcmp.eq.s32.totalorder %v15055_v3, %v14692_v17  ;;  %vm18691_vm10 = vnez %v18667_v21 }
 0x103   : > { %11378 = vmatpush1.bf16.msk.msra.mxu0 %vm14990_vm3, %v18471_v59 }
 0x104   : > { %11379 = vmatprep.subr.bf16.mxu0 %v18481_v7 }
 0x105   : > { %11423 = vmatpush1.bf16.msk.msra.mxu1 %vm14990_vm3, %v18471_v59 }
 0x106   : > { %11424 = vmatprep.subr.bf16.mxu1 %v18481_v7 }
 0x107   : > { %11381 = vmatpush1.bf16.msk.msra.mxu0 %vm15012_vm4, %v18471_v59 }
 0x108   : > { %11382 = vmatprep.subr.bf16.mxu0 %v18481_v7 }
 0x109   : > { %11426 = vmatpush1.bf16.msk.msra.mxu1 %vm15012_vm4, %v18471_v59 }
 0x10a   : > { %11427 = vmatprep.subr.bf16.mxu1 %v18481_v7 }
 0x10b   : > { %11384 = vmatpush1.bf16.msk.msra.mxu0 %vm15034_vm5, %v18471_v59 }
 0x10c   : > { %11385 = vmatprep.subr.bf16.mxu0 %v18481_v7 }
 0x10d   : > { %11429 = vmatpush1.bf16.msk.msra.mxu1 %vm15034_vm5, %v18471_v59 }
 0x10e   : > { %11430 = vmatprep.subr.bf16.mxu1 %v18481_v7 }
 0x10f   : > { %11387 = vmatpush1.bf16.msk.msra.mxu0 %vm15050_vm8, %v18471_v59 }
 0x110   : > { %2765 = vmatprep.subr.mxu0 %v18469_v2 }
 0x111   : > { %11432 = vmatpush1.bf16.msk.msra.mxu1 %vm15050_vm8, %v18471_v59 }
 0x112   : > { %2846 = vmatprep.subr.mxu1 %v18469_v2 }
 0x113   : > { %9113 = vmatpush1.msk.msra.mxu0 %vm18503_vm14, %v18479_v4 }
 0x114   : > { %11433 = vmatprep.subr.bf16.mxu0 %v18481_v7 }
 0x115   : > { %9146 = vmatpush1.msk.msra.mxu1 %vm18503_vm14, %v18479_v4  ;;  %v15081_v4 = vpop.permute.xlu0 %1089  ;;  %vm18692_vm14 = vnez %v18671_v11 }
 0x116   : > { %11478 = vmatprep.subr.bf16.mxu1 %v18481_v7 }
 0x15d   : > { %v702_v6 = vpop.f32.mrb[0].mxu0 }
 0x15e   : > { %v704_v54 = vpop.f32.mrb[1].mxu0 }
 0x161   : > { %v708_v60 = vpop.f32.mrb[2].mxu0 }
 0x162   : > { %v710_v33 = vpop.f32.mrb[3].mxu0 }
 0x165   : > { %v830_v30 = vpop.f32.mrb[4].mxu0 }
 0x166   : > { %v841_v19 = vmax.f32 %v702_v6, %v830_v30  ;;  %v832_v55 = vpop.f32.mrb[5].mxu0 }
 0x167   : > { %v842_v36 = vmax.f32 %v704_v54, %v832_v55 }
 0x169   : > { %v836_v18 = vpop.f32.mrb[6].mxu0 }
 0x16a   : > { %v843_v10 = vmax.f32 %v708_v60, %v836_v18  ;;  %v838_v20 = vpop.f32.mrb[7].mxu0 }
 0x16b   : > { %v844_v26 = vmax.f32 %v710_v33, %v838_v20  ;;  %v15083_v33 = vpop.permute.xlu0 %1094 }
 0x16d   : > { %v960_v2 = vpop.f32.mrb[8].mxu0 }
 0x16e   : > { %v971_v59 = vmax.f32 %v841_v19, %v960_v2  ;;  %v962_v16 = vpop.f32.mrb[9].mxu0 }
 0x16f   : > { %v972_v47 = vmax.f32 %v842_v36, %v962_v16 }
 0x171   : > { %v966_v8 = vpop.f32.mrb[10].mxu0 }
 0x172   : > { %v973_v7 = vmax.f32 %v843_v10, %v966_v8  ;;  %v968_v25 = vpop.f32.mrb[11].mxu0 }
 0x173   : > { %v974_v13 = vmax.f32 %v844_v26, %v968_v25  ;;  %v1078_v38 = vpop.f32.mrb[0].mxu1 }
 0x174   : > { %v1085_v22 = vmax.f32 %v973_v7, %v1078_v38  ;;  %v1080_v35 = vpop.f32.mrb[1].mxu1 }
 0x175   : > { %v1086_v6 = vmax.f32 %v974_v13, %v1080_v35  ;;  %v1072_v30 = vpop.f32.mrb[12].mxu0 }
 0x176   : > { %v1083_v54 = vmax.f32 %v971_v59, %v1072_v30  ;;  %v1074_v55 = vpop.f32.mrb[13].mxu0  ;;  %v1099_v13 = vadd.f32 %v15083_v33, %v1085_v22 }
 0x177   : > { %v1084_v60 = vmax.f32 %v972_v47, %v1074_v55  ;;  %v1328_v18 = vpop.f32.mrb[2].mxu1  ;;  %v1100_v19 = vadd.f32 %v15083_v33, %v1086_v6 }
 0x178   : > { %v1097_v2 = vadd.f32 %v15081_v4, %v1083_v54  ;;  %v1330_v16 = vpop.f32.mrb[3].mxu1  ;;  %v18686_v54 = vmov 1.0|1.0   ;;  %v15103_v55 = vmax.f32 %v1099_v13, 0.0 }
 0x179   : > { %v1098_v8 = vadd.f32 %v15081_v4, %v1084_v60  ;;  %v1220_v36 = vpop.f32.mrb[14].mxu0  ;;  %v15093_v20 = vmax.f32 %v1100_v19, 0.0  ;;  %v18688_v60 = vmov 0.0|0.0  }
 0x17a   : > { %v1222_v25 = vpop.f32.mrb[15].mxu0  ;;  %v1339_v7 = vmax.f32 %v1220_v36, %v1328_v18  ;;  %v15091_v47 = vmax.f32 %v1097_v2, 0.0  ;;  %18687 = vst [vmem:[#allocation35_spill] sm:$0xff] %v15103_v55 }
 0x17b   : > { %v15088_v38 = vmax.f32 %v1098_v8, 0.0  ;;  %v1340_v35 = vmax.f32 %v1222_v25, %v1330_v16  ;;  %v1334_v59 = vpop.f32.mrb[4].mxu1 }
 0x17c   : > { %v1336_v10 = vpop.f32.mrb[5].mxu1 }
 0x17d   : > { %9114 = vmatprep.mubr.msk.f32.mxu0 %vm18508_vm0, %v15088_v38  ;;  %v1226_v26 = vpop.f32.mrb[16].mxu0 }
 0x17e   : > { %2770 = vmatmul.mubr.f32.vlgmr.msra.gmra.mrb[38].mxu0 %v15091_v47  ;;  %v1228_v6 = vpop.f32.mrb[17].mxu0  ;;  %v1341_v30 = vmax.f32 %v1226_v26, %v1334_v59 }
 0x17f   : > { %11435 = vmatpush1.bf16.msk.msra.mxu0 %vm14732_vm12, %v18686_v54  ;;  %9115 = vmatprep.mubr.msk.f32.mxu0 %vm18508_vm0, %v15093_v20  ;;  %v1342_v22 = vmax.f32 %v1228_v6, %v1336_v10 }
 0x180   : > { %11436 = vmatprep.subr.bf16.mxu0 %v18688_v60 }
 0x181   : > { %v1458_v18 = vpop.f32.mrb[18].mxu0 }
 0x182   : > { %v1469_v2 = vmax.f32 %v1339_v7, %v1458_v18  ;;  %v1460_v16 = vpop.f32.mrb[19].mxu0  ;;  %2775 = vmatmul.mubr.f32.gmra.mrb[40].mxu0 %v15103_v55  ;;  %v1570_v19 = vpop.f32.mrb[6].mxu1 }
 0x183   : > { %v1470_v8 = vmax.f32 %v1340_v35, %v1460_v16  ;;  %11438 = vmatpush1.bf16.msk.msra.mxu0 %vm14759_vm15, %v18686_v54  ;;  %v1572_v36 = vpop.f32.mrb[7].mxu1 }
 0x184   : > { %v1581_v25 = vmax.f32 %v1469_v2, %v1570_v19  ;;  %11439 = vmatprep.subr.bf16.mxu0 %v18688_v60 }
 0x185   : > { %v1582_v59 = vmax.f32 %v1470_v8, %v1572_v36  ;;  %v1464_v13 = vpop.f32.mrb[20].mxu0 }
 0x186   : > { %v1585_v10 = vadd.f32 %v1581_v25, %v15081_v4  ;;  %v1471_v26 = vmax.f32 %v1341_v30, %v1464_v13  ;;  %v1466_v6 = vpop.f32.mrb[21].mxu0  ;;  %v1576_v7 = vpop.f32.mrb[8].mxu1 }
 0x187   : > { %v1586_v18 = vadd.f32 %v1582_v59, %v15081_v4  ;;  %v1472_v55 = vmax.f32 %v1342_v22, %v1466_v6  ;;  %11441 = vmatpush1.bf16.msk.msra.mxu0 %vm14786_vm2, %v18686_v54  ;;  %v1578_v35 = vpop.f32.mrb[9].mxu1 }
 0x188   : > { %v1583_v16 = vmax.f32 %v1471_v26, %v1576_v7  ;;  %11442 = vmatprep.subr.bf16.mxu0 %v18688_v60  ;;  %v15119_v36 = vmax.f32 %v1585_v10, 0.0 }
 0x189   : > { %v15117_v2 = vmax.f32 %v1586_v18, 0.0  ;;  %v1584_v19 = vmax.f32 %v1472_v55, %v1578_v35  ;;  %v1708_v8 = vpop.f32.mrb[22].mxu0 }
 0x18a   : > { %v1587_v30 = vadd.f32 %v1583_v16, %v15083_v33  ;;  %v1710_v25 = vpop.f32.mrb[23].mxu0 }
 0x18b   : > { %v1588_v59 = vadd.f32 %v1584_v19, %v15083_v33  ;;  %11444 = vmatpush1.bf16.msk.msra.mxu0 %vm14808_vm6, %v18686_v54  ;;  %9147 = vmatprep.mubr.msk.f32.mxu1 %vm18508_vm0, %v15117_v2 }
 0x18c   : > { %2851 = vmatmul.mubr.f32.vlgmr.msra.gmra.mrb[26].mxu1 %v15119_v36  ;;  %11445 = vmatprep.subr.bf16.mxu0 %v18688_v60  ;;  %v15135_v10 = vmax.f32 %v1587_v30, 0.0 }
 0x18d   : > { %v15130_v22 = vmax.f32 %v1588_v59, 0.0  ;;  %11480 = vmatpush1.bf16.msk.msra.mxu1 %vm14732_vm12, %v18686_v54  ;;  %v1714_v55 = vpop.f32.mrb[24].mxu0  ;;  %v1816_v13 = vpop.f32.mrb[10].mxu1 }
 0x18e   : > { %18690 = vst [vmem:[#allocation37_spill] sm:$0xff] %v15135_v10  ;;  %v1827_v26 = vmax.f32 %v1708_v8, %v1816_v13  ;;  %11481 = vmatprep.subr.bf16.mxu1 %v18688_v60  ;;  %v1716_v6 = vpop.f32.mrb[25].mxu0  ;;  %v1818_v7 = vpop.f32.mrb[11].mxu1 }
 0x18f   : > { %18689 = vst [vmem:[#allocation36_spill] sm:$0xff] %v15130_v22  ;;  %11447 = vmatpush1.bf16.msk.msra.mxu0 %vm14830_vm9, %v18686_v54  ;;  %9148 = vmatprep.mubr.msk.f32.mxu1 %vm18508_vm0, %v15130_v22  ;;  %v1828_v18 = vmax.f32 %v1710_v25, %v1818_v7 }
 0x190   : > { %2856 = vmatmul.mubr.f32.gmra.mrb[28].mxu1 %v15135_v10  ;;  %11448 = vmatprep.subr.bf16.mxu0 %v18688_v60 }
 0x191   : > { %11483 = vmatpush1.bf16.msk.msra.mxu1 %vm14759_vm15, %v18686_v54  ;;  %v1822_v35 = vpop.f32.mrb[12].mxu1 }
 0x192   : > { %v1829_v16 = vmax.f32 %v1714_v55, %v1822_v35  ;;  %v1824_v19 = vpop.f32.mrb[13].mxu1  ;;  %11484 = vmatprep.subr.bf16.mxu1 %v18688_v60 }
 0x193   : > { %v1830_v8 = vmax.f32 %v1716_v6, %v1824_v19  ;;  %11450 = vmatpush1.bf16.msk.msra.mxu0 %vm14852_vm13, %v18686_v54 }
 0x194   : > { %v1946_v30 = vpop.f32.mrb[26].mxu0  ;;  %11451 = vmatprep.subr.bf16.mxu0 %v18688_v60 }
 0x195   : > { %v15153_v25 = vmax.f32 %v1827_v26, %v1946_v30  ;;  %v1948_v59 = vpop.f32.mrb[27].mxu0  ;;  %11486 = vmatpush1.bf16.msk.msra.mxu1 %vm14786_vm2, %v18686_v54  ;;  %vm3044_vm2 = vcmp.eq.s32.totalorder %v14936_v56, %v14643_v61 }
 0x196   : > { %v1958_v13 = vmax.f32 %v1828_v18, %v1948_v59  ;;  %11487 = vmatprep.subr.bf16.mxu1 %v18688_v60 }
 0x197   : > { %11453 = vmatpush1.bf16.msk.msra.mxu0 %vm14874_vm1, %v18686_v54 }
 0x198   : > { %v15162_v55 = vpop.f32.mrb[14].mxu1  ;;  %v1952_v6 = vpop.f32.mrb[28].mxu0  ;;  %11454 = vmatprep.subr.bf16.mxu0 %v18688_v60 }
 0x199   : > { %v2060_v7 = vpop.f32.mrb[15].mxu1  ;;  %v15167_v35 = vmax.f32 %v1829_v16, %v1952_v6  ;;  %v1954_v19 = vpop.f32.mrb[29].mxu0  ;;  %11489 = vmatpush1.bf16.msk.msra.mxu1 %vm14808_vm6, %v18686_v54  ;;  %vm3042_vm6 = vcmp.eq.s32.totalorder %v14914_v34, %v14643_v61 }
 0x19a   : > { %v2070_v18 = vmax.f32 %v1958_v13, %v2060_v7  ;;  %v15172_v30 = vmax.f32 %v1830_v8, %v1954_v19  ;;  %11490 = vmatprep.subr.bf16.mxu1 %v18688_v60 }
 0x19b   : > { %11456 = vmatpush1.bf16.msk.msra.mxu0 %vm14902_vm7, %v18686_v54 }
 0x19c   : > { %v2074_v59 = vadd.f32 %v2070_v18, %v15081_v4  ;;  %v15179_v26 = vpop.f32.mrb[16].mxu1  ;;  %11457 = vmatprep.subr.bf16.mxu0 %v18688_v60 }
 0x19d   : > { %v15184_v6 = vpop.f32.mrb[17].mxu1  ;;  %11492 = vmatpush1.bf16.msk.msra.mxu1 %vm14830_vm9, %v18686_v54  ;;  %vm3040_vm9 = vcmp.eq.s32.totalorder %v14886_v9, %v14643_v61 }
 0x19e   : > { %v15189_v8 = vmax.f32 %v2074_v59, 0.0  ;;  %v2072_v13 = vmax.f32 %v15172_v30, %v15184_v6  ;;  %11493 = vmatprep.subr.bf16.mxu1 %v18688_v60 }
 0x19f   : > { %v2196_v7 = vpop.f32.mrb[30].mxu0  ;;  %11459 = vmatpush1.bf16.msk.msra.mxu0 %vm14924_vm11, %v18686_v54 }
 0x1a0   : > { %9180 = vmatprep.mubr.msk.f32.mxu0 %vm18508_vm0, %v15189_v8  ;;  %v2198_v19 = vpop.f32.mrb[31].mxu0  ;;  %11460 = vmatprep.subr.bf16.mxu0 %v18688_v60 }
 0x1a1   : > { %11495 = vmatpush1.bf16.msk.msra.mxu1 %vm14852_vm13, %v18686_v54  ;;  %vm3036_vm13 = vcmp.eq.s32.totalorder %v14842_v46, %v14643_v61 }
 0x1a2   : > { %v2304_v18 = vpop.f32.mrb[18].mxu1  ;;  %11496 = vmatprep.subr.bf16.mxu1 %v18688_v60 }
 0x1a3   : > { %v2202_v30 = vpop.f32.mrb[32].mxu0  ;;  %v2315_v59 = vmax.f32 %v2196_v7, %v2304_v18  ;;  %v2306_v6 = vpop.f32.mrb[19].mxu1  ;;  %11462 = vmatpush1.bf16.msk.msra.mxu0 %vm18691_vm10, %v18686_v54 }
 0x1a4   : > { %v2204_v16 = vpop.f32.mrb[33].mxu0  ;;  %v2316_v27 = vmax.f32 %v2198_v19, %v2306_v6  ;;  %11463 = vmatprep.subr.bf16.mxu0 %v18688_v60 }
 0x1a5   : > { %11498 = vmatpush1.bf16.msk.msra.mxu1 %vm14874_vm1, %v18686_v54  ;;  %vm18702_vm1 = vcmask 982016  }
 0x1a6   : > { %v2310_v57 = vpop.f32.mrb[20].mxu1  ;;  %11499 = vmatprep.subr.bf16.mxu1 %v18688_v60 }
 0x1a7   : > { %v2317_v5 = vmax.f32 %v2202_v30, %v2310_v57  ;;  %v2312_v39 = vpop.f32.mrb[21].mxu1  ;;  %11465 = vmatpush1.bf16.msk.msra.mxu0 %vm18692_vm14, %v18686_v54 }
 0x1a8   : > { %v2318_v7 = vmax.f32 %v2204_v16, %v2312_v39  ;;  %11466 = vmatprep.subr.bf16.mxu0 %v18688_v60 }
 0x1a9   : > { %v2434_v18 = vpop.f32.mrb[34].mxu0  ;;  %11501 = vmatpush1.bf16.msk.msra.mxu1 %vm14902_vm7, %v18686_v54  ;;  %vm3023_vm7 = vcmp.eq.s32.totalorder %v13787_v1, %v14643_v61 }
 0x1aa   : > { %v15219_v19 = vmax.f32 %v2315_v59, %v2434_v18  ;;  %v2436_v6 = vpop.f32.mrb[35].mxu0  ;;  %11502 = vmatprep.subr.bf16.mxu1 %v18688_v60 }
 0x1ab   : > { %v2446_v32 = vmax.f32 %v2316_v27, %v2436_v6  ;;  %v2546_v57 = vpop.f32.mrb[22].mxu1  ;;  %11468 = vmatpush1.bf16.msk.msra.mxu0 %vm14990_vm3, %v18686_v54 }
 0x1ac   : > { %v2557_v39 = vmax.f32 %v15219_v19, %v2546_v57  ;;  %v2548_v16 = vpop.f32.mrb[23].mxu1  ;;  %11469 = vmatprep.subr.bf16.mxu0 %v18688_v60  ;;  %v18695_v57 = vmov 0.0  }
 0x1ad   : > { %v2558_v30 = vmax.f32 %v2446_v32, %v2548_v16  ;;  %v2440_v43 = vpop.f32.mrb[36].mxu0  ;;  %11504 = vmatpush1.bf16.msk.msra.mxu1 %vm14924_vm11, %v18686_v54  ;;  %vm3024_vm11 = vcmp.eq.s32.totalorder %v14674_v31, %v14643_v61  ;;  %v18697_v16 = vmov 1.0  }
 0x1ae   : > { %v15230_v41 = vmax.f32 %v2317_v5, %v2440_v43  ;;  %v2442_v59 = vpop.f32.mrb[37].mxu0  ;;  %11505 = vmatprep.subr.bf16.mxu1 %v18688_v60  ;;  %v18694_v5 = vmax.f32 %v15153_v25, %v15162_v55  ;;  %v18696_v25 = vmax.f32 %v15167_v35, %v15179_v26  ;;  %v18703_v26 = vmov 0 }
 0x1af   : > { %v2562_v27 = vadd.f32 %v2558_v30, %v15081_v4  ;;  %v2448_v18 = vmax.f32 %v2318_v7, %v2442_v59  ;;  %v2552_v6 = vpop.f32.mrb[24].mxu1  ;;  %11471 = vmatpush1.bf16.msk.msra.mxu0 %vm15012_vm4, %v18686_v54  ;;  %v2076_v7 = vadd.f32 %v2072_v13, %v15083_v33  ;;  %v18699_v30 = vmov 0 }
 0x1b0   : > { %v2559_v32 = vmax.f32 %v15230_v41, %v2552_v6  ;;  %v2554_v19 = vpop.f32.mrb[25].mxu1  ;;  %11472 = vmatprep.subr.bf16.mxu0 %v18688_v60  ;;  %v2073_v21 = vadd.f32 %v18694_v5, %v15081_v4  ;;  %v2075_v55 = vadd.f32 %v18696_v25, %v15083_v33  ;;  %v2561_v35 = vadd.f32 %v2557_v39, %v15081_v4  ;;  %v18732_v5 = vld [vmem:[#allocation27_spill] sm:$0xff]  ;;  %v18736_v25 = vld [vmem:[#allocation29_spill] sm:$0xff] }
 0x1b1   : > { %v15239_v23 = vmax.f32 %v2562_v27, 0.0  ;;  %v2560_v43 = vmax.f32 %v2448_v18, %v2554_v19  ;;  %11507 = vmatpush1.bf16.msk.msra.mxu1 %vm18691_vm10, %v18686_v54  ;;  %v15278_v13 = vmax.f32 %v2076_v7, 0.0  ;;  %vm15284_vm10 = vmpackc.low %vm3024_vm11, %vm3023_vm7  ;;  %vm18706_vm11 = vcmask 982016  }
 0x1b2   : > { %11508 = vmatprep.subr.bf16.mxu1 %v18688_v60  ;;  %v15271_v11 = vmax.f32 %v2073_v21, 0.0  ;;  %v18700_v30 = vsel %vm15284_vm10, 4294967295, %v18699_v30  ;;  %v15299_v45 = vmax.f32 %v2075_v55, 0.0  ;;  %v18710_v4 = vmov 0  ;;  %v18733_v21 = vld [vmem:[#allocation28_spill] sm:$0xff]  ;;  %v18737_v55 = vld [vmem:[#allocation30_spill] sm:$0xff] }
 0x1b3   : > { %18693 = vst [vmem:[#allocation38_spill] sm:$0xff] %v15239_v23  ;;  %9213 = vmatprep.mubr.msk.f32.mxu1 %vm18508_vm0, %v15239_v23  ;;  %11474 = vmatpush1.bf16.msk.msra.mxu0 %vm15034_vm5, %v18686_v54  ;;  %18701 = vst [vmem:[#allocation39_spill] sm:$0xff] %v18700_v30  ;;  %vm3026_vm0 = vcmp.eq.s32.totalorder %v14716_v62, %v14643_v61  ;;  %v2564_v48 = vadd.f32 %v2560_v43, %v15083_v33  ;;  %v15347_v39 = vmax.f32 %v2561_v35, 0.0  ;;  %v18718_v27 = vmov 0 }
 0x1b4   : > { %11475 = vmatprep.subr.bf16.mxu0 %v18688_v60  ;;  %v2563_v41 = vadd.f32 %v2559_v32, %v15083_v33  ;;  %v18714_v33 = vmov 0  ;;  %v18721_v18 = vmov 0  ;;  %v18724_v6 = vmov 0 }
 0x1b5   : > { %11510 = vmatpush1.bf16.msk.msra.mxu1 %vm18692_vm14, %v18686_v54  ;;  %vm18698_vm14 = vcmp.eq.s32.totalorder %v15055_v3, %v14692_v17  ;;  %v15354_v51 = vmax.f32 %v2564_v48, 0.0  ;;  %v18726_v32 = vmov 0  ;;  %vm3046_vm15 = vcmp.eq.s32.totalorder %v18733_v21, %v14643_v61  ;;  %v18740_v48 = vld [vmem:[#allocation31_spill] sm:$0xff] }
 0x1b6   : > { %11511 = vmatprep.subr.bf16.mxu1 %v18688_v60  ;;  %v15371_v59 = vmax.f32 %v2563_v41, 0.0  ;;  %vm3048_vm12 = vcmp.eq.s32.totalorder %v18737_v55, %v14643_v61  ;;  %v18741_v41 = vld [vmem:[#allocation32_spill] sm:$0xff]  ;;  %v18758_v19 = vmov 0  ;;  %v18762_v43 = vmov 0 }
 0x1b7   : > { %11477 = vmatpush1.bf16.msk.msra.mxu0 %vm15050_vm8, %v18686_v54  ;;  %v18767_v7 = vmov 0  ;;  %v18770_v35 = vmov 0 }
 0x1b8   : > { %2927 = vmatprep.subr.mxu0 %v18695_v57 }
 0x1b9   : > { %11513 = vmatpush1.bf16.msk.msra.mxu1 %vm14990_vm3, %v18686_v54  ;;  %vm3025_vm3 = vcmp.eq.s32.totalorder %v14713_v15, %v14643_v61 }
 0x1ba   : > { %11514 = vmatprep.subr.bf16.mxu1 %v18688_v60  ;;  %vm15306_vm7 = vmpackc.low %vm3026_vm0, %vm3025_vm3 }
 0x1bb   : > { %9179 = vmatpush1.msk.msra.mxu0 %vm18698_vm14, %v18697_v16  ;;  %v18704_v26 = vsel %vm15306_vm7, 4294967295, %v18703_v26  ;;  %vm3030_vm14 = vcmp.eq.s32.totalorder %v14772_v24, %v14643_v61 }
 0x1bc   : > { %2932 = vmatmul.mubr.f32.vlgmr.msra.gmra.mrb[42].mxu0 %v15271_v11  ;;  %11523 = vmatprep.subr.bf16.mxu0 %v18688_v60  ;;  %18705 = vst [vmem:[#allocation40_spill] sm:$0xff] %v18704_v26  ;;  %v18778_v26 = vmov 0 }
 0x1bd   : > { %9181 = vmatprep.mubr.msk.f32.mxu0 %vm18702_vm1, %v15278_v13  ;;  %11516 = vmatpush1.bf16.msk.msra.mxu1 %vm15012_vm4, %v18686_v54  ;;  %vm3027_vm1 = vcmp.eq.s32.totalorder %v14744_v44, %v14643_v61  ;;  %vm3028_vm4 = vcmp.eq.s32.totalorder %v14747_v50, %v14643_v61 }
 0x1be   : > { %11525 = vmatpush1.bf16.msk.msra.mxu0 %vm15284_vm10, %v18686_v54  ;;  %11517 = vmatprep.subr.bf16.mxu1 %v18688_v60  ;;  %vm15325_vm0 = vmpackc.low %vm3028_vm4, %vm3027_vm1  ;;  %vm3031_vm1 = vcmp.eq.s32.totalorder %v14795_v0, %v14643_v61  ;;  %vm18713_vm4 = vcmp.eq.s32.totalorder %v15055_v3, %v14692_v17  ;;  %v18764_v17 = vmov 0 }
 0x1bf   : > { %11526 = vmatprep.subr.bf16.mxu0 %v18688_v60  ;;  %v18708_v49 = vsel %vm15325_vm0, 4294967295, %v18707_v49 }
 0x1c0   : > { %2937 = vmatmul.mubr.f32.gmra.mrb[44].mxu0 %v15299_v45  ;;  %18709 = vst [vmem:[#allocation41_spill] sm:$0xff] %v18708_v49 }
 0x1c1   : > { %11519 = vmatpush1.bf16.msk.msra.mxu1 %vm15034_vm5, %v18686_v54  ;;  %9277 = vmatprep.mubr.msk.f32.mxu0 %vm18706_vm11, %v15088_v38  ;;  %vm3029_vm5 = vcmp.eq.s32.totalorder %v14769_v63, %v14643_v61 }
 0x1c2   : > { %11528 = vmatpush1.bf16.msk.msra.mxu0 %vm15306_vm7, %v18686_v54  ;;  %11520 = vmatprep.subr.bf16.mxu1 %v18688_v60  ;;  %vm15343_vm3 = vmpackc.low %vm3030_vm14, %vm3029_vm5  ;;  %vm3033_vm14 = vcmp.eq.s32.totalorder %v14817_v12, %v14643_v61 }
 0x1c3   : > { %11529 = vmatprep.subr.bf16.mxu0 %v18688_v60  ;;  %v18711_v4 = vsel %vm15343_vm3, 4294967295, %v18710_v4 }
 0x1c4   : > { %18712 = vst [vmem:[#allocation42_spill] sm:$0xff] %v18711_v4 }
 0x1c5   : > { %11522 = vmatpush1.bf16.msk.msra.mxu1 %vm15050_vm8, %v18686_v54  ;;  %vm3032_vm8 = vcmp.eq.s32.totalorder %v14798_v29, %v14643_v61 }
 0x1c6   : > { %11531 = vmatpush1.bf16.msk.msra.mxu0 %vm15325_vm0, %v18686_v54  ;;  %3008 = vmatprep.subr.mxu1 %v18695_v57  ;;  %vm15367_vm5 = vmpackc.low %vm3032_vm8, %vm3031_vm1 }
 0x1c7   : > { %11532 = vmatprep.subr.bf16.mxu0 %v18688_v60  ;;  %v18715_v33 = vsel %vm15367_vm5, 4294967295, %v18714_v33  ;;  %vm18717_vm1 = vmmov %vm18706_vm11 }
 0x1c8   : > { %18716 = vst [vmem:[#allocation43_spill] sm:$0xff] %v18715_v33 }
 0x1c9   : > { %9212 = vmatpush1.msk.msra.mxu1 %vm18713_vm4, %v18697_v16  ;;  %vm3034_vm4 = vcmp.eq.s32.totalorder %v14820_v14, %v14643_v61 }
 0x1ca   : > { %11534 = vmatpush1.bf16.msk.msra.mxu0 %vm15343_vm3, %v18686_v54  ;;  %3013 = vmatmul.mubr.f32.vlgmr.msra.gmra.mrb[30].mxu1 %v15347_v39  ;;  %vm15389_vm8 = vmpackc.low %vm3034_vm4, %vm3033_vm14  ;;  %vm18515_vm4 = vcmp.eq.s32.totalorder %v14861_v37, %v14643_v61 }
 0x1cb   : > { %11568 = vmatprep.subr.bf16.mxu1 %v18688_v60  ;;  %9214 = vmatprep.mubr.msk.f32.mxu1 %vm18706_vm11, %v15354_v51  ;;  %v18719_v27 = vsel %vm15389_vm8, 4294967295, %v18718_v27  ;;  %vm3035_vm11 = vcmp.eq.s32.totalorder %v14839_v58, %v14643_v61 }
 0x1cc   : > { %11570 = vmatpush1.bf16.msk.msra.mxu1 %vm15284_vm10, %v18686_v54  ;;  %11535 = vmatprep.subr.bf16.mxu0 %v18688_v60  ;;  %18720 = vst [vmem:[#allocation44_spill] sm:$0xff] %v18719_v27  ;;  %vm15405_vm14 = vmpackc.low %vm3036_vm13, %vm3035_vm11  ;;  %vm3039_vm11 = vcmp.eq.s32.totalorder %v14883_v52, %v14643_v61 }
 0x1cd   : > { %11571 = vmatprep.subr.bf16.mxu1 %v18688_v60  ;;  %v18722_v18 = vsel %vm15405_vm14, 4294967295, %v18721_v18 }
 0x1ce   : > { %11537 = vmatpush1.bf16.msk.msra.mxu0 %vm15367_vm5, %v18686_v54  ;;  %3018 = vmatmul.mubr.f32.gmra.mrb[32].mxu1 %v15371_v59  ;;  %18723 = vst [vmem:[#allocation45_spill] sm:$0xff] %v18722_v18 }
 0x1cf   : > { %9310 = vmatprep.mubr.msk.f32.mxu1 %vm18717_vm1, %v15117_v2  ;;  %11538 = vmatprep.subr.bf16.mxu0 %v18688_v60  ;;  %vm18516_vm1 = vcmp.eq.s32.totalorder %v14864_v42, %v14643_v61 }
 0x1d0   : > { %11573 = vmatpush1.bf16.msk.msra.mxu1 %vm15306_vm7, %v18686_v54  ;;  %vm15427_vm13 = vmpackc.low %vm18516_vm1, %vm18515_vm4  ;;  %vm3041_vm1 = vcmp.eq.s32.totalorder %v14911_v53, %v14643_v61 }
 0x1d1   : > { %11574 = vmatprep.subr.bf16.mxu1 %v18688_v60  ;;  %v18725_v6 = vsel %vm15427_vm13, 4294967295, %v18724_v6  ;;  %vm15443_vm4 = vmpackc.low %vm3040_vm9, %vm3039_vm11  ;;  %vm3043_vm11 = vcmp.eq.s32.totalorder %v14933_v28, %v14643_v61 }
 0x1d2   : > { %11540 = vmatpush1.bf16.msk.msra.mxu0 %vm15389_vm8, %v18686_v54  ;;  %v18727_v32 = vsel %vm15443_vm4, 4294967295, %v18726_v32  ;;  %vm15459_vm9 = vmpackc.low %vm3042_vm6, %vm3041_vm1  ;;  %vm3045_vm1 = vcmp.eq.s32.totalorder %v18732_v5, %v14643_v61 }
 0x1d3   : > { %11541 = vmatprep.subr.bf16.mxu0 %v18688_v60  ;;  %vm15475_vm6 = vmpackc.low %vm3044_vm2, %vm3043_vm11  ;;  %vm3047_vm11 = vcmp.eq.s32.totalorder %v18736_v25, %v14643_v61 }
 0x1d4   : > { %11576 = vmatpush1.bf16.msk.msra.mxu1 %vm15325_vm0, %v18686_v54  ;;  %vm15491_vm2 = vmpackc.low %vm3046_vm15, %vm3045_vm1  ;;  %vm3049_vm1 = vcmp.eq.s32.totalorder %v18740_v48, %v14643_v61  ;;  %v18773_v48 = vmov 0 }
 0x1d5   : > { %11577 = vmatprep.subr.bf16.mxu1 %v18688_v60  ;;  %vm15507_vm15 = vmpackc.low %vm3048_vm12, %vm3047_vm11  ;;  %vm3051_vm11 = vcmp.eq.s32.totalorder %v18744_v40, %v14643_v61 }
 0x1d6   : > { %11543 = vmatpush1.bf16.msk.msra.mxu0 %vm15405_vm14, %v18686_v54 }
 0x1d7   : > { %11544 = vmatprep.subr.bf16.mxu0 %v18688_v60 }
 0x1d8   : > { %11579 = vmatpush1.bf16.msk.msra.mxu1 %vm15343_vm3, %v18686_v54 }
 0x1d9   : > { %11580 = vmatprep.subr.bf16.mxu1 %v18688_v60 }
 0x1da   : > { %11546 = vmatpush1.bf16.msk.msra.mxu0 %vm15427_vm13, %v18686_v54 }
 0x1db   : > { %11547 = vmatprep.subr.bf16.mxu0 %v18688_v60 }
 0x1dc   : > { %11582 = vmatpush1.bf16.msk.msra.mxu1 %vm15367_vm5, %v18686_v54 }
 0x1dd   : > { %11583 = vmatprep.subr.bf16.mxu1 %v18688_v60 }
 0x1de   : > { %11549 = vmatpush1.bf16.msk.msra.mxu0 %vm15443_vm4, %v18686_v54 }
 0x1df   : > { %11550 = vmatprep.subr.bf16.mxu0 %v18688_v60 }
 0x1e0   : > { %11585 = vmatpush1.bf16.msk.msra.mxu1 %vm15389_vm8, %v18686_v54 }
 0x1e1   : > { %11586 = vmatprep.subr.bf16.mxu1 %v18688_v60 }
 0x1e2   : > { %11552 = vmatpush1.bf16.msk.msra.mxu0 %vm15459_vm9, %v18686_v54 }
 0x1e3   : > { %11553 = vmatprep.subr.bf16.mxu0 %v18688_v60 }
 0x1e4   : > { %11588 = vmatpush1.bf16.msk.msra.mxu1 %vm15405_vm14, %v18686_v54 }
 0x1e5   : > { %11589 = vmatprep.subr.bf16.mxu1 %v18688_v60 }
 0x1e6   : > { %11555 = vmatpush1.bf16.msk.msra.mxu0 %vm15475_vm6, %v18686_v54 }
 0x1e7   : > { %11556 = vmatprep.subr.bf16.mxu0 %v18688_v60 }
 0x1e8   : > { %11591 = vmatpush1.bf16.msk.msra.mxu1 %vm15427_vm13, %v18686_v54  ;;  %vm3050_vm13 = vcmp.eq.s32.totalorder %v18741_v41, %v14643_v61  ;;  %v18745_v41 = vld [vmem:[#allocation34_spill] sm:$0xff] }
 0x1e9   : > { %11592 = vmatprep.subr.bf16.mxu1 %v18688_v60  ;;  %vm15523_vm12 = vmpackc.low %vm3050_vm13, %vm3049_vm1  ;;  %vm3053_vm1 = vcmp.eq.s32.totalorder %v15055_v3, %v14643_v61 }
 0x1ea   : > { %11558 = vmatpush1.bf16.msk.msra.mxu0 %vm15491_vm2, %v18686_v54 }
 0x1eb   : > { %11559 = vmatprep.subr.bf16.mxu0 %v18688_v60 }
 0x1ec   : > { %11594 = vmatpush1.bf16.msk.msra.mxu1 %vm15443_vm4, %v18686_v54  ;;  %vm3052_vm4 = vcmp.eq.s32.totalorder %v18745_v41, %v14643_v61  ;;  %v18749_v41 = vld [vmem:[#allocation35_spill] sm:$0xff] }
 0x1ed   : > { %11595 = vmatprep.subr.bf16.mxu1 %v18688_v60  ;;  %vm15539_vm13 = vmpackc.low %vm3052_vm4, %vm3051_vm11  ;;  %vm18748_vm4 = vcmask 982016  }
 0x1ee   : > { %11561 = vmatpush1.bf16.msk.msra.mxu0 %vm15507_vm15, %v18686_v54  ;;  %vm18750_vm11 = vmmov %vm18748_vm4 }
 0x1ef   : > { %11562 = vmatprep.subr.bf16.mxu0 %v18688_v60 }
 0x1f0   : > { %11597 = vmatpush1.bf16.msk.msra.mxu1 %vm15459_vm9, %v18686_v54 }
 0x1f1   : > { %11598 = vmatprep.subr.bf16.mxu1 %v18688_v60 }
 0x1f2   : > { %11564 = vmatpush1.bf16.msk.msra.mxu0 %vm15523_vm12, %v18686_v54 }
 0x1f3   : > { %11565 = vmatprep.subr.bf16.mxu0 %v18688_v60 }
 0x1f4   : > { %11600 = vmatpush1.bf16.msk.msra.mxu1 %vm15475_vm6, %v18686_v54 }
 0x1f5   : > { %11601 = vmatprep.subr.bf16.mxu1 %v18688_v60 }
 0x1f6   : > { %11567 = vmatpush1.bf16.msk.msra.mxu0 %vm15539_vm13, %v18686_v54 }
 0x1f7   : > { %3176 = vmatprep.subr.mxu0 %v18695_v57 }
 0x1f8   : > { %11603 = vmatpush1.bf16.msk.msra.mxu1 %vm15491_vm2, %v18686_v54 }
 0x1f9   : > { %11604 = vmatprep.subr.bf16.mxu1 %v18688_v60 }
 0x1fa   : > { %9276 = vmatpush1.msk.msra.mxu0 %vm3053_vm1, %v18697_v16 }
 0x1fb   : > { %3181 = vmatmul.mubr.f32.vlgmr.msra.gmra.mrb[46].mxu0 %v15091_v47  ;;  %11613 = vmatprep.subr.bf16.mxu0 %v18688_v60 }
 0x1fc   : > { %9278 = vmatprep.mubr.msk.f32.mxu0 %vm18748_vm4, %v15093_v20  ;;  %11606 = vmatpush1.bf16.msk.msra.mxu1 %vm15507_vm15, %v18686_v54 }
 0x1fd   : > { %11615 = vmatpush1.bf16.msk.msra.mxu0 %vm15284_vm10, %v18686_v54  ;;  %11607 = vmatprep.subr.bf16.mxu1 %v18688_v60 }
 0x1fe   : > { %11616 = vmatprep.subr.bf16.mxu0 %v18688_v60 }
 0x1ff   : > { %3186 = vmatmul.mubr.f32.gmra.mrb[48].mxu0 %v18749_v41 }
 0x200   : > { %11609 = vmatpush1.bf16.msk.msra.mxu1 %vm15523_vm12, %v18686_v54  ;;  %9343 = vmatprep.mubr.msk.f32.mxu0 %vm18750_vm11, %v15189_v8  ;;  %vm18751_vm11 = vmmov %vm18748_vm4 }
 0x201   : > { %11618 = vmatpush1.bf16.msk.msra.mxu0 %vm15306_vm7, %v18686_v54  ;;  %11610 = vmatprep.subr.bf16.mxu1 %v18688_v60 }
 0x202   : > { %11619 = vmatprep.subr.bf16.mxu0 %v18688_v60 }
 0x204   : > { %11612 = vmatpush1.bf16.msk.msra.mxu1 %vm15539_vm13, %v18686_v54 }
 0x205   : > { %11621 = vmatpush1.bf16.msk.msra.mxu0 %vm15325_vm0, %v18686_v54  ;;  %3251 = vmatprep.subr.mxu1 %v18695_v57 }
 0x206   : > { %11622 = vmatprep.subr.bf16.mxu0 %v18688_v60 }
 0x208   : > { %9309 = vmatpush1.msk.msra.mxu1 %vm3053_vm1, %v18697_v16 }
 0x209   : > { %11624 = vmatpush1.bf16.msk.msra.mxu0 %vm15343_vm3, %v18686_v54  ;;  %3256 = vmatmul.mubr.f32.vlgmr.msra.gmra.mrb[34].mxu1 %v15119_v36 }
 0x20a   : > { %11658 = vmatprep.subr.bf16.mxu1 %v18688_v60  ;;  %9311 = vmatprep.mubr.msk.f32.mxu1 %vm18748_vm4, %v15130_v22  ;;  %vm18752_vm4 = vnez %v18725_v6  ;;  %v15688_v6 = vadd.s32 1, %v14643_v61 }
 0x20b   : > { %11660 = vmatpush1.bf16.msk.msra.mxu1 %vm15284_vm10, %v18686_v54  ;;  %11625 = vmatprep.subr.bf16.mxu0 %v18688_v60 }
 0x20c   : > { %11661 = vmatprep.subr.bf16.mxu1 %v18688_v60  ;;  %vm3442_vm10 = vcmp.eq.s32.totalorder %v18737_v55, %v15688_v6 }
 0x20d   : > { %11627 = vmatpush1.bf16.msk.msra.mxu0 %vm15367_vm5, %v18686_v54  ;;  %3261 = vmatmul.mubr.f32.gmra.mrb[36].mxu1 %v15135_v10 }
 0x20e   : > { %9376 = vmatprep.mubr.msk.f32.mxu1 %vm18751_vm11, %v15239_v23  ;;  %11628 = vmatprep.subr.bf16.mxu0 %v18688_v60  ;;  %vm18753_vm11 = vnez %v18727_v32  ;;  %v18754_v32 = vmov 0 }
 0x20f   : > { %11663 = vmatpush1.bf16.msk.msra.mxu1 %vm15306_vm7, %v18686_v54  ;;  %vm3440_vm7 = vcmp.eq.s32.totalorder %v18733_v21, %v15688_v6 }
 0x210   : > { %11664 = vmatprep.subr.bf16.mxu1 %v18688_v60 }
 0x211   : > { %11630 = vmatpush1.bf16.msk.msra.mxu0 %vm15389_vm8, %v18686_v54 }
 0x212   : > { %11631 = vmatprep.subr.bf16.mxu0 %v18688_v60 }
 0x213   : > { %11666 = vmatpush1.bf16.msk.msra.mxu1 %vm15325_vm0, %v18686_v54  ;;  %vm3438_vm0 = vcmp.eq.s32.totalorder %v14936_v56, %v15688_v6 }
 0x214   : > { %11667 = vmatprep.subr.bf16.mxu1 %v18688_v60 }
 0x215   : > { %11633 = vmatpush1.bf16.msk.msra.mxu0 %vm15405_vm14, %v18686_v54 }
 0x216   : > { %11634 = vmatprep.subr.bf16.mxu0 %v18688_v60 }
 0x217   : > { %11669 = vmatpush1.bf16.msk.msra.mxu1 %vm15343_vm3, %v18686_v54  ;;  %vm3436_vm3 = vcmp.eq.s32.totalorder %v14914_v34, %v15688_v6 }
 0x218   : > { %11670 = vmatprep.subr.bf16.mxu1 %v18688_v60 }
 0x219   : > { %11636 = vmatpush1.bf16.msk.msra.mxu0 %vm18752_vm4, %v18686_v54 }
 0x21a   : > { %11637 = vmatprep.subr.bf16.mxu0 %v18688_v60 }
 0x21b   : > { %11672 = vmatpush1.bf16.msk.msra.mxu1 %vm15367_vm5, %v18686_v54  ;;  %vm3434_vm5 = vcmp.eq.s32.totalorder %v14886_v9, %v15688_v6 }
 0x21c   : > { %11673 = vmatprep.subr.bf16.mxu1 %v18688_v60 }
 0x21d   : > { %11639 = vmatpush1.bf16.msk.msra.mxu0 %vm18753_vm11, %v18686_v54 }
 0x21e   : > { %11640 = vmatprep.subr.bf16.mxu0 %v18688_v60 }
 0x21f   : > { %11675 = vmatpush1.bf16.msk.msra.mxu1 %vm15389_vm8, %v18686_v54  ;;  %vm3430_vm8 = vcmp.eq.s32.totalorder %v14842_v46, %v15688_v6 }
 0x220   : > { %11676 = vmatprep.subr.bf16.mxu1 %v18688_v60 }
 0x221   : > { %11642 = vmatpush1.bf16.msk.msra.mxu0 %vm15459_vm9, %v18686_v54 }
 0x222   : > { %11643 = vmatprep.subr.bf16.mxu0 %v18688_v60 }
 0x223   : > { %11678 = vmatpush1.bf16.msk.msra.mxu1 %vm15405_vm14, %v18686_v54  ;;  %vm18757_vm14 = vcmask 982016  }
 0x224   : > { %11679 = vmatprep.subr.bf16.mxu1 %v18688_v60 }
 0x225   : > { %11645 = vmatpush1.bf16.msk.msra.mxu0 %vm15475_vm6, %v18686_v54 }
 0x226   : > { %11646 = vmatprep.subr.bf16.mxu0 %v18688_v60 }
 0x227   : > { %11681 = vmatpush1.bf16.msk.msra.mxu1 %vm18752_vm4, %v18686_v54  ;;  %vm3418_vm4 = vcmp.eq.s32.totalorder %v14674_v31, %v15688_v6 }
 0x228   : > { %11682 = vmatprep.subr.bf16.mxu1 %v18688_v60 }
 0x229   : > { %11648 = vmatpush1.bf16.msk.msra.mxu0 %vm15491_vm2, %v18686_v54 }
 0x22a   : > { %11649 = vmatprep.subr.bf16.mxu0 %v18688_v60 }
 0x22b   : > { %11684 = vmatpush1.bf16.msk.msra.mxu1 %vm18753_vm11, %v18686_v54  ;;  %vm3419_vm11 = vcmp.eq.s32.totalorder %v14713_v15, %v15688_v6 }
 0x22c   : > { %11685 = vmatprep.subr.bf16.mxu1 %v18688_v60 }
 0x22d   : > { %11651 = vmatpush1.bf16.msk.msra.mxu0 %vm15507_vm15, %v18686_v54 }
 0x22e   : > { %11652 = vmatprep.subr.bf16.mxu0 %v18688_v60 }
 0x22f   : > { %11687 = vmatpush1.bf16.msk.msra.mxu1 %vm15459_vm9, %v18686_v54  ;;  %vm3417_vm9 = vcmp.eq.s32.totalorder %v13787_v1, %v15688_v6 }
 0x230   : > { %11688 = vmatprep.subr.bf16.mxu1 %v18688_v60 }
 0x231   : > { %11654 = vmatpush1.bf16.msk.msra.mxu0 %vm15523_vm12, %v18686_v54 }
 0x232   : > { %11655 = vmatprep.subr.bf16.mxu0 %v18688_v60 }
 0x233   : > { %11690 = vmatpush1.bf16.msk.msra.mxu1 %vm15475_vm6, %v18686_v54  ;;  %vm15710_vm6 = vmpackc.low %vm3418_vm4, %vm3417_vm9  ;;  %vm18761_vm4 = vcmask 982016  }
 0x234   : > { %11691 = vmatprep.subr.bf16.mxu1 %v18688_v60  ;;  %v18755_v32 = vsel %vm15710_vm6, 4294967295, %v18754_v32 }
 0x235   : > { %11657 = vmatpush1.bf16.msk.msra.mxu0 %vm15539_vm13, %v18686_v54  ;;  %18756 = vst [vmem:[#allocation27_spill] sm:$0xff] %v18755_v32 }
 0x236   : > { %3326 = vmatprep.subr.mxu0 %v18695_v57 }
 0x237   : > { %11693 = vmatpush1.bf16.msk.msra.mxu1 %vm15491_vm2, %v18686_v54  ;;  %vm3420_vm2 = vcmp.eq.s32.totalorder %v14716_v62, %v15688_v6 }
 0x238   : > { %11694 = vmatprep.subr.bf16.mxu1 %v18688_v60  ;;  %vm15730_vm9 = vmpackc.low %vm3420_vm2, %vm3419_vm11  ;;  %vm3423_vm2 = vcmp.eq.s32.totalorder %v14769_v63, %v15688_v6 }
 0x239   : > { %9342 = vmatpush1.msk.msra.mxu0 %vm3053_vm1, %v18697_v16  ;;  %v18759_v19 = vsel %vm15730_vm9, 4294967295, %v18758_v19 }
 0x23a   : > { %3331 = vmatmul.mubr.f32.vlgmr.msra.gmra.mrb[50].mxu0 %v15271_v11  ;;  %11703 = vmatprep.subr.bf16.mxu0 %v18688_v60  ;;  %18760 = vst [vmem:[#allocation28_spill] sm:$0xff] %v18759_v19 }
 0x23b   : > { %9344 = vmatprep.mubr.msk.f32.mxu0 %vm18757_vm14, %v15278_v13  ;;  %11696 = vmatpush1.bf16.msk.msra.mxu1 %vm15507_vm15, %v18686_v54  ;;  %vm3421_vm14 = vcmp.eq.s32.totalorder %v14744_v44, %v15688_v6  ;;  %vm3422_vm15 = vcmp.eq.s32.totalorder %v14747_v50, %v15688_v6 }
 0x23c   : > { %11705 = vmatpush1.bf16.msk.msra.mxu0 %vm15710_vm6, %v18686_v54  ;;  %11697 = vmatprep.subr.bf16.mxu1 %v18688_v60  ;;  %vm15749_vm11 = vmpackc.low %vm3422_vm15, %vm3421_vm14  ;;  %vm3425_vm15 = vcmp.eq.s32.totalorder %v14795_v0, %v15688_v6 }
 0x23d   : > { %11706 = vmatprep.subr.bf16.mxu0 %v18688_v60  ;;  %v18763_v43 = vsel %vm15749_vm11, 4294967295, %v18762_v43 }
 0x23e   : > { %3336 = vmatmul.mubr.f32.gmra.mrb[52].mxu0 %v15299_v45 }
 0x23f   : > { %11699 = vmatpush1.bf16.msk.msra.mxu1 %vm15523_vm12, %v18686_v54  ;;  %9440 = vmatprep.mubr.msk.f32.mxu0 %vm18761_vm4, %v15088_v38  ;;  %vm3424_vm12 = vcmp.eq.s32.totalorder %v14772_v24, %v15688_v6  ;;  %vm3426_vm4 = vcmp.eq.s32.totalorder %v14798_v29, %v15688_v6 }
 0x240   : > { %11708 = vmatpush1.bf16.msk.msra.mxu0 %vm15730_vm9, %v18686_v54  ;;  %11700 = vmatprep.subr.bf16.mxu1 %v18688_v60  ;;  %vm15765_vm14 = vmpackc.low %vm3424_vm12, %vm3423_vm2  ;;  %vm3428_vm12 = vcmp.eq.s32.totalorder %v14820_v14, %v15688_v6 }
 0x241   : > { %11709 = vmatprep.subr.bf16.mxu0 %v18688_v60  ;;  %v18765_v17 = vsel %vm15765_vm14, 4294967295, %v18764_v17  ;;  %vm15784_vm2 = vmpackc.low %vm3426_vm4, %vm3425_vm15 }
 0x242   : > { %v18768_v7 = vsel %vm15784_vm2, 4294967295, %v18767_v7 }
 0x243   : > { %11702 = vmatpush1.bf16.msk.msra.mxu1 %vm15539_vm13, %v18686_v54  ;;  %vm18766_vm13 = vcmask 982016  }
 0x244   : > { %11711 = vmatpush1.bf16.msk.msra.mxu0 %vm15749_vm11, %v18686_v54  ;;  %3401 = vmatprep.subr.mxu1 %v18695_v57  ;;  %vm18769_vm15 = vmmov %vm18766_vm13 }
 0x245   : > { %11712 = vmatprep.subr.bf16.mxu0 %v18688_v60 }
 0x247   : > { %9375 = vmatpush1.msk.msra.mxu1 %vm3053_vm1, %v18697_v16  ;;  %vm3427_vm1 = vcmp.eq.s32.totalorder %v14817_v12, %v15688_v6 }
 0x248   : > { %11714 = vmatpush1.bf16.msk.msra.mxu0 %vm15765_vm14, %v18686_v54  ;;  %3406 = vmatmul.mubr.f32.vlgmr.msra.gmra.mrb[38].mxu1 %v15347_v39  ;;  %vm15804_vm4 = vmpackc.low %vm3428_vm12, %vm3427_vm1  ;;  %vm18549_vm12 = vcmp.eq.s32.totalorder %v14861_v37, %v15688_v6 }
 0x249   : > { %11748 = vmatprep.subr.bf16.mxu1 %v18688_v60  ;;  %9377 = vmatprep.mubr.msk.f32.mxu1 %vm18766_vm13, %v15354_v51  ;;  %v18771_v35 = vsel %vm15804_vm4, 4294967295, %v18770_v35  ;;  %vm3429_vm13 = vcmp.eq.s32.totalorder %v14839_v58, %v15688_v6 }
 0x24a   : > { %11750 = vmatpush1.bf16.msk.msra.mxu1 %vm15710_vm6, %v18686_v54  ;;  %11715 = vmatprep.subr.bf16.mxu0 %v18688_v60  ;;  %18772 = vst [vmem:[#allocation29_spill] sm:$0xff] %v18771_v35  ;;  %vm15820_vm1 = vmpackc.low %vm3430_vm8, %vm3429_vm13  ;;  %vm3433_vm13 = vcmp.eq.s32.totalorder %v14883_v52, %v15688_v6 }
 0x24b   : > { %11751 = vmatprep.subr.bf16.mxu1 %v18688_v60  ;;  %v18774_v48 = vsel %vm15820_vm1, 4294967295, %v18773_v48 }
 0x24c   : > { %11717 = vmatpush1.bf16.msk.msra.mxu0 %vm15784_vm2, %v18686_v54  ;;  %3411 = vmatmul.mubr.f32.gmra.mrb[40].mxu1 %v15371_v59 }
 0x24d   : > { %9473 = vmatprep.mubr.msk.f32.mxu1 %vm18769_vm15, %v15117_v2  ;;  %11718 = vmatprep.subr.bf16.mxu0 %v18688_v60  ;;  %vm18552_vm15 = vcmp.eq.s32.totalorder %v14864_v42, %v15688_v6 }
 0x24e   : > { %11753 = vmatpush1.bf16.msk.msra.mxu1 %vm15730_vm9, %v18686_v54  ;;  %vm15842_vm8 = vmpackc.low %vm18552_vm15, %vm18549_vm12  ;;  %vm3435_vm15 = vcmp.eq.s32.totalorder %v14911_v53, %v15688_v6 }
 0x24f   : > { %11754 = vmatprep.subr.bf16.mxu1 %v18688_v60  ;;  %vm15860_vm12 = vmpackc.low %vm3434_vm5, %vm3433_vm13  ;;  %vm3437_vm13 = vcmp.eq.s32.totalorder %v14933_v28, %v15688_v6  ;;  %v16654_v28 = vld [vmem:[%s18445_s3 + $0x38] sm:$0xff] }
 0x250   : > { %11720 = vmatpush1.bf16.msk.msra.mxu0 %vm15804_vm4, %v18686_v54  ;;  %v18779_v26 = vsel %vm15860_vm12, 4294967295, %v18778_v26  ;;  %vm15876_vm5 = vmpackc.low %vm3436_vm3, %vm3435_vm15  ;;  %vm3439_vm15 = vcmp.eq.s32.totalorder %v18732_v5, %v15688_v6 }
 0x251   : > { %11721 = vmatprep.subr.bf16.mxu0 %v18688_v60  ;;  %v2771_v18 = vpop.f32.mrb[38].mxu0  ;;  %vm15892_vm3 = vmpackc.low %vm3438_vm0, %vm3437_vm13  ;;  %vm3441_vm13 = vcmp.eq.s32.totalorder %v18736_v25, %v15688_v6 }
 0x252   : > { %11756 = vmatpush1.bf16.msk.msra.mxu1 %vm15749_vm11, %v18686_v54  ;;  %v2773_v27 = vpop.f32.mrb[39].mxu0  ;;  %vm15910_vm0 = vmpackc.low %vm3440_vm7, %vm3439_vm15 }
 0x253   : > { %11757 = vmatprep.subr.bf16.mxu1 %v18688_v60  ;;  %v18775_v27 = vmov 0  ;;  %vm15926_vm7 = vmpackc.low %vm3442_vm10, %vm3441_vm13  ;;  %vm3445_vm13 = vcmp.eq.s32.totalorder %v18744_v40, %v15688_v6 }
 0x254   : > { %11723 = vmatpush1.bf16.msk.msra.mxu0 %vm15820_vm1, %v18686_v54  ;;  %v18776_v27 = vsel %vm15842_vm8, 4294967295, %v18775_v27 }
 0x255   : > { %11724 = vmatprep.subr.bf16.mxu0 %v18688_v60  ;;  %v2776_v33 = vpop.f32.mrb[40].mxu0 }
 0x256   : > { %11759 = vmatpush1.bf16.msk.msra.mxu1 %vm15765_vm14, %v18686_v54  ;;  %v15849_v4 = vpack.c.bf16 %v2776_v33, %v2771_v18  ;;  %v2778_v49 = vpop.f32.mrb[41].mxu0 }
 0x257   : > { %11760 = vmatprep.subr.bf16.mxu1 %v18688_v60 }
 0x258   : > { %18777 = vst [vmem:[#allocation30_spill] sm:$0xff] %v15849_v4  ;;  %11726 = vmatpush1.bf16.msk.msra.mxu0 %vm15842_vm8, %v18686_v54 }
 0x259   : > { %11727 = vmatprep.subr.bf16.mxu0 %v18688_v60 }
 0x25a   : > { %11762 = vmatpush1.bf16.msk.msra.mxu1 %vm15784_vm2, %v18686_v54 }
 0x25b   : > { %11763 = vmatprep.subr.bf16.mxu1 %v18688_v60 }
 0x25c   : > { %11729 = vmatpush1.bf16.msk.msra.mxu0 %vm15860_vm12, %v18686_v54 }
 0x25d   : > { %11730 = vmatprep.subr.bf16.mxu0 %v18688_v60 }
 0x25e   : > { %11765 = vmatpush1.bf16.msk.msra.mxu1 %vm15804_vm4, %v18686_v54 }
 0x25f   : > { %11766 = vmatprep.subr.bf16.mxu1 %v18688_v60  ;;  %v2852_v33 = vpop.f32.mrb[26].mxu1 }
 0x260   : > { %11732 = vmatpush1.bf16.msk.msra.mxu0 %vm15876_vm5, %v18686_v54  ;;  %v2854_v18 = vpop.f32.mrb[27].mxu1 }
 0x261   : > { %11733 = vmatprep.subr.bf16.mxu0 %v18688_v60 }
 0x262   : > { %11768 = vmatpush1.bf16.msk.msra.mxu1 %vm15820_vm1, %v18686_v54 }
 0x263   : > { %11769 = vmatprep.subr.bf16.mxu1 %v18688_v60  ;;  %v2857_v4 = vpop.f32.mrb[28].mxu1 }
 0x264   : > { %11735 = vmatpush1.bf16.msk.msra.mxu0 %vm15892_vm3, %v18686_v54  ;;  %v15907_v18 = vpack.c.bf16 %v2857_v4, %v2852_v33  ;;  %v2859_v56 = vpop.f32.mrb[29].mxu1  ;;  %v18789_v4 = vld [vmem:[#allocation31_spill] sm:$0xff]  ;;  %v18790_v33 = vld [vmem:[#allocation32_spill] sm:$0xff] }
 0x265   : > { %11736 = vmatprep.subr.bf16.mxu0 %v18688_v60  ;;  %vm3443_vm15 = vcmp.eq.s32.totalorder %v18789_v4, %v15688_v6 }
 0x266   : > { %18784 = vst [vmem:[#allocation33_spill] sm:$0xff] %v15907_v18  ;;  %11771 = vmatpush1.bf16.msk.msra.mxu1 %vm15842_vm8, %v18686_v54  ;;  %vm3444_vm8 = vcmp.eq.s32.totalorder %v18790_v33, %v15688_v6  ;;  %v18793_v33 = vld [vmem:[#allocation34_spill] sm:$0xff] }
 0x267   : > { %11772 = vmatprep.subr.bf16.mxu1 %v18688_v60  ;;  %vm15942_vm10 = vmpackc.low %vm3444_vm8, %vm3443_vm15  ;;  %vm3447_vm15 = vcmp.eq.s32.totalorder %v15055_v3, %v15688_v6 }
 0x268   : > { %11738 = vmatpush1.bf16.msk.msra.mxu0 %vm15910_vm0, %v18686_v54 }
 0x269   : > { %11739 = vmatprep.subr.bf16.mxu0 %v18688_v60 }
 0x26a   : > { %11774 = vmatpush1.bf16.msk.msra.mxu1 %vm15860_vm12, %v18686_v54  ;;  %vm3446_vm12 = vcmp.eq.s32.totalorder %v18793_v33, %v15688_v6 }
 0x26b   : > { %11775 = vmatprep.subr.bf16.mxu1 %v18688_v60  ;;  %vm15958_vm8 = vmpackc.low %vm3446_vm12, %vm3445_vm13  ;;  %vm18796_vm12 = vcmask 982016  }
 0x26c   : > { %11741 = vmatpush1.bf16.msk.msra.mxu0 %vm15926_vm7, %v18686_v54  ;;  %vm18797_vm13 = vmmov %vm18796_vm12 }
 0x26d   : > { %11742 = vmatprep.subr.bf16.mxu0 %v18688_v60 }
 0x26e   : > { %11777 = vmatpush1.bf16.msk.msra.mxu1 %vm15876_vm5, %v18686_v54 }
 0x26f   : > { %11778 = vmatprep.subr.bf16.mxu1 %v18688_v60 }
 0x270   : > { %11744 = vmatpush1.bf16.msk.msra.mxu0 %vm15942_vm10, %v18686_v54 }
 0x271   : > { %11745 = vmatprep.subr.bf16.mxu0 %v18688_v60 }
 0x272   : > { %11780 = vmatpush1.bf16.msk.msra.mxu1 %vm15892_vm3, %v18686_v54 }
 0x273   : > { %11781 = vmatprep.subr.bf16.mxu1 %v18688_v60 }
 0x274   : > { %11747 = vmatpush1.bf16.msk.msra.mxu0 %vm15958_vm8, %v18686_v54 }
 0x275   : > { %3570 = vmatprep.subr.mxu0 %v18695_v57 }
 0x276   : > { %11783 = vmatpush1.bf16.msk.msra.mxu1 %vm15910_vm0, %v18686_v54 }
 0x277   : > { %11784 = vmatprep.subr.bf16.mxu1 %v18688_v60 }
 0x278   : > { %9439 = vmatpush1.msk.msra.mxu0 %vm3447_vm15, %v18697_v16 }
 0x279   : > { %3575 = vmatmul.mubr.f32.vlgmr.msra.gmra.mrb[54].mxu0 %v15091_v47  ;;  %11793 = vmatprep.subr.bf16.mxu0 %v18688_v60 }
 0x27a   : > { %9441 = vmatprep.mubr.msk.f32.mxu0 %vm18796_vm12, %v15093_v20  ;;  %11786 = vmatpush1.bf16.msk.msra.mxu1 %vm15926_vm7, %v18686_v54 }
 0x27b   : > { %11795 = vmatpush1.bf16.msk.msra.mxu0 %vm15710_vm6, %v18686_v54  ;;  %11787 = vmatprep.subr.bf16.mxu1 %v18688_v60 }
 0x27c   : > { %11796 = vmatprep.subr.bf16.mxu0 %v18688_v60 }
 0x27d   : > { %3580 = vmatmul.mubr.f32.gmra.mrb[56].mxu0 %v18749_v41 }
 0x27e   : > { %11789 = vmatpush1.bf16.msk.msra.mxu1 %vm15942_vm10, %v18686_v54  ;;  %9506 = vmatprep.mubr.msk.f32.mxu0 %vm18797_vm13, %v15189_v8  ;;  %vm18798_vm13 = vmmov %vm18796_vm12 }
 0x27f   : > { %11798 = vmatpush1.bf16.msk.msra.mxu0 %vm15730_vm9, %v18686_v54  ;;  %11790 = vmatprep.subr.bf16.mxu1 %v18688_v60 }
 0x280   : > { %11799 = vmatprep.subr.bf16.mxu0 %v18688_v60 }
 0x282   : > { %11792 = vmatpush1.bf16.msk.msra.mxu1 %vm15958_vm8, %v18686_v54 }
 0x283   : > { %11801 = vmatpush1.bf16.msk.msra.mxu0 %vm15749_vm11, %v18686_v54  ;;  %3645 = vmatprep.subr.mxu1 %v18695_v57 }
 0x284   : > { %11802 = vmatprep.subr.bf16.mxu0 %v18688_v60 }
 0x286   : > { %9472 = vmatpush1.msk.msra.mxu1 %vm3447_vm15, %v18697_v16 }
 0x287   : > { %11804 = vmatpush1.bf16.msk.msra.mxu0 %vm15765_vm14, %v18686_v54  ;;  %3650 = vmatmul.mubr.f32.vlgmr.msra.gmra.mrb[42].mxu1 %v15119_v36 }
 0x288   : > { %11838 = vmatprep.subr.bf16.mxu1 %v18688_v60  ;;  %9474 = vmatprep.mubr.msk.f32.mxu1 %vm18796_vm12, %v15130_v22  ;;  %vm18799_vm12 = vnez %v18776_v27 }
 0x289   : > { %11840 = vmatpush1.bf16.msk.msra.mxu1 %vm15710_vm6, %v18686_v54  ;;  %11805 = vmatprep.subr.bf16.mxu0 %v18688_v60 }
 0x28a   : > { %11841 = vmatprep.subr.bf16.mxu1 %v18688_v60 }
 0x28b   : > { %11807 = vmatpush1.bf16.msk.msra.mxu0 %vm15784_vm2, %v18686_v54  ;;  %3655 = vmatmul.mubr.f32.gmra.mrb[44].mxu1 %v15135_v10 }
 0x28c   : > { %9539 = vmatprep.mubr.msk.f32.mxu1 %vm18798_vm13, %v15239_v23  ;;  %11808 = vmatprep.subr.bf16.mxu0 %v18688_v60  ;;  %vm18800_vm13 = vnez %v18779_v26  ;;  %v16111_v26 = vadd.s32 2, %v14643_v61 }
 0x28d   : > { %11843 = vmatpush1.bf16.msk.msra.mxu1 %vm15730_vm9, %v18686_v54 }
 0x28e   : > { %11844 = vmatprep.subr.bf16.mxu1 %v18688_v60  ;;  %vm3834_vm9 = vcmp.eq.s32.totalorder %v18733_v21, %v16111_v26  ;;  %vm3836_vm6 = vcmp.eq.s32.totalorder %v18737_v55, %v16111_v26  ;;  %v18833_v21 = vld [vmem:[#allocation31_spill] sm:$0xff] }
 0x28f   : > { %11810 = vmatpush1.bf16.msk.msra.mxu0 %vm15804_vm4, %v18686_v54  ;;  %v2933_v32 = vpop.f32.mrb[42].mxu0 }
 0x290   : > { %11811 = vmatprep.subr.bf16.mxu0 %v18688_v60  ;;  %v2935_v22 = vpop.f32.mrb[43].mxu0 }
 0x291   : > { %11846 = vmatpush1.bf16.msk.msra.mxu1 %vm15749_vm11, %v18686_v54 }
 0x292   : > { %11847 = vmatprep.subr.bf16.mxu1 %v18688_v60 }
 0x293   : > { %11813 = vmatpush1.bf16.msk.msra.mxu0 %vm15820_vm1, %v18686_v54  ;;  %v2938_v19 = vpop.f32.mrb[44].mxu0 }
 0x294   : > { %11814 = vmatprep.subr.bf16.mxu0 %v18688_v60  ;;  %v16050_v23 = vpack.c.bf16 %v2938_v19, %v2933_v32  ;;  %v2940_v10 = vpop.f32.mrb[45].mxu0 }
 0x295   : > { %11849 = vmatpush1.bf16.msk.msra.mxu1 %vm15765_vm14, %v18686_v54  ;;  %vm3830_vm14 = vcmp.eq.s32.totalorder %v14914_v34, %v16111_v26 }
 0x296   : > { %11850 = vmatprep.subr.bf16.mxu1 %v18688_v60 }
 0x297   : > { %11816 = vmatpush1.bf16.msk.msra.mxu0 %vm18799_vm12, %v18686_v54 }
 0x298   : > { %11817 = vmatprep.subr.bf16.mxu0 %v18688_v60 }
 0x299   : > { %11852 = vmatpush1.bf16.msk.msra.mxu1 %vm15784_vm2, %v18686_v54  ;;  %vm3828_vm2 = vcmp.eq.s32.totalorder %v14886_v9, %v16111_v26  ;;  %v18825_v9 = vld [vmem:[#allocation25_spill] sm:$0xff] }
 0x29a   : > { %11853 = vmatprep.subr.bf16.mxu1 %v18688_v60 }
 0x29b   : > { %11819 = vmatpush1.bf16.msk.msra.mxu0 %vm18800_vm13, %v18686_v54 }
 0x29c   : > { %11820 = vmatprep.subr.bf16.mxu0 %v18688_v60 }
 0x29d   : > { %11855 = vmatpush1.bf16.msk.msra.mxu1 %vm15804_vm4, %v18686_v54  ;;  %v3014_v22 = vpop.f32.mrb[30].mxu1  ;;  %vm3824_vm4 = vcmp.eq.s32.totalorder %v14842_v46, %v16111_v26  ;;  %v16618_v46 = vld [vmem:[%s18445_s3] sm:$0xff] }
 0x29e   : > { %11856 = vmatprep.subr.bf16.mxu1 %v18688_v60  ;;  %v3016_v10 = vpop.f32.mrb[31].mxu1 }
 0x29f   : > { %11822 = vmatpush1.bf16.msk.msra.mxu0 %vm15876_vm5, %v18686_v54 }
 0x2a0   : > { %11823 = vmatprep.subr.bf16.mxu0 %v18688_v60 }
 0x2a1   : > { %11858 = vmatpush1.bf16.msk.msra.mxu1 %vm15820_vm1, %v18686_v54  ;;  %v3019_v32 = vpop.f32.mrb[32].mxu1  ;;  %vm18803_vm1 = vcmask 982016  }
 0x2a2   : > { %11859 = vmatprep.subr.bf16.mxu1 %v18688_v60  ;;  %v16080_v19 = vpack.c.bf16 %v3019_v32, %v3014_v22  ;;  %v3021_v35 = vpop.f32.mrb[33].mxu1 }
 0x2a3   : > { %11825 = vmatpush1.bf16.msk.msra.mxu0 %vm15892_vm3, %v18686_v54 }
 0x2a4   : > { %11826 = vmatprep.subr.bf16.mxu0 %v18688_v60 }
 0x2a5   : > { %11861 = vmatpush1.bf16.msk.msra.mxu1 %vm18799_vm12, %v18686_v54  ;;  %vm3812_vm12 = vcmp.eq.s32.totalorder %v14674_v31, %v16111_v26 }
 0x2a6   : > { %11862 = vmatprep.subr.bf16.mxu1 %v18688_v60 }
 0x2a7   : > { %11828 = vmatpush1.bf16.msk.msra.mxu0 %vm15910_vm0, %v18686_v54 }
 0x2a8   : > { %11829 = vmatprep.subr.bf16.mxu0 %v18688_v60 }
 0x2a9   : > { %11864 = vmatpush1.bf16.msk.msra.mxu1 %vm18800_vm13, %v18686_v54  ;;  %vm3813_vm13 = vcmp.eq.s32.totalorder %v14713_v15, %v16111_v26 }
 0x2aa   : > { %11865 = vmatprep.subr.bf16.mxu1 %v18688_v60 }
 0x2ab   : > { %11831 = vmatpush1.bf16.msk.msra.mxu0 %vm15926_vm7, %v18686_v54 }
 0x2ac   : > { %11832 = vmatprep.subr.bf16.mxu0 %v18688_v60 }
 0x2ad   : > { %11867 = vmatpush1.bf16.msk.msra.mxu1 %vm15876_vm5, %v18686_v54  ;;  %vm3811_vm5 = vcmp.eq.s32.totalorder %v13787_v1, %v16111_v26 }
 0x2ae   : > { %11868 = vmatprep.subr.bf16.mxu1 %v18688_v60 }
 0x2af   : > { %11834 = vmatpush1.bf16.msk.msra.mxu0 %vm15942_vm10, %v18686_v54 }
 0x2b0   : > { %11835 = vmatprep.subr.bf16.mxu0 %v18688_v60 }
 0x2b1   : > { %11870 = vmatpush1.bf16.msk.msra.mxu1 %vm15892_vm3, %v18686_v54  ;;  %vm16133_vm3 = vmpackc.low %vm3812_vm12, %vm3811_vm5  ;;  %vm18806_vm12 = vcmask 982016  }
 0x2b2   : > { %11871 = vmatprep.subr.bf16.mxu1 %v18688_v60 }
 0x2b3   : > { %11837 = vmatpush1.bf16.msk.msra.mxu0 %vm15958_vm8, %v18686_v54 }
 0x2b4   : > { %3720 = vmatprep.subr.mxu0 %v18695_v57 }
 0x2b5   : > { %11873 = vmatpush1.bf16.msk.msra.mxu1 %vm15910_vm0, %v18686_v54  ;;  %vm3814_vm0 = vcmp.eq.s32.totalorder %v14716_v62, %v16111_v26 }
 0x2b6   : > { %11874 = vmatprep.subr.bf16.mxu1 %v18688_v60  ;;  %vm16153_vm5 = vmpackc.low %vm3814_vm0, %vm3813_vm13  ;;  %vm3817_vm0 = vcmp.eq.s32.totalorder %v14769_v63, %v16111_v26  ;;  %v18817_v63 = vmov 0 }
 0x2b7   : > { %9505 = vmatpush1.msk.msra.mxu0 %vm3447_vm15, %v18697_v16 }
 0x2b8   : > { %3725 = vmatmul.mubr.f32.vlgmr.msra.gmra.mrb[58].mxu0 %v15271_v11  ;;  %11883 = vmatprep.subr.bf16.mxu0 %v18688_v60 }
 0x2b9   : > { %9507 = vmatprep.mubr.msk.f32.mxu0 %vm18803_vm1, %v15278_v13  ;;  %11876 = vmatpush1.bf16.msk.msra.mxu1 %vm15926_vm7, %v18686_v54  ;;  %vm3815_vm1 = vcmp.eq.s32.totalorder %v14744_v44, %v16111_v26  ;;  %vm3816_vm7 = vcmp.eq.s32.totalorder %v14747_v50, %v16111_v26  ;;  %v18815_v44 = vmov 0 }
 0x2ba   : > { %11885 = vmatpush1.bf16.msk.msra.mxu0 %vm16133_vm3, %v18686_v54  ;;  %11877 = vmatprep.subr.bf16.mxu1 %v18688_v60  ;;  %vm16172_vm13 = vmpackc.low %vm3816_vm7, %vm3815_vm1  ;;  %vm3819_vm7 = vcmp.eq.s32.totalorder %v14795_v0, %v16111_v26 }
 0x2bb   : > { %11886 = vmatprep.subr.bf16.mxu0 %v18688_v60 }
 0x2bc   : > { %3730 = vmatmul.mubr.f32.gmra.mrb[60].mxu0 %v15299_v45 }
 0x2bd   : > { %11879 = vmatpush1.bf16.msk.msra.mxu1 %vm15942_vm10, %v18686_v54  ;;  %9603 = vmatprep.mubr.msk.f32.mxu0 %vm18806_vm12, %v15088_v38  ;;  %vm3818_vm10 = vcmp.eq.s32.totalorder %v14772_v24, %v16111_v26  ;;  %vm3820_vm12 = vcmp.eq.s32.totalorder %v14798_v29, %v16111_v26 }
 0x2be   : > { %11888 = vmatpush1.bf16.msk.msra.mxu0 %vm16153_vm5, %v18686_v54  ;;  %11880 = vmatprep.subr.bf16.mxu1 %v18688_v60  ;;  %vm16188_vm1 = vmpackc.low %vm3818_vm10, %vm3817_vm0  ;;  %vm3822_vm10 = vcmp.eq.s32.totalorder %v14820_v14, %v16111_v26 }
 0x2bf   : > { %11889 = vmatprep.subr.bf16.mxu0 %v18688_v60  ;;  %vm16207_vm0 = vmpackc.low %vm3820_vm12, %vm3819_vm7 }
 0x2c1   : > { %11882 = vmatpush1.bf16.msk.msra.mxu1 %vm15958_vm8, %v18686_v54  ;;  %vm18811_vm8 = vcmask 982016  }
 0x2c2   : > { %11891 = vmatpush1.bf16.msk.msra.mxu0 %vm16172_vm13, %v18686_v54  ;;  %3795 = vmatprep.subr.mxu1 %v18695_v57  ;;  %vm18814_vm7 = vmmov %vm18811_vm8 }
 0x2c3   : > { %11892 = vmatprep.subr.bf16.mxu0 %v18688_v60 }
 0x2c5   : > { %9538 = vmatpush1.msk.msra.mxu1 %vm3447_vm15, %v18697_v16  ;;  %vm3821_vm15 = vcmp.eq.s32.totalorder %v14817_v12, %v16111_v26  ;;  %v18819_v12 = vmov 0 }
 0x2c6   : > { %11894 = vmatpush1.bf16.msk.msra.mxu0 %vm16188_vm1, %v18686_v54  ;;  %3800 = vmatmul.mubr.f32.vlgmr.msra.gmra.mrb[46].mxu1 %v15347_v39  ;;  %vm16227_vm12 = vmpackc.low %vm3822_vm10, %vm3821_vm15  ;;  %vm18586_vm10 = vcmp.eq.s32.totalorder %v14861_v37, %v16111_v26 }
 0x2c7   : > { %11928 = vmatprep.subr.bf16.mxu1 %v18688_v60  ;;  %9540 = vmatprep.mubr.msk.f32.mxu1 %vm18811_vm8, %v15354_v51  ;;  %v18816_v44 = vsel %vm16227_vm12, 4294967295, %v18815_v44  ;;  %vm3823_vm8 = vcmp.eq.s32.totalorder %v14839_v58, %v16111_v26  ;;  %v18821_v58 = vmov 0 }
 0x2c8   : > { %11930 = vmatpush1.bf16.msk.msra.mxu1 %vm16133_vm3, %v18686_v54  ;;  %11895 = vmatprep.subr.bf16.mxu0 %v18688_v60  ;;  %vm16243_vm15 = vmpackc.low %vm3824_vm4, %vm3823_vm8  ;;  %vm3827_vm8 = vcmp.eq.s32.totalorder %v14883_v52, %v16111_v26 }
 0x2c9   : > { %11931 = vmatprep.subr.bf16.mxu1 %v18688_v60  ;;  %v18818_v63 = vsel %vm16243_vm15, 4294967295, %v18817_v63 }
 0x2ca   : > { %11897 = vmatpush1.bf16.msk.msra.mxu0 %vm16207_vm0, %v18686_v54  ;;  %3805 = vmatmul.mubr.f32.gmra.mrb[48].mxu1 %v15371_v59 }
 0x2cb   : > { %9636 = vmatprep.mubr.msk.f32.mxu1 %vm18814_vm7, %v15117_v2  ;;  %11898 = vmatprep.subr.bf16.mxu0 %v18688_v60  ;;  %vm18587_vm7 = vcmp.eq.s32.totalorder %v14864_v42, %v16111_v26 }
 0x2cc   : > { %11933 = vmatpush1.bf16.msk.msra.mxu1 %vm16153_vm5, %v18686_v54  ;;  %vm16267_vm4 = vmpackc.low %vm18587_vm7, %vm18586_vm10  ;;  %vm3829_vm7 = vcmp.eq.s32.totalorder %v14911_v53, %v16111_v26  ;;  %v18826_v53 = vld [vmem:[#allocation26_spill] sm:$0xff] }
 0x2cd   : > { %11934 = vmatprep.subr.bf16.mxu1 %v18688_v60  ;;  %v18820_v12 = vsel %vm16267_vm4, 4294967295, %v18819_v12  ;;  %vm16283_vm10 = vmpackc.low %vm3828_vm2, %vm3827_vm8  ;;  %vm3831_vm8 = vcmp.eq.s32.totalorder %v18825_v9, %v16111_v26  ;;  %vm3832_vm11 = vcmp.eq.s32.totalorder %v18826_v53, %v16111_v26  ;;  %v16633_v9 = vld [vmem:[%s18445_s3 + $0x10] sm:$0xff]  ;;  %v16639_v53 = vld [vmem:[%s18445_s3 + $0x28] sm:$0xff] }
 0x2ce   : > { %11900 = vmatpush1.bf16.msk.msra.mxu0 %vm16227_vm12, %v18686_v54  ;;  %v3182_v50 = vpop.f32.mrb[46].mxu0  ;;  %v18822_v58 = vsel %vm16283_vm10, 4294967295, %v18821_v58  ;;  %vm16299_vm2 = vmpackc.low %vm3830_vm14, %vm3829_vm7  ;;  %vm3833_vm7 = vcmp.eq.s32.totalorder %v18732_v5, %v16111_v26 }
 0x2cf   : > { %11901 = vmatprep.subr.bf16.mxu0 %v18688_v60  ;;  %v3184_v24 = vpop.f32.mrb[47].mxu0  ;;  %vm16315_vm14 = vmpackc.low %vm3832_vm11, %vm3831_vm8  ;;  %vm3835_vm8 = vcmp.eq.s32.totalorder %v18736_v25, %v16111_v26  ;;  %v18834_v25 = vld [vmem:[#allocation32_spill] sm:$0xff] }
 0x2d0   : > { %11936 = vmatpush1.bf16.msk.msra.mxu1 %vm16172_vm13, %v18686_v54  ;;  %vm16333_vm11 = vmpackc.low %vm3834_vm9, %vm3833_vm7  ;;  %vm3837_vm7 = vcmp.eq.s32.totalorder %v18833_v21, %v16111_v26 }
 0x2d1   : > { %11937 = vmatprep.subr.bf16.mxu1 %v18688_v60  ;;  %vm16349_vm9 = vmpackc.low %vm3836_vm6, %vm3835_vm8  ;;  %vm3839_vm8 = vcmp.eq.s32.totalorder %v18744_v40, %v16111_v26  ;;  %v18841_v40 = vld [vmem:[#allocation36_spill] sm:$0xff] }
 0x2d2   : > { %11903 = vmatpush1.bf16.msk.msra.mxu0 %vm16243_vm15, %v18686_v54  ;;  %v3187_v0 = vpop.f32.mrb[48].mxu0 }
 0x2d3   : > { %11904 = vmatprep.subr.bf16.mxu0 %v18688_v60  ;;  %v16259_v29 = vpack.c.bf16 %v3187_v0, %v3182_v50  ;;  %v3189_v14 = vpop.f32.mrb[49].mxu0  ;;  %v16561_v50 = vld [vmem:[%s18445_s3 + $0x8] sm:$0xff] }
 0x2d4   : > { %11939 = vmatpush1.bf16.msk.msra.mxu1 %vm16188_vm1, %v18686_v54 }
 0x2d5   : > { %11940 = vmatprep.subr.bf16.mxu1 %v18688_v60 }
 0x2d6   : > { %11906 = vmatpush1.bf16.msk.msra.mxu0 %vm16267_vm4, %v18686_v54 }
 0x2d7   : > { %11907 = vmatprep.subr.bf16.mxu0 %v18688_v60 }
 0x2d8   : > { %11942 = vmatpush1.bf16.msk.msra.mxu1 %vm16207_vm0, %v18686_v54 }
 0x2d9   : > { %11943 = vmatprep.subr.bf16.mxu1 %v18688_v60 }
 0x2da   : > { %11909 = vmatpush1.bf16.msk.msra.mxu0 %vm16283_vm10, %v18686_v54 }
 0x2db   : > { %11910 = vmatprep.subr.bf16.mxu0 %v18688_v60 }
 0x2dc   : > { %11945 = vmatpush1.bf16.msk.msra.mxu1 %vm16227_vm12, %v18686_v54  ;;  %v3257_v52 = vpop.f32.mrb[34].mxu1 }
 0x2dd   : > { %11946 = vmatprep.subr.bf16.mxu1 %v18688_v60  ;;  %v3259_v34 = vpop.f32.mrb[35].mxu1 }
 0x2de   : > { %11912 = vmatpush1.bf16.msk.msra.mxu0 %vm16299_vm2, %v18686_v54  ;;  %v16648_v34 = vld [vmem:[%s18445_s3 + $0x20] sm:$0xff] }
 0x2df   : > { %11913 = vmatprep.subr.bf16.mxu0 %v18688_v60 }
 0x2e0   : > { %11948 = vmatpush1.bf16.msk.msra.mxu1 %vm16243_vm15, %v18686_v54  ;;  %v3262_v38 = vpop.f32.mrb[36].mxu1 }
 0x2e1   : > { %11949 = vmatprep.subr.bf16.mxu1 %v18688_v60  ;;  %v16327_v2 = vpack.c.bf16 %v3262_v38, %v3257_v52  ;;  %v3264_v35 = vpop.f32.mrb[37].mxu1  ;;  %v16624_v52 = vld [vmem:[%s18445_s3 + $0x18] sm:$0xff]  ;;  %v16663_v38 = vld [vmem:[%s18445_s3 + $0x30] sm:$0xff] }
 0x2e2   : > { %11915 = vmatpush1.bf16.msk.msra.mxu0 %vm16315_vm14, %v18686_v54 }
 0x2e3   : > { %11916 = vmatprep.subr.bf16.mxu0 %v18688_v60 }
 0x2e4   : > { %11951 = vmatpush1.bf16.msk.msra.mxu1 %vm16267_vm4, %v18686_v54  ;;  %vm3838_vm4 = vcmp.eq.s32.totalorder %v18834_v25, %v16111_v26 }
 0x2e5   : > { %11952 = vmatprep.subr.bf16.mxu1 %v18688_v60  ;;  %vm16365_vm6 = vmpackc.low %vm3838_vm4, %vm3837_vm7  ;;  %vm3841_vm7 = vcmp.eq.s32.totalorder %v15055_v3, %v16111_v26 }
 0x2e6   : > { %11918 = vmatpush1.bf16.msk.msra.mxu0 %vm16333_vm11, %v18686_v54 }
 0x2e7   : > { %11919 = vmatprep.subr.bf16.mxu0 %v18688_v60 }
 0x2e8   : > { %11954 = vmatpush1.bf16.msk.msra.mxu1 %vm16283_vm10, %v18686_v54  ;;  %vm3840_vm10 = vcmp.eq.s32.totalorder %v18793_v33, %v16111_v26 }
 0x2e9   : > { %11955 = vmatprep.subr.bf16.mxu1 %v18688_v60  ;;  %vm16381_vm4 = vmpackc.low %vm3840_vm10, %vm3839_vm8  ;;  %vm18839_vm10 = vcmask 982016  }
 0x2ea   : > { %11921 = vmatpush1.bf16.msk.msra.mxu0 %vm16349_vm9, %v18686_v54  ;;  %vm18840_vm8 = vmmov %vm18839_vm10 }
 0x2eb   : > { %11922 = vmatprep.subr.bf16.mxu0 %v18688_v60 }
 0x2ec   : > { %11957 = vmatpush1.bf16.msk.msra.mxu1 %vm16299_vm2, %v18686_v54 }
 0x2ed   : > { %11958 = vmatprep.subr.bf16.mxu1 %v18688_v60 }
 0x2ee   : > { %11924 = vmatpush1.bf16.msk.msra.mxu0 %vm16365_vm6, %v18686_v54 }
 0x2ef   : > { %11925 = vmatprep.subr.bf16.mxu0 %v18688_v60 }
 0x2f0   : > { %11960 = vmatpush1.bf16.msk.msra.mxu1 %vm16315_vm14, %v18686_v54 }
 0x2f1   : > { %11961 = vmatprep.subr.bf16.mxu1 %v18688_v60 }
 0x2f2   : > { %11927 = vmatpush1.bf16.msk.msra.mxu0 %vm16381_vm4, %v18686_v54 }
 0x2f3   : > { %3964 = vmatprep.subr.mxu0 %v18695_v57 }
 0x2f4   : > { %11963 = vmatpush1.bf16.msk.msra.mxu1 %vm16333_vm11, %v18686_v54 }
 0x2f5   : > { %11964 = vmatprep.subr.bf16.mxu1 %v18688_v60 }
 0x2f6   : > { %9602 = vmatpush1.msk.msra.mxu0 %vm3841_vm7, %v18697_v16 }
 0x2f7   : > { %3969 = vmatmul.mubr.f32.vlgmr.msra.gmra.mrb[62].mxu0 %v15091_v47  ;;  %11973 = vmatprep.subr.bf16.mxu0 %v18688_v60  ;;  %v18843_v47 = vld [vmem:[#allocation37_spill] sm:$0xff] }
 0x2f8   : > { %9604 = vmatprep.mubr.msk.f32.mxu0 %vm18839_vm10, %v15093_v20  ;;  %11966 = vmatpush1.bf16.msk.msra.mxu1 %vm16349_vm9, %v18686_v54  ;;  %vm18842_vm10 = vmmov %vm18840_vm8  ;;  %v18844_v20 = vld [vmem:[#allocation38_spill] sm:$0xff] }
 0x2f9   : > { %11975 = vmatpush1.bf16.msk.msra.mxu0 %vm16133_vm3, %v18686_v54  ;;  %11967 = vmatprep.subr.bf16.mxu1 %v18688_v60 }
 0x2fa   : > { %11976 = vmatprep.subr.bf16.mxu0 %v18688_v60 }
 0x2fb   : > { %3974 = vmatmul.mubr.f32.gmra.mrb[64].mxu0 %v18749_v41 }
 0x2fc   : > { %11969 = vmatpush1.bf16.msk.msra.mxu1 %vm16365_vm6, %v18686_v54  ;;  %9669 = vmatprep.mubr.msk.f32.mxu0 %vm18840_vm8, %v15189_v8 }
 0x2fd   : > { %11978 = vmatpush1.bf16.msk.msra.mxu0 %vm16153_vm5, %v18686_v54  ;;  %11970 = vmatprep.subr.bf16.mxu1 %v18688_v60 }
 0x2fe   : > { %11979 = vmatprep.subr.bf16.mxu0 %v18688_v60 }
 0x300   : > { %11972 = vmatpush1.bf16.msk.msra.mxu1 %vm16381_vm4, %v18686_v54 }
 0x301   : > { %11981 = vmatpush1.bf16.msk.msra.mxu0 %vm16172_vm13, %v18686_v54  ;;  %4039 = vmatprep.subr.mxu1 %v18695_v57 }
 0x302   : > { %11982 = vmatprep.subr.bf16.mxu0 %v18688_v60 }
 0x304   : > { %9635 = vmatpush1.msk.msra.mxu1 %vm3841_vm7, %v18697_v16 }
 0x305   : > { %11984 = vmatpush1.bf16.msk.msra.mxu0 %vm16188_vm1, %v18686_v54  ;;  %4044 = vmatmul.mubr.f32.vlgmr.msra.gmra.mrb[50].mxu1 %v15119_v36 }
 0x306   : > { %12018 = vmatprep.subr.bf16.mxu1 %v18688_v60  ;;  %9637 = vmatprep.mubr.msk.f32.mxu1 %vm18842_vm10, %v18841_v40  ;;  %vm18845_vm10 = vnez %v18820_v12 }
 0x307   : > { %12020 = vmatpush1.bf16.msk.msra.mxu1 %vm16133_vm3, %v18686_v54  ;;  %11985 = vmatprep.subr.bf16.mxu0 %v18688_v60 }
 0x308   : > { %12021 = vmatprep.subr.bf16.mxu1 %v18688_v60 }
 0x309   : > { %11987 = vmatpush1.bf16.msk.msra.mxu0 %vm16207_vm0, %v18686_v54  ;;  %4049 = vmatmul.mubr.f32.gmra.mrb[52].mxu1 %v18843_v47 }
 0x30a   : > { %9702 = vmatprep.mubr.msk.f32.mxu1 %vm18840_vm8, %v18844_v20  ;;  %11988 = vmatprep.subr.bf16.mxu0 %v18688_v60  ;;  %vm18846_vm8 = vnez %v18822_v58 }
 0x30b   : > { %12023 = vmatpush1.bf16.msk.msra.mxu1 %vm16153_vm5, %v18686_v54 }
 0x30c   : > { %12024 = vmatprep.subr.bf16.mxu1 %v18688_v60 }
 0x30d   : > { %11990 = vmatpush1.bf16.msk.msra.mxu0 %vm16227_vm12, %v18686_v54  ;;  %v3332_v36 = vpop.f32.mrb[50].mxu0 }
 0x30e   : > { %11991 = vmatprep.subr.bf16.mxu0 %v18688_v60  ;;  %v3334_v8 = vpop.f32.mrb[51].mxu0 }
 0x30f   : > { %12026 = vmatpush1.bf16.msk.msra.mxu1 %vm16172_vm13, %v18686_v54 }
 0x310   : > { %12027 = vmatprep.subr.bf16.mxu1 %v18688_v60 }
 0x311   : > { %11993 = vmatpush1.bf16.msk.msra.mxu0 %vm16243_vm15, %v18686_v54  ;;  %v3337_v41 = vpop.f32.mrb[52].mxu0 }
 0x312   : > { %11994 = vmatprep.subr.bf16.mxu0 %v18688_v60  ;;  %v16473_v18 = vpack.c.bf16 %v3337_v41, %v3332_v36  ;;  %v3339_v56 = vpop.f32.mrb[53].mxu0 }
 0x313   : > { %12029 = vmatpush1.bf16.msk.msra.mxu1 %vm16188_vm1, %v18686_v54 }
 0x314   : > { %12030 = vmatprep.subr.bf16.mxu1 %v18688_v60 }
 0x315   : > { %11996 = vmatpush1.bf16.msk.msra.mxu0 %vm18845_vm10, %v18686_v54 }
 0x316   : > { %11997 = vmatprep.subr.bf16.mxu0 %v18688_v60 }
 0x317   : > { %12032 = vmatpush1.bf16.msk.msra.mxu1 %vm16207_vm0, %v18686_v54 }
 0x318   : > { %12033 = vmatprep.subr.bf16.mxu1 %v18688_v60 }
 0x319   : > { %11999 = vmatpush1.bf16.msk.msra.mxu0 %vm18846_vm8, %v18686_v54 }
 0x31a   : > { %12000 = vmatprep.subr.bf16.mxu0 %v18688_v60 }
 0x31b   : > { %12035 = vmatpush1.bf16.msk.msra.mxu1 %vm16227_vm12, %v18686_v54  ;;  %v3407_v4 = vpop.f32.mrb[38].mxu1 }
 0x31c   : > { %12036 = vmatprep.subr.bf16.mxu1 %v18688_v60  ;;  %v3409_v33 = vpop.f32.mrb[39].mxu1 }
 0x31d   : > { %12002 = vmatpush1.bf16.msk.msra.mxu0 %vm16299_vm2, %v18686_v54 }
 0x31e   : > { %12003 = vmatprep.subr.bf16.mxu0 %v18688_v60 }
 0x31f   : > { %12038 = vmatpush1.bf16.msk.msra.mxu1 %vm16243_vm15, %v18686_v54  ;;  %v3412_v22 = vpop.f32.mrb[40].mxu1  ;;  %vm18885_vm15 = vcmask 1043456  }
 0x320   : > { %12039 = vmatprep.subr.bf16.mxu1 %v18688_v60  ;;  %v16503_v10 = vpack.c.bf16 %v3412_v22, %v3407_v4  ;;  %v3414_v32 = vpop.f32.mrb[41].mxu1  ;;  %v18851_v4 = vld [vmem:[#allocation18_spill] sm:$0xff]  ;;  %v18855_v22 = vld [vmem:[#allocation20_spill] sm:$0xff] }
 0x321   : > { %12005 = vmatpush1.bf16.msk.msra.mxu0 %vm16315_vm14, %v18686_v54 }
 0x322   : > { %12006 = vmatprep.subr.bf16.mxu0 %v18688_v60 }
 0x323   : > { %12041 = vmatpush1.bf16.msk.msra.mxu1 %vm18845_vm10, %v18686_v54 }
 0x324   : > { %12042 = vmatprep.subr.bf16.mxu1 %v18688_v60 }
 0x325   : > { %12008 = vmatpush1.bf16.msk.msra.mxu0 %vm16333_vm11, %v18686_v54 }
 0x326   : > { %12009 = vmatprep.subr.bf16.mxu0 %v18688_v60 }
 0x327   : > { %12044 = vmatpush1.bf16.msk.msra.mxu1 %vm18846_vm8, %v18686_v54 }
 0x328   : > { %12045 = vmatprep.subr.bf16.mxu1 %v18688_v60 }
 0x329   : > { %12011 = vmatpush1.bf16.msk.msra.mxu0 %vm16349_vm9, %v18686_v54 }
 0x32a   : > { %12012 = vmatprep.subr.bf16.mxu0 %v18688_v60 }
 0x32b   : > { %12047 = vmatpush1.bf16.msk.msra.mxu1 %vm16299_vm2, %v18686_v54  ;;  %vm18847_vm2 = vcmask 982016  }
 0x32c   : > { %12048 = vmatprep.subr.bf16.mxu1 %v18688_v60 }
 0x32d   : > { %12014 = vmatpush1.bf16.msk.msra.mxu0 %vm16365_vm6, %v18686_v54 }
 0x32e   : > { %12015 = vmatprep.subr.bf16.mxu0 %v18688_v60 }
 0x32f   : > { %12050 = vmatpush1.bf16.msk.msra.mxu1 %vm16315_vm14, %v18686_v54  ;;  %vm4216_vm14 = vcmask 130048  }
 0x330   : > { %12051 = vmatprep.subr.bf16.mxu1 %v18688_v60 }
 0x331   : > { %12017 = vmatpush1.bf16.msk.msra.mxu0 %vm16381_vm4, %v18686_v54 }
 0x332   : > { %4114 = vmatprep.subr.mxu0 %v18695_v57 }
 0x333   : > { %12053 = vmatpush1.bf16.msk.msra.mxu1 %vm16333_vm11, %v18686_v54  ;;  %vm18849_vm11 = vmmov %vm18847_vm2 }
 0x334   : > { %12054 = vmatprep.subr.bf16.mxu1 %v18688_v60 }
 0x335   : > { %9668 = vmatpush1.msk.msra.mxu0 %vm3841_vm7, %v18697_v16 }
 0x336   : > { %4119 = vmatmul.mubr.f32.vlgmr.msra.gmra.mrb[66].mxu0 %v15271_v11  ;;  %12063 = vmatprep.subr.bf16.mxu0 %v18688_v60  ;;  %v18848_v11 = vld [vmem:[#allocation30_spill] sm:$0xff] }
 0x337   : > { %9670 = vmatprep.mubr.msk.f32.mxu0 %vm18847_vm2, %v15278_v13  ;;  %12056 = vmatpush1.bf16.msk.msra.mxu1 %vm16349_vm9, %v18686_v54  ;;  %vm18852_vm9 = vnez %v18851_v4 }
 0x338   : > { %12064 = vmatpush1.bf16.msra.mxu0 %v18688_v60  ;;  %12057 = vmatprep.subr.bf16.mxu1 %v18688_v60 }
 0x339   : > { %12065 = vmatprep.subr.bf16.mxu0 %v18688_v60 }
 0x33a   : > { %4124 = vmatmul.mubr.f32.gmra.mrb[68].mxu0 %v15299_v45 }
 0x33b   : > { %12059 = vmatpush1.bf16.msk.msra.mxu1 %vm16365_vm6, %v18686_v54  ;;  %9704 = vmatprep.mubr.msk.f32.mxu0 %vm4216_vm14, %v16561_v50 }
 0x33c   : > { %12066 = vmatpush1.bf16.msra.mxu0 %v18688_v60  ;;  %12060 = vmatprep.subr.bf16.mxu1 %v18688_v60 }
 0x33d   : > { %12067 = vmatprep.subr.bf16.mxu0 %v18688_v60 }
 0x33f   : > { %12062 = vmatpush1.bf16.msk.msra.mxu1 %vm16381_vm4, %v18686_v54  ;;  %vm18856_vm4 = vnez %v18855_v22 }
 0x340   : > { %12068 = vmatpush1.bf16.msra.mxu0 %v18688_v60  ;;  %4189 = vmatprep.subr.mxu1 %v18695_v57 }
 0x341   : > { %12069 = vmatprep.subr.bf16.mxu0 %v18688_v60 }
 0x343   : > { %9701 = vmatpush1.msk.msra.mxu1 %vm3841_vm7, %v18697_v16 }
 0x344   : > { %12071 = vmatpush1.bf16.msra.mxu0 %v18848_v11  ;;  %4194 = vmatmul.mubr.f32.vlgmr.msra.gmra.mrb[54].mxu1 %v15347_v39 }
 0x345   : > { %12087 = vmatprep.subr.bf16.mxu1 %v18688_v60  ;;  %9703 = vmatprep.mubr.msk.f32.mxu1 %vm18849_vm11, %v15354_v51 }
 0x346   : > { %12088 = vmatpush1.bf16.msra.mxu1 %v18688_v60  ;;  %12072 = vmatprep.subr.bf16.mxu0 %v18688_v60 }
 0x347   : > { %12089 = vmatprep.subr.bf16.mxu1 %v18688_v60 }
 0x348   : > { %12074 = vmatpush1.bf16.msra.mxu0 %v16259_v29  ;;  %4199 = vmatmul.mubr.f32.gmra.mrb[56].mxu1 %v15371_v59  ;;  %v18850_v59 = vld [vmem:[#allocation33_spill] sm:$0xff] }
 0x349   : > { %12075 = vmatprep.subr.bf16.mxu0 %v18688_v60  ;;  %9708 = vmatprep.mubr.msk.f32.mxu1 %vm4216_vm14, %v16561_v50 }
 0x34a   : > { %12090 = vmatpush1.bf16.msra.mxu1 %v18688_v60 }
 0x34b   : > { %12091 = vmatprep.subr.bf16.mxu1 %v18688_v60 }
 0x34c   : > { %v3576_v3 = vpop.f32.mrb[54].mxu0 }
 0x34d   : > { %v3578_v13 = vpop.f32.mrb[55].mxu0 }
 0x34e   : > { %12092 = vmatpush1.bf16.msra.mxu1 %v18688_v60  ;;  %v18857_v13 = vld [vmem:[#allocation21_spill] sm:$0xff] }
 0x34f   : > { %12093 = vmatprep.subr.bf16.mxu1 %v18688_v60  ;;  %vm18858_vm7 = vnez %v18857_v13 }
 0x350   : > { %v3581_v45 = vpop.f32.mrb[56].mxu0 }
 0x351   : > { %v16600_v39 = vpack.c.bf16 %v3581_v45, %v3576_v3  ;;  %v3583_v51 = vpop.f32.mrb[57].mxu0 }
 0x352   : > { %12095 = vmatpush1.bf16.msra.mxu1 %v16259_v29 }
 0x353   : > { %12096 = vmatprep.subr.bf16.mxu1 %v18688_v60  ;;  %12077 = vmatpush1.bf16.msra.mxu0 %v16600_v39 }
 0x354   : > { %12078 = vmatprep.subr.bf16.mxu0 %v18688_v60 }
 0x356   : > { %12098 = vmatpush1.bf16.msra.mxu1 %v16600_v39 }
 0x357   : > { %12080 = vmatpush1.bf16.msra.mxu0 %v18850_v59  ;;  %12099 = vmatprep.subr.bf16.mxu1 %v18688_v60 }
 0x358   : > { %12081 = vmatprep.subr.bf16.mxu0 %v18688_v60 }
 0x35a   : > { %v3651_v24 = vpop.f32.mrb[42].mxu1 }
 0x35b   : > { %v3653_v0 = vpop.f32.mrb[43].mxu1  ;;  %12083 = vmatpush1.bf16.msra.mxu0 %v16327_v2 }
 0x35c   : > { %12084 = vmatprep.subr.bf16.mxu0 %v18688_v60  ;;  %v18859_v0 = vld [vmem:[#allocation22_spill] sm:$0xff] }
 0x35d   : > { %vm18860_vm10 = vnez %v18859_v0 }
 0x35e   : > { %v3656_v12 = vpop.f32.mrb[44].mxu1 }
 0x35f   : > { %v16612_v14 = vpack.c.bf16 %v3656_v12, %v3651_v24  ;;  %v3658_v58 = vpop.f32.mrb[45].mxu1  ;;  %v4215_v24 = vld [vmem:[%s18446_s4 + $0x18] sm:$0xff]  ;;  %v5710_v12 = vld [vmem:[%s18448_s6] sm:$0xff] }
 0x360   : > { %v18861_v58 = vld [vmem:[#allocation23_spill] sm:$0xff] }
 0x361   : > { %12086 = vmatpush1.bf16.msra.mxu0 %v16612_v14  ;;  %vm18862_vm8 = vnez %v18861_v58 }
 0x362   : > { %12111 = vmatprep.subr.bf16.mxu0 %v18688_v60 }
 0x364   : > { %4294 = vmatmul.mubr.f32.vlgmr.msra.gmra.mrb[70].mxu0 %v16618_v46 }
 0x365   : > { %12113 = vmatpush1.bf16.msra.mxu0 %v18848_v11  ;;  %9705 = vmatprep.mubr.msk.f32.mxu0 %vm4216_vm14, %v16624_v52  ;;  %v4212_v11 = vld [vmem:[%s18446_s4] sm:$0xff] }
 0x366   : > { %12114 = vmatprep.subr.bf16.mxu0 %v18688_v60  ;;  %4583 = vperm.xlu1 %13295, %v4212_v11  }
 0x368   : > { %4299 = vmatmul.mubr.f32.gmra.mrb[72].mxu0 %v16633_v9 }
 0x369   : > { %12116 = vmatpush1.bf16.msra.mxu0 %v16259_v29  ;;  %9706 = vmatprep.mubr.msk.f32.mxu0 %vm4216_vm14, %v16639_v53 }
 0x36a   : > { %12117 = vmatprep.subr.bf16.mxu0 %v18688_v60 }
 0x36c   : > { %4304 = vmatmul.mubr.f32.gmra.mrb[74].mxu0 %v16648_v34 }
 0x36d   : > { %12119 = vmatpush1.bf16.msra.mxu0 %v16600_v39  ;;  %9707 = vmatprep.mubr.msk.f32.mxu0 %vm4216_vm14, %v16654_v28 }
 0x36e   : > { %12120 = vmatprep.subr.bf16.mxu0 %v18688_v60 }
 0x370   : > { %4309 = vmatmul.mubr.f32.gmra.mrb[76].mxu0 %v16663_v38 }
 0x371   : > { %12122 = vmatpush1.bf16.msra.mxu0 %v18850_v59  ;;  %9712 = vmatprep.mubr.msk.f32.mxu0 %vm4216_vm14, %v16561_v50 }
 0x372   : > { %12123 = vmatprep.subr.bf16.mxu0 %v18688_v60 }
 0x375   : > { %12125 = vmatpush1.bf16.msra.mxu0 %v16327_v2 }
 0x376   : > { %12126 = vmatprep.subr.bf16.mxu0 %v18688_v60 }
 0x379   : > { %12128 = vmatpush1.bf16.msra.mxu0 %v16612_v14 }
 0x37a   : > { %12129 = vmatprep.subr.bf16.mxu0 %v18688_v60 }
 0x37d   : > { %12131 = vmatpush1.bf16.msra.mxu0 %v16050_v23 }
 0x37e   : > { %12132 = vmatprep.subr.bf16.mxu0 %v18688_v60 }
 0x381   : > { %12134 = vmatpush1.bf16.msra.mxu0 %v16473_v18 }
 0x382   : > { %12135 = vmatprep.subr.bf16.mxu0 %v18688_v60 }
 0x38b   : > { %v3726_v35 = vpop.f32.mrb[58].mxu0 }
 0x38c   : > { %v3728_v27 = vpop.f32.mrb[59].mxu0 }
 0x38f   : > { %v3731_v5 = vpop.f32.mrb[60].mxu0 }
 0x390   : > { %v16679_v21 = vpack.c.bf16 %v3731_v5, %v3726_v35  ;;  %v3733_v25 = vpop.f32.mrb[61].mxu0  ;;  %v18863_v35 = vld [vmem:[#allocation24_spill] sm:$0xff] }
 0x391   : > { %vm18864_vm2 = vnez %v18863_v35 }
 0x392   : > { %12137 = vmatpush1.bf16.msra.mxu0 %v16679_v21 }
 0x393   : > { %12165 = vmatprep.subr.bf16.mxu0 %v18688_v60 }
 0x395   : > { %4468 = vmatmul.mubr.f32.vlgmr.msra.gmra.mrb[78].mxu0 %v16618_v46 }
 0x396   : > { %12167 = vmatpush1.bf16.msra.mxu0 %v18850_v59  ;;  %9713 = vmatprep.mubr.msk.f32.mxu0 %vm4216_vm14, %v16624_v52  ;;  %v4213_v59 = vld [vmem:[%s18446_s4 + $0x8] sm:$0xff] }
 0x397   : > { %12168 = vmatprep.subr.bf16.mxu0 %v18688_v60  ;;  %4588 = vperm.xlu1 %13295, %v4213_v59  }
 0x399   : > { %v3801_v55 = vpop.f32.mrb[46].mxu1  ;;  %4473 = vmatmul.mubr.f32.gmra.mrb[80].mxu0 %v16633_v9 }
 0x39a   : > { %v3803_v49 = vpop.f32.mrb[47].mxu1  ;;  %12170 = vmatpush1.bf16.msra.mxu0 %v16327_v2  ;;  %9714 = vmatprep.mubr.msk.f32.mxu0 %vm4216_vm14, %v16639_v53 }
 0x39b   : > { %12171 = vmatprep.subr.bf16.mxu0 %v18688_v60  ;;  %4598 = vperm.xlu1 %13295, %v4215_v24  }
 0x39d   : > { %v3806_v40 = vpop.f32.mrb[48].mxu1  ;;  %4478 = vmatmul.mubr.f32.gmra.mrb[82].mxu0 %v16648_v34 }
 0x39e   : > { %v16694_v47 = vpack.c.bf16 %v3806_v40, %v3801_v55  ;;  %v3808_v20 = vpop.f32.mrb[49].mxu1  ;;  %12173 = vmatpush1.bf16.msra.mxu0 %v16612_v14  ;;  %9715 = vmatprep.mubr.msk.f32.mxu0 %vm4216_vm14, %v16654_v28 }
 0x39f   : > { %12174 = vmatprep.subr.bf16.mxu0 %v18688_v60  ;;  %6609 = vperm.xlu1 %13295, %v5710_v12  }
 0x3a1   : > { %4483 = vmatmul.mubr.f32.gmra.mrb[84].mxu0 %v16663_v38 }
 0x3a2   : > { %12176 = vmatpush1.bf16.msra.mxu0 %v16050_v23  ;;  %9720 = vmatprep.mubr.msk.f32.mxu0 %vm4216_vm14, %v16561_v50 }
 0x3a3   : > { %12177 = vmatprep.subr.bf16.mxu0 %v18688_v60 }
 0x3a6   : > { %12179 = vmatpush1.bf16.msra.mxu0 %v16473_v18 }
 0x3a7   : > { %12180 = vmatprep.subr.bf16.mxu0 %v18688_v60 }
 0x3aa   : > { %12182 = vmatpush1.bf16.msra.mxu0 %v16679_v21 }
 0x3ab   : > { %12183 = vmatprep.subr.bf16.mxu0 %v18688_v60 }
 0x3ae   : > { %12185 = vmatpush1.bf16.msra.mxu0 %v16080_v19 }
 0x3af   : > { %12186 = vmatprep.subr.bf16.mxu0 %v18688_v60 }
 0x3b2   : > { %12188 = vmatpush1.bf16.msra.mxu0 %v16503_v10 }
 0x3b3   : > { %12189 = vmatprep.subr.bf16.mxu0 %v18688_v60 }
 0x3b6   : > { %12191 = vmatpush1.bf16.msra.mxu0 %v16694_v47 }
 0x3b7   : > { %12219 = vmatprep.subr.bf16.mxu0 %v18688_v60 }
 0x3b9   : > { %4674 = vmatmul.mubr.f32.vlgmr.msra.gmra.mrb[86].mxu0 %v16618_v46 }
 0x3ba   : > { %12221 = vmatpush1.bf16.msra.mxu0 %v16050_v23  ;;  %9721 = vmatprep.mubr.msk.f32.mxu0 %vm4216_vm14, %v16624_v52 }
 0x3bb   : > { %12222 = vmatprep.subr.bf16.mxu0 %v18688_v60 }
 0x3bd   : > { %4679 = vmatmul.mubr.f32.gmra.mrb[88].mxu0 %v16633_v9 }
 0x3be   : > { %12224 = vmatpush1.bf16.msra.mxu0 %v16473_v18  ;;  %9722 = vmatprep.mubr.msk.f32.mxu0 %vm4216_vm14, %v16639_v53 }
 0x3bf   : > { %12225 = vmatprep.subr.bf16.mxu0 %v18688_v60 }
 0x3c1   : > { %4684 = vmatmul.mubr.f32.gmra.mrb[90].mxu0 %v16648_v34 }
 0x3c2   : > { %12227 = vmatpush1.bf16.msra.mxu0 %v16679_v21  ;;  %9723 = vmatprep.mubr.msk.f32.mxu0 %vm4216_vm14, %v16654_v28 }
 0x3c3   : > { %12228 = vmatprep.subr.bf16.mxu0 %v18688_v60 }
 0x3c5   : > { %4689 = vmatmul.mubr.f32.gmra.mrb[92].mxu0 %v16663_v38 }
 0x3c6   : > { %12230 = vmatpush1.bf16.msra.mxu0 %v16080_v19  ;;  %9728 = vmatprep.mubr.msk.f32.mxu0 %vm4216_vm14, %v16561_v50  ;;  %v18853_v19 = vld [vmem:[#allocation19_spill] sm:$0xff] }
 0x3c7   : > { %12231 = vmatprep.subr.bf16.mxu0 %v18688_v60  ;;  %vm18854_vm6 = vnez %v18853_v19 }
 0x3ca   : > { %v3970_v23 = vpop.f32.mrb[62].mxu0  ;;  %12233 = vmatpush1.bf16.msra.mxu0 %v16503_v10 }
 0x3cb   : > { %v3972_v36 = vpop.f32.mrb[63].mxu0  ;;  %12234 = vmatprep.subr.bf16.mxu0 %v18688_v60 }
 0x3ce   : > { %v3975_v8 = vpop.f32.mrb[64].mxu0  ;;  %12236 = vmatpush1.bf16.msra.mxu0 %v16694_v47 }
 0x3cf   : > { %v12100_v41 = vpack.c.bf16 %v3975_v8, %v3970_v23  ;;  %v3977_v56 = vpop.f32.mrb[65].mxu0  ;;  %12256 = vmatprep.subr.msk.bf16.mxu0 %vm18852_vm9, %v18686_v54 }
 0x3d1   : > { %12101 = vmatpush1.bf16.msra.mxu1 %v12100_v41  ;;  %4848 = vmatmul.mubr.f32.vlgmr.msra.gmra.mrb[94].mxu0 %v16618_v46 }
 0x3d2   : > { %12102 = vmatprep.subr.bf16.mxu1 %v18688_v60  ;;  %9729 = vmatprep.mubr.msk.f32.mxu0 %vm4216_vm14, %v16624_v52 }
 0x3d3   : > { %12258 = vmatpush3.bf16.msk.msra.mxu0 %vm18852_vm9, %v18686_v54 }
 0x3d4   : > { %12260 = vmatprep.subr.msk.bf16.mxu0 %vm18854_vm6, %v18686_v54 }
 0x3d5   : > { %12104 = vmatpush1.bf16.msra.mxu1 %v16327_v2  ;;  %4853 = vmatmul.mubr.f32.gmra.mrb[96].mxu0 %v16633_v9 }
 0x3d6   : > { %12105 = vmatprep.subr.bf16.mxu1 %v18688_v60  ;;  %9730 = vmatprep.mubr.msk.f32.mxu0 %vm4216_vm14, %v16639_v53 }
 0x3d7   : > { %12262 = vmatpush3.bf16.msk.msra.mxu0 %vm18854_vm6, %v18686_v54 }
 0x3d8   : > { %v4045_v33 = vpop.f32.mrb[50].mxu1  ;;  %12264 = vmatprep.subr.msk.bf16.mxu0 %vm18856_vm4, %v18686_v54 }
 0x3d9   : > { %v4047_v32 = vpop.f32.mrb[51].mxu1  ;;  %12107 = vmatpush1.bf16.msra.mxu1 %v16612_v14  ;;  %4858 = vmatmul.mubr.f32.gmra.mrb[98].mxu0 %v16648_v34 }
 0x3da   : > { %12108 = vmatprep.subr.bf16.mxu1 %v18688_v60  ;;  %9731 = vmatprep.mubr.msk.f32.mxu0 %vm4216_vm14, %v16654_v28 }
 0x3db   : > { %12266 = vmatpush3.bf16.msk.msra.mxu0 %vm18856_vm4, %v18686_v54 }
 0x3dc   : > { %v4050_v3 = vpop.f32.mrb[52].mxu1  ;;  %12268 = vmatprep.subr.msk.bf16.mxu0 %vm18858_vm7, %v18686_v54 }
 0x3dd   : > { %v16776_v45 = vpack.c.bf16 %v4050_v3, %v4045_v33  ;;  %v4052_v51 = vpop.f32.mrb[53].mxu1  ;;  %4863 = vmatmul.mubr.f32.gmra.mrb[100].mxu0 %v16663_v38 }
 0x3df   : > { %12110 = vmatpush1.bf16.msra.mxu1 %v16776_v45  ;;  %12270 = vmatpush3.bf16.msk.msra.mxu0 %vm18858_vm7, %v18686_v54 }
 0x3e0   : > { %12138 = vmatprep.subr.bf16.mxu1 %v18688_v60  ;;  %12272 = vmatprep.subr.msk.bf16.mxu0 %vm18860_vm10, %v18686_v54 }
 0x3e2   : > { %4379 = vmatmul.mubr.f32.vlgmr.msra.gmra.mrb[58].mxu1 %v16618_v46 }
 0x3e3   : > { %12140 = vmatpush1.bf16.msra.mxu1 %v16259_v29  ;;  %9709 = vmatprep.mubr.msk.f32.mxu1 %vm4216_vm14, %v16624_v52  ;;  %v5713_v29 = vld [vmem:[%s18448_s6 + $0x18] sm:$0xff] }
 0x3e4   : > { %12141 = vmatprep.subr.bf16.mxu1 %v18688_v60  ;;  %12274 = vmatpush3.bf16.msk.msra.mxu0 %vm18860_vm10, %v18686_v54 }
 0x3e5   : > { %12276 = vmatprep.subr.msk.bf16.mxu0 %vm18862_vm8, %v18686_v54  ;;  %6624 = vperm.xlu1 %13295, %v5713_v29  }
 0x3e6   : > { %4384 = vmatmul.mubr.f32.gmra.mrb[60].mxu1 %v16633_v9 }
 0x3e7   : > { %12143 = vmatpush1.bf16.msra.mxu1 %v16600_v39  ;;  %9710 = vmatprep.mubr.msk.f32.mxu1 %vm4216_vm14, %v16639_v53 }
 0x3e8   : > { %12144 = vmatprep.subr.bf16.mxu1 %v18688_v60  ;;  %12278 = vmatpush3.bf16.msk.msra.mxu0 %vm18862_vm8, %v18686_v54 }
 0x3e9   : > { %12280 = vmatprep.subr.msk.bf16.mxu0 %vm18864_vm2, %v18686_v54 }
 0x3ea   : > { %4389 = vmatmul.mubr.f32.gmra.mrb[62].mxu1 %v16648_v34 }
 0x3eb   : > { %12146 = vmatpush1.bf16.msra.mxu1 %v12100_v41  ;;  %9711 = vmatprep.mubr.msk.f32.mxu1 %vm4216_vm14, %v16654_v28 }
 0x3ec   : > { %12147 = vmatprep.subr.bf16.mxu1 %v18688_v60  ;;  %12282 = vmatpush3.bf16.msk.msra.mxu0 %vm18864_vm2, %v18686_v54 }
 0x3ee   : > { %4394 = vmatmul.mubr.f32.gmra.mrb[64].mxu1 %v16663_v38 }
 0x3ef   : > { %12149 = vmatpush1.bf16.msra.mxu1 %v16327_v2  ;;  %9716 = vmatprep.mubr.msk.f32.mxu1 %vm4216_vm14, %v16561_v50 }
 0x3f0   : > { %12150 = vmatprep.subr.bf16.mxu1 %v18688_v60 }
 0x3f3   : > { %12152 = vmatpush1.bf16.msra.mxu1 %v16612_v14 }
 0x3f4   : > { %12153 = vmatprep.subr.bf16.mxu1 %v18688_v60 }
 0x3f7   : > { %12155 = vmatpush1.bf16.msra.mxu1 %v16776_v45 }
 0x3f8   : > { %12156 = vmatprep.subr.bf16.mxu1 %v18688_v60 }
 0x3fb   : > { %12158 = vmatpush1.bf16.msra.mxu1 %v16473_v18 }
 0x3fc   : > { %12159 = vmatprep.subr.bf16.mxu1 %v18688_v60 }
 0x3ff   : > { %12161 = vmatpush1.bf16.msra.mxu1 %v16679_v21 }
 0x400   : > { %12162 = vmatprep.subr.bf16.mxu1 %v18688_v60 }
 0x409   : > { %v4120_v39 = vpop.f32.mrb[66].mxu0 }
 0x40a   : > { %v4122_v27 = vpop.f32.mrb[67].mxu0 }
 0x40d   : > { %v4125_v5 = vpop.f32.mrb[68].mxu0 }
 0x40e   : > { %v12163_v25 = vpack.c.bf16 %v4125_v5, %v4120_v39  ;;  %v4127_v55 = vpop.f32.mrb[69].mxu0 }
 0x410   : > { %12164 = vmatpush1.bf16.msra.mxu1 %v12163_v25 }
 0x411   : > { %12192 = vmatprep.subr.bf16.mxu1 %v18688_v60 }
 0x413   : > { %4557 = vmatmul.mubr.f32.vlgmr.msra.gmra.mrb[66].mxu1 %v16618_v46 }
 0x414   : > { %12194 = vmatpush1.bf16.msra.mxu1 %v16327_v2  ;;  %9717 = vmatprep.mubr.msk.f32.mxu1 %vm4216_vm14, %v16624_v52 }
 0x415   : > { %12195 = vmatprep.subr.bf16.mxu1 %v18688_v60 }
 0x417   : > { %v4195_v49 = vpop.f32.mrb[54].mxu1  ;;  %4562 = vmatmul.mubr.f32.gmra.mrb[68].mxu1 %v16633_v9 }
 0x418   : > { %v4197_v40 = vpop.f32.mrb[55].mxu1  ;;  %12197 = vmatpush1.bf16.msra.mxu1 %v16612_v14  ;;  %9718 = vmatprep.mubr.msk.f32.mxu1 %vm4216_vm14, %v16639_v53 }
 0x419   : > { %12198 = vmatprep.subr.bf16.mxu1 %v18688_v60 }
 0x41b   : > { %v4200_v20 = vpop.f32.mrb[56].mxu1  ;;  %4567 = vmatmul.mubr.f32.gmra.mrb[70].mxu1 %v16648_v34 }
 0x41c   : > { %v12217_v2 = vpack.c.bf16 %v4200_v20, %v4195_v49  ;;  %v4202_v23 = vpop.f32.mrb[57].mxu1  ;;  %12200 = vmatpush1.bf16.msra.mxu1 %v16776_v45  ;;  %9719 = vmatprep.mubr.msk.f32.mxu1 %vm4216_vm14, %v16654_v28 }
 0x41d   : > { %12201 = vmatprep.subr.bf16.mxu1 %v18688_v60 }
 0x41f   : > { %4572 = vmatmul.mubr.f32.gmra.mrb[72].mxu1 %v16663_v38 }
 0x420   : > { %12203 = vmatpush1.bf16.msra.mxu1 %v16473_v18  ;;  %9724 = vmatprep.mubr.msk.f32.mxu1 %vm4216_vm14, %v16561_v50 }
 0x421   : > { %12204 = vmatprep.subr.bf16.mxu1 %v18688_v60 }
 0x424   : > { %12206 = vmatpush1.bf16.msra.mxu1 %v16679_v21 }
 0x425   : > { %12207 = vmatprep.subr.bf16.mxu1 %v18688_v60 }
 0x428   : > { %12209 = vmatpush1.bf16.msra.mxu1 %v12163_v25 }
 0x429   : > { %12210 = vmatprep.subr.bf16.mxu1 %v18688_v60 }
 0x42c   : > { %12212 = vmatpush1.bf16.msra.mxu1 %v16503_v10 }
 0x42d   : > { %12213 = vmatprep.subr.bf16.mxu1 %v18688_v60 }
 0x430   : > { %12215 = vmatpush1.bf16.msra.mxu1 %v16694_v47 }
 0x431   : > { %12216 = vmatprep.subr.bf16.mxu1 %v18688_v60 }
 0x434   : > { %12218 = vmatpush1.bf16.msra.mxu1 %v12217_v2 }
 0x435   : > { %12237 = vmatprep.subr.bf16.mxu1 %v18688_v60 }
 0x437   : > { %4759 = vmatmul.mubr.f32.vlgmr.msra.gmra.mrb[74].mxu1 %v16618_v46  ;;  %v16871_v14 = vpop.f32.mrb[70].mxu0 }
 0x438   : > { %12239 = vmatpush1.bf16.msra.mxu1 %v16473_v18  ;;  %9725 = vmatprep.mubr.msk.f32.mxu1 %vm4216_vm14, %v16624_v52  ;;  %v4297_v36 = vpop.f32.mrb[71].mxu0 }
 0x439   : > { %12240 = vmatprep.subr.bf16.mxu1 %v18688_v60 }
 0x43b   : > { %4764 = vmatmul.mubr.f32.gmra.mrb[76].mxu1 %v16633_v9  ;;  %v16878_v8 = vpop.f32.mrb[72].mxu0 }
 0x43c   : > { %12242 = vmatpush1.bf16.msra.mxu1 %v16679_v21  ;;  %9726 = vmatprep.mubr.msk.f32.mxu1 %vm4216_vm14, %v16639_v53  ;;  %v4302_v41 = vpop.f32.mrb[73].mxu0 }
 0x43d   : > { %12243 = vmatprep.subr.bf16.mxu1 %v18688_v60 }
 0x43f   : > { %4769 = vmatmul.mubr.f32.gmra.mrb[78].mxu1 %v16648_v34  ;;  %v16885_v18 = vpop.f32.mrb[74].mxu0 }
 0x440   : > { %12245 = vmatpush1.bf16.msra.mxu1 %v12163_v25  ;;  %9727 = vmatprep.mubr.msk.f32.mxu1 %vm4216_vm14, %v16654_v28  ;;  %v4307_v56 = vpop.f32.mrb[75].mxu0 }
 0x441   : > { %12246 = vmatprep.subr.bf16.mxu1 %v18688_v60 }
 0x443   : > { %4774 = vmatmul.mubr.f32.gmra.mrb[80].mxu1 %v16663_v38  ;;  %v16891_v21 = vpop.f32.mrb[76].mxu0 }
 0x444   : > { %12248 = vmatpush1.bf16.msra.mxu1 %v16503_v10  ;;  %9732 = vmatprep.mubr.msk.f32.mxu1 %vm4216_vm14, %v16561_v50  ;;  %v4312_v33 = vpop.f32.mrb[77].mxu0  ;;  %v18865_v10 = vld [vmem:[#allocation17_spill] sm:$0xff] }
 0x445   : > { %12249 = vmatprep.subr.bf16.mxu1 %v18688_v60  ;;  %vm18867_vm11 = vcmp.eq.s32.totalorder %v14861_v37, %v18865_v10 }
 0x448   : > { %12251 = vmatpush1.bf16.msra.mxu1 %v16694_v47 }
 0x449   : > { %12252 = vmatprep.subr.bf16.mxu1 %v18688_v60 }
 0x44c   : > { %12254 = vmatpush1.bf16.msra.mxu1 %v12217_v2 }
 0x44d   : > { %12290 = vmatprep.subr.msk.bf16.mxu1 %vm18852_vm9, %v18686_v54 }
 0x44f   : > { %4937 = vmatmul.mubr.f32.vlgmr.msra.gmra.mrb[82].mxu1 %v16618_v46 }
 0x450   : > { %9733 = vmatprep.mubr.msk.f32.mxu1 %vm4216_vm14, %v16624_v52  ;;  %12292 = vmatpush3.bf16.msk.msra.mxu1 %vm18852_vm9, %v18686_v54  ;;  %vm18868_vm9 = vcmask 1043456  }
 0x451   : > { %12294 = vmatprep.subr.msk.bf16.mxu1 %vm18854_vm6, %v18686_v54 }
 0x453   : > { %4942 = vmatmul.mubr.f32.gmra.mrb[84].mxu1 %v16633_v9 }
 0x454   : > { %9734 = vmatprep.mubr.msk.f32.mxu1 %vm4216_vm14, %v16639_v53  ;;  %12296 = vmatpush3.bf16.msk.msra.mxu1 %vm18854_vm6, %v18686_v54  ;;  %vm12284_vm6 = vmpackc.low %vm18868_vm9, %vm18867_vm11  ;;  %vm18881_vm9 = vcmp.eq.s32.totalorder %v14864_v42, %v14643_v61 }
 0x455   : > { %12298 = vmatprep.subr.msk.bf16.mxu1 %vm18856_vm4, %v18686_v54 }
 0x457   : > { %4947 = vmatmul.mubr.f32.gmra.mrb[86].mxu1 %v16648_v34 }
 0x458   : > { %9735 = vmatprep.mubr.msk.f32.mxu1 %vm4216_vm14, %v16654_v28  ;;  %12300 = vmatpush3.bf16.msk.msra.mxu1 %vm18856_vm4, %v18686_v54  ;;  %vm18866_vm14 = vcmp.eq.s32.totalorder %v14864_v42, %v18865_v10  ;;  %v18869_v28 = vld [vmem:[#allocation39_spill] sm:$0xff] }
 0x459   : > { %12302 = vmatprep.subr.msk.bf16.mxu1 %vm18858_vm7, %v18686_v54  ;;  %v9067_v50 = vsel %vm18866_vm14, 1.0, %v18695_v57  ;;  %vm18870_vm4 = vnez %v18869_v28 }
 0x45a   : > { %v12283_v9 = vpack.c.bf16 %v9067_v50, %v18697_v16 }
 0x45b   : > { %4952 = vmatmul.mubr.f32.gmra.mrb[88].mxu1 %v16663_v38 }
 0x45c   : > { %12304 = vmatpush3.bf16.msk.msra.mxu1 %vm18858_vm7, %v18686_v54  ;;  %12285 = vmatprep.subr.msk.bf16.mxu0 %vm12284_vm6, %v12283_v9  ;;  %vm18600_vm7 = vcmask 1014784  }
 0x45d   : > { %12306 = vmatprep.subr.msk.bf16.mxu1 %vm18860_vm10, %v18686_v54  ;;  %12288 = vmatpush3.bf16.msk.msra.mxu0 %vm12284_vm6, %v12283_v9 }
 0x45e   : > { %12324 = vmatprep.subr.msk.bf16.mxu0 %vm18870_vm4, %v18686_v54 }
 0x460   : > { %12308 = vmatpush3.bf16.msk.msra.mxu1 %vm18860_vm10, %v18686_v54 }
 0x461   : > { %12310 = vmatprep.subr.msk.bf16.mxu1 %vm18862_vm8, %v18686_v54 }
 0x464   : > { %12312 = vmatpush3.bf16.msk.msra.mxu1 %vm18862_vm8, %v18686_v54 }
 0x465   : > { %12314 = vmatprep.subr.msk.bf16.mxu1 %vm18864_vm2, %v18686_v54 }
 0x468   : > { %v4469_v46 = vpop.f32.mrb[78].mxu0  ;;  %12316 = vmatpush3.bf16.msk.msra.mxu1 %vm18864_vm2, %v18686_v54 }
 0x469   : > { %v4471_v52 = vpop.f32.mrb[79].mxu0  ;;  %12319 = vmatprep.subr.msk.bf16.mxu1 %vm12284_vm6, %v12283_v9 }
 0x46c   : > { %v4474_v53 = vpop.f32.mrb[80].mxu0  ;;  %12322 = vmatpush3.bf16.msk.msra.mxu1 %vm12284_vm6, %v12283_v9 }
 0x46d   : > { %v4476_v34 = vpop.f32.mrb[81].mxu0  ;;  %12358 = vmatprep.subr.msk.bf16.mxu1 %vm18870_vm4, %v18686_v54 }
 0x46e   : > { %v16986_v34 = vpop.permute.xlu1 %4583 }
 0x470   : > { %v4479_v38 = vpop.f32.mrb[82].mxu0 }
 0x471   : > { %v4481_v47 = vpop.f32.mrb[83].mxu0 }
 0x474   : > { %v4484_v4 = vpop.f32.mrb[84].mxu0 }
 0x475   : > { %v4486_v19 = vpop.f32.mrb[85].mxu0 }
 0x48c   : > { %v16966_v22 = vpop.f32.mrb[86].mxu0 }
 0x48d   : > { %v4677_v32 = vpop.f32.mrb[87].mxu0 }
 0x48e   : > { %v16989_v32 = vpop.permute.xlu1 %4588 }
 0x490   : > { %v16968_v11 = vpop.f32.mrb[88].mxu0 }
 0x491   : > { %v4682_v3 = vpop.f32.mrb[89].mxu0 }
 0x494   : > { %v16970_v13 = vpop.f32.mrb[90].mxu0 }
 0x495   : > { %v4687_v45 = vpop.f32.mrb[91].mxu0 }
 0x498   : > { %v16972_v51 = vpop.f32.mrb[92].mxu0 }
 0x499   : > { %v4692_v59 = vpop.f32.mrb[93].mxu0 }
 0x4a4   : > { %v16974_v24 = vpop.f32.mrb[94].mxu0 }
 0x4a5   : > { %v4851_v0 = vpop.f32.mrb[95].mxu0 }
 0x4a6   : > { %v16998_v0 = vpop.permute.xlu0 %4593 }
 0x4a8   : > { %v16976_v12 = vpop.f32.mrb[96].mxu0 }
 0x4a9   : > { %v4856_v58 = vpop.f32.mrb[97].mxu0 }
 0x4ac   : > { %v16978_v29 = vpop.f32.mrb[98].mxu0 }
 0x4ad   : > { %v4861_v35 = vpop.f32.mrb[99].mxu0 }
 0x4b0   : > { %v16980_v39 = vpop.f32.mrb[100].mxu0 }
 0x4b1   : > { %v4866_v27 = vpop.f32.mrb[101].mxu0 }
 0x4b2   : > { %v17006_v27 = vpop.permute.xlu1 %4598 }
 0x4b5   : > { %v4380_v5 = vpop.f32.mrb[58].mxu1 }
 0x4b6   : > { %v4399_v25 = vmax.f32 %v16871_v14, %v4380_v5  ;;  %v4382_v55 = vpop.f32.mrb[59].mxu1 }
 0x4b7   : > { %v18871_v55 = vld [vmem:[#allocation40_spill] sm:$0xff] }
 0x4b8   : > { %v4488_v49 = vmax.f32 %v4399_v25, %v4469_v46  ;;  %vm18872_vm10 = vnez %v18871_v55 }
 0x4b9   : > { %v4385_v40 = vpop.f32.mrb[60].mxu1 }
 0x4ba   : > { %v4400_v20 = vmax.f32 %v16878_v8, %v4385_v40  ;;  %v4387_v2 = vpop.f32.mrb[61].mxu1 }
 0x4bb   : > { %v18873_v2 = vld [vmem:[#allocation41_spill] sm:$0xff] }
 0x4bc   : > { %v4489_v23 = vmax.f32 %v4400_v20, %v4474_v53  ;;  %vm18874_vm8 = vnez %v18873_v2 }
 0x4bd   : > { %v4390_v36 = vpop.f32.mrb[62].mxu1 }
 0x4be   : > { %v4401_v41 = vmax.f32 %v16885_v18, %v4390_v36  ;;  %v4392_v56 = vpop.f32.mrb[63].mxu1  ;;  %v18877_v36 = vld [vmem:[#allocation43_spill] sm:$0xff] }
 0x4bf   : > { %vm18878_vm14 = vnez %v18877_v36  ;;  %v9230_v56 = vsel %vm18881_vm9, 1.0, %v18695_v57 }
 0x4c0   : > { %v4490_v33 = vmax.f32 %v4401_v41, %v4479_v38  ;;  %v18879_v41 = vld [vmem:[#allocation44_spill] sm:$0xff] }
 0x4c1   : > { %v4395_v10 = vpop.f32.mrb[64].mxu1  ;;  %vm18880_vm11 = vnez %v18879_v41 }
 0x4c2   : > { %v4402_v50 = vmax.f32 %v16891_v21, %v4395_v10  ;;  %v4397_v52 = vpop.f32.mrb[65].mxu1  ;;  %v17057_v10 = vpack.c.bf16 %v9230_v56, %v18697_v16 }
 0x4c4   : > { %v4491_v9 = vmax.f32 %v4402_v50, %v4484_v4  ;;  %v18886_v50 = vmov 0 }
 0x4e6   : > { %v4558_v14 = vpop.f32.mrb[66].mxu1 }
 0x4e7   : > { %v4577_v47 = vmax.f32 %v4488_v49, %v4558_v14  ;;  %v4560_v46 = vpop.f32.mrb[67].mxu1 }
 0x4e8   : > { %v18888_v46 = vld [vmem:[#allocation27_spill] sm:$0xff] }
 0x4e9   : > { %v4601_v19 = vadd.f32 %v16986_v34, %v4577_v47 }
 0x4ea   : > { %v4563_v8 = vpop.f32.mrb[68].mxu1 }
 0x4eb   : > { %v16991_v53 = vmax.f32 %v4601_v19, 0.0  ;;  %v4578_v18 = vmax.f32 %v4489_v23, %v4563_v8  ;;  %v4565_v38 = vpop.f32.mrb[69].mxu1  ;;  %v18875_v23 = vld [vmem:[#allocation42_spill] sm:$0xff] }
 0x4ec   : > { %vm18876_vm2 = vnez %v18875_v23 }
 0x4ed   : > { %v4602_v3 = vadd.f32 %v16989_v32, %v4578_v18  ;;  %10837 = vmatprep.mubr.msk.f32.mxu0 %vm18600_vm7, %v16991_v53  ;;  %v18892_v18 = vld [vmem:[#allocation28_spill] sm:$0xff] }
 0x4ee   : > { %v4568_v21 = vpop.f32.mrb[70].mxu1 }
 0x4ef   : > { %v16996_v4 = vmax.f32 %v4602_v3, 0.0  ;;  %v4579_v45 = vmax.f32 %v4490_v33, %v4568_v21  ;;  %v4570_v59 = vpop.f32.mrb[71].mxu1  ;;  %v18882_v33 = vld [vmem:[#allocation45_spill] sm:$0xff] }
 0x4f0   : > { %vm18883_vm6 = vnez %v18882_v33  ;;  %v18899_v59 = vld [vmem:[#allocation29_spill] sm:$0xff] }
 0x4f1   : > { %v4603_v58 = vadd.f32 %v16998_v0, %v4579_v45  ;;  %10838 = vmatmul.mubr.msk.f32.vlgmr.msra.gmra.mrb[102].mxu0 %vm18600_vm7, %v16996_v4 }
 0x4f2   : > { %12326 = vmatpush3.bf16.msk.msra.mxu0 %vm18870_vm4, %v18686_v54  ;;  %v4573_v35 = vpop.f32.mrb[72].mxu1 }
 0x4f3   : > { %v17008_v5 = vmax.f32 %v4603_v58, 0.0  ;;  %v4580_v25 = vmax.f32 %v4491_v9, %v4573_v35  ;;  %12328 = vmatprep.subr.msk.bf16.mxu0 %vm18872_vm10, %v18686_v54  ;;  %v4575_v49 = vpop.f32.mrb[73].mxu1 }
 0x4f5   : > { %v4604_v40 = vadd.f32 %v17006_v27, %v4580_v25  ;;  %10840 = vmatprep.mubr.msk.f32.mxu0 %vm18600_vm7, %v17008_v5 }
 0x4f6   : > { %12330 = vmatpush3.bf16.msk.msra.mxu0 %vm18872_vm10, %v18686_v54 }
 0x4f7   : > { %v17019_v20 = vmax.f32 %v4604_v40, 0.0  ;;  %12332 = vmatprep.subr.msk.bf16.mxu0 %vm18874_vm8, %v18686_v54 }
 0x4f9   : > { %10841 = vmatmul.mubr.msk.f32.gmra.mrb[104].mxu0 %vm18600_vm7, %v17019_v20 }
 0x4fa   : > { %12334 = vmatpush3.bf16.msk.msra.mxu0 %vm18874_vm8, %v18686_v54  ;;  %10913 = vmatprep.mubr.msk.f32.mxu0 %vm18600_vm7, %v16991_v53  ;;  %vm18884_vm7 = vcmp.eq.s32.totalorder %v14861_v37, %v14643_v61 }
 0x4fb   : > { %12336 = vmatprep.subr.msk.bf16.mxu0 %vm18876_vm2, %v18686_v54  ;;  %vm17063_vm12 = vmpackc.low %vm18885_vm15, %vm18884_vm7  ;;  %vm18889_vm15 = vnez %v18888_v46  ;;  %vm18890_vm7 = vcmask 1014784  }
 0x4fc   : > { %v18887_v50 = vsel %vm17063_vm12, 4294967295, %v18886_v50  ;;  %vm18891_vm9 = vmmov %vm18890_vm7 }
 0x4fe   : > { %12338 = vmatpush3.bf16.msk.msra.mxu0 %vm18876_vm2, %v18686_v54 }
 0x4ff   : > { %12340 = vmatprep.subr.msk.bf16.mxu0 %vm18878_vm14, %v18686_v54 }
 0x502   : > { %12342 = vmatpush3.bf16.msk.msra.mxu0 %vm18878_vm14, %v18686_v54 }
 0x503   : > { %12344 = vmatprep.subr.msk.bf16.mxu0 %vm18880_vm11, %v18686_v54 }
 0x506   : > { %12346 = vmatpush3.bf16.msk.msra.mxu0 %vm18880_vm11, %v18686_v54 }
 0x507   : > { %12348 = vmatprep.subr.msk.bf16.mxu0 %vm18883_vm6, %v18686_v54 }
 0x50a   : > { %12350 = vmatpush3.bf16.msk.msra.mxu0 %vm18883_vm6, %v18686_v54  ;;  %v4760_v52 = vpop.f32.mrb[74].mxu1  ;;  %vm18894_vm6 = vmmov %vm18890_vm7 }
 0x50b   : > { %v4779_v9 = vmax.f32 %v16966_v22, %v4760_v52  ;;  %v4762_v14 = vpop.f32.mrb[75].mxu1  ;;  %12353 = vmatprep.subr.msk.bf16.mxu0 %vm17063_vm12, %v17057_v10 }
 0x50d   : > { %v4868_v47 = vmax.f32 %v4779_v9, %v16974_v24 }
 0x50e   : > { %12356 = vmatpush3.bf16.msk.msra.mxu0 %vm17063_vm12, %v17057_v10  ;;  %v4765_v61 = vpop.f32.mrb[76].mxu1  ;;  %vm18893_vm12 = vnez %v18892_v18 }
 0x50f   : > { %12392 = vmatprep.subr.msk.bf16.mxu0 %vm18889_vm15, %v18686_v54  ;;  %v4780_v19 = vmax.f32 %v16968_v11, %v4765_v61  ;;  %v4767_v8 = vpop.f32.mrb[77].mxu1 }
 0x511   : > { %10914 = vmatmul.mubr.msk.f32.vlgmr.msra.gmra.mrb[106].mxu0 %vm18890_vm7, %v16996_v4  ;;  %v4869_v22 = vmax.f32 %v4780_v19, %v16976_v12  ;;  %vm18895_vm7 = vmmov %vm18894_vm6 }
 0x512   : > { %10916 = vmatprep.mubr.msk.f32.mxu0 %vm18891_vm9, %v17008_v5  ;;  %12394 = vmatpush3.bf16.msk.msra.mxu0 %vm18889_vm15, %v18686_v54  ;;  %v4770_v24 = vpop.f32.mrb[78].mxu1  ;;  %vm18896_vm9 = vnez %v18763_v43 }
 0x513   : > { %12396 = vmatprep.subr.msk.bf16.mxu0 %vm18893_vm12, %v18686_v54  ;;  %v4781_v11 = vmax.f32 %v16970_v13, %v4770_v24  ;;  %v4772_v38 = vpop.f32.mrb[79].mxu1 }
 0x515   : > { %10917 = vmatmul.mubr.msk.f32.gmra.mrb[108].mxu0 %vm18894_vm6, %v17019_v20  ;;  %v4870_v12 = vmax.f32 %v4781_v11, %v16978_v29  ;;  %vm18897_vm6 = vnez %v18765_v17 }
 0x516   : > { %12398 = vmatpush3.bf16.msk.msra.mxu0 %vm18893_vm12, %v18686_v54  ;;  %10989 = vmatprep.mubr.msk.f32.mxu0 %vm18895_vm7, %v16991_v53  ;;  %v4775_v3 = vpop.f32.mrb[80].mxu1  ;;  %vm18898_vm7 = vnez %v18768_v7  ;;  %vm18901_vm12 = vcmp.eq.s32.totalorder %v14864_v42, %v15688_v6 }
 0x517   : > { %12400 = vmatprep.subr.msk.bf16.mxu0 %vm18896_vm9, %v18686_v54  ;;  %v4782_v13 = vmax.f32 %v16972_v51, %v4775_v3  ;;  %v4777_v21 = vpop.f32.mrb[81].mxu1  ;;  %v9393_v58 = vsel %vm18901_vm12, 1.0, %v18695_v57  ;;  %vm18903_vm12 = vcmp.eq.s32.totalorder %v14861_v37, %v15688_v6 }
 0x518   : > { %v17139_v52 = vpack.c.bf16 %v9393_v58, %v18697_v16 }
 0x519   : > { %v4871_v45 = vmax.f32 %v4782_v13, %v16980_v39 }
 0x51a   : > { %12402 = vmatpush3.bf16.msk.msra.mxu0 %vm18896_vm9, %v18686_v54  ;;  %vm18900_vm9 = vnez %v18899_v59 }
 0x51b   : > { %12404 = vmatprep.subr.msk.bf16.mxu0 %vm18897_vm6, %v18686_v54 }
 0x51e   : > { %12406 = vmatpush3.bf16.msk.msra.mxu0 %vm18897_vm6, %v18686_v54  ;;  %vm18904_vm6 = vcmask 1043456  }
 0x51f   : > { %12408 = vmatprep.subr.msk.bf16.mxu0 %vm18898_vm7, %v18686_v54  ;;  %vm17145_vm15 = vmpackc.low %vm18904_vm6, %vm18903_vm12 }
 0x522   : > { %12410 = vmatpush3.bf16.msk.msra.mxu0 %vm18898_vm7, %v18686_v54  ;;  %v4938_v51 = vpop.f32.mrb[82].mxu1  ;;  %vm18902_vm7 = vnez %v18774_v48 }
 0x523   : > { %v4957_v29 = vmax.f32 %v4868_v47, %v4938_v51  ;;  %v4940_v39 = vpop.f32.mrb[83].mxu1  ;;  %12412 = vmatprep.subr.msk.bf16.mxu0 %vm18900_vm9, %v18686_v54 }
 0x525   : > { %v4961_v35 = vadd.f32 %v4957_v29, %v16986_v34  ;;  %v17465_v29 = vld [vmem:[%s18447_s5] sm:$0xff] }
 0x526   : > { %12414 = vmatpush3.bf16.msk.msra.mxu0 %vm18900_vm9, %v18686_v54  ;;  %v4943_v25 = vpop.f32.mrb[84].mxu1  ;;  %vm18907_vm9 = vcmask 1014784   ;;  %v17515_v34 = vld [vmem:[%s18447_s5 + $0x60] sm:$0xff] }
 0x527   : > { %v17133_v49 = vmax.f32 %v4961_v35, 0.0  ;;  %v4958_v40 = vmax.f32 %v4869_v22, %v4943_v25  ;;  %v4945_v56 = vpop.f32.mrb[85].mxu1  ;;  %12416 = vmatprep.subr.msk.bf16.mxu0 %vm18902_vm7, %v18686_v54  ;;  %vm18908_vm6 = vmmov %vm18907_vm9  ;;  %v17479_v35 = vld [vmem:[%s18447_s5 + $0x18] sm:$0xff] }
 0x528   : > { %v17484_v25 = vld [vmem:[%s18447_s5 + $0x38] sm:$0xff]  ;;  %v17503_v56 = vld [vmem:[%s18447_s5 + $0x48] sm:$0xff] }
 0x529   : > { %v4962_v9 = vadd.f32 %v4958_v40, %v16989_v32  ;;  %10875 = vmatprep.mubr.msk.f32.mxu1 %vm18907_vm9, %v17133_v49  ;;  %v17496_v40 = vld [vmem:[%s18447_s5 + $0x50] sm:$0xff] }
 0x52a   : > { %12418 = vmatpush3.bf16.msk.msra.mxu0 %vm18902_vm7, %v18686_v54  ;;  %v4948_v14 = vpop.f32.mrb[86].mxu1 }
 0x52b   : > { %v17155_v47 = vmax.f32 %v4962_v9, 0.0  ;;  %v4959_v61 = vmax.f32 %v4870_v12, %v4948_v14  ;;  %12421 = vmatprep.subr.msk.bf16.mxu0 %vm17145_vm15, %v17139_v52  ;;  %v4950_v6 = vpop.f32.mrb[87].mxu1  ;;  %v17520_v9 = vld [vmem:[%s18447_s5 + $0x80] sm:$0xff]  ;;  %v17527_v14 = vld [vmem:[%s18447_s5 + $0x78] sm:$0xff] }
 0x52d   : > { %v4963_v19 = vadd.f32 %v4959_v61, %v16998_v0  ;;  %10876 = vmatmul.mubr.msk.f32.vlgmr.msra.gmra.mrb[90].mxu1 %vm18908_vm6, %v17155_v47 }
 0x52e   : > { %12360 = vmatpush3.bf16.msk.msra.mxu1 %vm18870_vm4, %v18686_v54  ;;  %12424 = vmatpush3.bf16.msk.msra.mxu0 %vm17145_vm15, %v17139_v52  ;;  %v4953_v32 = vpop.f32.mrb[88].mxu1  ;;  %vm18909_vm4 = vmmov %vm18908_vm6 }
 0x52f   : > { %v17169_v8 = vmax.f32 %v4963_v19, 0.0  ;;  %v4960_v22 = vmax.f32 %v4871_v45, %v4953_v32  ;;  %12362 = vmatprep.subr.msk.bf16.mxu1 %vm18872_vm10, %v18686_v54  ;;  %12460 = vmatprep.subr.msk.bf16.mxu0 %vm16133_vm3, %v18686_v54  ;;  %v4955_v0 = vpop.f32.mrb[89].mxu1  ;;  %vm18910_vm9 = vmmov %vm18909_vm4  ;;  %v17539_v19 = vld [vmem:[%s18447_s5 + $0x90] sm:$0xff] }
 0x530   : > { %vm18911_vm12 = vmmov %vm18909_vm4 }
 0x531   : > { %v4964_v28 = vadd.f32 %v4960_v22, %v17006_v27  ;;  %10990 = vmatmul.mubr.msk.f32.vlgmr.msra.gmra.mrb[110].mxu0 %vm18909_vm4, %v16996_v4  ;;  %10878 = vmatprep.mubr.msk.f32.mxu1 %vm18910_vm9, %v17169_v8  ;;  %vm18912_vm6 = vmmov %vm18909_vm4 }
 0x532   : > { %12364 = vmatpush3.bf16.msk.msra.mxu1 %vm18872_vm10, %v18686_v54  ;;  %10992 = vmatprep.mubr.msk.f32.mxu0 %vm18911_vm12, %v17008_v5  ;;  %vm18913_vm10 = vmmov %vm18909_vm4  ;;  %vm18919_vm12 = vnez %v18818_v63 }
 0x533   : > { %v17187_v24 = vmax.f32 %v4964_v28, 0.0  ;;  %12462 = vmatpush3.bf16.msk.msra.mxu0 %vm16133_vm3, %v18686_v54  ;;  %12366 = vmatprep.subr.msk.bf16.mxu1 %vm18874_vm8, %v18686_v54  ;;  %vm18914_vm9 = vmmov %vm18909_vm4  ;;  %v17555_v28 = vld [vmem:[%s18447_s5 + $0xa8] sm:$0xff] }
 0x534   : > { %12464 = vmatprep.subr.msk.bf16.mxu0 %vm16153_vm5, %v18686_v54 }
 0x535   : > { %10993 = vmatmul.mubr.msk.f32.gmra.mrb[112].mxu0 %vm18912_vm6, %v17019_v20  ;;  %10879 = vmatmul.mubr.msk.f32.gmra.mrb[92].mxu1 %vm18913_vm10, %v17187_v24  ;;  %vm18920_vm6 = vcmp.eq.s32.totalorder %v14861_v37, %v16111_v26  ;;  %vm18921_vm10 = vcmask 1043456  }
 0x536   : > { %12368 = vmatpush3.bf16.msk.msra.mxu1 %vm18874_vm8, %v18686_v54  ;;  %11065 = vmatprep.mubr.msk.f32.mxu0 %vm18909_vm4, %v16991_v53  ;;  %vm18915_vm8 = vnez %v18882_v33  ;;  %vm17275_vm4 = vmpackc.low %vm18921_vm10, %vm18920_vm6 }
 0x537   : > { %12466 = vmatpush3.bf16.msk.msra.mxu0 %vm16153_vm5, %v18686_v54  ;;  %10951 = vmatprep.mubr.msk.f32.mxu1 %vm18914_vm9, %v17133_v49  ;;  %vm18924_vm9 = vnez %v18888_v46 }
 0x538   : > { %12370 = vmatprep.subr.msk.bf16.mxu1 %vm18876_vm2, %v18686_v54  ;;  %12468 = vmatprep.subr.msk.bf16.mxu0 %vm16172_vm13, %v18686_v54 }
 0x53a   : > { %12372 = vmatpush3.bf16.msk.msra.mxu1 %vm18876_vm2, %v18686_v54  ;;  %vm18916_vm2 = vnez %v18816_v44 }
 0x53b   : > { %12470 = vmatpush3.bf16.msk.msra.mxu0 %vm16172_vm13, %v18686_v54  ;;  %12374 = vmatprep.subr.msk.bf16.mxu1 %vm18878_vm14, %v18686_v54 }
 0x53c   : > { %12472 = vmatprep.subr.msk.bf16.mxu0 %vm16188_vm1, %v18686_v54 }
 0x53e   : > { %12376 = vmatpush3.bf16.msk.msra.mxu1 %vm18878_vm14, %v18686_v54  ;;  %vm18917_vm14 = vcmp.eq.s32.totalorder %v14864_v42, %v16111_v26  ;;  %v18922_v42 = vmov 0 }
 0x53f   : > { %12474 = vmatpush3.bf16.msk.msra.mxu0 %vm16188_vm1, %v18686_v54  ;;  %12378 = vmatprep.subr.msk.bf16.mxu1 %vm18880_vm11, %v18686_v54  ;;  %v9556_v53 = vsel %vm18917_vm14, 1.0, %v18695_v57  ;;  %v18923_v42 = vsel %vm17275_vm4, 4294967295, %v18922_v42 }
 0x540   : > { %12476 = vmatprep.subr.msk.bf16.mxu0 %vm16207_vm0, %v18686_v54  ;;  %v12487_v27 = vpack.c.bf16 %v9556_v53, %v18697_v16  ;;  %v17565_v53 = vld [vmem:[%s18447_s5 + $0x28] sm:$0xff] }
 0x542   : > { %12380 = vmatpush3.bf16.msk.msra.mxu1 %vm18880_vm11, %v18686_v54  ;;  %vm18918_vm11 = vnez %v18887_v50 }
 0x543   : > { %12478 = vmatpush3.bf16.msk.msra.mxu0 %vm16207_vm0, %v18686_v54  ;;  %12382 = vmatprep.subr.msk.bf16.mxu1 %vm18915_vm8, %v18686_v54 }
 0x544   : > { %12480 = vmatprep.subr.msk.bf16.mxu0 %vm18916_vm2, %v18686_v54 }
 0x546   : > { %12384 = vmatpush3.bf16.msk.msra.mxu1 %vm18915_vm8, %v18686_v54  ;;  %vm18925_vm8 = vcmask 1014784  }
 0x547   : > { %12482 = vmatpush3.bf16.msk.msra.mxu0 %vm18916_vm2, %v18686_v54  ;;  %12387 = vmatprep.subr.msk.bf16.mxu1 %vm18918_vm11, %v17057_v10  ;;  %vm18926_vm14 = vmmov %vm18925_vm8 }
 0x548   : > { %12484 = vmatprep.subr.msk.bf16.mxu0 %vm18919_vm12, %v18686_v54  ;;  %vm18928_vm6 = vmmov %vm18925_vm8 }
 0x549   : > { %vm18929_vm10 = vmmov %vm18928_vm6 }
 0x54a   : > { %12390 = vmatpush3.bf16.msk.msra.mxu1 %vm18918_vm11, %v17057_v10  ;;  %vm18927_vm11 = vnez %v18892_v18 }
 0x54b   : > { %12486 = vmatpush3.bf16.msk.msra.mxu0 %vm18919_vm12, %v18686_v54  ;;  %12426 = vmatprep.subr.msk.bf16.mxu1 %vm18924_vm9, %v18686_v54 }
 0x54c   : > { %12489 = vmatprep.subr.msk.bf16.mxu0 %vm17275_vm4, %v12487_v27 }
 0x54d   : > { %10952 = vmatmul.mubr.msk.f32.vlgmr.msra.gmra.mrb[94].mxu1 %vm18925_vm8, %v17155_v47  ;;  %vm18930_vm8 = vmmov %vm18928_vm6 }
 0x54e   : > { %10954 = vmatprep.mubr.msk.f32.mxu1 %vm18926_vm14, %v17169_v8  ;;  %12428 = vmatpush3.bf16.msk.msra.mxu1 %vm18924_vm9, %v18686_v54  ;;  %vm18931_vm9 = vmmov %vm18928_vm6  ;;  %vm18932_vm14 = vnez %v18763_v43 }
 0x54f   : > { %12492 = vmatpush3.bf16.msk.msra.mxu0 %vm17275_vm4, %v12487_v27  ;;  %12430 = vmatprep.subr.msk.bf16.mxu1 %vm18927_vm11, %v18686_v54  ;;  %vm18933_vm4 = vmmov %vm18928_vm6 }
 0x551   : > { %10955 = vmatmul.mubr.msk.f32.gmra.mrb[96].mxu1 %vm18928_vm6, %v17187_v24  ;;  %vm18935_vm6 = vnez %v18768_v7 }
 0x552   : > { %11066 = vmatmul.mubr.msk.f32.vlgmr.msra.gmra.mrb[114].mxu0 %vm18929_vm10, %v16996_v4  ;;  %12432 = vmatpush3.bf16.msk.msra.mxu1 %vm18927_vm11, %v18686_v54  ;;  %vm18934_vm11 = vnez %v18765_v17  ;;  %vm18937_vm10 = vmmov %vm18930_vm8  ;;  %v17422_v17 = vld [vmem:[%s18447_s5 + $0x10] sm:$0xff] }
 0x553   : > { %11027 = vmatprep.mubr.msk.f32.mxu1 %vm18930_vm8, %v17133_v49  ;;  %11068 = vmatprep.mubr.msk.f32.mxu0 %vm18931_vm9, %v17008_v5  ;;  %vm6727_vm9 = vcmask 474112  }
 0x554   : > { %12434 = vmatprep.subr.msk.bf16.mxu1 %vm18932_vm14, %v18686_v54 }
 0x556   : > { %11069 = vmatmul.mubr.msk.f32.gmra.mrb[116].mxu0 %vm18933_vm4, %v17019_v20  ;;  %12436 = vmatpush3.bf16.msk.msra.mxu1 %vm18932_vm14, %v18686_v54  ;;  %vm18936_vm4 = vnez %v18899_v59  ;;  %v17470_v59 = vld [vmem:[%s18447_s5 + $0x20] sm:$0xff]  ;;  %vm18945_vm14 = vcmask 982016  }
 0x557   : > { %12438 = vmatprep.subr.msk.bf16.mxu1 %vm18934_vm11, %v18686_v54 }
 0x55a   : > { %12440 = vmatpush3.bf16.msk.msra.mxu1 %vm18934_vm11, %v18686_v54 }
 0x55b   : > { %12442 = vmatprep.subr.msk.bf16.mxu1 %vm18935_vm6, %v18686_v54 }
 0x55e   : > { %12444 = vmatpush3.bf16.msk.msra.mxu1 %vm18935_vm6, %v18686_v54  ;;  %vm6730_vm6 = vcmask 441344  }
 0x55f   : > { %12446 = vmatprep.subr.msk.bf16.mxu1 %vm18936_vm4, %v18686_v54 }
 0x562   : > { %12448 = vmatpush3.bf16.msk.msra.mxu1 %vm18936_vm4, %v18686_v54  ;;  %vm6732_vm4 = vcmask 949248  }
 0x563   : > { %12450 = vmatprep.subr.msk.bf16.mxu1 %vm18902_vm7, %v18686_v54 }
 0x566   : > { %12452 = vmatpush3.bf16.msk.msra.mxu1 %vm18902_vm7, %v18686_v54  ;;  %vm18939_vm7 = vmmov %vm18930_vm8 }
 0x567   : > { %12455 = vmatprep.subr.msk.bf16.mxu1 %vm17145_vm15, %v17139_v52 }
 0x56a   : > { %12458 = vmatpush3.bf16.msk.msra.mxu1 %vm17145_vm15, %v17139_v52  ;;  %vm18938_vm15 = vmmov %vm18930_vm8  ;;  %v17508_v52 = vld [vmem:[%s18447_s5 + $0x68] sm:$0xff] }
 0x56b   : > { %12494 = vmatprep.subr.msk.bf16.mxu1 %vm16133_vm3, %v18686_v54 }
 0x56d   : > { %11028 = vmatmul.mubr.msk.f32.vlgmr.msra.gmra.mrb[98].mxu1 %vm18937_vm10, %v17155_v47  ;;  %vm18947_vm10 = vmmov %vm18945_vm14 }
 0x56e   : > { %11030 = vmatprep.mubr.msk.f32.mxu1 %vm18930_vm8, %v17169_v8  ;;  %12496 = vmatpush3.bf16.msk.msra.mxu1 %vm16133_vm3, %v18686_v54  ;;  %vm18940_vm3 = vnez %v18923_v42  ;;  %v17583_v42 = vld [vmem:[%s18447_s5 + $0x58] sm:$0xff]  ;;  %vm6734_vm8 = vcmask 408576  }
 0x56f   : > { %12498 = vmatprep.subr.msk.bf16.mxu1 %vm16153_vm5, %v18686_v54 }
 0x571   : > { %11031 = vmatmul.mubr.msk.f32.gmra.mrb[100].mxu1 %vm18938_vm15, %v17187_v24  ;;  %vm6736_vm15 = vcmask 916480  }
 0x572   : > { %12500 = vmatpush3.bf16.msk.msra.mxu1 %vm16153_vm5, %v18686_v54  ;;  %11103 = vmatprep.mubr.msk.f32.mxu1 %vm18939_vm7, %v17133_v49  ;;  %vm18941_vm5 = vmmov %vm18939_vm7  ;;  %v17491_v49 = vld [vmem:[%s18447_s5 + $0x30] sm:$0xff]  ;;  %vm6738_vm7 = vcmask 375808  }
 0x573   : > { %12502 = vmatprep.subr.msk.bf16.mxu1 %vm16172_vm13, %v18686_v54 }
 0x576   : > { %12504 = vmatpush3.bf16.msk.msra.mxu1 %vm16172_vm13, %v18686_v54  ;;  %vm18942_vm13 = vmmov %vm18941_vm5 }
 0x577   : > { %12506 = vmatprep.subr.msk.bf16.mxu1 %vm16188_vm1, %v18686_v54 }
 0x57a   : > { %12508 = vmatpush3.bf16.msk.msra.mxu1 %vm16188_vm1, %v18686_v54  ;;  %vm18943_vm1 = vmmov %vm18941_vm5 }
 0x57b   : > { %12510 = vmatprep.subr.msk.bf16.mxu1 %vm16207_vm0, %v18686_v54  ;;  %vm18946_vm11 = vmmov %vm18943_vm1 }
 0x57e   : > { %12512 = vmatpush3.bf16.msk.msra.mxu1 %vm16207_vm0, %v18686_v54  ;;  %vm5718_vm0 = vcmask 261120  }
 0x57f   : > { %12514 = vmatprep.subr.msk.bf16.mxu1 %vm18916_vm2, %v18686_v54 }
 0x582   : > { %12516 = vmatpush3.bf16.msk.msra.mxu1 %vm18916_vm2, %v18686_v54  ;;  %vm6724_vm2 = vcmask 506880  }
 0x583   : > { %12518 = vmatprep.subr.msk.bf16.mxu1 %vm18919_vm12, %v18686_v54 }
 0x586   : > { %12520 = vmatpush3.bf16.msk.msra.mxu1 %vm18919_vm12, %v18686_v54  ;;  %v17414_v54 = vld [vmem:[%s18447_s5 + $0x8] sm:$0xff]  ;;  %vm18944_vm12 = vmmov %vm18943_vm1 }
 0x587   : > { %12523 = vmatprep.subr.msk.bf16.mxu1 %vm18940_vm3, %v12487_v27  ;;  %5807 = vmatprep.mubr.f32.mxu0 %v17414_v54 }
 0x58a   : > { %12526 = vmatpush3.bf16.msk.msra.mxu1 %vm18940_vm3, %v12487_v27  ;;  %v17573_v27 = vld [vmem:[%s18447_s5 + $0x40] sm:$0xff]  ;;  %vm6740_vm3 = vcmask 883712  }
 0x58d   : > { %11104 = vmatmul.mubr.msk.f32.vlgmr.msra.gmra.mrb[102].mxu1 %vm18941_vm5, %v17155_v47  ;;  %v17532_v47 = vld [vmem:[%s18447_s5 + $0x98] sm:$0xff]  ;;  %vm6742_vm5 = vcmask 343040  }
 0x58e   : > { %11106 = vmatprep.mubr.msk.f32.mxu1 %vm18942_vm13, %v17169_v8  ;;  %v17546_v8 = vld [vmem:[%s18447_s5 + $0xb0] sm:$0xff]  ;;  %vm6744_vm13 = vcmask 850944  }
 0x591   : > { %11107 = vmatmul.mubr.msk.f32.gmra.mrb[104].mxu1 %vm18943_vm1, %v17187_v24  ;;  %vm6746_vm1 = vcmask 310272  }
 0x592   : > { %11117 = vmatprep.mubr.msk.f32.mxu1 %vm5718_vm0, %v17422_v17 }
 0x5c4   : > { %v10839_v37 = vpop.f32.mrb[102].mxu0 }
 0x5c5   : > { %v5051_v16 = vpop.f32.mrb[103].mxu0 }
 0x5c6   : > { %v17416_v43 = vpack.c.bf16 %v10839_v37, %v5051_v16  ;;  %v17589_v37 = vld [vmem:[%s18447_s5 + $0x70] sm:$0xff]  ;;  %v17599_v16 = vld [vmem:[%s18447_s5 + $0x88] sm:$0xff] }
 0x5cc   : > { %v10842_v7 = vpop.f32.mrb[104].mxu0 }
 0x5cd   : > { %v5061_v48 = vpop.f32.mrb[105].mxu0 }
 0x5ce   : > { %v17426_v26 = vpack.c.bf16 %v10842_v7, %v5061_v48  ;;  %v17605_v7 = vld [vmem:[%s18447_s5 + $0xa0] sm:$0xff]  ;;  %v17615_v48 = vld [vmem:[%s18447_s5 + $0xb8] sm:$0xff] }
 0x5e4   : > { %v10915_v30 = vpop.f32.mrb[106].mxu0 }
 0x5e5   : > { %v5236_v1 = vpop.f32.mrb[107].mxu0 }
 0x5e6   : > { %v17428_v31 = vpack.c.bf16 %v10915_v30, %v5236_v1 }
 0x5e8   : > { %v10918_v15 = vpop.f32.mrb[108].mxu0  ;;  %12528 = vmatprep.subr.bf16.mxu0 %v17428_v31 }
 0x5e9   : > { %v5246_v62 = vpop.f32.mrb[109].mxu0  ;;  %12529 = vmatpush3.bf16.msra.mxu0 %v18688_v60 }
 0x5ea   : > { %v17432_v44 = vpack.c.bf16 %v10918_v15, %v5246_v62 }
 0x5ec   : > { %12531 = vmatprep.subr.bf16.mxu0 %v17432_v44 }
 0x5ed   : > { %12532 = vmatpush3.bf16.msra.mxu0 %v18688_v60 }
 0x600   : > { %v10877_v63 = vpop.f32.mrb[90].mxu1 }
 0x601   : > { %v5148_v4 = vpop.f32.mrb[91].mxu1 }
 0x602   : > { %v17436_v5 = vpack.c.bf16 %v10877_v63, %v5148_v4 }
 0x604   : > { %v10991_v55 = vpop.f32.mrb[110].mxu0 }
 0x605   : > { %v5409_v20 = vpop.f32.mrb[111].mxu0 }
 0x606   : > { %v17438_v2 = vpack.c.bf16 %v10991_v55, %v5409_v20 }
 0x608   : > { %v10994_v23 = vpop.f32.mrb[112].mxu0  ;;  %12534 = vmatprep.subr.bf16.mxu0 %v17438_v2  ;;  %v10880_v36 = vpop.f32.mrb[92].mxu1 }
 0x609   : > { %v5419_v41 = vpop.f32.mrb[113].mxu0  ;;  %12535 = vmatpush3.bf16.msra.mxu0 %v18688_v60  ;;  %v5158_v33 = vpop.f32.mrb[93].mxu1 }
 0x60a   : > { %v17442_v10 = vpack.c.bf16 %v10994_v23, %v5419_v41  ;;  %v17444_v50 = vpack.c.bf16 %v10880_v36, %v5158_v33 }
 0x60c   : > { %12537 = vmatprep.subr.bf16.mxu0 %v17442_v10 }
 0x60d   : > { %12538 = vmatpush3.bf16.msra.mxu0 %v18688_v60 }
 0x60e   : > { %12540 = vmatprep.subr.bf16.mxu0 %v17436_v5 }
 0x611   : > { %12541 = vmatpush3.bf16.msra.mxu0 %v18688_v60 }
 0x612   : > { %12543 = vmatprep.subr.bf16.mxu0 %v17444_v50 }
 0x615   : > { %12544 = vmatpush3.bf16.msra.mxu0 %v18688_v60 }
 0x620   : > { %v10953_v46 = vpop.f32.mrb[94].mxu1 }
 0x621   : > { %v5321_v18 = vpop.f32.mrb[95].mxu1 }
 0x622   : > { %v17452_v11 = vpack.c.bf16 %v10953_v46, %v5321_v18 }
 0x624   : > { %v10956_v38 = vpop.f32.mrb[96].mxu1  ;;  %12546 = vmatprep.subr.bf16.mxu0 %v17452_v11 }
 0x625   : > { %v11067_v12 = vpop.f32.mrb[114].mxu0  ;;  %v5331_v3 = vpop.f32.mrb[97].mxu1  ;;  %12548 = vmatpush3.bf16.msra.mxu0 %v17416_v43 }
 0x626   : > { %v17456_v13 = vpack.c.bf16 %v10956_v38, %v5331_v3  ;;  %v5582_v21 = vpop.f32.mrb[115].mxu0 }
 0x627   : > { %v17458_v45 = vpack.c.bf16 %v11067_v12, %v5582_v21 }
 0x628   : > { %12550 = vmatprep.subr.bf16.mxu0 %v17456_v13 }
 0x629   : > { %v11070_v51 = vpop.f32.mrb[116].mxu0  ;;  %12552 = vmatpush3.bf16.msra.mxu0 %v17426_v26 }
 0x62a   : > { %v5592_v39 = vpop.f32.mrb[117].mxu0 }
 0x62b   : > { %v17472_v58 = vpack.c.bf16 %v11070_v51, %v5592_v39 }
 0x62c   : > { %5808 = vmatmul.mubr.f32.vlgmr.msra.gmra.mrb[118].mxu0 %v17465_v29 }
 0x62d   : > { %5812 = vmatprep.mubr.f32.mxu0 %v17470_v59 }
 0x630   : > { %5813 = vmatmul.mubr.f32.gmra.mrb[120].mxu0 %v17479_v35 }
 0x631   : > { %5817 = vmatprep.mubr.f32.mxu0 %v17484_v25 }
 0x634   : > { %5818 = vmatmul.mubr.f32.gmra.mrb[122].mxu0 %v17491_v49 }
 0x635   : > { %5822 = vmatprep.mubr.f32.mxu0 %v17496_v40 }
 0x638   : > { %5823 = vmatmul.mubr.f32.gmra.mrb[124].mxu0 %v17503_v56 }
 0x639   : > { %5827 = vmatprep.mubr.f32.mxu0 %v17508_v52 }
 0x63c   : > { %5828 = vmatmul.mubr.f32.gmra.mrb[126].mxu0 %v17515_v34 }
 0x63d   : > { %5832 = vmatprep.mubr.f32.mxu0 %v17520_v9 }
 0x640   : > { %v11029_v61 = vpop.f32.mrb[98].mxu1  ;;  %5833 = vmatmul.mubr.f32.gmra.mrb[128].mxu0 %v17527_v14 }
 0x641   : > { %v5494_v6 = vpop.f32.mrb[99].mxu1  ;;  %5837 = vmatprep.mubr.f32.mxu0 %v17532_v47 }
 0x642   : > { %v17541_v32 = vpack.c.bf16 %v11029_v61, %v5494_v6 }
 0x644   : > { %v11032_v22 = vpop.f32.mrb[100].mxu1  ;;  %12554 = vmatprep.subr.bf16.mxu1 %v17541_v32  ;;  %5838 = vmatmul.mubr.f32.gmra.mrb[130].mxu0 %v17539_v19 }
 0x645   : > { %v5504_v0 = vpop.f32.mrb[101].mxu1  ;;  %12556 = vmatpush3.bf16.msra.mxu1 %v17541_v32  ;;  %5842 = vmatprep.mubr.f32.mxu0 %v17546_v8 }
 0x646   : > { %v17557_v24 = vpack.c.bf16 %v11032_v22, %v5504_v0 }
 0x648   : > { %12558 = vmatprep.subr.bf16.mxu1 %v17557_v24  ;;  %5843 = vmatmul.mubr.f32.gmra.mrb[132].mxu0 %v17555_v28 }
 0x649   : > { %12560 = vmatpush3.bf16.msra.mxu1 %v17557_v24  ;;  %11137 = vmatprep.mubr.msk.f32.mxu0 %vm5718_vm0, %v17422_v17 }
 0x64a   : > { %12562 = vmatprep.subr.bf16.mxu1 %v17438_v2 }
 0x64c   : > { %11118 = vmatmul.mubr.msk.f32.vlgmr.msra.gmra.mrb[106].mxu1 %vm5718_vm0, %v17565_v53 }
 0x64d   : > { %12563 = vmatpush3.bf16.msra.mxu1 %v18688_v60  ;;  %11120 = vmatprep.mubr.msk.f32.mxu1 %vm5718_vm0, %v17573_v27 }
 0x64e   : > { %12565 = vmatprep.subr.bf16.mxu1 %v17442_v10 }
 0x650   : > { %11121 = vmatmul.mubr.msk.f32.gmra.mrb[108].mxu1 %vm5718_vm0, %v17583_v42 }
 0x651   : > { %12566 = vmatpush3.bf16.msra.mxu1 %v18688_v60  ;;  %11123 = vmatprep.mubr.msk.f32.mxu1 %vm5718_vm0, %v17589_v37 }
 0x652   : > { %12568 = vmatprep.subr.bf16.mxu1 %v17458_v45 }
 0x654   : > { %11124 = vmatmul.mubr.msk.f32.gmra.mrb[110].mxu1 %vm5718_vm0, %v17599_v16 }
 0x655   : > { %12569 = vmatpush3.bf16.msra.mxu1 %v18688_v60  ;;  %11126 = vmatprep.mubr.msk.f32.mxu1 %vm5718_vm0, %v17605_v7 }
 0x656   : > { %12571 = vmatprep.subr.bf16.mxu1 %v17472_v58 }
 0x658   : > { %11127 = vmatmul.mubr.msk.f32.gmra.mrb[112].mxu1 %vm5718_vm0, %v17615_v48 }
 0x659   : > { %12572 = vmatpush3.bf16.msra.mxu1 %v18688_v60  ;;  %6017 = vmatprep.mubr.f32.mxu1 %v17414_v54 }
 0x65a   : > { %12574 = vmatprep.subr.bf16.mxu1 %v17452_v11 }
 0x65d   : > { %12575 = vmatpush3.bf16.msra.mxu1 %v18688_v60 }
 0x65e   : > { %12577 = vmatprep.subr.bf16.mxu1 %v17456_v13 }
 0x660   : > { %v11105_v30 = vpop.f32.mrb[102].mxu1 }
 0x661   : > { %v5667_v1 = vpop.f32.mrb[103].mxu1  ;;  %12578 = vmatpush3.bf16.msra.mxu1 %v18688_v60 }
 0x662   : > { %v17626_v15 = vpack.c.bf16 %v11105_v30, %v5667_v1  ;;  %12580 = vmatprep.subr.bf16.mxu1 %v17541_v32 }
 0x664   : > { %v11108_v62 = vpop.f32.mrb[104].mxu1  ;;  %12588 = vmatprep.subr.bf16.mxu0 %v17626_v15 }
 0x665   : > { %v5677_v63 = vpop.f32.mrb[105].mxu1  ;;  %12582 = vmatpush3.bf16.msra.mxu1 %v17428_v31  ;;  %12590 = vmatpush3.bf16.msra.mxu0 %v17626_v15 }
 0x666   : > { %v17632_v4 = vpack.c.bf16 %v11108_v62, %v5677_v63  ;;  %12584 = vmatprep.subr.bf16.mxu1 %v17557_v24 }
 0x668   : > { %12592 = vmatprep.subr.bf16.mxu0 %v17632_v4 }
 0x669   : > { %12586 = vmatpush3.bf16.msra.mxu1 %v17432_v44  ;;  %12594 = vmatpush3.bf16.msra.mxu0 %v17632_v4 }
 0x66a   : > { %12595 = vmatprep.subr.bf16.mxu1 %v18688_v60  ;;  %11149 = vmatprep.subr.mxu0 %v18695_v57 }
 0x66c   : > { %6018 = vmatmul.mubr.f32.vlgmr.msra.gmra.mrb[114].mxu1 %v17465_v29  ;;  %11138 = vmatmul.mubr.msk.f32.vlgmr.msra.gmra.mrb[134].mxu0 %vm5718_vm0, %v17565_v53 }
 0x66d   : > { %12597 = vmatpush1.bf16.msra.mxu1 %v17416_v43  ;;  %6022 = vmatprep.mubr.f32.mxu1 %v17470_v59 }
 0x66e   : > { %11140 = vmatprep.mubr.msk.f32.mxu0 %vm5718_vm0, %v17573_v27  ;;  %12598 = vmatprep.subr.bf16.mxu1 %v18688_v60 }
 0x66f   : > { %11150 = vmatpush3.msra.mxu0 %v18695_v57 }
 0x670   : > { %6023 = vmatmul.mubr.f32.gmra.mrb[116].mxu1 %v17479_v35  ;;  %11141 = vmatmul.mubr.msk.f32.gmra.mrb[136].mxu0 %vm5718_vm0, %v17583_v42 }
 0x671   : > { %12600 = vmatpush1.bf16.msra.mxu1 %v17426_v26  ;;  %6027 = vmatprep.mubr.f32.mxu1 %v17484_v25 }
 0x672   : > { %11143 = vmatprep.mubr.msk.f32.mxu0 %vm5718_vm0, %v17589_v37  ;;  %12601 = vmatprep.subr.bf16.mxu1 %v18688_v60 }
 0x673   : > { %12631 = vmatprep.subr.bf16.mxu0 %v18688_v60 }
 0x674   : > { %6028 = vmatmul.mubr.f32.gmra.mrb[118].mxu1 %v17491_v49  ;;  %11144 = vmatmul.mubr.msk.f32.gmra.mrb[138].mxu0 %vm5718_vm0, %v17599_v16 }
 0x675   : > { %12603 = vmatpush1.bf16.msra.mxu1 %v17428_v31  ;;  %6032 = vmatprep.mubr.f32.mxu1 %v17496_v40 }
 0x676   : > { %11146 = vmatprep.mubr.msk.f32.mxu0 %vm5718_vm0, %v17605_v7  ;;  %12604 = vmatprep.subr.bf16.mxu1 %v18688_v60 }
 0x678   : > { %6033 = vmatmul.mubr.f32.gmra.mrb[120].mxu1 %v17503_v56  ;;  %11147 = vmatmul.mubr.msk.f32.gmra.mrb[140].mxu0 %vm5718_vm0, %v17615_v48 }
 0x679   : > { %12606 = vmatpush1.bf16.msra.mxu1 %v17432_v44  ;;  %6037 = vmatprep.mubr.f32.mxu1 %v17508_v52 }
 0x67a   : > { %11151 = vmatprep.mubr.msk.f32.mxu0 %vm5718_vm0, %v17422_v17  ;;  %12607 = vmatprep.subr.bf16.mxu1 %v18688_v60 }
 0x67c   : > { %6038 = vmatmul.mubr.f32.gmra.mrb[122].mxu1 %v17515_v34  ;;  %11152 = vmatmul.mubr.msk.f32.vlgmr.msra.gmra.mrb[142].mxu0 %vm5718_vm0, %v17565_v53 }
 0x67d   : > { %12633 = vmatpush1.bf16.msra.mxu0 %v17428_v31  ;;  %12609 = vmatpush1.bf16.msra.mxu1 %v17438_v2 }
 0x67e   : > { %6042 = vmatprep.mubr.f32.mxu1 %v17520_v9  ;;  %12634 = vmatprep.subr.bf16.mxu0 %v18688_v60 }
 0x67f   : > { %12610 = vmatprep.subr.bf16.mxu1 %v18688_v60  ;;  %11154 = vmatprep.mubr.msk.f32.mxu0 %vm5718_vm0, %v17573_v27 }
 0x680   : > { %6043 = vmatmul.mubr.f32.gmra.mrb[124].mxu1 %v17527_v14  ;;  %11155 = vmatmul.mubr.msk.f32.gmra.mrb[144].mxu0 %vm5718_vm0, %v17583_v42 }
 0x681   : > { %12636 = vmatpush1.bf16.msra.mxu0 %v17432_v44  ;;  %12612 = vmatpush1.bf16.msra.mxu1 %v17442_v10 }
 0x682   : > { %6047 = vmatprep.mubr.f32.mxu1 %v17532_v47  ;;  %12637 = vmatprep.subr.bf16.mxu0 %v18688_v60 }
 0x683   : > { %12613 = vmatprep.subr.bf16.mxu1 %v18688_v60  ;;  %11157 = vmatprep.mubr.msk.f32.mxu0 %vm5718_vm0, %v17589_v37 }
 0x684   : > { %6048 = vmatmul.mubr.f32.gmra.mrb[126].mxu1 %v17539_v19  ;;  %11158 = vmatmul.mubr.msk.f32.gmra.mrb[146].mxu0 %vm5718_vm0, %v17599_v16 }
 0x685   : > { %12639 = vmatpush1.bf16.msra.mxu0 %v17438_v2  ;;  %12615 = vmatpush1.bf16.msra.mxu1 %v17436_v5 }
 0x686   : > { %6052 = vmatprep.mubr.f32.mxu1 %v17546_v8  ;;  %12640 = vmatprep.subr.bf16.mxu0 %v18688_v60 }
 0x687   : > { %12616 = vmatprep.subr.bf16.mxu1 %v18688_v60  ;;  %11160 = vmatprep.mubr.msk.f32.mxu0 %vm5718_vm0, %v17605_v7 }
 0x688   : > { %6053 = vmatmul.mubr.f32.gmra.mrb[128].mxu1 %v17555_v28  ;;  %11161 = vmatmul.mubr.msk.f32.gmra.mrb[148].mxu0 %vm5718_vm0, %v17615_v48 }
 0x689   : > { %12642 = vmatpush1.bf16.msra.mxu0 %v17442_v10  ;;  %12618 = vmatpush1.bf16.msra.mxu1 %v17444_v50 }
 0x68a   : > { %12643 = vmatprep.subr.bf16.mxu0 %v18688_v60  ;;  %12619 = vmatprep.subr.bf16.mxu1 %v18688_v60 }
 0x68b   : > { %6235 = vmatprep.mubr.f32.mxu1 %v17414_v54  ;;  %6453 = vmatprep.mubr.f32.mxu0 %v17414_v54 }
 0x68d   : > { %12645 = vmatpush1.bf16.msra.mxu0 %v17458_v45  ;;  %12621 = vmatpush1.bf16.msra.mxu1 %v17452_v11 }
 0x68e   : > { %12646 = vmatprep.subr.bf16.mxu0 %v18688_v60  ;;  %12622 = vmatprep.subr.bf16.mxu1 %v18688_v60 }
 0x691   : > { %12648 = vmatpush1.bf16.msra.mxu0 %v17472_v58  ;;  %12624 = vmatpush1.bf16.msra.mxu1 %v17456_v13 }
 0x692   : > { %12649 = vmatprep.subr.bf16.mxu0 %v18688_v60  ;;  %12625 = vmatprep.subr.bf16.mxu1 %v18688_v60 }
 0x695   : > { %12651 = vmatpush1.bf16.msra.mxu0 %v17452_v11  ;;  %12627 = vmatpush1.bf16.msra.mxu1 %v17541_v32 }
 0x696   : > { %12652 = vmatprep.subr.bf16.mxu0 %v18688_v60  ;;  %12628 = vmatprep.subr.bf16.mxu1 %v18688_v60 }
 0x699   : > { %12654 = vmatpush1.bf16.msra.mxu0 %v17456_v13  ;;  %12630 = vmatpush1.bf16.msra.mxu1 %v17557_v24 }
 0x69a   : > { %12655 = vmatprep.subr.bf16.mxu0 %v18688_v60  ;;  %11163 = vmatprep.subr.mxu1 %v18695_v57 }
 0x69c   : > { %6236 = vmatmul.mubr.f32.vlgmr.msra.gmra.mrb[130].mxu1 %v17465_v29 }
 0x69d   : > { %12657 = vmatpush1.bf16.msra.mxu0 %v17541_v32  ;;  %6240 = vmatprep.mubr.f32.mxu1 %v17470_v59 }
 0x69e   : > { %12658 = vmatprep.subr.bf16.mxu0 %v18688_v60  ;;  %11164 = vmatpush3.msra.mxu1 %v18695_v57 }
 0x6a0   : > { %6241 = vmatmul.mubr.f32.gmra.mrb[132].mxu1 %v17479_v35 }
 0x6a1   : > { %12660 = vmatpush1.bf16.msra.mxu0 %v17557_v24  ;;  %6245 = vmatprep.mubr.f32.mxu1 %v17484_v25 }
 0x6a2   : > { %12661 = vmatprep.subr.bf16.mxu0 %v18688_v60 }
 0x6a4   : > { %6246 = vmatmul.mubr.f32.gmra.mrb[134].mxu1 %v17491_v49 }
 0x6a5   : > { %12663 = vmatpush1.bf16.msra.mxu0 %v17626_v15  ;;  %6250 = vmatprep.mubr.f32.mxu1 %v17496_v40 }
 0x6a6   : > { %12664 = vmatprep.subr.bf16.mxu0 %v18688_v60 }
 0x6a8   : > { %6251 = vmatmul.mubr.f32.gmra.mrb[136].mxu1 %v17503_v56 }
 0x6a9   : > { %12666 = vmatpush1.bf16.msra.mxu0 %v17632_v4  ;;  %6255 = vmatprep.mubr.f32.mxu1 %v17508_v52 }
 0x6ac   : > { %6256 = vmatmul.mubr.f32.gmra.mrb[138].mxu1 %v17515_v34  ;;  %6454 = vmatmul.mubr.f32.vlgmr.msra.gmra.mrb[150].mxu0 %v17465_v29 }
 0x6ad   : > { %6260 = vmatprep.mubr.f32.mxu1 %v17520_v9  ;;  %6458 = vmatprep.mubr.f32.mxu0 %v17470_v59 }
 0x6b0   : > { %6261 = vmatmul.mubr.f32.gmra.mrb[140].mxu1 %v17527_v14  ;;  %6459 = vmatmul.mubr.f32.gmra.mrb[152].mxu0 %v17479_v35 }
 0x6b1   : > { %6265 = vmatprep.mubr.f32.mxu1 %v17532_v47  ;;  %6463 = vmatprep.mubr.f32.mxu0 %v17484_v25 }
 0x6b4   : > { %6266 = vmatmul.mubr.f32.gmra.mrb[142].mxu1 %v17539_v19  ;;  %6464 = vmatmul.mubr.f32.gmra.mrb[154].mxu0 %v17491_v49 }
 0x6b5   : > { %6270 = vmatprep.mubr.f32.mxu1 %v17546_v8  ;;  %6468 = vmatprep.mubr.f32.mxu0 %v17496_v40 }
 0x6b8   : > { %6271 = vmatmul.mubr.f32.gmra.mrb[144].mxu1 %v17555_v28  ;;  %6469 = vmatmul.mubr.f32.gmra.mrb[156].mxu0 %v17503_v56 }
 0x6b9   : > { %6473 = vmatprep.mubr.f32.mxu0 %v17508_v52  ;;  %11165 = vmatprep.mubr.msk.f32.mxu1 %vm5718_vm0, %v17422_v17 }
 0x6bc   : > { %6474 = vmatmul.mubr.f32.gmra.mrb[158].mxu0 %v17515_v34  ;;  %11166 = vmatmul.mubr.msk.f32.vlgmr.msra.gmra.mrb[146].mxu1 %vm5718_vm0, %v17565_v53 }
 0x6bd   : > { %6478 = vmatprep.mubr.f32.mxu0 %v17520_v9  ;;  %11168 = vmatprep.mubr.msk.f32.mxu1 %vm5718_vm0, %v17573_v27 }
 0x6c0   : > { %6479 = vmatmul.mubr.f32.gmra.mrb[160].mxu0 %v17527_v14  ;;  %11169 = vmatmul.mubr.msk.f32.gmra.mrb[148].mxu1 %vm5718_vm0, %v17583_v42 }
 0x6c1   : > { %6483 = vmatprep.mubr.f32.mxu0 %v17532_v47  ;;  %11171 = vmatprep.mubr.msk.f32.mxu1 %vm5718_vm0, %v17589_v37 }
 0x6c4   : > { %6484 = vmatmul.mubr.f32.gmra.mrb[162].mxu0 %v17539_v19  ;;  %11172 = vmatmul.mubr.msk.f32.gmra.mrb[150].mxu1 %vm5718_vm0, %v17599_v16 }
 0x6c5   : > { %6488 = vmatprep.mubr.f32.mxu0 %v17546_v8  ;;  %11174 = vmatprep.mubr.msk.f32.mxu1 %vm5718_vm0, %v17605_v7 }
 0x6c8   : > { %6489 = vmatmul.mubr.f32.gmra.mrb[164].mxu0 %v17555_v28  ;;  %11175 = vmatmul.mubr.msk.f32.gmra.mrb[152].mxu1 %vm5718_vm0, %v17615_v48 }
 0x6ff   : > { %v10124_v54 = vpop.f32.mrb[118].mxu0 }
 0x700   : > { %v10125_v43 = vpop.f32.mrb[119].mxu0 }
 0x701   : > { %v10126_v17 = vadd.f32 %v10125_v43, %v10124_v54 }
 0x703   : > { %v10127_v26 = vpop.f32.mrb[120].mxu0 }
 0x704   : > { %v10128_v31 = vpop.f32.mrb[121].mxu0 }
 0x705   : > { %v10129_v44 = vadd.f32 %v10128_v31, %v10127_v26 }
 0x707   : > { %v10130_v5 = vpop.f32.mrb[122].mxu0 }
 0x708   : > { %v10131_v55 = vpop.f32.mrb[123].mxu0 }
 0x709   : > { %v10132_v20 = vadd.f32 %v10131_v55, %v10130_v5 }
 0x70b   : > { %v10133_v2 = vpop.f32.mrb[124].mxu0 }
 0x70c   : > { %v10134_v23 = vpop.f32.mrb[125].mxu0 }
 0x70d   : > { %v10135_v36 = vadd.f32 %v10134_v23, %v10133_v2 }
 0x70f   : > { %v10136_v41 = vpop.f32.mrb[126].mxu0 }
 0x710   : > { %v10137_v33 = vpop.f32.mrb[127].mxu0 }
 0x711   : > { %v10138_v10 = vadd.f32 %v10137_v33, %v10136_v41 }
 0x713   : > { %v10139_v50 = vpop.f32.mrb[128].mxu0 }
 0x714   : > { %v10140_v46 = vpop.f32.mrb[129].mxu0 }
 0x715   : > { %v10141_v18 = vadd.f32 %v10140_v46, %v10139_v50 }
 0x717   : > { %v10142_v11 = vpop.f32.mrb[130].mxu0 }
 0x718   : > { %v10143_v38 = vpop.f32.mrb[131].mxu0 }
 0x719   : > { %v10144_v12 = vadd.f32 %v10143_v38, %v10142_v11 }
 0x71b   : > { %v10145_v3 = vpop.f32.mrb[132].mxu0 }
 0x71c   : > { %v10146_v13 = vpop.f32.mrb[133].mxu0 }
 0x71d   : > { %v10147_v21 = vadd.f32 %v10146_v13, %v10145_v3 }
 0x71f   : > { %v11119_v45 = vpop.f32.mrb[106].mxu1 }
 0x720   : > { %v17783_v51 = vadd.f32 %v11119_v45, %v10129_v44  ;;  %v5914_v29 = vpop.f32.mrb[107].mxu1 }
 0x721   : > { %v17785_v39 = vadd.f32 %v10126_v17, %v5914_v29 }
 0x723   : > { %v11122_v59 = vpop.f32.mrb[108].mxu1 }
 0x724   : > { %v17787_v58 = vadd.f32 %v11122_v59, %v10135_v36  ;;  %v5924_v35 = vpop.f32.mrb[109].mxu1 }
 0x725   : > { %v17789_v25 = vadd.f32 %v10132_v20, %v5924_v35 }
 0x727   : > { %v11125_v49 = vpop.f32.mrb[110].mxu1 }
 0x728   : > { %v17791_v40 = vadd.f32 %v11125_v49, %v10141_v18  ;;  %v5934_v56 = vpop.f32.mrb[111].mxu1 }
 0x729   : > { %v17793_v52 = vadd.f32 %v10138_v10, %v5934_v56 }
 0x72b   : > { %v11128_v34 = vpop.f32.mrb[112].mxu1 }
 0x72c   : > { %v5944_v9 = vpop.f32.mrb[113].mxu1  ;;  %v17795_v14 = vadd.f32 %v11128_v34, %v10147_v21 }
 0x72d   : > { %v17797_v47 = vadd.f32 %v10144_v12, %v5944_v9 }
 0x73f   : > { %v10192_v61 = vpop.f32.mrb[114].mxu1  ;;  %v11139_v6 = vpop.f32.mrb[134].mxu0 }
 0x740   : > { %v10193_v19 = vpop.f32.mrb[115].mxu1  ;;  %v6124_v32 = vpop.f32.mrb[135].mxu0 }
 0x741   : > { %v10194_v8 = vadd.f32 %v10193_v19, %v10192_v61  ;;  %v7120_v61 = vld [vmem:[#allocation2 + $0x80] sm:$0xff] }
 0x742   : > { %v7104_v19 = vld [vmem:[#allocation2] sm:$0xff] }
 0x743   : > { %v17799_v22 = vadd.f32 %v10194_v8, %v6124_v32  ;;  %v10195_v0 = vpop.f32.mrb[116].mxu1  ;;  %v11142_v28 = vpop.f32.mrb[136].mxu0  ;;  %v7105_v8 = vld [vmem:[#allocation2 + $0x8] sm:$0xff] }
 0x744   : > { %v10196_v24 = vpop.f32.mrb[117].mxu1  ;;  %v6134_v53 = vpop.f32.mrb[137].mxu0 }
 0x745   : > { %v6163_v27 = vmax.f32 %v17785_v39, %v17799_v22  ;;  %v10197_v42 = vadd.f32 %v10196_v24, %v10195_v0  ;;  %v7122_v0 = vld [vmem:[#allocation2 + $0x90] sm:$0xff] }
 0x747   : > { %v17803_v37 = vadd.f32 %v11139_v6, %v10197_v42  ;;  %v10198_v16 = vpop.f32.mrb[118].mxu1  ;;  %v11145_v7 = vpop.f32.mrb[138].mxu0  ;;  %v7121_v6 = vld [vmem:[#allocation2 + $0x88] sm:$0xff] }
 0x748   : > { %v10199_v48 = vpop.f32.mrb[119].mxu1  ;;  %v6144_v30 = vpop.f32.mrb[139].mxu0  ;;  %v12667_v32 = vpack.c.bf16 %v7121_v6, %v7120_v61 }
 0x749   : > { %v10200_v1 = vadd.f32 %v10199_v48, %v10198_v16  ;;  %v6164_v15 = vmax.f32 %v17783_v51, %v17803_v37  ;;  %v7106_v16 = vld [vmem:[#allocation2 + $0x10] sm:$0xff]  ;;  %v7124_v48 = vld [vmem:[#allocation2 + $0xa0] sm:$0xff] }
 0x74a   : > { %12668 = vmatprep.subr.bf16.mxu1 %v12667_v32 }
 0x74b   : > { %v17807_v62 = vadd.f32 %v10200_v1, %v6134_v53  ;;  %v10201_v63 = vpop.f32.mrb[120].mxu1  ;;  %v11148_v4 = vpop.f32.mrb[140].mxu0  ;;  %v12669_v53 = vpack.c.bf16 %v7105_v8, %v7104_v19 }
 0x74c   : > { %v10202_v54 = vpop.f32.mrb[121].mxu1  ;;  %v6154_v43 = vpop.f32.mrb[141].mxu0 }
 0x74d   : > { %v6165_v17 = vmax.f32 %v17789_v25, %v17807_v62  ;;  %v10203_v26 = vadd.f32 %v10202_v54, %v10201_v63  ;;  %12670 = vmatpush3.bf16.msra.mxu1 %v12669_v53 }
 0x74f   : > { %v17811_v31 = vadd.f32 %v11142_v28, %v10203_v26  ;;  %v10204_v44 = vpop.f32.mrb[122].mxu1  ;;  %v17813_v5 = vpop.f32.mrb[142].mxu0  ;;  %v7123_v28 = vld [vmem:[#allocation2 + $0x98] sm:$0xff]  ;;  %v7109_v26 = vld [vmem:[#allocation2 + $0x28] sm:$0xff] }
 0x750   : > { %v10205_v55 = vpop.f32.mrb[123].mxu1  ;;  %v17815_v20 = vpop.f32.mrb[143].mxu0  ;;  %v12671_v42 = vpack.c.bf16 %v7123_v28, %v7122_v0 }
 0x751   : > { %v10206_v2 = vadd.f32 %v10205_v55, %v10204_v44  ;;  %v6166_v23 = vmax.f32 %v17787_v58, %v17811_v31  ;;  %v7126_v44 = vld [vmem:[#allocation2 + $0xb0] sm:$0xff]  ;;  %v7127_v55 = vld [vmem:[#allocation2 + $0xb8] sm:$0xff] }
 0x752   : > { %12672 = vmatprep.subr.bf16.mxu1 %v12671_v42 }
 0x753   : > { %v17819_v36 = vadd.f32 %v10206_v2, %v6144_v30  ;;  %v10207_v41 = vpop.f32.mrb[124].mxu1  ;;  %v17821_v33 = vpop.f32.mrb[144].mxu0  ;;  %v7125_v30 = vld [vmem:[#allocation2 + $0xa8] sm:$0xff]  ;;  %v12679_v2 = vpack.c.bf16 %v7127_v55, %v7126_v44 }
 0x754   : > { %v10208_v10 = vpop.f32.mrb[125].mxu1  ;;  %v17823_v50 = vpop.f32.mrb[145].mxu0  ;;  %v12675_v54 = vpack.c.bf16 %v7125_v30, %v7124_v48 }
 0x755   : > { %v6167_v46 = vmax.f32 %v17793_v52, %v17819_v36  ;;  %v10209_v18 = vadd.f32 %v10208_v10, %v10207_v41  ;;  %v7110_v41 = vld [vmem:[#allocation2 + $0x30] sm:$0xff]  ;;  %v7111_v10 = vld [vmem:[#allocation2 + $0x38] sm:$0xff] }
 0x757   : > { %v17827_v11 = vadd.f32 %v11145_v7, %v10209_v18  ;;  %v10210_v38 = vpop.f32.mrb[126].mxu1  ;;  %v17829_v12 = vpop.f32.mrb[146].mxu0  ;;  %v7107_v7 = vld [vmem:[#allocation2 + $0x18] sm:$0xff]  ;;  %v7128_v18 = vld [vmem:[#allocation2 + $0xc0] sm:$0xff] }
 0x758   : > { %v10211_v3 = vpop.f32.mrb[127].mxu1  ;;  %v17831_v13 = vpop.f32.mrb[147].mxu0  ;;  %v12673_v63 = vpack.c.bf16 %v7107_v7, %v7106_v16 }
 0x759   : > { %v10212_v21 = vadd.f32 %v10211_v3, %v10210_v38  ;;  %v6168_v45 = vmax.f32 %v17791_v40, %v17827_v11  ;;  %v7129_v38 = vld [vmem:[#allocation2 + $0xc8] sm:$0xff]  ;;  %v12681_v3 = vpack.c.bf16 %v7111_v10, %v7110_v41  ;;  %v6620_v40 = vpop.permute.xlu0 %6619  ;;  %v6610_v11 = vpop.permute.xlu1 %6609  ;;  %v7130_v41 = vld [vmem:[#allocation2 + $0xd0] sm:$0xff]  ;;  %v7131_v10 = vld [vmem:[#allocation2 + $0xd8] sm:$0xff] }
 0x75a   : > { %12674 = vmatpush3.bf16.msra.mxu1 %v12673_v63 }
 0x75b   : > { %v17835_v29 = vadd.f32 %v10212_v21, %v6154_v43  ;;  %v10213_v59 = vpop.f32.mrb[128].mxu1  ;;  %v17837_v35 = vpop.f32.mrb[148].mxu0  ;;  %v7108_v43 = vld [vmem:[#allocation2 + $0x20] sm:$0xff]  ;;  %12676 = vmatprep.subr.bf16.mxu1 %v12675_v54  ;;  %v12683_v21 = vpack.c.bf16 %v7129_v38, %v7128_v18 }
 0x75c   : > { %v10214_v49 = vpop.f32.mrb[129].mxu1  ;;  %v17839_v56 = vpop.f32.mrb[149].mxu0 }
 0x75d   : > { %v6169_v34 = vmax.f32 %v17797_v47, %v17835_v29  ;;  %v10215_v9 = vadd.f32 %v10214_v49, %v10213_v59  ;;  %v7112_v59 = vld [vmem:[#allocation2 + $0x40] sm:$0xff]  ;;  %v7113_v49 = vld [vmem:[#allocation2 + $0x48] sm:$0xff] }
 0x75f   : > { %v17843_v24 = vadd.f32 %v11148_v4, %v10215_v9  ;;  %v12677_v4 = vpack.c.bf16 %v7109_v26, %v7108_v43  ;;  %v12685_v9 = vpack.c.bf16 %v7113_v49, %v7112_v59  ;;  %v7115_v59 = vld [vmem:[#allocation2 + $0x58] sm:$0xff] }
 0x761   : > { %v6170_v1 = vmax.f32 %v17795_v14, %v17843_v24  ;;  %12678 = vmatpush3.bf16.msra.mxu1 %v12677_v4 }
 0x762   : > { %12680 = vmatprep.subr.bf16.mxu1 %v12679_v2 }
 0x765   : > { %12682 = vmatpush3.bf16.msra.mxu1 %v12681_v3 }
 0x766   : > { %12684 = vmatprep.subr.bf16.mxu1 %v12683_v21  ;;  %v12687_v21 = vpack.c.bf16 %v7131_v10, %v7130_v41  ;;  %v7116_v41 = vld [vmem:[#allocation2 + $0x60] sm:$0xff] }
 0x769   : > { %12686 = vmatpush3.bf16.msra.mxu1 %v12685_v9  ;;  %v7152_v9 = vld [vmem:[#allocation2 + $0x180] sm:$0xff] }
 0x76a   : > { %12688 = vmatprep.subr.bf16.mxu1 %v12687_v21  ;;  %v7154_v21 = vld [vmem:[#allocation2 + $0x190] sm:$0xff] }
 0x76f   : > { %v6237_v61 = vpop.f32.mrb[130].mxu1 }
 0x770   : > { %v6343_v6 = vadd.f32 %v17815_v20, %v6237_v61  ;;  %v6239_v19 = vpop.f32.mrb[131].mxu1  ;;  %v7153_v61 = vld [vmem:[#allocation2 + $0x188] sm:$0xff] }
 0x772   : > { %v6381_v32 = vmax.f32 %v6163_v27, %v6343_v6  ;;  %v6615_v6 = vpop.permute.xlu0 %6614 }
 0x773   : > { %v6242_v8 = vpop.f32.mrb[132].mxu1 }
 0x774   : > { %v6348_v0 = vadd.f32 %v17813_v5, %v6242_v8  ;;  %v6244_v28 = vpop.f32.mrb[133].mxu1 }
 0x775   : > { %v6625_v28 = vpop.permute.xlu1 %6624 }
 0x776   : > { %v17855_v53 = vmax.f32 %v6164_v15, %v6348_v0  ;;  %v12699_v0 = vpack.c.bf16 %v7153_v61, %v7152_v9  ;;  %v7135_v9 = vld [vmem:[#allocation2 + $0xf8] sm:$0xff] }
 0x777   : > { %v6247_v42 = vpop.f32.mrb[134].mxu1 }
 0x778   : > { %v6353_v16 = vadd.f32 %v17823_v50, %v6247_v42  ;;  %v6249_v7 = vpop.f32.mrb[135].mxu1  ;;  %12700 = vmatprep.subr.bf16.mxu0 %v12699_v0 }
 0x77a   : > { %v17861_v20 = vmax.f32 %v6165_v17, %v6353_v16 }
 0x77b   : > { %v6252_v39 = vpop.f32.mrb[136].mxu1 }
 0x77c   : > { %v6358_v22 = vadd.f32 %v17821_v33, %v6252_v39  ;;  %v6254_v27 = vpop.f32.mrb[137].mxu1 }
 0x77e   : > { %v6384_v5 = vmax.f32 %v6166_v23, %v6358_v22 }
 0x77f   : > { %v6257_v51 = vpop.f32.mrb[138].mxu1  ;;  %v6455_v37 = vpop.f32.mrb[150].mxu0 }
 0x780   : > { %v6363_v15 = vadd.f32 %v17831_v13, %v6257_v51  ;;  %v6259_v48 = vpop.f32.mrb[139].mxu1  ;;  %v6457_v50 = vpop.f32.mrb[151].mxu0 }
 0x782   : > { %v17871_v25 = vmax.f32 %v6167_v46, %v6363_v15 }
 0x783   : > { %v6262_v62 = vpop.f32.mrb[140].mxu1  ;;  %v6460_v17 = vpop.f32.mrb[152].mxu0 }
 0x784   : > { %v6368_v33 = vadd.f32 %v17829_v12, %v6262_v62  ;;  %v6264_v30 = vpop.f32.mrb[141].mxu1  ;;  %v6462_v63 = vpop.f32.mrb[153].mxu0 }
 0x786   : > { %v17877_v58 = vmax.f32 %v6168_v45, %v6368_v33 }
 0x787   : > { %v6267_v31 = vpop.f32.mrb[142].mxu1  ;;  %v6465_v23 = vpop.f32.mrb[154].mxu0 }
 0x788   : > { %v6373_v13 = vadd.f32 %v17839_v56, %v6267_v31  ;;  %v6269_v54 = vpop.f32.mrb[143].mxu1  ;;  %v6467_v43 = vpop.f32.mrb[155].mxu0 }
 0x78a   : > { %v17883_v52 = vmax.f32 %v6169_v34, %v6373_v13 }
 0x78b   : > { %v6272_v36 = vpop.f32.mrb[144].mxu1  ;;  %v6470_v46 = vpop.f32.mrb[156].mxu0 }
 0x78c   : > { %v6378_v12 = vadd.f32 %v17837_v35, %v6272_v36  ;;  %v6274_v26 = vpop.f32.mrb[145].mxu1  ;;  %v6472_v44 = vpop.f32.mrb[157].mxu0  ;;  %v7114_v35 = vld [vmem:[#allocation2 + $0x50] sm:$0xff] }
 0x78e   : > { %v17889_v45 = vmax.f32 %v6170_v1, %v6378_v12  ;;  %v12689_v1 = vpack.c.bf16 %v7115_v59, %v7114_v35 }
 0x78f   : > { %v11167_v56 = vpop.f32.mrb[146].mxu1  ;;  %v6475_v55 = vpop.f32.mrb[158].mxu0 }
 0x790   : > { %v6566_v4 = vadd.f32 %v11167_v56, %v6460_v17  ;;  %v6560_v2 = vpop.f32.mrb[147].mxu1  ;;  %v6477_v47 = vpop.f32.mrb[159].mxu0  ;;  %12690 = vmatpush3.bf16.msra.mxu1 %v12689_v1  ;;  %v7133_v56 = vld [vmem:[#allocation2 + $0xe8] sm:$0xff]  ;;  %v7134_v1 = vld [vmem:[#allocation2 + $0xf0] sm:$0xff] }
 0x791   : > { %v6561_v29 = vadd.f32 %v6560_v2, %v6455_v37 }
 0x792   : > { %v6600_v34 = vmax.f32 %v17855_v53, %v6566_v4 }
 0x793   : > { %v6599_v18 = vmax.f32 %v6381_v32, %v6561_v29  ;;  %v11170_v38 = vpop.f32.mrb[148].mxu1  ;;  %v6480_v3 = vpop.f32.mrb[160].mxu0  ;;  %v7136_v29 = vld [vmem:[#allocation2 + $0x100] sm:$0xff] }
 0x794   : > { %v6576_v49 = vadd.f32 %v11170_v38, %v6470_v46  ;;  %v6570_v14 = vpop.f32.mrb[149].mxu1  ;;  %v6482_v24 = vpop.f32.mrb[161].mxu0  ;;  %v6648_v53 = vadd.f32 %v6615_v6, %v6600_v34  ;;  %v7137_v34 = vld [vmem:[#allocation2 + $0x108] sm:$0xff] }
 0x795   : > { %v6647_v19 = vadd.f32 %v6610_v11, %v6599_v18  ;;  %v6571_v8 = vadd.f32 %v6570_v14, %v6465_v23  ;;  %v7132_v11 = vld [vmem:[#allocation2 + $0xe0] sm:$0xff]  ;;  %v7155_v24 = vld [vmem:[#allocation2 + $0x198] sm:$0xff] }
 0x796   : > { %v6602_v42 = vmax.f32 %v6384_v5, %v6576_v49  ;;  %v17899_v50 = vmax.f32 %v6648_v53, 0.0  ;;  %v12691_v53 = vpack.c.bf16 %v7133_v56, %v7132_v11  ;;  %v7140_v11 = vld [vmem:[#allocation2 + $0x120] sm:$0xff]  ;;  %v7141_v56 = vld [vmem:[#allocation2 + $0x128] sm:$0xff] }
 0x797   : > { %v6601_v32 = vmax.f32 %v17861_v20, %v6571_v8  ;;  %v11173_v16 = vpop.f32.mrb[150].mxu1  ;;  %v6485_v7 = vpop.f32.mrb[162].mxu0  ;;  %v17895_v37 = vmax.f32 %v6647_v19, 0.0  ;;  %v7138_v8 = vld [vmem:[#allocation2 + $0x110] sm:$0xff] }
 0x798   : > { %v6650_v39 = vadd.f32 %v6625_v28, %v6602_v42  ;;  %v17893_v22 = vadd.f32 %v11173_v16, %v6480_v3  ;;  %v6580_v27 = vpop.f32.mrb[151].mxu1  ;;  %v6487_v51 = vpop.f32.mrb[163].mxu0  ;;  %v6704_v44 = vrot.slane %v17899_v50, 3  ;;  %v6708_v10 = vrot.slane %v17899_v50, 4  ;;  %v7117_v3 = vld [vmem:[#allocation2 + $0x68] sm:$0xff]  ;;  %v7118_v16 = vld [vmem:[#allocation2 + $0x70] sm:$0xff]  ;;  %12692 = vmatprep.subr.bf16.mxu1 %v12691_v53 }
 0x799   : > { %v6649_v15 = vadd.f32 %v6620_v40, %v6601_v32  ;;  %v17897_v48 = vadd.f32 %v6580_v27, %v6475_v55  ;;  %v6668_v54 = vrot.slane %v17895_v37, 2  ;;  %v6672_v26 = vrot.slane %v17895_v37, 3  ;;  %v7139_v32 = vld [vmem:[#allocation2 + $0x118] sm:$0xff] }
 0x79a   : > { %v17901_v62 = vmax.f32 %v6650_v39, 0.0  ;;  %v6664_v4 = vrot.slane %v17895_v37, 1  ;;  %v6716_v18 = vrot.slane %v17899_v50, 6  ;;  %v6676_v59 = vrot.slane %v17895_v37, 4  ;;  %v5715_v39 = vld [vmem:[%s18448_s6 + $0x28] sm:$0xff]  ;;  %v7163_v53 = vld [vmem:[#allocation2 + $0x1d8] sm:$0xff] }
 0x79b   : > { %v17903_v5 = vmax.f32 %v6649_v15, 0.0  ;;  %v6603_v20 = vmax.f32 %v17871_v25, %v17897_v48  ;;  %v6490_v17 = vpop.f32.mrb[164].mxu0  ;;  %v11176_v33 = vpop.f32.mrb[152].mxu1  ;;  %v6712_v49 = vrot.slane %v17899_v50, 5  ;;  %v12701_v42 = vpack.c.bf16 %v7137_v34, %v7136_v29 }
 0x79c   : > { %v17907_v30 = vadd.f32 %v11176_v33, %v6490_v17  ;;  %v6590_v63 = vpop.f32.mrb[153].mxu1  ;;  %v13326_v31 = vpack.i.bf16 %v17901_v62, %v17899_v50  ;;  %v6492_v36 = vpop.f32.mrb[165].mxu0  ;;  %v6793_v40 = vrot.slane %v17901_v62, 3  ;;  %v6797_v35 = vrot.slane %v17901_v62, 4  ;;  %v7156_v17 = vld [vmem:[#allocation2 + $0x1a0] sm:$0xff]  ;;  %v7157_v33 = vld [vmem:[#allocation2 + $0x1a8] sm:$0xff] }
 0x79d   : > { %v17911_v23 = vadd.f32 %v6590_v63, %v6485_v7  ;;  %v6753_v13 = vrot.slane %v17903_v5, 1  ;;  %v6757_v43 = vrot.slane %v17903_v5, 2  ;;  %v6761_v46 = vrot.slane %v17903_v5, 3  ;;  %v7119_v7 = vld [vmem:[#allocation2 + $0x78] sm:$0xff]  ;;  %12702 = vmatpush3.bf16.msra.mxu0 %v12701_v42 }
 0x79e   : > { %v6765_v2 = vrot.slane %v17903_v5, 4  ;;  %v17924_v47 = vpack.i.bf16 %v6793_v40, %v6704_v44  ;;  %v6805_v38 = vrot.slane %v17901_v62, 6  ;;  %v6801_v14 = vrot.slane %v17901_v62, 5 }
 0x79f   : > { %6754 = vrot.lane.b32.xlu1 %v6753_v13, %s13563_s28  ;;  %v13296_v12 = vpack.i.bf16 %v6668_v54, %v6757_v43  ;;  %v13301_v55 = vpack.i.bf16 %v6761_v46, %v6672_v26  ;;  %v6773_v61 = vrot.slane %v17903_v5, 6  ;;  %v17935_v6 = vpack.i.bf16 %v6797_v35, %v6708_v10  ;;  %v7184_v54 = vld [vmem:[#allocation2 + $0x280] sm:$0xff]  ;;  %v7185_v43 = vld [vmem:[#allocation2 + $0x288] sm:$0xff] }
 0x7a0   : > { %v17937_v19 = vpack.i.bf16 %v6805_v38, %v6716_v18  ;;  %v13306_v0 = vpack.i.bf16 %v6765_v2, %v6676_v59  ;;  %v17940_v28 = vpack.i.bf16 %v6712_v49, %v6801_v14  ;;  %v12693_v27 = vpack.c.bf16 %v7117_v3, %v7116_v41  ;;  %v7159_v2 = vld [vmem:[#allocation2 + $0x1b8] sm:$0xff]  ;;  %v7160_v49 = vld [vmem:[#allocation2 + $0x1c0] sm:$0xff]  ;;  %v7161_v14 = vld [vmem:[#allocation2 + $0x1c8] sm:$0xff] }
 0x7a1   : > { %13297 = vrot.lane.b32.xlu0 %v13296_v12, %s13564_s8  ;;  %v12703_v51 = vpack.c.bf16 %v7155_v24, %v7154_v21  ;;  %v12695_v15 = vpack.c.bf16 %v7135_v9, %v7134_v1  ;;  %v6684_v63 = vrot.slane %v17895_v37, 6  ;;  %v6777_v13 = vrot.slane %v17903_v5, 7  ;;  %v7142_v21 = vld [vmem:[#allocation2 + $0x130] sm:$0xff]  ;;  %v7143_v59 = vld [vmem:[#allocation2 + $0x138] sm:$0xff] }
 0x7a2   : > { %12694 = vmatpush3.bf16.msra.mxu1 %v12693_v27  ;;  %v12705_v36 = vpack.c.bf16 %v7139_v32, %v7138_v8  ;;  %v12697_v46 = vpack.c.bf16 %v7119_v7, %v7118_v16  ;;  %v6688_v26 = vrot.slane %v17895_v37, 7  ;;  %v6769_v44 = vrot.slane %v17903_v5, 5  ;;  %v7145_v8 = vld [vmem:[#allocation2 + $0x148] sm:$0xff]  ;;  %v7146_v7 = vld [vmem:[#allocation2 + $0x150] sm:$0xff]  ;;  %v7164_v27 = vld [vmem:[#allocation2 + $0x1e0] sm:$0xff] }
 0x7a3   : > { %13302 = vrot.lane.b32.xlu1 %v13301_v55, %s13565_s29  ;;  %v13311_v12 = vpack.i.bf16 %v6773_v61, %v6684_v63  ;;  %12704 = vmatprep.subr.bf16.mxu0 %v12703_v51  ;;  %v12707_v40 = vpack.c.bf16 %v7157_v33, %v7156_v17  ;;  %v6680_v55 = vrot.slane %v17895_v37, 5  ;;  %v12731_v29 = vpack.c.bf16 %v7185_v43, %v7184_v54  ;;  %v7144_v61 = vld [vmem:[#allocation2 + $0x140] sm:$0xff]  ;;  %v7165_v51 = vld [vmem:[#allocation2 + $0x1e8] sm:$0xff]  ;;  %v7166_v54 = vld [vmem:[#allocation2 + $0x1f0] sm:$0xff] }
 0x7a4   : > { %12696 = vmatprep.subr.bf16.mxu1 %v12695_v15  ;;  %v13316_v34 = vpack.i.bf16 %v6777_v13, %v6688_v26  ;;  %v6604_v41 = vmax.f32 %v17877_v58, %v17893_v22  ;;  %v6605_v10 = vmax.f32 %v17883_v52, %v17911_v23  ;;  %v6606_v35 = vmax.f32 %v17889_v45, %v17907_v30  ;;  %v7148_v63 = vld [vmem:[#allocation2 + $0x160] sm:$0xff]  ;;  %v7149_v13 = vld [vmem:[#allocation2 + $0x168] sm:$0xff]  ;;  %v7167_v43 = vld [vmem:[#allocation2 + $0x1f8] sm:$0xff] }
 0x7a5   : > { %6665 = vrot.lane.b32.xlu0 %v6664_v4, %s13563_s28  ;;  %v7158_v4 = vld [vmem:[#allocation2 + $0x1b0] sm:$0xff]  ;;  %12706 = vmatpush3.bf16.msra.mxu0 %v12705_v36  ;;  %v12709_v18 = vpack.c.bf16 %v7141_v56, %v7140_v11  ;;  %v13321_v38 = vpack.i.bf16 %v6680_v55, %v6769_v44  ;;  %v12713_v24 = vpack.c.bf16 %v7143_v59, %v7142_v21  ;;  %v6785_v1 = vrot.slane %v17901_v62, 1  ;;  %v7151_v26 = vld [vmem:[#allocation2 + $0x178] sm:$0xff]  ;;  %v6630_v44 = vpop.permute.xlu0 %6629  ;;  %v7216_v55 = vld [vmem:[#allocation2 + $0x380] sm:$0xff] }
 0x7a6   : > { %12698 = vmatpush3.bf16.msra.mxu1 %v12697_v46  ;;  %12708 = vmatprep.subr.bf16.mxu0 %v12707_v40  ;;  %v12711_v3 = vpack.c.bf16 %v7159_v2, %v7158_v4  ;;  %v12715_v9 = vpack.c.bf16 %v7161_v14, %v7160_v49  ;;  %v6789_v42 = vrot.slane %v17901_v62, 2  ;;  %v12717_v32 = vpack.c.bf16 %v7145_v8, %v7144_v61  ;;  %v5716_v36 = vld [vmem:[%s18448_s6 + $0x30] sm:$0xff]  ;;  %v7217_v4 = vld [vmem:[#allocation2 + $0x388] sm:$0xff]  ;;  %v7168_v14 = vld [vmem:[#allocation2 + $0x200] sm:$0xff] }
 0x7a7   : > { %13307 = vrot.lane.b32.xlu1 %v13306_v0, %s13566_s25  ;;  %12732 = vmatprep.subr.bf16.mxu1 %v12731_v29  ;;  %v7162_v0 = vld [vmem:[#allocation2 + $0x1d0] sm:$0xff]  ;;  %v6696_v17 = vrot.slane %v17899_v50, 1  ;;  %v12723_v33 = vpack.c.bf16 %v7165_v51, %v7164_v27  ;;  %v12725_v46 = vpack.c.bf16 %v7149_v13, %v7148_v63  ;;  %v6651_v40 = vadd.f32 %v6630_v44, %v6603_v20  ;;  %v7188_v51 = vld [vmem:[#allocation2 + $0x2a0] sm:$0xff] }
 0x7a8   : > { %v12719_v16 = vpack.c.bf16 %v7163_v53, %v7162_v0  ;;  %v6720_v56 = vrot.slane %v17899_v50, 7  ;;  %v12763_v2 = vpack.c.bf16 %v7217_v4, %v7216_v55  ;;  %v6809_v61 = vrot.slane %v17901_v62, 7  ;;  %v7186_v8 = vld [vmem:[#allocation2 + $0x290] sm:$0xff]  ;;  %v7187_v0 = vld [vmem:[#allocation2 + $0x298] sm:$0xff]  ;;  %v7172_v13 = vld [vmem:[#allocation2 + $0x220] sm:$0xff] }
 0x7a9   : > { %6634 = vperm.xlu0 %13294, %v5715_v39   ;;  %12710 = vmatpush3.bf16.msra.mxu0 %v12709_v18  ;;  %v7147_v39 = vld [vmem:[#allocation2 + $0x158] sm:$0xff]  ;;  %v7193_v55 = vld [vmem:[#allocation2 + $0x2c8] sm:$0xff]  ;;  %v7180_v22 = vld [vmem:[#allocation2 + $0x260] sm:$0xff] }
 0x7aa   : > { %12712 = vmatprep.subr.bf16.mxu0 %v12711_v3  ;;  %v12721_v15 = vpack.c.bf16 %v7147_v39, %v7146_v7  ;;  %v7170_v7 = vld [vmem:[#allocation2 + $0x210] sm:$0xff]  ;;  %v7171_v39 = vld [vmem:[#allocation2 + $0x218] sm:$0xff]  ;;  %v7276_v45 = vld [vmem:[#allocation2 + $0x560] sm:$0xff] }
 0x7ab   : > { %13312 = vrot.lane.b32.xlu1 %v13311_v12, %s13567_s13  ;;  %v7150_v12 = vld [vmem:[#allocation2 + $0x170] sm:$0xff] }
 0x7ac   : > { %v12729_v11 = vpack.c.bf16 %v7151_v26, %v7150_v12  ;;  %v7191_v12 = vld [vmem:[#allocation2 + $0x2b8] sm:$0xff] }
 0x7ad   : > { %13317 = vrot.lane.b32.xlu0 %v13316_v34, %s13568_s23  ;;  %12714 = vmatpush3.bf16.msra.mxu0 %v12713_v24  ;;  %v7169_v24 = vld [vmem:[#allocation2 + $0x208] sm:$0xff] }
 0x7ae   : > { %12716 = vmatprep.subr.bf16.mxu0 %v12715_v9 }
 0x7af   : > { %13322 = vrot.lane.b32.xlu1 %v13321_v38, %s13569_s30 }
 0x7b1   : > { %13327 = vrot.lane.b32.xlu0 %v13326_v31, %s13570_s16  ;;  %v6700_v31 = vrot.slane %v17899_v50, 2  ;;  %12718 = vmatpush3.bf16.msra.mxu0 %v12717_v32  ;;  %v5717_v50 = vld [vmem:[%s18448_s6 + $0x38] sm:$0xff]  ;;  %v12733_v32 = vpack.c.bf16 %v7169_v24, %v7168_v14 }
 0x7b2   : > { %12720 = vmatprep.subr.bf16.mxu0 %v12719_v16  ;;  %v12735_v16 = vpack.c.bf16 %v7187_v0, %v7186_v8  ;;  %v7179_v8 = vld [vmem:[#allocation2 + $0x258] sm:$0xff] }
 0x7b3   : > { %6786 = vrot.lane.b32.xlu1 %v6785_v1, %s13571_s24 }
 0x7b5   : > { %6790 = vrot.lane.b32.xlu0 %v6789_v42, %s13572_s19  ;;  %12722 = vmatpush3.bf16.msra.mxu0 %v12721_v15  ;;  %v7189_v15 = vld [vmem:[#allocation2 + $0x2a8] sm:$0xff] }
 0x7b6   : > { %12724 = vmatprep.subr.bf16.mxu0 %v12723_v33  ;;  %v12739_v63 = vpack.c.bf16 %v7189_v15, %v7188_v51  ;;  %v7181_v15 = vld [vmem:[#allocation2 + $0x268] sm:$0xff] }
 0x7b7   : > { %6701 = vrot.lane.b32.xlu1 %v6700_v31, %s13572_s19 }
 0x7b9   : > { %13332 = vrot.lane.b32.xlu0 %v17924_v47, %s13573_s12  ;;  %v12727_v47 = vpack.c.bf16 %v7167_v43, %v7166_v54  ;;  %12726 = vmatpush3.bf16.msra.mxu0 %v12725_v46  ;;  %v7173_v54 = vld [vmem:[#allocation2 + $0x228] sm:$0xff] }
 0x7bb   : > { %6697 = vrot.lane.b32.xlu1 %v6696_v17, %s13571_s24  ;;  %12728 = vmatprep.subr.bf16.mxu0 %v12727_v47  ;;  %v12737_v17 = vpack.c.bf16 %v7171_v39, %v7170_v7  ;;  %v7190_v47 = vld [vmem:[#allocation2 + $0x2b0] sm:$0xff] }
 0x7bd   : > { %13337 = vrot.lane.b32.xlu0 %v17935_v6, %s18618_s17  ;;  %v17985_v6 = vmax.f32 %v6651_v40, 0.0  ;;  %12730 = vmatpush3.bf16.msra.mxu0 %v12729_v11  ;;  %v12741_v40 = vpack.c.bf16 %v7173_v54, %v7172_v13 }
 0x7be   : > { %12764 = vmatprep.subr.bf16.mxu0 %v12763_v2 }
 0x7bf   : > { %6639 = vperm.xlu1 %13295, %v5716_v36   ;;  %v6829_v25 = vrot.slane %v17985_v6, 1  ;;  %v6833_v48 = vrot.slane %v17985_v6, 2  ;;  %v6841_v20 = vrot.slane %v17985_v6, 4  ;;  %v6845_v46 = vrot.slane %v17985_v6, 5 }
 0x7c1   : > { %13342 = vrot.lane.b32.xlu0 %v17937_v19, %s18616_s15  ;;  %v6849_v19 = vrot.slane %v17985_v6, 6  ;;  %s13578_s15 = smov 96  }
 0x7c3   : > { %6721 = vrot.lane.b32.xlu1 %v6720_v56, %s13576_s22 }
 0x7c5   : > { %13347 = vrot.lane.b32.xlu0 %v17940_v28, %s13577_s26  ;;  %v6853_v28 = vrot.slane %v17985_v6, 7 }
 0x7c9   : > { %6830 = vrot.lane.b32.xlu0 %v6829_v25, %s13563_s28  ;;  %v12743_v25 = vpack.c.bf16 %v7191_v12, %v7190_v47 }
 0x7cd   : > { %6834 = vrot.lane.b32.xlu0 %v6833_v48, %s13564_s8  ;;  %v7174_v48 = vld [vmem:[#allocation2 + $0x230] sm:$0xff] }
 0x7d1   : > { %6644 = vperm.xlu0 %13294, %v5717_v50   ;;  %v7175_v50 = vld [vmem:[#allocation2 + $0x238] sm:$0xff] }
 0x7d2   : > { %v12745_v2 = vpack.c.bf16 %v7175_v50, %v7174_v48 }
 0x7d5   : > { %6842 = vrot.lane.b32.xlu0 %v6841_v20, %s13566_s25 }
 0x7d9   : > { %6850 = vrot.lane.b32.xlu0 %v6849_v19, %s13567_s13 }
 0x7dd   : > { %6854 = vrot.lane.b32.xlu0 %v6853_v28, %s13568_s23  ;;  %v7192_v28 = vld [vmem:[#allocation2 + $0x2c0] sm:$0xff] }
 0x811   : > { %v6755_v29 = vpop.permute.xlu1 %6754 }
 0x812   : > { %v6813_v38 = vsel %vm6724_vm2, %v17903_v5, %v6755_v29 }
 0x813   : > { %v13298_v34 = vpop.permute.xlu0 %13297 }
 0x814   : > { %v13299_v18 = vunpack.i.l.bf16 %v13298_v34  ;;  %v13300_v1 = vunpack.i.h.bf16 %v13298_v34  ;;  %v12747_v34 = vpack.c.bf16 %v7193_v55, %v7192_v28  ;;  %v7220_v28 = vld [vmem:[#allocation2 + $0x3a0] sm:$0xff]  ;;  %v7221_v55 = vld [vmem:[#allocation2 + $0x3a8] sm:$0xff] }
 0x815   : > { %v13303_v3 = vpop.permute.xlu1 %13302 }
 0x816   : > { %v6814_v21 = vsel %vm18944_vm12, %v6813_v38, %v13299_v18  ;;  %v13304_v59 = vunpack.i.l.bf16 %v13303_v3  ;;  %v13305_v33 = vunpack.i.h.bf16 %v13303_v3  ;;  %v7177_v38 = vld [vmem:[#allocation2 + $0x248] sm:$0xff]  ;;  %vm6748_vm12 = vcmask 818176  }
 0x817   : > { %6988 = vrot.lane.b32.xlu1 %v6814_v21, %s13578_s15  ;;  %v6666_v49 = vpop.permute.xlu0 %6665  ;;  %v7194_v21 = vld [vmem:[#allocation2 + $0x2d0] sm:$0xff] }
 0x818   : > { %v6725_v5 = vsel %vm6724_vm2, %v17895_v37, %v6666_v49  ;;  %v6728_v42 = vsel %vm6727_vm9, %v13300_v1, %v13304_v59  ;;  %v6837_v37 = vrot.slane %v17985_v6, 3  ;;  %v6815_v11 = vsel %vm6727_vm9, %v13299_v18, %v13305_v33  ;;  %v7176_v18 = vld [vmem:[#allocation2 + $0x240] sm:$0xff]  ;;  %v7195_v59 = vld [vmem:[#allocation2 + $0x2d8] sm:$0xff] }
 0x819   : > { %v18007_v9 = vpop.permute.xlu1 %13307  ;;  %v6726_v62 = vsel %vm18946_vm11, %v6725_v5, %v13300_v1  ;;  %v12749_v14 = vpack.c.bf16 %v7177_v38, %v7176_v18  ;;  %v12751_v1 = vpack.c.bf16 %v7195_v59, %v7194_v21  ;;  %v7219_v33 = vld [vmem:[#allocation2 + $0x398] sm:$0xff]  ;;  %v7204_v21 = vld [vmem:[#allocation2 + $0x320] sm:$0xff]  ;;  %v7205_v59 = vld [vmem:[#allocation2 + $0x328] sm:$0xff] }
 0x81a   : > { %v13309_v53 = vunpack.i.l.bf16 %v18007_v9  ;;  %v13310_v43 = vunpack.i.h.bf16 %v18007_v9  ;;  %v12757_v9 = vpack.c.bf16 %v7181_v15, %v7180_v22  ;;  %v7233_v22 = vld [vmem:[#allocation2 + $0x408] sm:$0xff] }
 0x81b   : > { %6810 = vrot.lane.b32.xlu1 %v6809_v61, %s13576_s22  ;;  %v7178_v61 = vld [vmem:[#allocation2 + $0x250] sm:$0xff] }
 0x81c   : > { %v6729_v31 = vsel %vm18945_vm14, %v6728_v42, %v13309_v53  ;;  %v6816_v20 = vsel %vm18947_vm10, %v6815_v11, %v13310_v43  ;;  %v7196_v42 = vld [vmem:[#allocation2 + $0x2e0] sm:$0xff]  ;;  %v12753_v58 = vpack.c.bf16 %v7179_v8, %v7178_v61  ;;  %v7202_v11 = vld [vmem:[#allocation2 + $0x310] sm:$0xff]  ;;  %vm18949_vm14 = vmmov %vm18946_vm11  ;;  %vm6750_vm11 = vcmask 277504  }
 0x81d   : > { %v18019_v27 = vpop.permute.xlu1 %13312  ;;  %7665 = vmatprep.mubr.f32.mxu1 %v6729_v31  ;;  %vm7004_vm10 = vcmask 785408  }
 0x81e   : > { %7666 = vmatmul.mubr.f32.vlgmr.msra.gmra.mrb[154].mxu1 %v6726_v62  ;;  %v13315_v44 = vunpack.i.h.bf16 %v18019_v27  ;;  %v13314_v7 = vunpack.i.l.bf16 %v18019_v27 }
 0x81f   : > { %6838 = vrot.lane.b32.xlu1 %v6837_v37, %s13565_s29  ;;  %12734 = vmatpush3.bf16.msra.mxu1 %v12733_v32  ;;  %v7197_v32 = vld [vmem:[#allocation2 + $0x2e8] sm:$0xff] }
 0x820   : > { %12736 = vmatprep.subr.bf16.mxu1 %v12735_v16  ;;  %v7201_v16 = vld [vmem:[#allocation2 + $0x308] sm:$0xff]  ;;  %v12755_v51 = vpack.c.bf16 %v7197_v32, %v7196_v42  ;;  %v7207_v42 = vld [vmem:[#allocation2 + $0x338] sm:$0xff] }
 0x821   : > { %v18024_v36 = vpop.permute.xlu1 %13322 }
 0x822   : > { %v13324_v26 = vunpack.i.l.bf16 %v18024_v36  ;;  %v13325_v0 = vunpack.i.h.bf16 %v18024_v36  ;;  %v7199_v36 = vld [vmem:[#allocation2 + $0x2f8] sm:$0xff] }
 0x823   : > { %6846 = vrot.lane.b32.xlu1 %v6845_v46, %s13569_s30  ;;  %12738 = vmatpush3.bf16.msra.mxu1 %v12737_v17  ;;  %v7218_v17 = vld [vmem:[#allocation2 + $0x390] sm:$0xff] }
 0x824   : > { %v6817_v56 = vsel %vm6730_vm6, %v13310_v43, %v13324_v26  ;;  %12740 = vmatprep.subr.bf16.mxu1 %v12739_v63  ;;  %v6731_v63 = vsel %vm6730_vm6, %v13309_v53, %v13325_v0  ;;  %v7198_v43 = vld [vmem:[#allocation2 + $0x2f0] sm:$0xff]  ;;  %v12767_v53 = vpack.c.bf16 %v7219_v33, %v7218_v17  ;;  %v12773_v0 = vpack.c.bf16 %v7205_v59, %v7204_v21 }
 0x825   : > { %v6818_v19 = vsel %vm6732_vm4, %v6817_v56, %v13315_v44  ;;  %v6787_v39 = vpop.permute.xlu1 %6786  ;;  %v7203_v56 = vld [vmem:[#allocation2 + $0x318] sm:$0xff]  ;;  %v6733_v50 = vsel %vm6732_vm4, %v6731_v63, %v13314_v7 }
 0x826   : > { %v13351_v4 = vpack.i.bf16 %v6818_v19, %v6816_v20  ;;  %v12759_v20 = vpack.c.bf16 %v7199_v36, %v7198_v43  ;;  %v7183_v19 = vld [vmem:[#allocation2 + $0x278] sm:$0xff]  ;;  %v7209_v43 = vld [vmem:[#allocation2 + $0x348] sm:$0xff] }
 0x827   : > { %12742 = vmatpush3.bf16.msra.mxu1 %v12741_v40  ;;  %v7182_v40 = vld [vmem:[#allocation2 + $0x270] sm:$0xff] }
 0x828   : > { %13352 = vrot.lane.b32.xlu1 %v13351_v4, %s13578_s15  ;;  %v6635_v29 = vpop.permute.xlu0 %6634  ;;  %12744 = vmatprep.subr.bf16.mxu1 %v12743_v25  ;;  %v12761_v38 = vpack.c.bf16 %v7183_v19, %v7182_v40  ;;  %v7211_v19 = vld [vmem:[#allocation2 + $0x358] sm:$0xff] }
 0x829   : > { %v6652_v3 = vadd.f32 %v6635_v29, %v6604_v41  ;;  %v7200_v41 = vld [vmem:[#allocation2 + $0x300] sm:$0xff]  ;;  %v6702_v18 = vpop.permute.xlu1 %6701 }
 0x82a   : > { %v12765_v47 = vpack.c.bf16 %v7201_v16, %v7200_v41  ;;  %v7248_v29 = vld [vmem:[#allocation2 + $0x480] sm:$0xff] }
 0x82b   : > { %v18040_v49 = vmax.f32 %v6652_v3, 0.0  ;;  %12746 = vmatpush3.bf16.msra.mxu1 %v12745_v2  ;;  %v12771_v3 = vpack.c.bf16 %v7221_v55, %v7220_v28  ;;  %v7228_v28 = vld [vmem:[#allocation2 + $0x3e0] sm:$0xff]  ;;  %v7229_v55 = vld [vmem:[#allocation2 + $0x3e8] sm:$0xff] }
 0x82c   : > { %v13318_v24 = vpop.permute.xlu0 %13317  ;;  %12748 = vmatprep.subr.bf16.mxu1 %v12747_v34  ;;  %v7249_v34 = vld [vmem:[#allocation2 + $0x488] sm:$0xff] }
 0x82d   : > { %v6861_v5 = vrot.slane %v18040_v49, 1  ;;  %v13319_v31 = vunpack.i.l.bf16 %v13318_v24  ;;  %v13320_v62 = vunpack.i.h.bf16 %v13318_v24  ;;  %v7222_v24 = vld [vmem:[#allocation2 + $0x3b0] sm:$0xff]  ;;  %v12795_v61 = vpack.c.bf16 %v7249_v34, %v7248_v29  ;;  %v6698_v41 = vpop.permute.xlu1 %6697 }
 0x82e   : > { %v6865_v33 = vrot.slane %v18040_v49, 2  ;;  %v6885_v52 = vrot.slane %v18040_v49, 7 }
 0x82f   : > { %6862 = vrot.lane.b32.xlu0 %v6861_v5, %s13571_s24  ;;  %12750 = vmatpush3.bf16.msra.mxu1 %v12749_v14  ;;  %v6735_v46 = vsel %vm6734_vm8, %v13314_v7, %v13319_v31  ;;  %v6819_v48 = vsel %vm6734_vm8, %v13315_v44, %v13320_v62  ;;  %v12769_v44 = vpack.c.bf16 %v7203_v56, %v7202_v11  ;;  %v7206_v5 = vld [vmem:[#allocation2 + $0x330] sm:$0xff]  ;;  %v7224_v31 = vld [vmem:[#allocation2 + $0x3c0] sm:$0xff]  ;;  %v7225_v7 = vld [vmem:[#allocation2 + $0x3c8] sm:$0xff] }
 0x830   : > { %v18046_v37 = vpop.permute.xlu0 %13327  ;;  %12752 = vmatprep.subr.bf16.mxu1 %v12751_v1  ;;  %v7223_v1 = vld [vmem:[#allocation2 + $0x3b8] sm:$0xff]  ;;  %v12777_v63 = vpack.c.bf16 %v7207_v42, %v7206_v5  ;;  %v7252_v11 = vld [vmem:[#allocation2 + $0x4a0] sm:$0xff]  ;;  %v7253_v56 = vld [vmem:[#allocation2 + $0x4a8] sm:$0xff] }
 0x831   : > { %v13330_v13 = vunpack.i.h.bf16 %v18046_v37  ;;  %v13329_v54 = vunpack.i.l.bf16 %v18046_v37  ;;  %v12775_v32 = vpack.c.bf16 %v7223_v1, %v7222_v24  ;;  %v7251_v62 = vld [vmem:[#allocation2 + $0x498] sm:$0xff]  ;;  %v7234_v37 = vld [vmem:[#allocation2 + $0x410] sm:$0xff]  ;;  %v12803_v34 = vpack.c.bf16 %v7253_v56, %v7252_v11  ;;  %v7212_v5 = vld [vmem:[#allocation2 + $0x360] sm:$0xff] }
 0x832   : > { %v12787_v24 = vpack.c.bf16 %v7229_v55, %v7228_v28  ;;  %v7254_v1 = vld [vmem:[#allocation2 + $0x4b0] sm:$0xff]  ;;  %v6873_v11 = vrot.slane %v18040_v49, 4  ;;  %v7243_v55 = vld [vmem:[#allocation2 + $0x458] sm:$0xff] }
 0x833   : > { %v6821_v12 = vsel %vm6738_vm7, %v13330_v13, %v6787_v39  ;;  %v6737_v26 = vsel %vm6736_vm15, %v6735_v46, %v13329_v54  ;;  %12754 = vmatpush3.bf16.msra.mxu1 %v12753_v58  ;;  %v6820_v4 = vsel %vm6736_vm15, %v6819_v48, %v13330_v13  ;;  %v7232_v58 = vld [vmem:[#allocation2 + $0x400] sm:$0xff]  ;;  %v7250_v39 = vld [vmem:[#allocation2 + $0x490] sm:$0xff]  ;;  %v6739_v15 = vsel %vm6738_vm7, %v13329_v54, %v6698_v41 }
 0x834   : > { %v18058_v25 = vpop.permute.xlu0 %6790  ;;  %7735 = vmatprep.mubr.f32.mxu0 %v6737_v26  ;;  %12756 = vmatprep.subr.bf16.mxu1 %v12755_v51  ;;  %v7208_v13 = vld [vmem:[#allocation2 + $0x340] sm:$0xff]  ;;  %v12797_v36 = vpack.c.bf16 %v7233_v22, %v7232_v58  ;;  %v12799_v26 = vpack.c.bf16 %v7251_v62, %v7250_v39  ;;  %v6741_v40 = vsel %vm6740_vm3, %v6739_v15, %v6702_v18  ;;  %v7210_v48 = vld [vmem:[#allocation2 + $0x350] sm:$0xff]  ;;  %v7213_v58 = vld [vmem:[#allocation2 + $0x368] sm:$0xff] }
 0x835   : > { %v6822_v2 = vsel %vm6740_vm3, %v6821_v12, %v18058_v25  ;;  %7736 = vmatmul.mubr.f32.vlgmr.msra.gmra.mrb[166].mxu0 %v6733_v50  ;;  %v7226_v12 = vld [vmem:[#allocation2 + $0x3d0] sm:$0xff]  ;;  %v6869_v50 = vrot.slane %v18040_v49, 3  ;;  %v12785_v59 = vpack.c.bf16 %v7211_v19, %v7210_v48  ;;  %v7231_v15 = vld [vmem:[#allocation2 + $0x3f8] sm:$0xff] }
 0x836   : > { %v13356_v27 = vpack.i.bf16 %v6822_v2, %v6820_v4  ;;  %12766 = vmatpush3.bf16.msra.mxu0 %v12765_v47  ;;  %v12779_v47 = vpack.c.bf16 %v7225_v7, %v7224_v31  ;;  %v7238_v41 = vld [vmem:[#allocation2 + $0x430] sm:$0xff]  ;;  %v7239_v7 = vld [vmem:[#allocation2 + $0x438] sm:$0xff] }
 0x837   : > { %12758 = vmatpush3.bf16.msra.mxu1 %v12757_v9  ;;  %12768 = vmatprep.subr.bf16.mxu0 %v12767_v53  ;;  %v7235_v9 = vld [vmem:[#allocation2 + $0x418] sm:$0xff]  ;;  %v7258_v56 = vld [vmem:[#allocation2 + $0x4d0] sm:$0xff] }
 0x838   : > { %v18067_v14 = vpop.permute.xlu0 %13332  ;;  %13357 = vrot.lane.b32.xlu1 %v13356_v27, %s13578_s15  ;;  %12760 = vmatprep.subr.bf16.mxu1 %v12759_v20  ;;  %v7227_v53 = vld [vmem:[#allocation2 + $0x3d8] sm:$0xff]  ;;  %v12781_v20 = vpack.c.bf16 %v7209_v43, %v7208_v13  ;;  %v12801_v4 = vpack.c.bf16 %v7235_v9, %v7234_v37  ;;  %v7237_v27 = vld [vmem:[#allocation2 + $0x428] sm:$0xff]  ;;  %v12789_v13 = vpack.c.bf16 %v7213_v58, %v7212_v5  ;;  %v7214_v43 = vld [vmem:[#allocation2 + $0x370] sm:$0xff] }
 0x839   : > { %v13334_v8 = vunpack.i.l.bf16 %v18067_v14  ;;  %v13335_v2 = vunpack.i.h.bf16 %v18067_v14  ;;  %v12783_v29 = vpack.c.bf16 %v7227_v53, %v7226_v12  ;;  %v7240_v12 = vld [vmem:[#allocation2 + $0x440] sm:$0xff]  ;;  %v7259_v48 = vld [vmem:[#allocation2 + $0x4d8] sm:$0xff]  ;;  %v7242_v28 = vld [vmem:[#allocation2 + $0x450] sm:$0xff] }
 0x83a   : > { %12770 = vmatpush3.bf16.msra.mxu0 %v12769_v44  ;;  %v7280_v9 = vld [vmem:[#allocation2 + $0x580] sm:$0xff] }
 0x83b   : > { %12762 = vmatpush3.bf16.msra.mxu1 %v12761_v38  ;;  %12772 = vmatprep.subr.bf16.mxu0 %v12771_v3  ;;  %v6743_v17 = vsel %vm6742_vm5, %v6702_v18, %v13334_v8  ;;  %v7236_v18 = vld [vmem:[#allocation2 + $0x420] sm:$0xff] }
 0x83c   : > { %v18071_v16 = vpop.permute.xlu0 %13337  ;;  %6858 = vrot.lane.b32.xlu1 %v18040_v49, %s13570_s16  ;;  %12796 = vmatprep.subr.bf16.mxu1 %v12795_v61  ;;  %v7255_v61 = vld [vmem:[#allocation2 + $0x4b8] sm:$0xff]  ;;  %v12805_v42 = vpack.c.bf16 %v7237_v27, %v7236_v18  ;;  %v12817_v27 = vpack.c.bf16 %v7243_v55, %v7242_v28  ;;  %v7312_v58 = vld [vmem:[#allocation2 + $0x680] sm:$0xff]  ;;  %v7289_v28 = vld [vmem:[#allocation2 + $0x5c8] sm:$0xff] }
 0x83d   : > { %v13339_v51 = vunpack.i.l.bf16 %v18071_v16  ;;  %v13340_v44 = vunpack.i.h.bf16 %v18071_v16 }
 0x83e   : > { %12774 = vmatpush3.bf16.msra.mxu0 %v12773_v0  ;;  %v6877_v0 = vrot.slane %v18040_v49, 5  ;;  %v6640_v18 = vpop.permute.xlu1 %6639 }
 0x83f   : > { %v6745_v46 = vsel %vm6744_vm13, %v6743_v17, %v13339_v51  ;;  %12776 = vmatprep.subr.bf16.mxu0 %v12775_v32  ;;  %v6823_v32 = vsel %vm6742_vm5, %v18058_v25, %v13335_v2  ;;  %v7230_v25 = vld [vmem:[#allocation2 + $0x3f0] sm:$0xff]  ;;  %v12807_v17 = vpack.c.bf16 %v7255_v61, %v7254_v1  ;;  %v7260_v2 = vld [vmem:[#allocation2 + $0x4e0] sm:$0xff]  ;;  %v6653_v1 = vadd.f32 %v6640_v18, %v6605_v10 }
 0x840   : > { %v18084_v54 = vpop.permute.xlu0 %13342  ;;  %7805 = vmatprep.mubr.f32.mxu1 %v6745_v46  ;;  %6866 = vrot.lane.b32.xlu1 %v6865_v33, %s13572_s19  ;;  %v6824_v39 = vsel %vm6744_vm13, %v6823_v32, %v13340_v44  ;;  %v12791_v46 = vpack.c.bf16 %v7231_v15, %v7230_v25  ;;  %v7246_v32 = vld [vmem:[#allocation2 + $0x470] sm:$0xff]  ;;  %v7283_v15 = vld [vmem:[#allocation2 + $0x598] sm:$0xff] }
 0x841   : > { %7806 = vmatmul.mubr.f32.vlgmr.msra.gmra.mrb[156].mxu1 %v6741_v40  ;;  %v13345_v14 = vunpack.i.h.bf16 %v18084_v54  ;;  %v13344_v8 = vunpack.i.l.bf16 %v18084_v54  ;;  %v7281_v40 = vld [vmem:[#allocation2 + $0x588] sm:$0xff]  ;;  %v7282_v25 = vld [vmem:[#allocation2 + $0x590] sm:$0xff]  ;;  %v7271_v54 = vld [vmem:[#allocation2 + $0x538] sm:$0xff] }
 0x842   : > { %12778 = vmatpush3.bf16.msra.mxu0 %v12777_v63  ;;  %12798 = vmatpush3.bf16.msra.mxu1 %v12797_v36  ;;  %v7257_v63 = vld [vmem:[#allocation2 + $0x4c8] sm:$0xff]  ;;  %v12809_v36 = vpack.c.bf16 %v7239_v7, %v7238_v41  ;;  %v12827_v19 = vpack.c.bf16 %v7281_v40, %v7280_v9  ;;  %v18126_v41 = vmax.f32 %v6653_v1, 0.0  ;;  %v6722_v7 = vpop.permute.xlu1 %6721  ;;  %v7268_v9 = vld [vmem:[#allocation2 + $0x520] sm:$0xff]  ;;  %v7291_v1 = vld [vmem:[#allocation2 + $0x5d8] sm:$0xff] }
 0x843   : > { %12780 = vmatprep.subr.bf16.mxu0 %v12779_v47  ;;  %12800 = vmatprep.subr.bf16.mxu1 %v12799_v26  ;;  %v7215_v47 = vld [vmem:[#allocation2 + $0x378] sm:$0xff]  ;;  %v7241_v26 = vld [vmem:[#allocation2 + $0x448] sm:$0xff] }
 0x844   : > { %v13348_v38 = vpop.permute.xlu0 %13347  ;;  %6870 = vrot.lane.b32.xlu1 %v6869_v50, %s13573_s12  ;;  %v12793_v50 = vpack.c.bf16 %v7215_v47, %v7214_v43  ;;  %v7266_v43 = vld [vmem:[#allocation2 + $0x510] sm:$0xff]  ;;  %v7285_v47 = vld [vmem:[#allocation2 + $0x5a8] sm:$0xff] }
 0x845   : > { %v13350_v3 = vunpack.i.h.bf16 %v13348_v38  ;;  %v13349_v21 = vunpack.i.l.bf16 %v13348_v38  ;;  %v7269_v40 = vld [vmem:[#allocation2 + $0x528] sm:$0xff] }
 0x846   : > { %12782 = vmatpush3.bf16.msra.mxu0 %v12781_v20  ;;  %12802 = vmatpush3.bf16.msra.mxu1 %v12801_v4  ;;  %v12813_v20 = vpack.c.bf16 %v7241_v26, %v7240_v12  ;;  %v12815_v4 = vpack.c.bf16 %v7259_v48, %v7258_v56 }
 0x847   : > { %v6825_v31 = vsel %vm6746_vm1, %v13340_v44, %v13349_v21  ;;  %12784 = vmatprep.subr.bf16.mxu0 %v12783_v29  ;;  %12804 = vmatprep.subr.bf16.mxu1 %v12803_v34  ;;  %v6747_v22 = vsel %vm6746_vm1, %v13339_v51, %v13350_v3  ;;  %v7256_v51 = vld [vmem:[#allocation2 + $0x4c0] sm:$0xff]  ;;  %v7261_v29 = vld [vmem:[#allocation2 + $0x4e8] sm:$0xff]  ;;  %v6881_v34 = vrot.slane %v18040_v49, 6  ;;  %v6751_v49 = vsel %vm6750_vm11, %v13344_v8, %v6722_v7 }
 0x848   : > { %6878 = vrot.lane.b32.xlu1 %v6877_v0, %s13577_s26  ;;  %v6826_v62 = vsel %vm6748_vm12, %v6825_v31, %v13345_v14  ;;  %v18109_v33 = vsel %vm6748_vm12, %v6747_v22, %v13344_v8  ;;  %v12811_v37 = vpack.c.bf16 %v7257_v63, %v7256_v51  ;;  %v6831_v53 = vpop.permute.xlu0 %6830  ;;  %v12819_v38 = vpack.c.bf16 %v7261_v29, %v7260_v2  ;;  %v7244_v3 = vld [vmem:[#allocation2 + $0x460] sm:$0xff]  ;;  %v7245_v21 = vld [vmem:[#allocation2 + $0x468] sm:$0xff]  ;;  %v7247_v31 = vld [vmem:[#allocation2 + $0x478] sm:$0xff] }
 0x849   : > { %v13361_v16 = vpack.i.bf16 %v6826_v62, %v6824_v39  ;;  %v6889_v61 = vsel %vm6724_vm2, %v17985_v6, %v6831_v53  ;;  %v12821_v5 = vpack.c.bf16 %v7245_v21, %v7244_v3  ;;  %v7313_v22 = vld [vmem:[#allocation2 + $0x688] sm:$0xff]  ;;  %v12825_v23 = vpack.c.bf16 %v7247_v31, %v7246_v32  ;;  %v7264_v39 = vld [vmem:[#allocation2 + $0x500] sm:$0xff]  ;;  %v7286_v53 = vld [vmem:[#allocation2 + $0x5b0] sm:$0xff] }
 0x84a   : > { %12786 = vmatpush3.bf16.msra.mxu0 %v12785_v59  ;;  %12806 = vmatpush3.bf16.msra.mxu1 %v12805_v42  ;;  %v7262_v59 = vld [vmem:[#allocation2 + $0x4f0] sm:$0xff]  ;;  %v12859_v10 = vpack.c.bf16 %v7313_v22, %v7312_v58  ;;  %v6917_v6 = vrot.slane %v18126_v41, 4  ;;  %v7265_v62 = vld [vmem:[#allocation2 + $0x508] sm:$0xff]  ;;  %v6909_v2 = vrot.slane %v18126_v41, 2  ;;  %v7275_v31 = vld [vmem:[#allocation2 + $0x558] sm:$0xff] }
 0x84b   : > { %13362 = vrot.lane.b32.xlu0 %v13361_v16, %s13578_s15  ;;  %12788 = vmatprep.subr.bf16.mxu0 %v12787_v24  ;;  %v7263_v24 = vld [vmem:[#allocation2 + $0x4f8] sm:$0xff]  ;;  %v12829_v16 = vpack.c.bf16 %v7265_v62, %v7264_v39  ;;  %v7273_v3 = vld [vmem:[#allocation2 + $0x548] sm:$0xff]  ;;  %v7274_v32 = vld [vmem:[#allocation2 + $0x550] sm:$0xff] }
 0x84c   : > { %12808 = vmatprep.subr.bf16.mxu1 %v12807_v17  ;;  %v18115_v44 = vpop.permute.xlu0 %6834  ;;  %v12823_v42 = vpack.c.bf16 %v7263_v24, %v7262_v59  ;;  %v7290_v24 = vld [vmem:[#allocation2 + $0x5d0] sm:$0xff]  ;;  %v7292_v7 = vld [vmem:[#allocation2 + $0x5e0] sm:$0xff]  ;;  %v7293_v39 = vld [vmem:[#allocation2 + $0x5e8] sm:$0xff] }
 0x84d   : > { %v6890_v0 = vsel %vm18949_vm14, %v6889_v61, %v18115_v44  ;;  %vm18950_vm14 = vcmask 982016   ;;  %v7296_v61 = vld [vmem:[#allocation2 + $0x600] sm:$0xff]  ;;  %v7314_v22 = vld [vmem:[#allocation2 + $0x690] sm:$0xff]  ;;  %v12851_v30 = vpack.c.bf16 %v7293_v39, %v7292_v7 }
 0x84e   : > { %12790 = vmatpush3.bf16.msra.mxu0 %v12789_v13  ;;  %12810 = vmatpush3.bf16.msra.mxu1 %v12809_v36  ;;  %v12831_v13 = vpack.c.bf16 %v7283_v15, %v7282_v25  ;;  %v7267_v36 = vld [vmem:[#allocation2 + $0x518] sm:$0xff]  ;;  %v6925_v25 = vrot.slane %v18126_v41, 6 }
 0x84f   : > { %6874 = vrot.lane.b32.xlu0 %v6873_v11, %s18618_s17  ;;  %12792 = vmatprep.subr.bf16.mxu0 %v12791_v46  ;;  %s13579_s17 = smov 64   ;;  %v7284_v46 = vld [vmem:[#allocation2 + $0x5a0] sm:$0xff]  ;;  %v12833_v26 = vpack.c.bf16 %v7267_v36, %v7266_v43  ;;  %v7287_v11 = vld [vmem:[#allocation2 + $0x5b8] sm:$0xff]  ;;  %v7298_v36 = vld [vmem:[#allocation2 + $0x610] sm:$0xff] }
 0x850   : > { %12812 = vmatprep.subr.bf16.mxu1 %v12811_v37  ;;  %v18137_v51 = vpop.permute.xlu0 %6644  ;;  %v12835_v37 = vpack.c.bf16 %v7285_v47, %v7284_v46  ;;  %v7299_v46 = vld [vmem:[#allocation2 + $0x618] sm:$0xff]  ;;  %v7317_v47 = vld [vmem:[#allocation2 + $0x6a8] sm:$0xff] }
 0x851   : > { %v6654_v62 = vadd.f32 %v18137_v51, %v6606_v35  ;;  %v7277_v35 = vld [vmem:[#allocation2 + $0x568] sm:$0xff]  ;;  %v7316_v51 = vld [vmem:[#allocation2 + $0x6a0] sm:$0xff] }
 0x852   : > { %12794 = vmatpush3.bf16.msra.mxu0 %v12793_v50  ;;  %12814 = vmatpush3.bf16.msra.mxu1 %v12813_v20  ;;  %v6905_v50 = vrot.slane %v18126_v41, 1  ;;  %v12839_v20 = vpack.c.bf16 %v7287_v11, %v7286_v53  ;;  %v7300_v53 = vld [vmem:[#allocation2 + $0x620] sm:$0xff]  ;;  %v7301_v11 = vld [vmem:[#allocation2 + $0x628] sm:$0xff] }
 0x853   : > { %6882 = vrot.lane.b32.xlu0 %v6881_v34, %s18948_s14  ;;  %12828 = vmatprep.subr.bf16.mxu0 %v12827_v19  ;;  %v7270_v19 = vld [vmem:[#allocation2 + $0x530] sm:$0xff] }
 0x854   : > { %12816 = vmatprep.subr.bf16.mxu1 %v12815_v4  ;;  %v6843_v56 = vpop.permute.xlu0 %6842  ;;  %v12841_v29 = vpack.c.bf16 %v7271_v54, %v7270_v19  ;;  %v7344_v19 = vld [vmem:[#allocation2 + $0x780] sm:$0xff]  ;;  %v7345_v54 = vld [vmem:[#allocation2 + $0x788] sm:$0xff] }
 0x856   : > { %12818 = vmatpush3.bf16.msra.mxu1 %v12817_v27 }
 0x857   : > { %7029 = vrot.lane.b32.xlu0 %v6890_v0, %s13579_s17  ;;  %12820 = vmatprep.subr.bf16.mxu1 %v12819_v38  ;;  %v7272_v38 = vld [vmem:[#allocation2 + $0x540] sm:$0xff]  ;;  %v6913_v0 = vrot.slane %v18126_v41, 3 }
 0x858   : > { %v18151_v34 = vpop.permute.xlu0 %6850 }
 0x85a   : > { %12822 = vmatpush3.bf16.msra.mxu1 %v12821_v5  ;;  %v12845_v5 = vpack.c.bf16 %v7273_v3, %v7272_v38  ;;  %v12891_v38 = vpack.c.bf16 %v7345_v54, %v7344_v19  ;;  %v7310_v54 = vld [vmem:[#allocation2 + $0x670] sm:$0xff] }
 0x85b   : > { %6886 = vrot.lane.b32.xlu0 %v6885_v52, %s13576_s22  ;;  %12824 = vmatprep.subr.bf16.mxu1 %v12823_v42  ;;  %v7297_v42 = vld [vmem:[#allocation2 + $0x608] sm:$0xff]  ;;  %v7315_v52 = vld [vmem:[#allocation2 + $0x698] sm:$0xff] }
 0x85c   : > { %v12861_v15 = vpack.c.bf16 %v7297_v42, %v7296_v61  ;;  %v12863_v43 = vpack.c.bf16 %v7315_v52, %v7314_v22  ;;  %v7329_v61 = vld [vmem:[#allocation2 + $0x708] sm:$0xff]  ;;  %v7346_v42 = vld [vmem:[#allocation2 + $0x790] sm:$0xff]  ;;  %v6855_v39 = vpop.permute.xlu0 %6854 }
 0x85e   : > { %12826 = vmatpush3.bf16.msra.mxu1 %v12825_v23 }
 0x85f   : > { %6918 = vrot.lane.b32.xlu0 %v6917_v6, %s13566_s25  ;;  %12860 = vmatprep.subr.bf16.mxu1 %v12859_v10  ;;  %v12847_v6 = vpack.c.bf16 %v7291_v1, %v7290_v24  ;;  %v7322_v24 = vld [vmem:[#allocation2 + $0x6d0] sm:$0xff]  ;;  %v7328_v1 = vld [vmem:[#allocation2 + $0x700] sm:$0xff]  ;;  %s9928_s25 = sshll.u32 %s13664_s21, 4  ;;  %s13582_s21 = smov [#allocation8]  }
 0x860   : > { %v12893_v7 = vpack.c.bf16 %v7329_v61, %v7328_v1  ;;  %v7337_v1 = vld [vmem:[#allocation2 + $0x748] sm:$0xff]  ;;  %v7354_v61 = vld [vmem:[#allocation2 + $0x7d0] sm:$0xff] }
 0x889   : > { %v18135_v17 = vpop.permute.xlu1 %6988 }
 0x88a   : > { %v7101_v63 = vsel %vm7004_vm10, %v6751_v49, %v18135_v17  ;;  %v12849_v49 = vpack.c.bf16 %v7275_v31, %v7274_v32  ;;  %v7347_v32 = vld [vmem:[#allocation2 + $0x798] sm:$0xff] }
 0x88b   : > { %7875 = vmatprep.mubr.f32.mxu0 %v7101_v63 }
 0x88c   : > { %7876 = vmatmul.mubr.f32.vlgmr.msra.gmra.mrb[168].mxu0 %v18109_v33  ;;  %v12837_v33 = vpack.c.bf16 %v7269_v40, %v7268_v9  ;;  %v12853_v9 = vpack.c.bf16 %v7277_v35, %v7276_v45  ;;  %v12867_v40 = vpack.c.bf16 %v7317_v47, %v7316_v51  ;;  %v7349_v45 = vld [vmem:[#allocation2 + $0x7a8] sm:$0xff]  ;;  %v7308_v35 = vld [vmem:[#allocation2 + $0x660] sm:$0xff] }
 0x88d   : > { %v6811_v12 = vpop.permute.xlu1 %6810  ;;  %12830 = vmatpush3.bf16.msra.mxu0 %v12829_v16  ;;  %v7309_v51 = vld [vmem:[#allocation2 + $0x668] sm:$0xff] }
 0x88e   : > { %v6827_v8 = vsel %vm6750_vm11, %v13345_v14, %v6811_v12  ;;  %12832 = vmatprep.subr.bf16.mxu0 %v12831_v13  ;;  %v7288_v14 = vld [vmem:[#allocation2 + $0x5c0] sm:$0xff]  ;;  %v6921_v13 = vrot.slane %v18126_v41, 5  ;;  %v7294_v12 = vld [vmem:[#allocation2 + $0x5f0] sm:$0xff]  ;;  %v12885_v19 = vpack.c.bf16 %v7309_v51, %v7308_v35  ;;  %v7363_v51 = vld [vmem:[#allocation2 + $0x818] sm:$0xff] }
 0x88f   : > { %7002 = vrot.lane.b32.xlu1 %v6827_v8, %s13578_s15  ;;  %v12843_v27 = vpack.c.bf16 %v7289_v28, %v7288_v14  ;;  %v6929_v8 = vrot.slane %v18126_v41, 7  ;;  %v12869_v28 = vpack.c.bf16 %v7301_v11, %v7300_v53  ;;  %v7327_v11 = vld [vmem:[#allocation2 + $0x6f8] sm:$0xff]  ;;  %v7362_v35 = vld [vmem:[#allocation2 + $0x810] sm:$0xff] }
 0x891   : > { %v6839_v48 = vpop.permute.xlu1 %6838  ;;  %12834 = vmatpush3.bf16.msra.mxu0 %v12833_v26  ;;  %v7295_v26 = vld [vmem:[#allocation2 + $0x5f8] sm:$0xff] }
 0x892   : > { %12836 = vmatprep.subr.bf16.mxu0 %v12835_v37  ;;  %v6891_v55 = vsel %vm6727_vm9, %v18115_v44, %v6839_v48  ;;  %v12865_v37 = vpack.c.bf16 %v7299_v46, %v7298_v36  ;;  %v12855_v48 = vpack.c.bf16 %v7295_v26, %v7294_v12  ;;  %v7325_v36 = vld [vmem:[#allocation2 + $0x6e8] sm:$0xff]  ;;  %v7348_v46 = vld [vmem:[#allocation2 + $0x7a0] sm:$0xff]  ;;  %v7326_v12 = vld [vmem:[#allocation2 + $0x6f0] sm:$0xff] }
 0x893   : > { %6906 = vrot.lane.b32.xlu1 %v6905_v50, %s13563_s28  ;;  %v6892_v21 = vsel %vm18950_vm14, %v6891_v55, %v6843_v56  ;;  %v7279_v50 = vld [vmem:[#allocation2 + $0x578] sm:$0xff]  ;;  %v12899_v26 = vpack.c.bf16 %v7349_v45, %v7348_v46  ;;  %s18951_s28 = smov 104   ;;  %vm7045_vm14 = vcmask 523264  }
 0x895   : > { %v6847_v4 = vpop.permute.xlu1 %6846  ;;  %12838 = vmatpush3.bf16.msra.mxu0 %v12837_v33  ;;  %v7318_v33 = vld [vmem:[#allocation2 + $0x6b0] sm:$0xff] }
 0x896   : > { %v6893_v18 = vsel %vm6730_vm6, %v6843_v56, %v6847_v4  ;;  %12840 = vmatprep.subr.bf16.mxu0 %v12839_v20  ;;  %v7278_v56 = vld [vmem:[#allocation2 + $0x570] sm:$0xff]  ;;  %v7319_v20 = vld [vmem:[#allocation2 + $0x6b8] sm:$0xff] }
 0x897   : > { %v6894_v59 = vsel %vm6732_vm4, %v6893_v18, %v18151_v34  ;;  %6910 = vrot.lane.b32.xlu1 %v6909_v2, %s13564_s8  ;;  %v12857_v55 = vpack.c.bf16 %v7279_v50, %v7278_v56  ;;  %v12871_v4 = vpack.c.bf16 %v7319_v20, %v7318_v33  ;;  %v7302_v2 = vld [vmem:[#allocation2 + $0x630] sm:$0xff]  ;;  %v7320_v18 = vld [vmem:[#allocation2 + $0x6c0] sm:$0xff]  ;;  %s13580_s8 = smov 32  }
 0x898   : > { %v13366_v44 = vpack.i.bf16 %v6894_v59, %v6892_v21  ;;  %v7304_v21 = vld [vmem:[#allocation2 + $0x640] sm:$0xff]  ;;  %v7305_v59 = vld [vmem:[#allocation2 + $0x648] sm:$0xff]  ;;  %v7350_v56 = vld [vmem:[#allocation2 + $0x7b0] sm:$0xff] }
 0x899   : > { %12842 = vmatpush3.bf16.msra.mxu0 %v12841_v29  ;;  %v7303_v29 = vld [vmem:[#allocation2 + $0x638] sm:$0xff]  ;;  %v12877_v52 = vpack.c.bf16 %v7305_v59, %v7304_v21 }
 0x89a   : > { %v18159_v58 = vpop.permute.xlu1 %13352  ;;  %13367 = vrot.lane.b32.xlu0 %v13366_v44, %s13579_s17  ;;  %12844 = vmatprep.subr.bf16.mxu0 %v12843_v27  ;;  %v7321_v27 = vld [vmem:[#allocation2 + $0x6c8] sm:$0xff]  ;;  %v12873_v3 = vpack.c.bf16 %v7303_v29, %v7302_v2  ;;  %v7335_v2 = vld [vmem:[#allocation2 + $0x738] sm:$0xff]  ;;  %v7376_v29 = vld [vmem:[#allocation2 + $0x880] sm:$0xff] }
 0x89b   : > { %v13355_v23 = vunpack.i.h.bf16 %v18159_v58  ;;  %v13354_v10 = vunpack.i.l.bf16 %v18159_v58  ;;  %6914 = vrot.lane.b32.xlu1 %v6913_v0, %s13565_s29  ;;  %v12875_v44 = vpack.c.bf16 %v7321_v27, %v7320_v18  ;;  %v7377_v18 = vld [vmem:[#allocation2 + $0x888] sm:$0xff]  ;;  %v7352_v27 = vld [vmem:[#allocation2 + $0x7c0] sm:$0xff]  ;;  %s417_s29 = sand.u32 1, %s13542_s18  }
 0x89c   : > { %v12923_v59 = vpack.c.bf16 %v7377_v18, %v7376_v29  ;;  %v7408_v18 = vld [vmem:[#allocation2 + $0x980] sm:$0xff] }
 0x89d   : > { %v7006_v16 = vsel %vm7004_vm10, %v13354_v10, %v13355_v23  ;;  %v7005_v63 = vsel %vm7004_vm10, %v18135_v17, %v13354_v10  ;;  %12846 = vmatpush3.bf16.msra.mxu0 %v12845_v5  ;;  %v18178_v17 = vmax.f32 %v6654_v62, 0.0  ;;  %v7323_v5 = vld [vmem:[#allocation2 + $0x6d8] sm:$0xff]  ;;  %v7306_v10 = vld [vmem:[#allocation2 + $0x650] sm:$0xff] }
 0x89e   : > { %6926 = vrot.lane.b32.xlu0 %v6925_v25, %s13567_s13  ;;  %7945 = vmatprep.mubr.f32.mxu1 %v7006_v16  ;;  %v12895_v16 = vpack.c.bf16 %v7347_v32, %v7346_v42  ;;  %v7360_v32 = vld [vmem:[#allocation2 + $0x800] sm:$0xff]  ;;  %s418_s13 = scalar_lea.vmem [#allocation8], %s417_s29 }
 0x89f   : > { %7946 = vmatmul.mubr.f32.vlgmr.msra.gmra.mrb[158].mxu1 %v7005_v63  ;;  %6922 = vrot.lane.b32.xlu1 %v6921_v13, %s13569_s30  ;;  %v6937_v14 = vrot.slane %v18178_v17, 1  ;;  %v7330_v63 = vld [vmem:[#allocation2 + $0x710] sm:$0xff]  ;;  %v7331_v13 = vld [vmem:[#allocation2 + $0x718] sm:$0xff]  ;;  %v6941_v42 = vrot.slane %v18178_v17, 2 }
 0x8a0   : > { %12848 = vmatprep.subr.bf16.mxu0 %v12847_v6  ;;  %12862 = vmatpush3.bf16.msra.mxu1 %v12861_v15  ;;  %v7307_v6 = vld [vmem:[#allocation2 + $0x658] sm:$0xff]  ;;  %v12879_v15 = vpack.c.bf16 %v7323_v5, %v7322_v24  ;;  %v12897_v58 = vpack.c.bf16 %v7331_v13, %v7330_v63  ;;  %v7336_v24 = vld [vmem:[#allocation2 + $0x740] sm:$0xff]  ;;  %v7357_v13 = vld [vmem:[#allocation2 + $0x7e8] sm:$0xff] }
 0x8a1   : > { %12850 = vmatpush3.bf16.msra.mxu0 %v12849_v49  ;;  %12864 = vmatprep.subr.bf16.mxu1 %v12863_v43  ;;  %v7324_v49 = vld [vmem:[#allocation2 + $0x6e0] sm:$0xff]  ;;  %v6863_v47 = vpop.permute.xlu0 %6862  ;;  %v7355_v5 = vld [vmem:[#allocation2 + $0x7d8] sm:$0xff] }
 0x8a2   : > { %6930 = vrot.lane.b32.xlu0 %v6929_v8, %s13568_s23  ;;  %12852 = vmatprep.subr.bf16.mxu0 %v12851_v30  ;;  %v12881_v30 = vpack.c.bf16 %v7307_v6, %v7306_v10  ;;  %v7332_v8 = vld [vmem:[#allocation2 + $0x720] sm:$0xff]  ;;  %v7378_v10 = vld [vmem:[#allocation2 + $0x890] sm:$0xff]  ;;  %s8824_s23 = sshll.u32 %s418_s13, 4  ;;  %s18402_s23 = int_to_ptr.vmem [resolvable:$true] %s8824_s23 }
 0x8a3   : > { %v7356_v63 = vld [vmem:[#allocation2 + $0x7e0] sm:$0xff] }
 0x8a4   : > { %12866 = vmatpush3.bf16.msra.mxu1 %v12865_v37  ;;  %v7333_v37 = vld [vmem:[#allocation2 + $0x728] sm:$0xff] }
 0x8a5   : > { %12854 = vmatpush3.bf16.msra.mxu0 %v12853_v9  ;;  %12868 = vmatprep.subr.bf16.mxu1 %v12867_v40  ;;  %v6895_v9 = vsel %vm6734_vm8, %v18151_v34, %v6855_v39  ;;  %v12887_v34 = vpack.c.bf16 %v7327_v11, %v7326_v12  ;;  %v12911_v39 = vpack.c.bf16 %v7355_v5, %v7354_v61  ;;  %v7381_v12 = vld [vmem:[#allocation2 + $0x8a8] sm:$0xff]  ;;  %v6953_v11 = vrot.slane %v18178_v17, 5 }
 0x8a6   : > { %6938 = vrot.lane.b32.xlu0 %v6937_v14, %s13571_s24  ;;  %12856 = vmatprep.subr.bf16.mxu0 %v12855_v48  ;;  %v7351_v48 = vld [vmem:[#allocation2 + $0x7b8] sm:$0xff]  ;;  %v7385_v61 = vld [vmem:[#allocation2 + $0x8c8] sm:$0xff]  ;;  %s18400_s24 = scalar_lea.hbm %s18453_s11, %s9928_s25 }
 0x8a7   : > { %v7311_v14 = vld [vmem:[#allocation2 + $0x678] sm:$0xff] }
 0x8a8   : > { %12870 = vmatpush3.bf16.msra.mxu1 %v12869_v28  ;;  %v12901_v28 = vpack.c.bf16 %v7333_v37, %v7332_v8  ;;  %v7340_v8 = vld [vmem:[#allocation2 + $0x760] sm:$0xff]  ;;  %v7341_v37 = vld [vmem:[#allocation2 + $0x768] sm:$0xff] }
 0x8a9   : > { %12858 = vmatpush3.bf16.msra.mxu0 %v12857_v55  ;;  %12872 = vmatprep.subr.bf16.mxu1 %v12871_v4  ;;  %v12903_v55 = vpack.c.bf16 %v7351_v48, %v7350_v56  ;;  %v7334_v4 = vld [vmem:[#allocation2 + $0x730] sm:$0xff]  ;;  %v7364_v48 = vld [vmem:[#allocation2 + $0x820] sm:$0xff] }
 0x8aa   : > { %v18184_v0 = vpop.permute.xlu1 %13357  ;;  %12892 = vmatprep.subr.bf16.mxu0 %v12891_v38  ;;  %v7353_v38 = vld [vmem:[#allocation2 + $0x7c8] sm:$0xff]  ;;  %v12905_v21 = vpack.c.bf16 %v7335_v2, %v7334_v4  ;;  %v7343_v4 = vld [vmem:[#allocation2 + $0x778] sm:$0xff] }
 0x8ab   : > { %v13360_v31 = vunpack.i.h.bf16 %v18184_v0  ;;  %v13359_v22 = vunpack.i.l.bf16 %v18184_v0  ;;  %v7359_v0 = vld [vmem:[#allocation2 + $0x7f8] sm:$0xff] }
 0x8ac   : > { %12874 = vmatpush3.bf16.msra.mxu1 %v12873_v3  ;;  %v12889_v3 = vpack.c.bf16 %v7311_v14, %v7310_v54 }
 0x8ad   : > { %v7008_v62 = vsel %vm7004_vm10, %v13359_v22, %v13360_v31  ;;  %v7007_v25 = vsel %vm7004_vm10, %v13355_v23, %v13359_v22  ;;  %12876 = vmatprep.subr.bf16.mxu1 %v12875_v44  ;;  %v12883_v23 = vpack.c.bf16 %v7325_v36, %v7324_v49  ;;  %v12907_v44 = vpack.c.bf16 %v7353_v38, %v7352_v27  ;;  %v7361_v22 = vld [vmem:[#allocation2 + $0x808] sm:$0xff] }
 0x8ae   : > { %v6859_v43 = vpop.permute.xlu1 %6858  ;;  %8015 = vmatprep.mubr.f32.mxu0 %v7008_v62  ;;  %v7338_v62 = vld [vmem:[#allocation2 + $0x750] sm:$0xff]  ;;  %v12925_v36 = vpack.c.bf16 %v7361_v22, %v7360_v32  ;;  %v7409_v27 = vld [vmem:[#allocation2 + $0x988] sm:$0xff] }
 0x8af   : > { %8016 = vmatmul.mubr.f32.vlgmr.msra.gmra.mrb[170].mxu0 %v7007_v25  ;;  %v6897_v40 = vsel %vm6738_vm7, %v6859_v43, %v6863_v47  ;;  %v6896_v50 = vsel %vm6736_vm15, %v6895_v9, %v6859_v43  ;;  %v7339_v25 = vld [vmem:[#allocation2 + $0x758] sm:$0xff]  ;;  %v6945_v43 = vrot.slane %v18178_v17, 3  ;;  %v7380_v47 = vld [vmem:[#allocation2 + $0x8a0] sm:$0xff]  ;;  %v7358_v9 = vld [vmem:[#allocation2 + $0x7f0] sm:$0xff]  ;;  %v12955_v5 = vpack.c.bf16 %v7409_v27, %v7408_v18 }
 0x8b0   : > { %12878 = vmatpush3.bf16.msra.mxu1 %v12877_v52  ;;  %12894 = vmatpush3.bf16.msra.mxu0 %v12893_v7  ;;  %v12909_v52 = vpack.c.bf16 %v7337_v1, %v7336_v24  ;;  %v7379_v7 = vld [vmem:[#allocation2 + $0x898] sm:$0xff]  ;;  %v12931_v56 = vpack.c.bf16 %v7381_v12, %v7380_v47  ;;  %v7384_v1 = vld [vmem:[#allocation2 + $0x8c0] sm:$0xff]  ;;  %v7390_v47 = vld [vmem:[#allocation2 + $0x8f0] sm:$0xff] }
 0x8b1   : > { %12880 = vmatprep.subr.bf16.mxu1 %v12879_v15  ;;  %12896 = vmatprep.subr.bf16.mxu0 %v12895_v16  ;;  %v12939_v22 = vpack.c.bf16 %v7385_v61, %v7384_v1 }
 0x8b2   : > { %v18197_v53 = vpop.permute.xlu1 %6866 }
 0x8b3   : > { %v6898_v33 = vsel %vm6740_vm3, %v6897_v40, %v18197_v53 }
 0x8b4   : > { %v13371_v20 = vpack.i.bf16 %v6898_v33, %v6896_v50  ;;  %12882 = vmatpush3.bf16.msra.mxu1 %v12881_v30  ;;  %12898 = vmatpush3.bf16.msra.mxu0 %v12897_v58  ;;  %v12927_v30 = vpack.c.bf16 %v7379_v7, %v7378_v10  ;;  %v12913_v58 = vpack.c.bf16 %v7339_v25, %v7338_v62  ;;  %v7365_v50 = vld [vmem:[#allocation2 + $0x828] sm:$0xff]  ;;  %v7387_v62 = vld [vmem:[#allocation2 + $0x8d8] sm:$0xff] }
 0x8b5   : > { %12884 = vmatprep.subr.bf16.mxu1 %v12883_v23  ;;  %12900 = vmatprep.subr.bf16.mxu0 %v12899_v26  ;;  %v12915_v26 = vpack.c.bf16 %v7357_v13, %v7356_v63  ;;  %v12917_v33 = vpack.c.bf16 %v7341_v37, %v7340_v8  ;;  %v7369_v10 = vld [vmem:[#allocation2 + $0x848] sm:$0xff]  ;;  %v7370_v13 = vld [vmem:[#allocation2 + $0x850] sm:$0xff]  ;;  %v7375_v37 = vld [vmem:[#allocation2 + $0x878] sm:$0xff] }
 0x8b6   : > { %13372 = vrot.lane.b32.xlu1 %v13371_v20, %s13579_s17  ;;  %v6871_v15 = vpop.permute.xlu1 %6870  ;;  %v7382_v20 = vld [vmem:[#allocation2 + $0x8b0] sm:$0xff] }
 0x8b7   : > { %v7374_v8 = vld [vmem:[#allocation2 + $0x870] sm:$0xff] }
 0x8b8   : > { %12886 = vmatpush3.bf16.msra.mxu1 %v12885_v19  ;;  %12902 = vmatpush3.bf16.msra.mxu0 %v12901_v28  ;;  %v6899_v19 = vsel %vm6742_vm5, %v18197_v53, %v6871_v15  ;;  %v7383_v28 = vld [vmem:[#allocation2 + $0x8b8] sm:$0xff]  ;;  %v6957_v15 = vrot.slane %v18178_v17, 6 }
 0x8b9   : > { %12888 = vmatprep.subr.bf16.mxu1 %v12887_v34  ;;  %12904 = vmatprep.subr.bf16.mxu0 %v12903_v55  ;;  %v12919_v34 = vpack.c.bf16 %v7359_v0, %v7358_v9  ;;  %v7342_v55 = vld [vmem:[#allocation2 + $0x770] sm:$0xff]  ;;  %v12935_v53 = vpack.c.bf16 %v7383_v28, %v7382_v20  ;;  %v7440_v9 = vld [vmem:[#allocation2 + $0xa80] sm:$0xff]  ;;  %v12953_v0 = vpack.c.bf16 %v7375_v37, %v7374_v8  ;;  %v7411_v20 = vld [vmem:[#allocation2 + $0x998] sm:$0xff] }
 0x8ba   : > { %6934 = vrot.lane.b32.xlu1 %v18178_v17, %s13570_s16  ;;  %v6879_v40 = vpop.permute.xlu1 %6878  ;;  %v7419_v8 = vld [vmem:[#allocation2 + $0x9d8] sm:$0xff] }
 0x8bc   : > { %12890 = vmatpush3.bf16.msra.mxu1 %v12889_v3  ;;  %12906 = vmatpush3.bf16.msra.mxu0 %v12905_v21  ;;  %v12933_v3 = vpack.c.bf16 %v7365_v50, %v7364_v48  ;;  %v7366_v21 = vld [vmem:[#allocation2 + $0x830] sm:$0xff]  ;;  %v7392_v48 = vld [vmem:[#allocation2 + $0x900] sm:$0xff]  ;;  %v7393_v50 = vld [vmem:[#allocation2 + $0x908] sm:$0xff] }
 0x8bd   : > { %v18206_v6 = vpop.permute.xlu0 %13362  ;;  %12924 = vmatprep.subr.bf16.mxu1 %v12923_v59  ;;  %12908 = vmatprep.subr.bf16.mxu0 %v12907_v44  ;;  %v7367_v59 = vld [vmem:[#allocation2 + $0x838] sm:$0xff]  ;;  %v12921_v44 = vpack.c.bf16 %v7343_v4, %v7342_v55  ;;  %v7394_v55 = vld [vmem:[#allocation2 + $0x910] sm:$0xff] }
 0x8be   : > { %v13365_v49 = vunpack.i.h.bf16 %v18206_v6  ;;  %v13364_v16 = vunpack.i.l.bf16 %v18206_v6  ;;  %6942 = vrot.lane.b32.xlu1 %v6941_v42, %s13572_s19  ;;  %v6949_v42 = vrot.slane %v18178_v17, 4  ;;  %v12937_v32 = vpack.c.bf16 %v7367_v59, %v7366_v21  ;;  %v7395_v4 = vld [vmem:[#allocation2 + $0x918] sm:$0xff]  ;;  %v7600_v6 = vld [vmem:[#allocation5] sm:$0x1]  ;;  %v7414_v21 = vld [vmem:[#allocation2 + $0x9b0] sm:$0xff]  ;;  %s8812_s19 = scalar_lea.sflag [#allocation4], %s417_s29 }
 0x8bf   : > { %v12961_v27 = vpack.c.bf16 %v7395_v4, %v7394_v55 }
 0x8c0   : > { %v7010_v46 = vsel %vm7004_vm10, %v13364_v16, %v13365_v49  ;;  %v7009_v45 = vsel %vm7004_vm10, %v13360_v31, %v13364_v16  ;;  %12910 = vmatpush3.bf16.msra.mxu0 %v12909_v52  ;;  %v12929_v31 = vpack.c.bf16 %v7363_v51, %v7362_v35  ;;  %v7368_v52 = vld [vmem:[#allocation2 + $0x840] sm:$0xff] }
 0x8c1   : > { %v6875_v23 = vpop.permute.xlu0 %6874  ;;  %8085 = vmatprep.mubr.f32.mxu1 %v7010_v46  ;;  %12912 = vmatprep.subr.bf16.mxu0 %v12911_v39  ;;  %v7386_v39 = vld [vmem:[#allocation2 + $0x8d0] sm:$0xff]  ;;  %v12941_v16 = vpack.c.bf16 %v7369_v10, %v7368_v52  ;;  %v7388_v46 = vld [vmem:[#allocation2 + $0x8e0] sm:$0xff] }
 0x8c2   : > { %6946 = vrot.lane.b32.xlu1 %v6945_v43, %s13573_s12  ;;  %8086 = vmatmul.mubr.f32.vlgmr.msra.gmra.mrb[160].mxu1 %v7009_v45  ;;  %v6901_v54 = vsel %vm6746_vm1, %v6875_v23, %v6879_v40  ;;  %v6900_v2 = vsel %vm6744_vm13, %v6899_v19, %v6875_v23  ;;  %v12943_v63 = vpack.c.bf16 %v7387_v62, %v7386_v39  ;;  %v7371_v43 = vld [vmem:[#allocation2 + $0x858] sm:$0xff]  ;;  %v7389_v45 = vld [vmem:[#allocation2 + $0x8e8] sm:$0xff]  ;;  %v7372_v51 = vld [vmem:[#allocation2 + $0x860] sm:$0xff]  ;;  %s13480_s12 = scalar_lea.vmem %s18402_s23, 16 }
 0x8c3   : > { %12926 = vmatpush3.bf16.msra.mxu1 %v12925_v36  ;;  %v6961_v36 = vrot.slane %v18178_v17, 7  ;;  %v12947_v35 = vpack.c.bf16 %v7389_v45, %v7388_v46  ;;  %v7391_v23 = vld [vmem:[#allocation2 + $0x8f8] sm:$0xff]  ;;  %v7441_v17 = vld [vmem:[#allocation2 + $0xa88] sm:$0xff]  ;;  %v7416_v62 = vld [vmem:[#allocation2 + $0x9c0] sm:$0xff]  ;;  %p13481_p12 = scmp.ne.s32.totalorder %s18402_s23, %s13480_s12 }
 0x8c4   : > { %12928 = vmatprep.subr.bf16.mxu1 %v12927_v30  ;;  %12914 = vmatpush3.bf16.msra.mxu0 %v12913_v58  ;;  %v12945_v30 = vpack.c.bf16 %v7371_v43, %v7370_v13  ;;  %v7373_v58 = vld [vmem:[#allocation2 + $0x868] sm:$0xff]  ;;  %v7399_v39 = vld [vmem:[#allocation2 + $0x938] sm:$0xff]  ;;  %v7442_v13 = vld [vmem:[#allocation2 + $0xa90] sm:$0xff] }
 0x8c5   : > { %v6883_v14 = vpop.permute.xlu0 %6882  ;;  %12916 = vmatprep.subr.bf16.mxu0 %v12915_v26  ;;  %v12949_v12 = vpack.c.bf16 %v7373_v58, %v7372_v51  ;;  %v12951_v26 = vpack.c.bf16 %v7391_v23, %v7390_v47  ;;  %v7443_v43 = vld [vmem:[#allocation2 + $0xa98] sm:$0xff]  ;;  %v7400_v51 = vld [vmem:[#allocation2 + $0x940] sm:$0xff]  ;;  %v7401_v58 = vld [vmem:[#allocation2 + $0x948] sm:$0xff]  ;;  %p13482_p2 = pnand %p13481_p12, %p18954_p10 }
 0x8c6   : > { %v6902_v29 = vsel %vm6748_vm12, %v6901_v54, %v6883_v14  ;;  %6954 = vrot.lane.b32.xlu1 %v6953_v11, %s13577_s26  ;;  %v12957_v54 = vpack.c.bf16 %v7393_v50, %v7392_v48  ;;  %v12991_v37 = vpack.c.bf16 %v7443_v43, %v7442_v13  ;;  %v7473_v13 = vld [vmem:[#allocation2 + $0xb88] sm:$0xff] }
 0x8c7   : > { %v13376_v38 = vpack.i.bf16 %v6902_v29, %v6900_v2  ;;  %12930 = vmatpush3.bf16.msra.mxu1 %v12929_v31  ;;  %v12987_v31 = vpack.c.bf16 %v7441_v17, %v7440_v9  ;;  %v7412_v2 = vld [vmem:[#allocation2 + $0x9a0] sm:$0xff]  ;;  %v7413_v29 = vld [vmem:[#allocation2 + $0x9a8] sm:$0xff]  ;;  %v7426_v17 = vld [vmem:[#allocation2 + $0xa10] sm:$0xff]  ;;  %p13483_p3 = pneg %p13482_p2 }
 0x8c8   : > { %12932 = vmatprep.subr.bf16.mxu1 %v12931_v56  ;;  %12918 = vmatpush3.bf16.msra.mxu0 %v12917_v33  ;;  %v7410_v33 = vld [vmem:[#allocation2 + $0x990] sm:$0xff] }
 0x8c9   : > { %v18226_v24 = vpop.permute.xlu0 %7029  ;;  %13377 = vrot.lane.b32.xlu0 %v13376_v38, %s13579_s17  ;;  %12920 = vmatprep.subr.bf16.mxu0 %v12919_v34  ;;  %v12959_v34 = vpack.c.bf16 %v7411_v20, %v7410_v33  ;;  %v12963_v38 = vpack.c.bf16 %v7413_v29, %v7412_v2  ;;  %v7402_v33 = vld [vmem:[#allocation2 + $0x950] sm:$0xff]  ;;  %v7403_v20 = vld [vmem:[#allocation2 + $0x958] sm:$0xff]  ;;  %v7428_v29 = vld [vmem:[#allocation2 + $0xa20] sm:$0xff] }
 0x8cb   : > { %12934 = vmatpush3.bf16.msra.mxu1 %v12933_v3  ;;  %v7396_v3 = vld [vmem:[#allocation2 + $0x920] sm:$0xff] }
 0x8cc   : > { %12936 = vmatprep.subr.bf16.mxu1 %v12935_v53  ;;  %12922 = vmatpush3.bf16.msra.mxu0 %v12921_v44  ;;  %v7397_v53 = vld [vmem:[#allocation2 + $0x928] sm:$0xff] }
 0x8cd   : > { %v6887_v7 = vpop.permute.xlu0 %6886  ;;  %6950 = vrot.lane.b32.xlu0 %v6949_v42, %s18951_s28  ;;  %12956 = vmatprep.subr.bf16.mxu0 %v12955_v5  ;;  %v12965_v42 = vpack.c.bf16 %v7397_v53, %v7396_v3  ;;  %v7446_v3 = vld [vmem:[#allocation2 + $0xab0] sm:$0xff]  ;;  %v7447_v53 = vld [vmem:[#allocation2 + $0xab8] sm:$0xff] }
 0x8ce   : > { %v6903_v25 = vsel %vm6750_vm11, %v6883_v14, %v6887_v7  ;;  %v7398_v7 = vld [vmem:[#allocation2 + $0x930] sm:$0xff] }
 0x8cf   : > { %7043 = vrot.lane.b32.xlu1 %v6903_v25, %s13579_s17  ;;  %12938 = vmatpush3.bf16.msra.mxu1 %v12937_v32  ;;  %v7417_v25 = vld [vmem:[#allocation2 + $0x9c8] sm:$0xff]  ;;  %s13484_s17 = sshll.u32 %s13582_s21, 4  ;;  %s13485_s17 = int_to_ptr.vmem [resolvable:$false] %s13484_s17 }
 0x8d0   : > { %12940 = vmatprep.subr.bf16.mxu1 %v12939_v22  ;;  %p13487_p4 = scmp.lt.s32.totalorder %s18402_s23, %s13485_s17 }
 0x8d1   : > { %6958 = vrot.lane.b32.xlu0 %v6957_v15, %s18948_s14  ;;  %v6919_v59 = vpop.permute.xlu0 %6918  ;;  %v7424_v15 = vld [vmem:[#allocation2 + $0xa00] sm:$0xff] }
 0x8d3   : > { %6962 = vrot.lane.b32.xlu1 %v6961_v36, %s13576_s22  ;;  %12942 = vmatpush3.bf16.msra.mxu1 %v12941_v16  ;;  %v7425_v16 = vld [vmem:[#allocation2 + $0xa08] sm:$0xff]  ;;  %s13486_s22 = scalar_lea.vmem %s13485_s17, 32 }
 0x8d4   : > { %12944 = vmatprep.subr.bf16.mxu1 %v12943_v63  ;;  %v12989_v47 = vpack.c.bf16 %v7425_v16, %v7424_v15  ;;  %v7472_v16 = vld [vmem:[#allocation2 + $0xb80] sm:$0xff]  ;;  %p13488_p7 = scmp.lt.s32.totalorder %s13486_s22, %s13480_s12 }
 0x8d6   : > { %p13489_p8 = por %p13488_p7, %p13487_p4 }
 0x8d7   : > { %12946 = vmatpush3.bf16.msra.mxu1 %v12945_v30  ;;  %v12969_v30 = vpack.c.bf16 %v7399_v39, %v7398_v7  ;;  %v7449_v7 = vld [vmem:[#allocation2 + $0xac8] sm:$0xff] }
 0x8d8   : > { %12948 = vmatprep.subr.bf16.mxu1 %v12947_v35  ;;  %v12971_v35 = vpack.c.bf16 %v7417_v25, %v7416_v62  ;;  %v7406_v62 = vld [vmem:[#allocation2 + $0x970] sm:$0xff]  ;;  %v7407_v25 = vld [vmem:[#allocation2 + $0x978] sm:$0xff]  ;;  %p13490_p11 = pnand %p13489_p8, %p13483_p3 }
 0x8db   : > { %12950 = vmatpush3.bf16.msra.mxu1 %v12949_v12 }
 0x8dc   : > { %12952 = vmatprep.subr.bf16.mxu1 %v12951_v26  ;;  %v7418_v26 = vld [vmem:[#allocation2 + $0x9d0] sm:$0xff] }
 0x8df   : > { %12954 = vmatpush3.bf16.msra.mxu1 %v12953_v0  ;;  %v7427_v0 = vld [vmem:[#allocation2 + $0xa18] sm:$0xff] }
 0x8e0   : > { %12988 = vmatprep.subr.bf16.mxu1 %v12987_v31 }
 0x8f1   : > { %v10278_v40 = vpop.f32.mrb[154].mxu1 }
 0x8f2   : > { %v10279_v11 = vpop.f32.mrb[155].mxu1 }
 0x8f3   : > { %v10280_v56 = vadd.f32 %v10279_v11, %v10278_v40  ;;  %v12973_v40 = vpack.c.bf16 %v7401_v58, %v7400_v51  ;;  %v7444_v11 = vld [vmem:[#allocation2 + $0xaa0] sm:$0xff]  ;;  %v13019_v51 = vpack.c.bf16 %v7473_v13, %v7472_v16  ;;  %v7462_v13 = vld [vmem:[#allocation2 + $0xb30] sm:$0xff] }
 0x8f5   : > { %v7668_v32 = vadd.f32 %v10280_v56, %v7600_v6  ;;  %v7445_v56 = vld [vmem:[#allocation2 + $0xaa8] sm:$0xff] }
 0x8f6   : > { %v12995_v2 = vpack.c.bf16 %v7445_v56, %v7444_v11  ;;  %v7438_v56 = vld [vmem:[#allocation2 + $0xa70] sm:$0xff] }
 0x901   : > { %v7003_v19 = vpop.permute.xlu1 %7002 }
 0x902   : > { %v7011_v14 = vsel %vm7004_vm10, %v13365_v49, %v7003_v19  ;;  %v7102_v28 = vsel %vm7045_vm14, %v7003_v19, %v18226_v24  ;;  %v7415_v49 = vld [vmem:[#allocation2 + $0x9b8] sm:$0xff]  ;;  %vm18952_vm10 = vcmask 1014784  }
 0x903   : > { %8155 = vmatprep.mubr.f32.mxu0 %v7102_v28  ;;  %v12967_v10 = vpack.c.bf16 %v7415_v49, %v7414_v21  ;;  %v7421_v28 = vld [vmem:[#allocation2 + $0x9e8] sm:$0xff]  ;;  %v7404_v49 = vld [vmem:[#allocation2 + $0x960] sm:$0xff] }
 0x904   : > { %8156 = vmatmul.mubr.f32.vlgmr.msra.gmra.mrb[172].mxu0 %v7011_v14  ;;  %v7420_v14 = vld [vmem:[#allocation2 + $0x9e0] sm:$0xff] }
 0x905   : > { %v6907_v18 = vpop.permute.xlu1 %6906  ;;  %12958 = vmatpush3.bf16.msra.mxu0 %v12957_v54  ;;  %v12979_v21 = vpack.c.bf16 %v7421_v28, %v7420_v14  ;;  %v7475_v14 = vld [vmem:[#allocation2 + $0xb98] sm:$0xff] }
 0x906   : > { %12960 = vmatprep.subr.bf16.mxu0 %v12959_v34  ;;  %v6965_v1 = vsel %vm6724_vm2, %v18126_v41, %v6907_v18  ;;  %vm18953_vm2 = vcmask 982016   ;;  %v12993_v34 = vpack.c.bf16 %v7427_v0, %v7426_v17  ;;  %v7429_v18 = vld [vmem:[#allocation2 + $0xa28] sm:$0xff]  ;;  %v7436_v17 = vld [vmem:[#allocation2 + $0xa60] sm:$0xff] }
 0x907   : > { %v7437_v0 = vld [vmem:[#allocation2 + $0xa68] sm:$0xff] }
 0x908   : > { %v10313_v44 = vpop.f32.mrb[166].mxu0  ;;  %v13013_v11 = vpack.c.bf16 %v7437_v0, %v7436_v17  ;;  %v7466_v0 = vld [vmem:[#allocation2 + $0xb50] sm:$0xff] }
 0x909   : > { %v6911_v61 = vpop.permute.xlu1 %6910  ;;  %v10314_v5 = vpop.f32.mrb[167].mxu0  ;;  %12962 = vmatpush3.bf16.msra.mxu0 %v12961_v27 }
 0x90a   : > { %v10315_v22 = vadd.f32 %v10314_v5, %v10313_v44  ;;  %v6966_v52 = vsel %vm18952_vm10, %v6965_v1, %v6911_v61  ;;  %12964 = vmatprep.subr.bf16.mxu0 %v12963_v38  ;;  %v12977_v38 = vpack.c.bf16 %v7403_v20, %v7402_v33  ;;  %v7422_v44 = vld [vmem:[#allocation2 + $0x9f0] sm:$0xff]  ;;  %v7423_v1 = vld [vmem:[#allocation2 + $0x9f8] sm:$0xff] }
 0x90b   : > { %7070 = vrot.lane.b32.xlu0 %v6966_v52, %s13580_s8  ;;  %v12983_v39 = vpack.c.bf16 %v7423_v1, %v7422_v44 }
 0x90c   : > { %v7738_v41 = vadd.f32 %v10315_v22, %v7668_v32  ;;  %v18246_v63 = vpop.permute.xlu0 %13367  ;;  %v7430_v32 = vld [vmem:[#allocation2 + $0xa30] sm:$0xff]  ;;  %v7431_v22 = vld [vmem:[#allocation2 + $0xa38] sm:$0xff] }
 0x90d   : > { %v13370_v36 = vunpack.i.h.bf16 %v18246_v63  ;;  %v13369_v46 = vunpack.i.l.bf16 %v18246_v63  ;;  %v6915_v45 = vpop.permute.xlu1 %6914  ;;  %12966 = vmatpush3.bf16.msra.mxu0 %v12965_v42  ;;  %v12999_v42 = vpack.c.bf16 %v7447_v53, %v7446_v3  ;;  %v13001_v15 = vpack.c.bf16 %v7431_v22, %v7430_v32  ;;  %v7458_v53 = vld [vmem:[#allocation2 + $0xb10] sm:$0xff] }
 0x90e   : > { %12968 = vmatprep.subr.bf16.mxu0 %v12967_v10  ;;  %v6967_v9 = vsel %vm6727_vm9, %v6911_v61, %v6915_v45  ;;  %v12997_v61 = vpack.c.bf16 %v7429_v18, %v7428_v29  ;;  %v7448_v10 = vld [vmem:[#allocation2 + $0xac0] sm:$0xff]  ;;  %v12985_v45 = vpack.c.bf16 %v7407_v25, %v7406_v62  ;;  %vm13581_vm9 = vmmov 0  }
 0x90f   : > { %v7047_v23 = vsel %vm7045_vm14, %v13369_v46, %v13370_v36  ;;  %v7046_v12 = vsel %vm7045_vm14, %v18226_v24, %v13369_v46  ;;  %v12975_v24 = vpack.c.bf16 %v7419_v8, %v7418_v26  ;;  %v6968_v19 = vsel %vm18953_vm2, %v6967_v9, %v6919_v59  ;;  %v7433_v46 = vld [vmem:[#allocation2 + $0xa48] sm:$0xff]  ;;  %v7452_v26 = vld [vmem:[#allocation2 + $0xae0] sm:$0xff] }
 0x910   : > { %8225 = vmatprep.mubr.f32.mxu1 %v7047_v23  ;;  %v18256_v48 = vpop.permute.xlu0 %6926  ;;  %v13003_v43 = vpack.c.bf16 %v7449_v7, %v7448_v10  ;;  %v7434_v23 = vld [vmem:[#allocation2 + $0xa50] sm:$0xff]  ;;  %v7453_v8 = vld [vmem:[#allocation2 + $0xae8] sm:$0xff]  ;;  %v7479_v7 = vld [vmem:[#allocation2 + $0xbb8] sm:$0xff] }
 0x911   : > { %v6923_v31 = vpop.permute.xlu1 %6922  ;;  %8226 = vmatmul.mubr.f32.vlgmr.msra.gmra.mrb[162].mxu1 %v7046_v12  ;;  %12970 = vmatpush3.bf16.msra.mxu0 %v12969_v30  ;;  %v7450_v30 = vld [vmem:[#allocation2 + $0xad0] sm:$0xff]  ;;  %v7435_v12 = vld [vmem:[#allocation2 + $0xa58] sm:$0xff]  ;;  %v13011_v9 = vpack.c.bf16 %v7453_v8, %v7452_v26 }
 0x912   : > { %v6969_v50 = vsel %vm6730_vm6, %v6919_v59, %v6923_v31  ;;  %12972 = vmatprep.subr.bf16.mxu0 %v12971_v35  ;;  %12990 = vmatpush3.bf16.msra.mxu1 %v12989_v47  ;;  %v7405_v59 = vld [vmem:[#allocation2 + $0x968] sm:$0xff]  ;;  %v7451_v35 = vld [vmem:[#allocation2 + $0xad8] sm:$0xff]  ;;  %v7454_v31 = vld [vmem:[#allocation2 + $0xaf0] sm:$0xff] }
 0x913   : > { %v6970_v54 = vsel %vm6732_vm4, %v6969_v50, %v18256_v48  ;;  %12992 = vmatprep.subr.bf16.mxu1 %v12991_v37  ;;  %v12981_v52 = vpack.c.bf16 %v7405_v59, %v7404_v49  ;;  %v13007_v47 = vpack.c.bf16 %v7451_v35, %v7450_v30  ;;  %v13009_v37 = vpack.c.bf16 %v7435_v12, %v7434_v23  ;;  %v7456_v50 = vld [vmem:[#allocation2 + $0xb00] sm:$0xff]  ;;  %v7477_v59 = vld [vmem:[#allocation2 + $0xba8] sm:$0xff]  ;;  %v7478_v10 = vld [vmem:[#allocation2 + $0xbb0] sm:$0xff] }
 0x914   : > { %v10348_v55 = vpop.f32.mrb[156].mxu1  ;;  %v13381_v4 = vpack.i.bf16 %v6970_v54, %v6968_v19  ;;  %v7439_v19 = vld [vmem:[#allocation2 + $0xa78] sm:$0xff]  ;;  %v7474_v54 = vld [vmem:[#allocation2 + $0xb90] sm:$0xff]  ;;  %v6931_v28 = vpop.permute.xlu0 %6930  ;;  %v7476_v49 = vld [vmem:[#allocation2 + $0xba0] sm:$0xff]  ;;  %v13031_v16 = vpack.c.bf16 %v7479_v7, %v7478_v10 }
 0x915   : > { %v10349_v27 = vpop.f32.mrb[157].mxu1  ;;  %12974 = vmatpush3.bf16.msra.mxu0 %v12973_v40  ;;  %v7455_v40 = vld [vmem:[#allocation2 + $0xaf8] sm:$0xff]  ;;  %v13023_v3 = vpack.c.bf16 %v7475_v14, %v7474_v54  ;;  %v13027_v63 = vpack.c.bf16 %v7477_v59, %v7476_v49  ;;  %v6971_v32 = vsel %vm6734_vm8, %v18256_v48, %v6931_v28  ;;  %v7480_v48 = vld [vmem:[#allocation2 + $0xbc0] sm:$0xff]  ;;  %v7489_v12 = vld [vmem:[#allocation2 + $0xc08] sm:$0xff] }
 0x916   : > { %v10350_v6 = vadd.f32 %v10349_v27, %v10348_v55  ;;  %13382 = vrot.lane.b32.xlu0 %v13381_v4, %s13580_s8  ;;  %12976 = vmatprep.subr.bf16.mxu0 %v12975_v24  ;;  %v7457_v24 = vld [vmem:[#allocation2 + $0xb08] sm:$0xff]  ;;  %v13015_v20 = vpack.c.bf16 %v7455_v40, %v7454_v31  ;;  %v7504_v4 = vld [vmem:[#allocation2 + $0xc80] sm:$0xff]  ;;  %v7506_v8 = vld [vmem:[#allocation2 + $0xc90] sm:$0xff] }
 0x917   : > { %12994 = vmatpush3.bf16.msra.mxu1 %v12993_v34  ;;  %v13021_v29 = vpack.c.bf16 %v7457_v24, %v7456_v50  ;;  %v7464_v35 = vld [vmem:[#allocation2 + $0xb40] sm:$0xff]  ;;  %v7467_v31 = vld [vmem:[#allocation2 + $0xb58] sm:$0xff]  ;;  %v7485_v50 = vld [vmem:[#allocation2 + $0xbe8] sm:$0xff] }
 0x918   : > { %v18263_v5 = vadd.f32 %v10350_v6, %v7738_v41  ;;  %12996 = vmatprep.subr.bf16.mxu1 %v12995_v2  ;;  %v7432_v41 = vld [vmem:[#allocation2 + $0xa40] sm:$0xff]  ;;  %v7505_v2 = vld [vmem:[#allocation2 + $0xc88] sm:$0xff]  ;;  %v7459_v6 = vld [vmem:[#allocation2 + $0xb18] sm:$0xff] }
 0x919   : > { %12978 = vmatpush3.bf16.msra.mxu0 %v12977_v38  ;;  %v13005_v58 = vpack.c.bf16 %v7433_v46, %v7432_v41  ;;  %v13017_v38 = vpack.c.bf16 %v7439_v19, %v7438_v56  ;;  %v13051_v44 = vpack.c.bf16 %v7505_v2, %v7504_v4  ;;  %v13025_v1 = vpack.c.bf16 %v7459_v6, %v7458_v53  ;;  %v7481_v41 = vld [vmem:[#allocation2 + $0xbc8] sm:$0xff]  ;;  %v7488_v23 = vld [vmem:[#allocation2 + $0xc00] sm:$0xff]  ;;  %v7490_v28 = vld [vmem:[#allocation2 + $0xc10] sm:$0xff] }
 0x91a   : > { %12980 = vmatprep.subr.bf16.mxu0 %v12979_v21  ;;  %v13035_v30 = vpack.c.bf16 %v7481_v41, %v7480_v48  ;;  %v7484_v56 = vld [vmem:[#allocation2 + $0xbe0] sm:$0xff]  ;;  %v13041_v4 = vpack.c.bf16 %v7467_v31, %v7466_v0  ;;  %v7486_v6 = vld [vmem:[#allocation2 + $0xbf0] sm:$0xff]  ;;  %v7471_v10 = vld [vmem:[#allocation2 + $0xb78] sm:$0xff] }
 0x91b   : > { %12998 = vmatpush3.bf16.msra.mxu1 %v12997_v61  ;;  %v6939_v61 = vpop.permute.xlu0 %6938  ;;  %v7508_v2 = vld [vmem:[#allocation2 + $0xca0] sm:$0xff]  ;;  %v7494_v41 = vld [vmem:[#allocation2 + $0xc30] sm:$0xff]  ;;  %v7499_v0 = vld [vmem:[#allocation2 + $0xc58] sm:$0xff] }
 0x91c   : > { %13000 = vmatprep.subr.bf16.mxu1 %v12999_v42  ;;  %v7460_v42 = vld [vmem:[#allocation2 + $0xb20] sm:$0xff] }
 0x91d   : > { %12982 = vmatpush3.bf16.msra.mxu0 %v12981_v52  ;;  %v7492_v59 = vld [vmem:[#allocation2 + $0xc20] sm:$0xff] }
 0x91e   : > { %12984 = vmatprep.subr.bf16.mxu0 %v12983_v39  ;;  %v7516_v31 = vld [vmem:[#allocation2 + $0xce0] sm:$0xff] }
 0x91f   : > { %13002 = vmatpush3.bf16.msra.mxu1 %v13001_v15 }
 0x920   : > { %13004 = vmatprep.subr.bf16.mxu1 %v13003_v43  ;;  %v7463_v43 = vld [vmem:[#allocation2 + $0xb38] sm:$0xff] }
 0x921   : > { %12986 = vmatpush3.bf16.msra.mxu0 %v12985_v45  ;;  %v13033_v46 = vpack.c.bf16 %v7463_v43, %v7462_v13 }
 0x922   : > { %13020 = vmatprep.subr.bf16.mxu0 %v13019_v51  ;;  %v7465_v51 = vld [vmem:[#allocation2 + $0xb48] sm:$0xff] }
 0x923   : > { %13006 = vmatpush3.bf16.msra.mxu1 %v13005_v58  ;;  %v7482_v58 = vld [vmem:[#allocation2 + $0xbd0] sm:$0xff]  ;;  %v13037_v26 = vpack.c.bf16 %v7465_v51, %v7464_v35  ;;  %v7513_v35 = vld [vmem:[#allocation2 + $0xcc8] sm:$0xff] }
 0x924   : > { %13008 = vmatprep.subr.bf16.mxu1 %v13007_v47  ;;  %v7483_v47 = vld [vmem:[#allocation2 + $0xbd8] sm:$0xff] }
 0x925   : > { %v13039_v17 = vpack.c.bf16 %v7483_v47, %v7482_v58 }
 0x927   : > { %13010 = vmatpush3.bf16.msra.mxu1 %v13009_v37 }
 0x928   : > { %v18265_v33 = vpop.permute.xlu1 %13372  ;;  %13012 = vmatprep.subr.bf16.mxu1 %v13011_v9  ;;  %v7507_v9 = vld [vmem:[#allocation2 + $0xc98] sm:$0xff] }
 0x929   : > { %v13375_v34 = vunpack.i.h.bf16 %v18265_v33  ;;  %v13374_v55 = vunpack.i.l.bf16 %v18265_v33  ;;  %v13055_v14 = vpack.c.bf16 %v7507_v9, %v7506_v8  ;;  %v7515_v8 = vld [vmem:[#allocation2 + $0xcd8] sm:$0xff] }
 0x92b   : > { %v7049_v18 = vsel %vm7045_vm14, %v13374_v55, %v13375_v34  ;;  %v7048_v27 = vsel %vm7045_vm14, %v13370_v36, %v13374_v55  ;;  %13014 = vmatpush3.bf16.msra.mxu1 %v13013_v11  ;;  %v7461_v36 = vld [vmem:[#allocation2 + $0xb28] sm:$0xff]  ;;  %v7491_v55 = vld [vmem:[#allocation2 + $0xc18] sm:$0xff] }
 0x92c   : > { %v6935_v21 = vpop.permute.xlu1 %6934  ;;  %8295 = vmatprep.mubr.f32.mxu0 %v7049_v18  ;;  %13016 = vmatprep.subr.bf16.mxu1 %v13015_v20  ;;  %v13029_v15 = vpack.c.bf16 %v7461_v36, %v7460_v42  ;;  %v13053_v20 = vpack.c.bf16 %v7489_v12, %v7488_v23  ;;  %v7509_v18 = vld [vmem:[#allocation2 + $0xca8] sm:$0xff]  ;;  %v13057_v33 = vpack.c.bf16 %v7491_v55, %v7490_v28  ;;  %v7496_v23 = vld [vmem:[#allocation2 + $0xc40] sm:$0xff]  ;;  %v7502_v28 = vld [vmem:[#allocation2 + $0xc70] sm:$0xff] }
 0x92d   : > { %8296 = vmatmul.mubr.f32.vlgmr.msra.gmra.mrb[174].mxu0 %v7048_v27  ;;  %v6973_v22 = vsel %vm6738_vm7, %v6935_v21, %v6939_v61  ;;  %v6972_v39 = vsel %vm6736_vm15, %v6971_v32, %v6935_v21  ;;  %v13043_v27 = vpack.c.bf16 %v7485_v50, %v7484_v56  ;;  %v13059_v49 = vpack.c.bf16 %v7509_v18, %v7508_v2  ;;  %v7510_v61 = vld [vmem:[#allocation2 + $0xcb0] sm:$0xff]  ;;  %v7511_v32 = vld [vmem:[#allocation2 + $0xcb8] sm:$0xff]  ;;  %v7497_v12 = vld [vmem:[#allocation2 + $0xc48] sm:$0xff] }
 0x92e   : > { %13022 = vmatpush3.bf16.msra.mxu0 %v13021_v29  ;;  %v13063_v48 = vpack.c.bf16 %v7511_v32, %v7510_v61  ;;  %v7500_v50 = vld [vmem:[#allocation2 + $0xc60] sm:$0xff]  ;;  %v7503_v55 = vld [vmem:[#allocation2 + $0xc78] sm:$0xff]  ;;  %v7569_v2 = vld [vmem:[#allocation2 + $0xe88] sm:$0xff] }
 0x92f   : > { %13018 = vmatpush3.bf16.msra.mxu1 %v13017_v38  ;;  %13024 = vmatprep.subr.bf16.mxu0 %v13023_v3  ;;  %v7468_v38 = vld [vmem:[#allocation2 + $0xb60] sm:$0xff]  ;;  %v7469_v3 = vld [vmem:[#allocation2 + $0xb68] sm:$0xff]  ;;  %v7538_v61 = vld [vmem:[#allocation2 + $0xd90] sm:$0xff] }
 0x930   : > { %v18278_v52 = vpop.permute.xlu1 %6942  ;;  %13052 = vmatprep.subr.bf16.mxu1 %v13051_v44  ;;  %v7493_v44 = vld [vmem:[#allocation2 + $0xc28] sm:$0xff] }
 0x931   : > { %v6974_v62 = vsel %vm6740_vm3, %v6973_v22, %v18278_v52  ;;  %v7470_v22 = vld [vmem:[#allocation2 + $0xb70] sm:$0xff]  ;;  %v13061_v43 = vpack.c.bf16 %v7493_v44, %v7492_v59  ;;  %v7520_v44 = vld [vmem:[#allocation2 + $0xd00] sm:$0xff] }
 0x932   : > { %v13386_v25 = vpack.i.bf16 %v6974_v62, %v6972_v39  ;;  %13026 = vmatpush3.bf16.msra.mxu0 %v13025_v1  ;;  %v13045_v1 = vpack.c.bf16 %v7469_v3, %v7468_v38 }
 0x933   : > { %13028 = vmatprep.subr.bf16.mxu0 %v13027_v63 }
 0x934   : > { %13387 = vrot.lane.b32.xlu1 %v13386_v25, %s13580_s8  ;;  %v6947_v45 = vpop.permute.xlu1 %6946  ;;  %v7536_v25 = vld [vmem:[#allocation2 + $0xd80] sm:$0xff] }
 0x935   : > { %v6975_v63 = vsel %vm6742_vm5, %v18278_v52, %v6947_v45  ;;  %v13049_v45 = vpack.c.bf16 %v7471_v10, %v7470_v22  ;;  %v7522_v10 = vld [vmem:[#allocation2 + $0xd10] sm:$0xff] }
 0x936   : > { %13030 = vmatpush3.bf16.msra.mxu0 %v13029_v15  ;;  %v7537_v15 = vld [vmem:[#allocation2 + $0xd88] sm:$0xff] }
 0x937   : > { %13032 = vmatprep.subr.bf16.mxu0 %v13031_v16  ;;  %v13083_v51 = vpack.c.bf16 %v7537_v15, %v7536_v25 }
 0x938   : > { %v6955_v24 = vpop.permute.xlu1 %6954 }
 0x93a   : > { %13034 = vmatpush3.bf16.msra.mxu0 %v13033_v46  ;;  %v7495_v46 = vld [vmem:[#allocation2 + $0xc38] sm:$0xff] }
 0x93b   : > { %v13378_v37 = vpop.permute.xlu0 %13377  ;;  %13036 = vmatprep.subr.bf16.mxu0 %v13035_v30  ;;  %v7512_v30 = vld [vmem:[#allocation2 + $0xcc0] sm:$0xff]  ;;  %v13065_v58 = vpack.c.bf16 %v7495_v46, %v7494_v41 }
 0x93c   : > { %v13380_v40 = vunpack.i.h.bf16 %v13378_v37  ;;  %v13379_v11 = vunpack.i.l.bf16 %v13378_v37  ;;  %v13067_v47 = vpack.c.bf16 %v7513_v35, %v7512_v30  ;;  %v13069_v37 = vpack.c.bf16 %v7497_v12, %v7496_v23  ;;  %v7526_v30 = vld [vmem:[#allocation2 + $0xd30] sm:$0xff]  ;;  %v7527_v35 = vld [vmem:[#allocation2 + $0xd38] sm:$0xff] }
 0x93d   : > { %v7570_v12 = vld [vmem:[#allocation2 + $0xe90] sm:$0xff] }
 0x93e   : > { %v7051_v19 = vsel %vm7045_vm14, %v13379_v11, %v13380_v40  ;;  %v7050_v54 = vsel %vm7045_vm14, %v13375_v34, %v13379_v11  ;;  %13038 = vmatpush3.bf16.msra.mxu0 %v13037_v26  ;;  %v7487_v34 = vld [vmem:[#allocation2 + $0xbf8] sm:$0xff]  ;;  %v7514_v26 = vld [vmem:[#allocation2 + $0xcd0] sm:$0xff] }
 0x93f   : > { %v6951_v29 = vpop.permute.xlu0 %6950  ;;  %8365 = vmatprep.mubr.f32.mxu1 %v7051_v19  ;;  %13040 = vmatprep.subr.bf16.mxu0 %v13039_v17  ;;  %v13047_v62 = vpack.c.bf16 %v7487_v34, %v7486_v6  ;;  %v13071_v9 = vpack.c.bf16 %v7515_v8, %v7514_v26  ;;  %v7498_v17 = vld [vmem:[#allocation2 + $0xc50] sm:$0xff]  ;;  %v7519_v19 = vld [vmem:[#allocation2 + $0xcf8] sm:$0xff] }
 0x940   : > { %8366 = vmatmul.mubr.f32.vlgmr.msra.gmra.mrb[164].mxu1 %v7050_v54  ;;  %v6977_v42 = vsel %vm6746_vm1, %v6951_v29, %v6955_v24  ;;  %v6976_v7 = vsel %vm6744_vm13, %v6975_v63, %v6951_v29  ;;  %v13073_v11 = vpack.c.bf16 %v7499_v0, %v7498_v17  ;;  %v7501_v24 = vld [vmem:[#allocation2 + $0xc68] sm:$0xff]  ;;  %v13081_v29 = vpack.c.bf16 %v7503_v55, %v7502_v28  ;;  %v7539_v63 = vld [vmem:[#allocation2 + $0xd98] sm:$0xff]  ;;  %v7528_v0 = vld [vmem:[#allocation2 + $0xd40] sm:$0xff] }
 0x941   : > { %v18288_v53 = vpop.permute.xlu1 %7043  ;;  %13054 = vmatpush3.bf16.msra.mxu1 %v13053_v20  ;;  %v7518_v20 = vld [vmem:[#allocation2 + $0xcf0] sm:$0xff]  ;;  %v13077_v54 = vpack.c.bf16 %v7501_v24, %v7500_v50  ;;  %v13087_v22 = vpack.c.bf16 %v7539_v63, %v7538_v61  ;;  %v7571_v26 = vld [vmem:[#allocation2 + $0xe98] sm:$0xff]  ;;  %v7573_v28 = vld [vmem:[#allocation2 + $0xea8] sm:$0xff] }
 0x942   : > { %v18292_v21 = vsel %vm7045_vm14, %v13380_v40, %v18288_v53  ;;  %13056 = vmatprep.subr.bf16.mxu1 %v13055_v14  ;;  %13042 = vmatpush3.bf16.msra.mxu0 %v13041_v4  ;;  %v7517_v40 = vld [vmem:[#allocation2 + $0xce8] sm:$0xff]  ;;  %v13079_v14 = vpack.c.bf16 %v7519_v19, %v7518_v20  ;;  %v7568_v4 = vld [vmem:[#allocation2 + $0xe80] sm:$0xff]  ;;  %v7547_v24 = vld [vmem:[#allocation2 + $0xdd8] sm:$0xff]  ;;  %v13119_v20 = vpack.c.bf16 %v7571_v26, %v7570_v12 }
 0x943   : > { %v6959_v36 = vpop.permute.xlu0 %6958  ;;  %13044 = vmatprep.subr.bf16.mxu0 %v13043_v27  ;;  %v13075_v56 = vpack.c.bf16 %v7517_v40, %v7516_v31  ;;  %v13115_v18 = vpack.c.bf16 %v7569_v2, %v7568_v4  ;;  %v7529_v31 = vld [vmem:[#allocation2 + $0xd48] sm:$0xff]  ;;  %v7546_v40 = vld [vmem:[#allocation2 + $0xdd0] sm:$0xff]  ;;  %v7563_v12 = vld [vmem:[#allocation2 + $0xe58] sm:$0xff] }
 0x944   : > { %v6978_v39 = vsel %vm6748_vm12, %v6977_v42, %v6959_v36  ;;  %v7554_v19 = vld [vmem:[#allocation2 + $0xe10] sm:$0xff]  ;;  %v13101_v55 = vpack.c.bf16 %v7529_v31, %v7528_v0  ;;  %v13103_v4 = vpack.c.bf16 %v7547_v24, %v7546_v40  ;;  %v7533_v61 = vld [vmem:[#allocation2 + $0xd68] sm:$0xff]  ;;  %v7580_v26 = vld [vmem:[#allocation2 + $0xee0] sm:$0xff] }
 0x945   : > { %v13391_v16 = vpack.i.bf16 %v6978_v39, %v6976_v7  ;;  %v6963_v13 = vpop.permute.xlu1 %6962  ;;  %13058 = vmatpush3.bf16.msra.mxu1 %v13057_v33  ;;  %v7523_v7 = vld [vmem:[#allocation2 + $0xd18] sm:$0xff]  ;;  %v7540_v39 = vld [vmem:[#allocation2 + $0xda0] sm:$0xff]  ;;  %v7530_v2 = vld [vmem:[#allocation2 + $0xd50] sm:$0xff] }
 0x946   : > { %v6979_v52 = vsel %vm6750_vm11, %v6959_v36, %v6963_v13  ;;  %13060 = vmatprep.subr.bf16.mxu1 %v13059_v49  ;;  %13046 = vmatpush3.bf16.msra.mxu0 %v13045_v1  ;;  %v7521_v1 = vld [vmem:[#allocation2 + $0xd08] sm:$0xff]  ;;  %v7550_v63 = vld [vmem:[#allocation2 + $0xdf0] sm:$0xff]  ;;  %v7583_v40 = vld [vmem:[#allocation2 + $0xef8] sm:$0xff] }
 0x947   : > { %13392 = vrot.lane.b32.xlu0 %v13391_v16, %s13580_s8  ;;  %7084 = vrot.lane.b32.xlu1 %v6979_v52, %s13580_s8  ;;  %v13085_v36 = vpack.c.bf16 %v7521_v1, %v7520_v44  ;;  %v7524_v16 = vld [vmem:[#allocation2 + $0xd20] sm:$0xff]  ;;  %v7525_v13 = vld [vmem:[#allocation2 + $0xd28] sm:$0xff]  ;;  %v7542_v52 = vld [vmem:[#allocation2 + $0xdb0] sm:$0xff] }
 0x948   : > { %13048 = vmatprep.subr.bf16.mxu0 %v13047_v62  ;;  %v7541_v62 = vld [vmem:[#allocation2 + $0xda8] sm:$0xff]  ;;  %v7532_v1 = vld [vmem:[#allocation2 + $0xd60] sm:$0xff]  ;;  %v7582_v31 = vld [vmem:[#allocation2 + $0xef0] sm:$0xff] }
 0x949   : > { %13062 = vmatpush3.bf16.msra.mxu1 %v13061_v43  ;;  %v13091_v15 = vpack.c.bf16 %v7541_v62, %v7540_v39  ;;  %v7577_v39 = vld [vmem:[#allocation2 + $0xec8] sm:$0xff]  ;;  %v7567_v24 = vld [vmem:[#allocation2 + $0xe78] sm:$0xff] }
 0x94a   : > { %13064 = vmatprep.subr.bf16.mxu1 %v13063_v48  ;;  %13050 = vmatpush3.bf16.msra.mxu0 %v13049_v45  ;;  %v7543_v48 = vld [vmem:[#allocation2 + $0xdb8] sm:$0xff]  ;;  %v7565_v0 = vld [vmem:[#allocation2 + $0xe68] sm:$0xff] }
 0x94b   : > { %13084 = vmatprep.subr.bf16.mxu0 %v13083_v51  ;;  %v13095_v45 = vpack.c.bf16 %v7543_v48, %v7542_v52  ;;  %v7545_v51 = vld [vmem:[#allocation2 + $0xdc8] sm:$0xff] }
 0x94d   : > { %13066 = vmatpush3.bf16.msra.mxu1 %v13065_v58  ;;  %v7552_v58 = vld [vmem:[#allocation2 + $0xe00] sm:$0xff] }
 0x94e   : > { %13068 = vmatprep.subr.bf16.mxu1 %v13067_v47  ;;  %v7553_v47 = vld [vmem:[#allocation2 + $0xe08] sm:$0xff] }
 0x951   : > { %13070 = vmatpush3.bf16.msra.mxu1 %v13069_v37 }
 0x952   : > { %13072 = vmatprep.subr.bf16.mxu1 %v13071_v9  ;;  %v13097_v9 = vpack.c.bf16 %v7527_v35, %v7526_v30  ;;  %v7579_v30 = vld [vmem:[#allocation2 + $0xed8] sm:$0xff] }
 0x955   : > { %13074 = vmatpush3.bf16.msra.mxu1 %v13073_v11  ;;  %v13117_v11 = vpack.c.bf16 %v7553_v47, %v7552_v58  ;;  %v7562_v47 = vld [vmem:[#allocation2 + $0xe50] sm:$0xff] }
 0x956   : > { %13076 = vmatprep.subr.bf16.mxu1 %v13075_v56 }
 0x959   : > { %13078 = vmatpush3.bf16.msra.mxu1 %v13077_v54  ;;  %v7555_v54 = vld [vmem:[#allocation2 + $0xe18] sm:$0xff] }
 0x95a   : > { %13080 = vmatprep.subr.bf16.mxu1 %v13079_v14  ;;  %v7572_v14 = vld [vmem:[#allocation2 + $0xea0] sm:$0xff] }
 0x95d   : > { %13082 = vmatpush3.bf16.msra.mxu1 %v13081_v29  ;;  %v7531_v29 = vld [vmem:[#allocation2 + $0xd58] sm:$0xff] }
 0x95e   : > { %13116 = vmatprep.subr.bf16.mxu1 %v13115_v18  ;;  %v7548_v18 = vld [vmem:[#allocation2 + $0xde0] sm:$0xff] }
 0x95f   : > { %v10383_v27 = vpop.f32.mrb[168].mxu0 }
 0x960   : > { %v10384_v38 = vpop.f32.mrb[169].mxu0 }
 0x961   : > { %v10385_v3 = vadd.f32 %v10384_v38, %v10383_v27  ;;  %v13121_v27 = vpack.c.bf16 %v7555_v54, %v7554_v19  ;;  %v7549_v38 = vld [vmem:[#allocation2 + $0xde8] sm:$0xff] }
 0x962   : > { %v13107_v44 = vpack.c.bf16 %v7549_v38, %v7548_v18  ;;  %v7585_v19 = vld [vmem:[#allocation2 + $0xf08] sm:$0xff]  ;;  %v7586_v18 = vld [vmem:[#allocation2 + $0xf10] sm:$0xff] }
 0x963   : > { %v7878_v33 = vadd.f32 %v10385_v3, %v18263_v5  ;;  %v13089_v5 = vpack.c.bf16 %v7523_v7, %v7522_v10  ;;  %v13123_v3 = vpack.c.bf16 %v7573_v28, %v7572_v14  ;;  %v7559_v10 = vld [vmem:[#allocation2 + $0xe38] sm:$0xff]  ;;  %v7576_v7 = vld [vmem:[#allocation2 + $0xec0] sm:$0xff] }
 0x964   : > { %v13131_v48 = vpack.c.bf16 %v7577_v39, %v7576_v7  ;;  %v7596_v7 = vld [vmem:[#allocation2 + $0xf60] sm:$0xff]  ;;  %v7597_v39 = vld [vmem:[#allocation2 + $0xf68] sm:$0xff] }
 0x972   : > { %v10418_v6 = vpop.f32.mrb[158].mxu1 }
 0x973   : > { %v10419_v34 = vpop.f32.mrb[159].mxu1 }
 0x974   : > { %v10420_v49 = vadd.f32 %v10419_v34, %v10418_v6  ;;  %v7557_v6 = vld [vmem:[#allocation2 + $0xe28] sm:$0xff]  ;;  %v7574_v34 = vld [vmem:[#allocation2 + $0xeb0] sm:$0xff] }
 0x976   : > { %v7948_v59 = vadd.f32 %v10420_v49, %v7878_v33  ;;  %v7556_v33 = vld [vmem:[#allocation2 + $0xe20] sm:$0xff]  ;;  %v7575_v49 = vld [vmem:[#allocation2 + $0xeb8] sm:$0xff] }
 0x97d   : > { %v7071_v42 = vpop.permute.xlu0 %7070 }
 0x97e   : > { %v7103_v32 = vsel %vm5718_vm0, %v18288_v53, %v7071_v42  ;;  %v13093_v53 = vpack.c.bf16 %v7525_v13, %v7524_v16  ;;  %v7534_v16 = vld [vmem:[#allocation2 + $0xd70] sm:$0xff]  ;;  %v7535_v13 = vld [vmem:[#allocation2 + $0xd78] sm:$0xff] }
 0x97f   : > { %8435 = vmatprep.mubr.f32.mxu0 %v7103_v32  ;;  %v13127_v32 = vpack.c.bf16 %v7575_v49, %v7574_v34  ;;  %v7592_v49 = vld [vmem:[#allocation2 + $0xf40] sm:$0xff] }
 0x980   : > { %8436 = vmatmul.mubr.f32.vlgmr.msra.gmra.mrb[176].mxu0 %v18292_v21  ;;  %v7544_v21 = vld [vmem:[#allocation2 + $0xdc0] sm:$0xff] }
 0x981   : > { %13086 = vmatpush3.bf16.msra.mxu0 %v13085_v36  ;;  %v13099_v17 = vpack.c.bf16 %v7545_v51, %v7544_v21  ;;  %v7551_v36 = vld [vmem:[#allocation2 + $0xdf8] sm:$0xff]  ;;  %v13113_v21 = vpack.c.bf16 %v7535_v13, %v7534_v16 }
 0x982   : > { %v10453_v25 = vpop.f32.mrb[170].mxu0  ;;  %13088 = vmatprep.subr.bf16.mxu0 %v13087_v22  ;;  %v7558_v22 = vld [vmem:[#allocation2 + $0xe30] sm:$0xff] }
 0x983   : > { %v10454_v43 = vpop.f32.mrb[171].mxu0 }
 0x984   : > { %v10455_v41 = vadd.f32 %v10454_v43, %v10453_v25  ;;  %v13129_v43 = vpack.c.bf16 %v7559_v10, %v7558_v22 }
 0x985   : > { %13090 = vmatpush3.bf16.msra.mxu0 %v13089_v5  ;;  %v13109_v5 = vpack.c.bf16 %v7533_v61, %v7532_v1  ;;  %v7594_v61 = vld [vmem:[#allocation2 + $0xf50] sm:$0xff] }
 0x986   : > { %v18306_v46 = vadd.f32 %v10455_v41, %v7948_v59  ;;  %13092 = vmatprep.subr.bf16.mxu0 %v13091_v15  ;;  %v13105_v59 = vpack.c.bf16 %v7531_v29, %v7530_v2  ;;  %v13111_v15 = vpack.c.bf16 %v7551_v36, %v7550_v63  ;;  %v7560_v41 = vld [vmem:[#allocation2 + $0xe40] sm:$0xff]  ;;  %v7595_v63 = vld [vmem:[#allocation2 + $0xf58] sm:$0xff] }
 0x987   : > { %v13163_v10 = vpack.c.bf16 %v7595_v63, %v7594_v61 }
 0x988   : > { %v18308_v23 = vpop.permute.xlu0 %13382 }
 0x989   : > { %v13385_v8 = vunpack.i.h.bf16 %v18308_v23  ;;  %v13384_v37 = vunpack.i.l.bf16 %v18308_v23  ;;  %13094 = vmatpush3.bf16.msra.mxu0 %v13093_v53  ;;  %v7561_v53 = vld [vmem:[#allocation2 + $0xe48] sm:$0xff] }
 0x98a   : > { %13096 = vmatprep.subr.bf16.mxu0 %v13095_v45  ;;  %v7578_v45 = vld [vmem:[#allocation2 + $0xed0] sm:$0xff]  ;;  %v13133_v51 = vpack.c.bf16 %v7561_v53, %v7560_v41 }
 0x98b   : > { %v7087_v56 = vsel %vm5718_vm0, %v13384_v37, %v13385_v8  ;;  %v7086_v50 = vsel %vm5718_vm0, %v7071_v42, %v13384_v37  ;;  %v13125_v42 = vpack.c.bf16 %v7557_v6, %v7556_v33  ;;  %v13135_v58 = vpack.c.bf16 %v7579_v30, %v7578_v45  ;;  %v7581_v37 = vld [vmem:[#allocation2 + $0xee8] sm:$0xff]  ;;  %v7591_v6 = vld [vmem:[#allocation2 + $0xf38] sm:$0xff] }
 0x98c   : > { %8505 = vmatprep.mubr.f32.mxu1 %v7087_v56  ;;  %v13143_v56 = vpack.c.bf16 %v7583_v40, %v7582_v31  ;;  %v7589_v33 = vld [vmem:[#allocation2 + $0xf28] sm:$0xff]  ;;  %v8728_v40 = vld [vmem:[%s18451_s9 + $0x30] sm:$0xff] }
 0x98d   : > { %8506 = vmatmul.mubr.f32.vlgmr.msra.gmra.mrb[166].mxu1 %v7086_v50  ;;  %13098 = vmatpush3.bf16.msra.mxu0 %v13097_v9  ;;  %v13137_v9 = vpack.c.bf16 %v7563_v12, %v7562_v47  ;;  %v7566_v50 = vld [vmem:[#allocation2 + $0xe70] sm:$0xff]  ;;  %v8722_v47 = vld [vmem:[%s18451_s9] sm:$0xff]  ;;  %v8723_v12 = vld [vmem:[%s18451_s9 + $0x8] sm:$0xff] }
 0x98e   : > { %13100 = vmatprep.subr.bf16.mxu0 %v13099_v17  ;;  %13118 = vmatpush3.bf16.msra.mxu1 %v13117_v11  ;;  %v13139_v17 = vpack.c.bf16 %v7581_v37, %v7580_v26  ;;  %v13145_v14 = vpack.c.bf16 %v7567_v24, %v7566_v50  ;;  %v8724_v26 = vld [vmem:[%s18451_s9 + $0x10] sm:$0xff]  ;;  %v8725_v37 = vld [vmem:[%s18451_s9 + $0x18] sm:$0xff]  ;;  %v8730_v24 = vld [vmem:[%s18451_s9 + $0x40] sm:$0xff] }
 0x98f   : > { %13120 = vmatprep.subr.bf16.mxu1 %v13119_v20  ;;  %v7584_v20 = vld [vmem:[#allocation2 + $0xf00] sm:$0xff] }
 0x991   : > { %13102 = vmatpush3.bf16.msra.mxu0 %v13101_v55 }
 0x992   : > { %13104 = vmatprep.subr.bf16.mxu0 %v13103_v4  ;;  %13122 = vmatpush3.bf16.msra.mxu1 %v13121_v27  ;;  %v13148_v4 = vpack.c.bf16 %v7585_v19, %v7584_v20  ;;  %v7587_v27 = vld [vmem:[#allocation2 + $0xf18] sm:$0xff]  ;;  %v8731_v20 = vld [vmem:[%s18451_s9 + $0x48] sm:$0xff]  ;;  %v8732_v19 = vld [vmem:[%s18451_s9 + $0x50] sm:$0xff] }
 0x993   : > { %13124 = vmatprep.subr.bf16.mxu1 %v13123_v3  ;;  %v13151_v38 = vpack.c.bf16 %v7587_v27, %v7586_v18  ;;  %v7588_v3 = vld [vmem:[#allocation2 + $0xf20] sm:$0xff]  ;;  %v8735_v18 = vld [vmem:[%s18451_s9 + $0x68] sm:$0xff] }
 0x994   : > { %v13154_v23 = vpack.c.bf16 %v7589_v33, %v7588_v3  ;;  %v8737_v3 = vld [vmem:[%s18451_s9 + $0x78] sm:$0xff] }
 0x995   : > { %v10488_v62 = vpop.f32.mrb[160].mxu1  ;;  %13106 = vmatpush3.bf16.msra.mxu0 %v13105_v59  ;;  %v7593_v59 = vld [vmem:[#allocation2 + $0xf48] sm:$0xff] }
 0x996   : > { %v10489_v25 = vpop.f32.mrb[161].mxu1  ;;  %13108 = vmatprep.subr.bf16.mxu0 %v13107_v44  ;;  %13126 = vmatpush3.bf16.msra.mxu1 %v13125_v42  ;;  %v13160_v44 = vpack.c.bf16 %v7593_v59, %v7592_v49 }
 0x997   : > { %v10490_v52 = vadd.f32 %v10489_v25, %v10488_v62  ;;  %13128 = vmatprep.subr.bf16.mxu1 %v13127_v32  ;;  %v13166_v62 = vpack.c.bf16 %v7597_v39, %v7596_v7  ;;  %v7599_v25 = vld [vmem:[#allocation2 + $0xf78] sm:$0xff] }
 0x999   : > { %v18317_v35 = vadd.f32 %v10490_v52, %v18306_v46  ;;  %13110 = vmatpush3.bf16.msra.mxu0 %v13109_v5  ;;  %v7564_v46 = vld [vmem:[#allocation2 + $0xe60] sm:$0xff]  ;;  %v7598_v5 = vld [vmem:[#allocation2 + $0xf70] sm:$0xff] }
 0x99a   : > { %13112 = vmatprep.subr.bf16.mxu0 %v13111_v15  ;;  %13130 = vmatpush3.bf16.msra.mxu1 %v13129_v43  ;;  %v13141_v11 = vpack.c.bf16 %v7565_v0, %v7564_v46  ;;  %v13169_v15 = vpack.c.bf16 %v7599_v25, %v7598_v5  ;;  %v8726_v46 = vld [vmem:[%s18451_s9 + $0x20] sm:$0xff]  ;;  %v8727_v0 = vld [vmem:[%s18451_s9 + $0x28] sm:$0xff] }
 0x99b   : > { %13132 = vmatprep.subr.bf16.mxu1 %v13131_v48  ;;  %v13178_v31 = vpack.c.bf16 %v8727_v0, %v8726_v46  ;;  %v8738_v25 = vld [vmem:[#allocation7] sm:$0x1] }
 0x99d   : > { %13114 = vmatpush3.bf16.msra.mxu0 %v13113_v21 }
 0x99e   : > { %13147 = vmatprep.subr.bf16.mxu0 %v18688_v60  ;;  %13134 = vmatpush3.bf16.msra.mxu1 %v13133_v51 }
 0x99f   : > { %13136 = vmatprep.subr.bf16.mxu1 %v13135_v58 }
 0x9a2   : > { %13138 = vmatpush3.bf16.msra.mxu1 %v13137_v9 }
 0x9a3   : > { %13140 = vmatprep.subr.bf16.mxu1 %v13139_v17  ;;  %v13175_v17 = vpack.c.bf16 %v8725_v37, %v8724_v26 }
 0x9a6   : > { %v13388_v54 = vpop.permute.xlu1 %13387  ;;  %13142 = vmatpush3.bf16.msra.mxu1 %v13141_v11  ;;  %v8729_v11 = vld [vmem:[%s18451_s9 + $0x38] sm:$0xff] }
 0x9a7   : > { %v13390_v28 = vunpack.i.h.bf16 %v13388_v54  ;;  %v13389_v55 = vunpack.i.l.bf16 %v13388_v54  ;;  %13144 = vmatprep.subr.bf16.mxu1 %v13143_v56  ;;  %v13181_v56 = vpack.c.bf16 %v8729_v11, %v8728_v40 }
 0x9a9   : > { %v7089_v2 = vsel %vm5718_vm0, %v13389_v55, %v13390_v28  ;;  %v7088_v29 = vsel %vm5718_vm0, %v13385_v8, %v13389_v55  ;;  %v7590_v8 = vld [vmem:[#allocation2 + $0xf30] sm:$0xff] }
 0x9aa   : > { %8575 = vmatprep.mubr.f32.mxu0 %v7089_v2  ;;  %13146 = vmatpush3.bf16.msra.mxu1 %v13145_v14  ;;  %v13157_v34 = vpack.c.bf16 %v7591_v6, %v7590_v8  ;;  %v13184_v14 = vpack.c.bf16 %v8731_v20, %v8730_v24 }
 0x9ab   : > { %8576 = vmatmul.mubr.f32.vlgmr.msra.gmra.mrb[178].mxu0 %v7088_v29  ;;  %13171 = vmatprep.subr.bf16.mxu1 %v18688_v60  ;;  %v8734_v29 = vld [vmem:[%s18451_s9 + $0x60] sm:$0xff] }
 0x9ac   : > { %13149 = vmatpush3.bf16.msra.mxu0 %v13148_v4  ;;  %11209 = vmatprep.mubr.msk.f32.mxu0 %vm13581_vm9, %v18695_v57  ;;  %v13190_v27 = vpack.c.bf16 %v8735_v18, %v8734_v29 }
 0x9ad   : > { %13150 = vmatprep.subr.bf16.mxu0 %v18688_v60 }
 0x9b0   : > { %13152 = vmatpush3.bf16.msra.mxu0 %v13151_v38  ;;  %v8736_v38 = vld [vmem:[%s18451_s9 + $0x70] sm:$0xff] }
 0x9b1   : > { %13153 = vmatprep.subr.bf16.mxu0 %v18688_v60  ;;  %v13193_v33 = vpack.c.bf16 %v8737_v3, %v8736_v38 }
 0x9b4   : > { %13155 = vmatpush3.bf16.msra.mxu0 %v13154_v23 }
 0x9b5   : > { %13156 = vmatprep.subr.bf16.mxu0 %v18688_v60 }
 0x9b8   : > { %13158 = vmatpush3.bf16.msra.mxu0 %v13157_v34 }
 0x9b9   : > { %v13393_v1 = vpop.permute.xlu0 %13392  ;;  %13159 = vmatprep.subr.bf16.mxu0 %v18688_v60  ;;  %v7085_v16 = vpop.permute.xlu1 %7084 }
 0x9ba   : > { %v13395_v42 = vunpack.i.h.bf16 %v13393_v1  ;;  %v13394_v36 = vunpack.i.l.bf16 %v13393_v1 }
 0x9bc   : > { %13161 = vmatpush3.bf16.msra.mxu0 %v13160_v44  ;;  %v7091_v32 = vsel %vm5718_vm0, %v13394_v36, %v13395_v42  ;;  %v7090_v22 = vsel %vm5718_vm0, %v13390_v28, %v13394_v36  ;;  %v7092_v13 = vsel %vm5718_vm0, %v13395_v42, %v7085_v16  ;;  %v8733_v28 = vld [vmem:[%s18451_s9 + $0x58] sm:$0xff]  ;;  %vm8809_vm0 = vcmask 40960  }
 0x9bd   : > { %8645 = vmatprep.mubr.f32.mxu1 %v7091_v32  ;;  %13162 = vmatprep.subr.bf16.mxu0 %v18688_v60  ;;  %v13187_v4 = vpack.c.bf16 %v8733_v28, %v8732_v19 }
 0x9be   : > { %8646 = vmatmul.mubr.f32.vlgmr.msra.gmra.mrb[168].mxu1 %v7090_v22 }
 0x9bf   : > { %11244 = vmatprep.mubr.msk.f32.mxu1 %vm13581_vm9, %v18695_v57 }
 0x9c0   : > { %13164 = vmatpush3.bf16.msra.mxu0 %v13163_v10 }
 0x9c1   : > { %13165 = vmatprep.subr.bf16.mxu0 %v18688_v60 }
 0x9c4   : > { %13167 = vmatpush3.bf16.msra.mxu0 %v13166_v62 }
 0x9c5   : > { %13168 = vmatprep.subr.bf16.mxu0 %v18688_v60 }
 0x9c8   : > { %13170 = vmatpush3.bf16.msra.mxu0 %v13169_v15 }
 0x9cb   : > { %11210 = vmatmul.mubr.f32.vlgmr.msra.gmra.mrb[180].mxu0 %v7092_v13 }
 0x9d7   : > { %v10523_v43 = vpop.f32.mrb[172].mxu0 }
 0x9d8   : > { %v10524_v52 = vpop.f32.mrb[173].mxu0 }
 0x9d9   : > { %v10525_v48 = vadd.f32 %v10524_v52, %v10523_v43 }
 0x9db   : > { %v8158_v57 = vadd.f32 %v10525_v48, %v18317_v35  ;;  %v13172_v35 = vpack.c.bf16 %v8723_v12, %v8722_v47 }
 0x9dd   : > { %13173 = vmatpush3.bf16.msra.mxu1 %v13172_v35 }
 0x9de   : > { %13174 = vmatprep.subr.bf16.mxu1 %v18688_v60 }
 0x9e1   : > { %13176 = vmatpush3.bf16.msra.mxu1 %v13175_v17 }
 0x9e2   : > { %13177 = vmatprep.subr.bf16.mxu1 %v18688_v60 }
 0x9e4   : > { %v10558_v41 = vpop.f32.mrb[162].mxu1 }
 0x9e5   : > { %v10559_v53 = vpop.f32.mrb[163].mxu1  ;;  %13179 = vmatpush3.bf16.msra.mxu1 %v13178_v31 }
 0x9e6   : > { %v10560_v45 = vadd.f32 %v10559_v53, %v10558_v41  ;;  %13180 = vmatprep.subr.bf16.mxu1 %v18688_v60 }
 0x9e8   : > { %v8228_v30 = vadd.f32 %v10560_v45, %v8158_v57 }
 0x9e9   : > { %13182 = vmatpush3.bf16.msra.mxu1 %v13181_v56 }
 0x9ea   : > { %13183 = vmatprep.subr.bf16.mxu1 %v18688_v60 }
 0x9ed   : > { %13185 = vmatpush3.bf16.msra.mxu1 %v13184_v14 }
 0x9ee   : > { %13186 = vmatprep.subr.bf16.mxu1 %v18688_v60 }
 0x9f1   : > { %13188 = vmatpush3.bf16.msra.mxu1 %v13187_v4 }
 0x9f2   : > { %13189 = vmatprep.subr.bf16.mxu1 %v18688_v60 }
 0x9f5   : > { %13191 = vmatpush3.bf16.msra.mxu1 %v13190_v27 }
 0x9f6   : > { %13192 = vmatprep.subr.bf16.mxu1 %v18688_v60 }
 0x9f9   : > { %13194 = vmatpush3.bf16.msra.mxu1 %v13193_v33 }
 0xa00   : > { %v10593_v21 = vpop.f32.mrb[174].mxu0 }
 0xa01   : > { %v10594_v51 = vpop.f32.mrb[175].mxu0 }
 0xa02   : > { %v10595_v58 = vadd.f32 %v10594_v51, %v10593_v21 }
 0xa04   : > { %v8298_v9 = vadd.f32 %v10595_v58, %v8228_v30 }
 0xa13   : > { %v10628_v50 = vpop.f32.mrb[164].mxu1 }
 0xa14   : > { %v10629_v54 = vpop.f32.mrb[165].mxu1 }
 0xa15   : > { %v10630_v55 = vadd.f32 %v10629_v54, %v10628_v50 }
 0xa17   : > { %v8368_v2 = vadd.f32 %v10630_v55, %v8298_v9 }
 0xa53   : > { %v10663_v23 = vpop.f32.mrb[176].mxu0 }
 0xa54   : > { %v10664_v8 = vpop.f32.mrb[177].mxu0 }
 0xa55   : > { %v10665_v6 = vadd.f32 %v10664_v8, %v10663_v23 }
 0xa57   : > { %v8438_v34 = vadd.f32 %v10665_v6, %v8368_v2 }
 0xa60   : > { %v10698_v49 = vpop.f32.mrb[166].mxu1 }
 0xa61   : > { %v10699_v59 = vpop.f32.mrb[167].mxu1 }
 0xa62   : > { %v10700_v44 = vadd.f32 %v10699_v59, %v10698_v49 }
 0xa64   : > { %v8508_v1 = vadd.f32 %v10700_v44, %v8438_v34 }
 0xa7e   : > { %v10733_v60 = vpop.f32.mrb[178].mxu0 }
 0xa7f   : > { %v10734_v61 = vpop.f32.mrb[179].mxu0 }
 0xa80   : > { %v10735_v63 = vadd.f32 %v10734_v61, %v10733_v60 }
 0xa82   : > { %v8578_v42 = vadd.f32 %v10735_v63, %v8508_v1 }
 0xa91   : > { %v10768_v36 = vpop.f32.mrb[168].mxu1 }
 0xa92   : > { %v10769_v32 = vpop.f32.mrb[169].mxu1 }
 0xa93   : > { %v10770_v22 = vadd.f32 %v10769_v32, %v10768_v36 }
 0xa95   : > { %v8648_v10 = vadd.f32 %v10770_v22, %v8578_v42 }
 0xa9e   : > { %v8717_v7 = vpop.f32.mrb[180].mxu0 }
 0xa9f   : > { %v8718_v39 = vadd.f32 %v8717_v7, %v8648_v10  ;;  %v11211_v62 = vpop.f32.mrb[181].mxu0 }
 0xaa1   : > { %v8721_v5 = vmax.f32 %v8718_v39, 0.0 }
 0xaa3   : > { %11245 = vmatmul.mubr.f32.vlgmr.msra.gmra.mrb[170].mxu1 %v8721_v5 }
 0xb76   : > { %v8805_v15 = vpop.f32.mrb[170].mxu1 }
 0xb77   : > { %v8806_v16 = vadd.f32 %v8805_v15, %v8738_v25  ;;  %v11246_v13 = vpop.f32.mrb[171].mxu1 }
 0xb79   : > { %8810 = vst.msk [vmem:[%s418_s13] sm:$0x1] %vm8809_vm0, %v8806_v16 }
 0xb7a   : > { %13493 = shalt.err (!%p13490_p11)
}
 0xb7b   : > { %s13494_s26 = scalar_lea.hbm %s18400_s24, 16  ;;  %s13498_s28 = scalar_lea.hbm %s18453_s11, 32 }
 0xb7c   : > { %p13495_p13 = scmp.ne.s32.totalorder %s18400_s24, %s13494_s26  ;;  %p13499_p6 = scmp.lt.u32.totalorder %s18400_s24, %s18453_s11 }
 0xb7d   : > { %p13500_p5 = scmp.lt.u32.totalorder %s13498_s28, %s13494_s26  ;;  %p13502_p12 = scmp.lt.u32.totalorder %s13494_s26, %s18400_s24 }
 0xb7e   : > { %p13496_p1 = pnand %p13495_p13, %p18954_p10 }
 0xb7f   : > { %p13501_p9 = por %p13500_p5, %p13499_p6 }
 0xb80   : > { %p13497_p0 = pneg %p13496_p1 }
 0xb81   : > { %p13503_p2 = por %p13502_p12, %p13501_p9 }
 0xb83   : > { %p13504_p3 = pnand %p13503_p2, %p13497_p0 }
 0xb85   : > { %13507 = shalt.err (!%p13504_p3)
}
 0xb86   : > { %13209 = dma.vmem_to_hbm [thread:$0]  (%p18954_p10), %s18402_s23, 16, %s18400_s24, %s8812_s19  }
 0xb87 PF: > { %s18955_s25 = sld [smem:[#allocation12_spill]]  ;;  %s18956_s13 = sld [smem:[#allocation16_spill]] }
 0xb88   : > { %p13231_p4 = scmp.ge.s32.totalorder %s13550_s20, 2 }
 0xb8d   : > { %s8836_s30 = sand.u32 1, %s18955_s25   ;;  %p18957_p7 = scmp.ne.s32.totalorder %s18956_s13, 0 }
 0xb8e   : > { %s8837_s16 = scalar_lea.sflag [#allocation4], %s8836_s30 }
 0xb8f   : > { %p13222_p8 = pnand %p13231_p4, %p18957_p7 }
 0xb91   : > { %13533 = dma.done.wait (!%p13222_p8), %s8837_s16, 16  }
 0xb92   : > { %13535 = vsyncadd (!%p13222_p8), %s8837_s16, 4294967280  ;;  %s18958_s20 = sld [smem:[#allocation14_spill]]  ;;  %s18959_s12 = sld [smem:[#allocation13_spill]] }
 0xb93   : > { %s18960_s19 = sld [smem:[#allocation15_spill]]  ;;  %s18961_s17 = smov %s13542_s18 }
 0xb98   : > { %p23_p11 = scmp.ge.s32.totalorder %s18958_s20, 4   ;;  %s18962_s18 = smov %s18959_s12 }
 0xb9a   :  { %25 = sbr.rel (!%p23_p11) target bundleno = 7 (0x7), region = 151 }
 0xba1   :  { %8841 = vsyncpa [#allocation3], 1 }
 0xba2   :  { %8843 = vsyncpa [#allocation3 + $0x1], 1 }
 0xba3   :  { %8844 = vsyncpa [#allocation6], 1 }
 0xba4   :  { %8845 = vsyncpa [#allocation4], 1 }
 0xba5   :  { %8847 = vsyncpa [#allocation4 + $0x1], 1 }

</bundles_post_ra>
